<compile_context>
chip_gen: v5e
topology: v5e:2x2
jax: 0.10.0
libtpu: 0.0.40
codegen_flags: <defaults>
</compile_context>

<pallas_src>
import functools

import jax
import jax.numpy as jnp
from jax.experimental import pallas as pl
from jax.experimental.pallas import tpu as pltpu


_C1, _C2 = 64, 32              # conv1 / conv2 output channels
_K1, _K3 = 9, 3                # conv1 / conv3 kernel sizes
_T1 = _K1 * _K1                # 81 conv1 taps
_T3 = _K3 * _K3                # 9 conv3 taps
_HALO = _K1 // 2 + _K3 // 2    # 5: conv1 'same' pad (4) + conv3 halo (1)


def _srcnn_fused_kernel(x_ref, w1_ref, w2_ref, w3_ref, o_ref, *, H, W, TH, W_pad):
    """One (batch, row-strip) grid step of the fused SRCNN forward pass.

    x_ref : (1, 1, TH+10, W_pad+10) bf16  -- streamed zero-padded input strip
    w1_ref: (64, 81) bf16                 -- conv1 weights, (out-ch, tap)
    w2_ref: (32, 64) bf16                 -- conv2 1x1 weights
    w3_ref: (9, 32)  bf16                 -- conv3 weights, (tap, in-ch)
    o_ref : (1, TH, W_pad) f32            -- one strip of the width-padded output
    """
    He, We = TH + 2, W_pad + 2            # extended by the conv3 halo (1 px)
    P = He * We

    x = x_ref[0, 0]                       # (TH+10, W_pad+10) bf16

    # ---- conv1 (9x9, 1 -> 64): im2col + ONE MXU matmul --------------------
    # TODO(synk): the (81, He, We) -> (81, P) merge is still one relayout of
    # the bf16 patches; the relayout-free rank-3 dot_general ('ct,thw->chw')
    # has no reliable Mosaic lowering today.
    cols = [x[kh:kh + He, kw:kw + We]                        # 81 x (He, We)
            for kh in range(_K1) for kw in range(_K1)]
    patches = jnp.stack(cols, axis=0).reshape(_T1, P)        # bf16, taps-major
    h1 = jnp.dot(w1_ref[...], patches,
                 preferred_element_type=jnp.float32)         # (64, P)
    h1 = jnp.maximum(h1, 0.0)

    # ---- conv2 (1x1, 64 -> 32): plain MXU matmul, h1/h2 stay flat ----------
    h2 = jnp.dot(w2_ref[...], h1.astype(jnp.bfloat16),
                 preferred_element_type=jnp.float32)         # (32, P)
    h2 = jnp.maximum(h2, 0.0)

    # ---- conv3 (3x3, 32 -> 1): channel contraction on the MXU --------------
    # partial[t, p] = sum_c w3[t, c] * h2[c, p]; only this small 9xP buffer is
    # un-flattened (instead of the 32-channel h2 as in v1).
    partial = jnp.dot(w3_ref[...], h2.astype(jnp.bfloat16),
                      preferred_element_type=jnp.float32)    # (9, P)
    partial = partial.reshape(_T3, He, We)

    # conv3's 'same' zero padding must see zeros outside the real H x W image
    # (this also kills the lane-padding columns).  Masking the 9 per-tap
    # planes is equivalent to masking the 32-channel h2 (and 3.5x cheaper).
    r0 = pl.program_id(1) * TH
    row_ids = jax.lax.broadcasted_iota(jnp.int32, (He, We), 0) + (r0 - 1)
    col_ids = jax.lax.broadcasted_iota(jnp.int32, (He, We), 1) - 1
    inside = ((row_ids >= 0) & (row_ids < H) &
              (col_ids >= 0) & (col_ids < W))
    partial = jnp.where(inside[None, :, :], partial, 0.0)

    # 9 single-channel shifted adds on the VPU + final ReLU.
    out = partial[0, 0:TH, 0:W_pad]
    for t in range(1, _T3):
        kh, kw = divmod(t, _K3)
        out = out + partial[t, kh:kh + TH, kw:kw + W_pad]
    o_ref[0] = jnp.maximum(out, 0.0).astype(o_ref.dtype)


def _round_up(x, m):
    return ((x + m - 1) // m) * m


def _vmem_limit_bytes():
    """Generation-aware VMEM limit (never the whole physical VMEM)."""
    cap = None
    try:
        cap = getattr(pltpu.get_tpu_info(), "vmem_capacity_bytes", None)
    except Exception:
        cap = None
    if cap is None:
        cap = 64 * 1024 * 1024           # conservative: v7x physical per-TC VMEM
    # ~75% of physical (capped at 112 MiB on v5e/v6e) leaves headroom for
    # double buffers and compiler-internal scratch.
    return min((cap * 3) // 4, 112 * 1024 * 1024)


def _pick_strip_rows(H, W_pad, n_batch, vmem_budget_bytes):
    """Largest TH (multiple of 8) whose fused working set fits the budget,
    while keeping >= ~4 grid steps so both v7x TensorCores get work."""
    # Rough peak bytes per extended (He = TH+2) row of the fused body:
    # patches bf16 (81*2, x2 for the relayout) + h1 f32+bf16 (256+128) +
    # h2 f32+bf16 (128+64) + partial f32 (36*2) + misc  ~= 640 B / pixel.
    bytes_per_ext_row = 640 * (W_pad + 2)
    th = int(vmem_budget_bytes // bytes_per_ext_row) - 2
    th = min(th, _round_up(H, 8))
    th = max(8, (th // 8) * 8)
    while th > 8 and n_batch * (-(-H // th)) < 4:
        th -= 8
    return th


def srcnn_forward(params, x_nchw, *, strip_rows=None):
    """x_nchw: (N, 1, H, W) f32 -> (N, 1, H, W) f32 (matches the PyTorch module)."""
    N, C, H, W = x_nchw.shape
    assert C == 1, "SRCNN operates on single-channel (Y) images"

    W_pad = max(128, _round_up(W, 128))          # lane-dense output stores
    vmem_limit = _vmem_limit_bytes()
    if strip_rows is None:
        TH = _pick_strip_rows(H, W_pad, N, (vmem_limit * 7) // 10)
    else:
        TH = max(8, (strip_rows // 8) * 8)
    num_strips = -(-H // TH)                     # cdiv: ragged last strip OK
    H_pad = num_strips * TH
    # NOTE: for very wide images (W >~ 2-4K) a width-tile grid axis would
    # bound VMEM better than shrinking TH; not needed at these sizes.

    # 1-channel input: cast to bf16 once, zero-pad rows by 5 (+ragged rows)
    # and cols by 5 (+lane padding).
    x = x_nchw[:, 0].astype(jnp.bfloat16)                     # (N, H, W)
    xp = jnp.pad(x, ((0, 0),
                     (_HALO, _HALO + H_pad - H),
                     (_HALO, _HALO + W_pad - W)))
    Wp = W_pad + 2 * _HALO

    # Materialize overlapping (TH+10)-row strips in HBM so each grid step
    # streams only its own window (instead of keeping the whole padded image
    # resident + double-buffered in VMEM).
    rows = (jnp.arange(num_strips)[:, None] * TH
            + jnp.arange(TH + 2 * _HALO)[None, :])            # (S, TH+10)
    x_strips = jnp.take(xp, rows, axis=1)                     # (N, S, TH+10, Wp)

    # MXU-friendly weight slabs (bias=False in the reference for all layers).
    w1 = params["conv1"].reshape(_T1, _C1).T.astype(jnp.bfloat16)   # (64, 81)
    w2 = params["conv2"].reshape(_C1, _C2).T.astype(jnp.bfloat16)   # (32, 64)
    w3 = params["conv3"].reshape(_T3, _C2).astype(jnp.bfloat16)     # (9, 32)

    kernel = functools.partial(_srcnn_fused_kernel, H=H, W=W, TH=TH, W_pad=W_pad)

    out = pl.pallas_call(
        kernel,
        out_shape=jax.ShapeDtypeStruct((N, H_pad, W_pad), jnp.float32),
        grid_spec=pltpu.PrefetchScalarGridSpec(
            num_scalar_prefetch=0,
            grid=(N, num_strips),
            in_specs=[
                # streamed input strip (one per grid step)
                pl.BlockSpec((1, 1, TH + 2 * _HALO, Wp),
                             lambda n, s: (n, s, 0, 0)),
                # weights: constant block index -> stay resident
                pl.BlockSpec((_C1, _T1), lambda n, s: (0, 0)),
                pl.BlockSpec((_C2, _C1), lambda n, s: (0, 0)),
                pl.BlockSpec((_T3, _C2), lambda n, s: (0, 0)),
            ],
            out_specs=pl.BlockSpec((1, TH, W_pad), lambda n, s: (n, s, 0)),
        ),
        compiler_params=pltpu.CompilerParams(
            dimension_semantics=("parallel", "parallel"),
            vmem_limit_bytes=vmem_limit,
        ),
    )(x_strips, w1, w2, w3)

    # Crop ragged rows / lane padding and restore the channel dim.
    return out[:, :H, :W][:, None, :, :]


# ---------------------------------------------------------------------------
# Parameter init (matches default_conv: kaiming_normal_ fan_in * 0.1, no bias)
# and a pure-JAX reference for a correctness check.
# ---------------------------------------------------------------------------
def kaiming_weight(key, kh, kw, cin, cout, init_scale=0.1):
    fan_in = cin * kh * kw
    std = (2.0 / fan_in) ** 0.5
    w = jax.random.normal(key, (kh, kw, cin, cout), dtype=jnp.float32) * std
    return w * init_scale


def init_srcnn_params(key):
    k1, k2, k3 = jax.random.split(key, 3)
    return {
        "conv1": kaiming_weight(k1, 9, 9, 1, 64),
        "conv2": kaiming_weight(k2, 1, 1, 64, 32),
        "conv3": kaiming_weight(k3, 3, 3, 32, 1),
    }


def srcnn_reference(params, x):
    def conv(h, w):
        return jax.lax.conv_general_dilated(
            h, w, window_strides=(1, 1), padding="SAME",
            dimension_numbers=("NCHW", "HWIO", "NCHW"))
    h = jax.nn.relu(conv(x, params["conv1"]))
    h = jax.nn.relu(conv(h, params["conv2"]))
    return jax.nn.relu(conv(h, params["conv3"]))


if __name__ == "__main__":
    key = jax.random.PRNGKey(0)
    pkey, xkey = jax.random.split(key)

    params = init_srcnn_params(pkey)
    # SRCNN operates on single-channel (Y-channel) images: N=2, C=1, H=W=16
    x = jax.random.normal(xkey, (2, 1, 16, 16), dtype=jnp.float32)

    out = jax.jit(srcnn_forward)(params, x)
    out = jax.block_until_ready(out)

    assert out.shape == (2, 1, 16, 16)
    assert out.dtype == jnp.float32
    assert bool(jnp.all(out >= 0.0))          # final ReLU

    # Cross-check against a pure-JAX f32 reference (bf16 matmul tolerance).
    ref = srcnn_reference(params, x)
    err = float(jnp.max(jnp.abs(out - ref)))
    scale = float(jnp.max(jnp.abs(ref)))
    assert err <= 1e-4 + 0.05 * scale, f"mismatch vs reference: {err} (scale {scale})"

    print("KERNEL_OK")
</pallas_src>

<mosaic_0001>
module attributes {stable_mosaic.version = 11 : i64} {
  func.func @_srcnn_fused_kernel(%arg0: i32, %arg1: i32, %arg2: memref<1x1x18x138xbf16, #tpu.memory_space<vmem>>, %arg3: memref<64x81xbf16, #tpu.memory_space<vmem>>, %arg4: memref<32x64xbf16, #tpu.memory_space<vmem>>, %arg5: memref<9x32xbf16, #tpu.memory_space<vmem>>, %arg6: memref<1x8x128xf32, #tpu.memory_space<vmem>>) attributes {dimension_semantics = [#tpu.dimension_semantics<parallel>, #tpu.dimension_semantics<parallel>], iteration_bounds = array<i64: 2, 2>, scalar_prefetch = 0 : i64, scratch_operands = 0 : i64, tpu.core_type = #tpu.core_type<tc>, window_params = [{transform_indices = @transform_0, window_bounds = array<i64: 1, 1, 18, 138>}, {pipeline_mode = #tpu.pipeline_mode<synchronous>, transform_indices = @transform_1, window_bounds = array<i64: 64, 81>}, {pipeline_mode = #tpu.pipeline_mode<synchronous>, transform_indices = @transform_2, window_bounds = array<i64: 32, 64>}, {pipeline_mode = #tpu.pipeline_mode<synchronous>, transform_indices = @transform_3, window_bounds = array<i64: 9, 32>}, {transform_indices = @transform_4, window_bounds = array<i64: 1, 8, 128>}]} {
    %c0 = arith.constant 0 : index
    %c0_0 = arith.constant 0 : index
    %c0_1 = arith.constant 0 : index
    %c0_2 = arith.constant 0 : index
    %0 = vector.load %arg2[%c0, %c0_0, %c0_1, %c0_2] : memref<1x1x18x138xbf16, #tpu.memory_space<vmem>>, vector<1x1x18x138xbf16>
    %1 = vector.shape_cast %0 : vector<1x1x18x138xbf16> to vector<18x138xbf16>
    %2 = vector.extract_strided_slice %1 {offsets = [0, 0], sizes = [10, 130], strides = [1, 1]} : vector<18x138xbf16> to vector<10x130xbf16>
    %3 = vector.extract_strided_slice %1 {offsets = [0, 1], sizes = [10, 130], strides = [1, 1]} : vector<18x138xbf16> to vector<10x130xbf16>
    %4 = vector.extract_strided_slice %1 {offsets = [0, 2], sizes = [10, 130], strides = [1, 1]} : vector<18x138xbf16> to vector<10x130xbf16>
    %5 = vector.extract_strided_slice %1 {offsets = [0, 3], sizes = [10, 130], strides = [1, 1]} : vector<18x138xbf16> to vector<10x130xbf16>
    %6 = vector.extract_strided_slice %1 {offsets = [0, 4], sizes = [10, 130], strides = [1, 1]} : vector<18x138xbf16> to vector<10x130xbf16>
    %7 = vector.extract_strided_slice %1 {offsets = [0, 5], sizes = [10, 130], strides = [1, 1]} : vector<18x138xbf16> to vector<10x130xbf16>
    %8 = vector.extract_strided_slice %1 {offsets = [0, 6], sizes = [10, 130], strides = [1, 1]} : vector<18x138xbf16> to vector<10x130xbf16>
    %9 = vector.extract_strided_slice %1 {offsets = [0, 7], sizes = [10, 130], strides = [1, 1]} : vector<18x138xbf16> to vector<10x130xbf16>
    %10 = vector.extract_strided_slice %1 {offsets = [0, 8], sizes = [10, 130], strides = [1, 1]} : vector<18x138xbf16> to vector<10x130xbf16>
    %11 = vector.extract_strided_slice %1 {offsets = [1, 0], sizes = [10, 130], strides = [1, 1]} : vector<18x138xbf16> to vector<10x130xbf16>
    %12 = vector.extract_strided_slice %1 {offsets = [1, 1], sizes = [10, 130], strides = [1, 1]} : vector<18x138xbf16> to vector<10x130xbf16>
    %13 = vector.extract_strided_slice %1 {offsets = [1, 2], sizes = [10, 130], strides = [1, 1]} : vector<18x138xbf16> to vector<10x130xbf16>
    %14 = vector.extract_strided_slice %1 {offsets = [1, 3], sizes = [10, 130], strides = [1, 1]} : vector<18x138xbf16> to vector<10x130xbf16>
    %15 = vector.extract_strided_slice %1 {offsets = [1, 4], sizes = [10, 130], strides = [1, 1]} : vector<18x138xbf16> to vector<10x130xbf16>
    %16 = vector.extract_strided_slice %1 {offsets = [1, 5], sizes = [10, 130], strides = [1, 1]} : vector<18x138xbf16> to vector<10x130xbf16>
    %17 = vector.extract_strided_slice %1 {offsets = [1, 6], sizes = [10, 130], strides = [1, 1]} : vector<18x138xbf16> to vector<10x130xbf16>
    %18 = vector.extract_strided_slice %1 {offsets = [1, 7], sizes = [10, 130], strides = [1, 1]} : vector<18x138xbf16> to vector<10x130xbf16>
    %19 = vector.extract_strided_slice %1 {offsets = [1, 8], sizes = [10, 130], strides = [1, 1]} : vector<18x138xbf16> to vector<10x130xbf16>
    %20 = vector.extract_strided_slice %1 {offsets = [2, 0], sizes = [10, 130], strides = [1, 1]} : vector<18x138xbf16> to vector<10x130xbf16>
    %21 = vector.extract_strided_slice %1 {offsets = [2, 1], sizes = [10, 130], strides = [1, 1]} : vector<18x138xbf16> to vector<10x130xbf16>
    %22 = vector.extract_strided_slice %1 {offsets = [2, 2], sizes = [10, 130], strides = [1, 1]} : vector<18x138xbf16> to vector<10x130xbf16>
    %23 = vector.extract_strided_slice %1 {offsets = [2, 3], sizes = [10, 130], strides = [1, 1]} : vector<18x138xbf16> to vector<10x130xbf16>
    %24 = vector.extract_strided_slice %1 {offsets = [2, 4], sizes = [10, 130], strides = [1, 1]} : vector<18x138xbf16> to vector<10x130xbf16>
    %25 = vector.extract_strided_slice %1 {offsets = [2, 5], sizes = [10, 130], strides = [1, 1]} : vector<18x138xbf16> to vector<10x130xbf16>
    %26 = vector.extract_strided_slice %1 {offsets = [2, 6], sizes = [10, 130], strides = [1, 1]} : vector<18x138xbf16> to vector<10x130xbf16>
    %27 = vector.extract_strided_slice %1 {offsets = [2, 7], sizes = [10, 130], strides = [1, 1]} : vector<18x138xbf16> to vector<10x130xbf16>
    %28 = vector.extract_strided_slice %1 {offsets = [2, 8], sizes = [10, 130], strides = [1, 1]} : vector<18x138xbf16> to vector<10x130xbf16>
    %29 = vector.extract_strided_slice %1 {offsets = [3, 0], sizes = [10, 130], strides = [1, 1]} : vector<18x138xbf16> to vector<10x130xbf16>
    %30 = vector.extract_strided_slice %1 {offsets = [3, 1], sizes = [10, 130], strides = [1, 1]} : vector<18x138xbf16> to vector<10x130xbf16>
    %31 = vector.extract_strided_slice %1 {offsets = [3, 2], sizes = [10, 130], strides = [1, 1]} : vector<18x138xbf16> to vector<10x130xbf16>
    %32 = vector.extract_strided_slice %1 {offsets = [3, 3], sizes = [10, 130], strides = [1, 1]} : vector<18x138xbf16> to vector<10x130xbf16>
    %33 = vector.extract_strided_slice %1 {offsets = [3, 4], sizes = [10, 130], strides = [1, 1]} : vector<18x138xbf16> to vector<10x130xbf16>
    %34 = vector.extract_strided_slice %1 {offsets = [3, 5], sizes = [10, 130], strides = [1, 1]} : vector<18x138xbf16> to vector<10x130xbf16>
    %35 = vector.extract_strided_slice %1 {offsets = [3, 6], sizes = [10, 130], strides = [1, 1]} : vector<18x138xbf16> to vector<10x130xbf16>
    %36 = vector.extract_strided_slice %1 {offsets = [3, 7], sizes = [10, 130], strides = [1, 1]} : vector<18x138xbf16> to vector<10x130xbf16>
    %37 = vector.extract_strided_slice %1 {offsets = [3, 8], sizes = [10, 130], strides = [1, 1]} : vector<18x138xbf16> to vector<10x130xbf16>
    %38 = vector.extract_strided_slice %1 {offsets = [4, 0], sizes = [10, 130], strides = [1, 1]} : vector<18x138xbf16> to vector<10x130xbf16>
    %39 = vector.extract_strided_slice %1 {offsets = [4, 1], sizes = [10, 130], strides = [1, 1]} : vector<18x138xbf16> to vector<10x130xbf16>
    %40 = vector.extract_strided_slice %1 {offsets = [4, 2], sizes = [10, 130], strides = [1, 1]} : vector<18x138xbf16> to vector<10x130xbf16>
    %41 = vector.extract_strided_slice %1 {offsets = [4, 3], sizes = [10, 130], strides = [1, 1]} : vector<18x138xbf16> to vector<10x130xbf16>
    %42 = vector.extract_strided_slice %1 {offsets = [4, 4], sizes = [10, 130], strides = [1, 1]} : vector<18x138xbf16> to vector<10x130xbf16>
    %43 = vector.extract_strided_slice %1 {offsets = [4, 5], sizes = [10, 130], strides = [1, 1]} : vector<18x138xbf16> to vector<10x130xbf16>
    %44 = vector.extract_strided_slice %1 {offsets = [4, 6], sizes = [10, 130], strides = [1, 1]} : vector<18x138xbf16> to vector<10x130xbf16>
    %45 = vector.extract_strided_slice %1 {offsets = [4, 7], sizes = [10, 130], strides = [1, 1]} : vector<18x138xbf16> to vector<10x130xbf16>
    %46 = vector.extract_strided_slice %1 {offsets = [4, 8], sizes = [10, 130], strides = [1, 1]} : vector<18x138xbf16> to vector<10x130xbf16>
    %47 = vector.extract_strided_slice %1 {offsets = [5, 0], sizes = [10, 130], strides = [1, 1]} : vector<18x138xbf16> to vector<10x130xbf16>
    %48 = vector.extract_strided_slice %1 {offsets = [5, 1], sizes = [10, 130], strides = [1, 1]} : vector<18x138xbf16> to vector<10x130xbf16>
    %49 = vector.extract_strided_slice %1 {offsets = [5, 2], sizes = [10, 130], strides = [1, 1]} : vector<18x138xbf16> to vector<10x130xbf16>
    %50 = vector.extract_strided_slice %1 {offsets = [5, 3], sizes = [10, 130], strides = [1, 1]} : vector<18x138xbf16> to vector<10x130xbf16>
    %51 = vector.extract_strided_slice %1 {offsets = [5, 4], sizes = [10, 130], strides = [1, 1]} : vector<18x138xbf16> to vector<10x130xbf16>
    %52 = vector.extract_strided_slice %1 {offsets = [5, 5], sizes = [10, 130], strides = [1, 1]} : vector<18x138xbf16> to vector<10x130xbf16>
    %53 = vector.extract_strided_slice %1 {offsets = [5, 6], sizes = [10, 130], strides = [1, 1]} : vector<18x138xbf16> to vector<10x130xbf16>
    %54 = vector.extract_strided_slice %1 {offsets = [5, 7], sizes = [10, 130], strides = [1, 1]} : vector<18x138xbf16> to vector<10x130xbf16>
    %55 = vector.extract_strided_slice %1 {offsets = [5, 8], sizes = [10, 130], strides = [1, 1]} : vector<18x138xbf16> to vector<10x130xbf16>
    %56 = vector.extract_strided_slice %1 {offsets = [6, 0], sizes = [10, 130], strides = [1, 1]} : vector<18x138xbf16> to vector<10x130xbf16>
    %57 = vector.extract_strided_slice %1 {offsets = [6, 1], sizes = [10, 130], strides = [1, 1]} : vector<18x138xbf16> to vector<10x130xbf16>
    %58 = vector.extract_strided_slice %1 {offsets = [6, 2], sizes = [10, 130], strides = [1, 1]} : vector<18x138xbf16> to vector<10x130xbf16>
    %59 = vector.extract_strided_slice %1 {offsets = [6, 3], sizes = [10, 130], strides = [1, 1]} : vector<18x138xbf16> to vector<10x130xbf16>
    %60 = vector.extract_strided_slice %1 {offsets = [6, 4], sizes = [10, 130], strides = [1, 1]} : vector<18x138xbf16> to vector<10x130xbf16>
    %61 = vector.extract_strided_slice %1 {offsets = [6, 5], sizes = [10, 130], strides = [1, 1]} : vector<18x138xbf16> to vector<10x130xbf16>
    %62 = vector.extract_strided_slice %1 {offsets = [6, 6], sizes = [10, 130], strides = [1, 1]} : vector<18x138xbf16> to vector<10x130xbf16>
    %63 = vector.extract_strided_slice %1 {offsets = [6, 7], sizes = [10, 130], strides = [1, 1]} : vector<18x138xbf16> to vector<10x130xbf16>
    %64 = vector.extract_strided_slice %1 {offsets = [6, 8], sizes = [10, 130], strides = [1, 1]} : vector<18x138xbf16> to vector<10x130xbf16>
    %65 = vector.extract_strided_slice %1 {offsets = [7, 0], sizes = [10, 130], strides = [1, 1]} : vector<18x138xbf16> to vector<10x130xbf16>
    %66 = vector.extract_strided_slice %1 {offsets = [7, 1], sizes = [10, 130], strides = [1, 1]} : vector<18x138xbf16> to vector<10x130xbf16>
    %67 = vector.extract_strided_slice %1 {offsets = [7, 2], sizes = [10, 130], strides = [1, 1]} : vector<18x138xbf16> to vector<10x130xbf16>
    %68 = vector.extract_strided_slice %1 {offsets = [7, 3], sizes = [10, 130], strides = [1, 1]} : vector<18x138xbf16> to vector<10x130xbf16>
    %69 = vector.extract_strided_slice %1 {offsets = [7, 4], sizes = [10, 130], strides = [1, 1]} : vector<18x138xbf16> to vector<10x130xbf16>
    %70 = vector.extract_strided_slice %1 {offsets = [7, 5], sizes = [10, 130], strides = [1, 1]} : vector<18x138xbf16> to vector<10x130xbf16>
    %71 = vector.extract_strided_slice %1 {offsets = [7, 6], sizes = [10, 130], strides = [1, 1]} : vector<18x138xbf16> to vector<10x130xbf16>
    %72 = vector.extract_strided_slice %1 {offsets = [7, 7], sizes = [10, 130], strides = [1, 1]} : vector<18x138xbf16> to vector<10x130xbf16>
    %73 = vector.extract_strided_slice %1 {offsets = [7, 8], sizes = [10, 130], strides = [1, 1]} : vector<18x138xbf16> to vector<10x130xbf16>
    %74 = vector.extract_strided_slice %1 {offsets = [8, 0], sizes = [10, 130], strides = [1, 1]} : vector<18x138xbf16> to vector<10x130xbf16>
    %75 = vector.extract_strided_slice %1 {offsets = [8, 1], sizes = [10, 130], strides = [1, 1]} : vector<18x138xbf16> to vector<10x130xbf16>
    %76 = vector.extract_strided_slice %1 {offsets = [8, 2], sizes = [10, 130], strides = [1, 1]} : vector<18x138xbf16> to vector<10x130xbf16>
    %77 = vector.extract_strided_slice %1 {offsets = [8, 3], sizes = [10, 130], strides = [1, 1]} : vector<18x138xbf16> to vector<10x130xbf16>
    %78 = vector.extract_strided_slice %1 {offsets = [8, 4], sizes = [10, 130], strides = [1, 1]} : vector<18x138xbf16> to vector<10x130xbf16>
    %79 = vector.extract_strided_slice %1 {offsets = [8, 5], sizes = [10, 130], strides = [1, 1]} : vector<18x138xbf16> to vector<10x130xbf16>
    %80 = vector.extract_strided_slice %1 {offsets = [8, 6], sizes = [10, 130], strides = [1, 1]} : vector<18x138xbf16> to vector<10x130xbf16>
    %81 = vector.extract_strided_slice %1 {offsets = [8, 7], sizes = [10, 130], strides = [1, 1]} : vector<18x138xbf16> to vector<10x130xbf16>
    %82 = vector.extract_strided_slice %1 {offsets = [8, 8], sizes = [10, 130], strides = [1, 1]} : vector<18x138xbf16> to vector<10x130xbf16>
    %83 = vector.shape_cast %2 : vector<10x130xbf16> to vector<1x10x130xbf16>
    %84 = vector.shape_cast %3 : vector<10x130xbf16> to vector<1x10x130xbf16>
    %85 = vector.shape_cast %4 : vector<10x130xbf16> to vector<1x10x130xbf16>
    %86 = vector.shape_cast %5 : vector<10x130xbf16> to vector<1x10x130xbf16>
    %87 = vector.shape_cast %6 : vector<10x130xbf16> to vector<1x10x130xbf16>
    %88 = vector.shape_cast %7 : vector<10x130xbf16> to vector<1x10x130xbf16>
    %89 = vector.shape_cast %8 : vector<10x130xbf16> to vector<1x10x130xbf16>
    %90 = vector.shape_cast %9 : vector<10x130xbf16> to vector<1x10x130xbf16>
    %91 = vector.shape_cast %10 : vector<10x130xbf16> to vector<1x10x130xbf16>
    %92 = vector.shape_cast %11 : vector<10x130xbf16> to vector<1x10x130xbf16>
    %93 = vector.shape_cast %12 : vector<10x130xbf16> to vector<1x10x130xbf16>
    %94 = vector.shape_cast %13 : vector<10x130xbf16> to vector<1x10x130xbf16>
    %95 = vector.shape_cast %14 : vector<10x130xbf16> to vector<1x10x130xbf16>
    %96 = vector.shape_cast %15 : vector<10x130xbf16> to vector<1x10x130xbf16>
    %97 = vector.shape_cast %16 : vector<10x130xbf16> to vector<1x10x130xbf16>
    %98 = vector.shape_cast %17 : vector<10x130xbf16> to vector<1x10x130xbf16>
    %99 = vector.shape_cast %18 : vector<10x130xbf16> to vector<1x10x130xbf16>
    %100 = vector.shape_cast %19 : vector<10x130xbf16> to vector<1x10x130xbf16>
    %101 = vector.shape_cast %20 : vector<10x130xbf16> to vector<1x10x130xbf16>
    %102 = vector.shape_cast %21 : vector<10x130xbf16> to vector<1x10x130xbf16>
    %103 = vector.shape_cast %22 : vector<10x130xbf16> to vector<1x10x130xbf16>
    %104 = vector.shape_cast %23 : vector<10x130xbf16> to vector<1x10x130xbf16>
    %105 = vector.shape_cast %24 : vector<10x130xbf16> to vector<1x10x130xbf16>
    %106 = vector.shape_cast %25 : vector<10x130xbf16> to vector<1x10x130xbf16>
    %107 = vector.shape_cast %26 : vector<10x130xbf16> to vector<1x10x130xbf16>
    %108 = vector.shape_cast %27 : vector<10x130xbf16> to vector<1x10x130xbf16>
    %109 = vector.shape_cast %28 : vector<10x130xbf16> to vector<1x10x130xbf16>
    %110 = vector.shape_cast %29 : vector<10x130xbf16> to vector<1x10x130xbf16>
    %111 = vector.shape_cast %30 : vector<10x130xbf16> to vector<1x10x130xbf16>
    %112 = vector.shape_cast %31 : vector<10x130xbf16> to vector<1x10x130xbf16>
    %113 = vector.shape_cast %32 : vector<10x130xbf16> to vector<1x10x130xbf16>
    %114 = vector.shape_cast %33 : vector<10x130xbf16> to vector<1x10x130xbf16>
    %115 = vector.shape_cast %34 : vector<10x130xbf16> to vector<1x10x130xbf16>
    %116 = vector.shape_cast %35 : vector<10x130xbf16> to vector<1x10x130xbf16>
    %117 = vector.shape_cast %36 : vector<10x130xbf16> to vector<1x10x130xbf16>
    %118 = vector.shape_cast %37 : vector<10x130xbf16> to vector<1x10x130xbf16>
    %119 = vector.shape_cast %38 : vector<10x130xbf16> to vector<1x10x130xbf16>
    %120 = vector.shape_cast %39 : vector<10x130xbf16> to vector<1x10x130xbf16>
    %121 = vector.shape_cast %40 : vector<10x130xbf16> to vector<1x10x130xbf16>
    %122 = vector.shape_cast %41 : vector<10x130xbf16> to vector<1x10x130xbf16>
    %123 = vector.shape_cast %42 : vector<10x130xbf16> to vector<1x10x130xbf16>
    %124 = vector.shape_cast %43 : vector<10x130xbf16> to vector<1x10x130xbf16>
    %125 = vector.shape_cast %44 : vector<10x130xbf16> to vector<1x10x130xbf16>
    %126 = vector.shape_cast %45 : vector<10x130xbf16> to vector<1x10x130xbf16>
    %127 = vector.shape_cast %46 : vector<10x130xbf16> to vector<1x10x130xbf16>
    %128 = vector.shape_cast %47 : vector<10x130xbf16> to vector<1x10x130xbf16>
    %129 = vector.shape_cast %48 : vector<10x130xbf16> to vector<1x10x130xbf16>
    %130 = vector.shape_cast %49 : vector<10x130xbf16> to vector<1x10x130xbf16>
    %131 = vector.shape_cast %50 : vector<10x130xbf16> to vector<1x10x130xbf16>
    %132 = vector.shape_cast %51 : vector<10x130xbf16> to vector<1x10x130xbf16>
    %133 = vector.shape_cast %52 : vector<10x130xbf16> to vector<1x10x130xbf16>
    %134 = vector.shape_cast %53 : vector<10x130xbf16> to vector<1x10x130xbf16>
    %135 = vector.shape_cast %54 : vector<10x130xbf16> to vector<1x10x130xbf16>
    %136 = vector.shape_cast %55 : vector<10x130xbf16> to vector<1x10x130xbf16>
    %137 = vector.shape_cast %56 : vector<10x130xbf16> to vector<1x10x130xbf16>
    %138 = vector.shape_cast %57 : vector<10x130xbf16> to vector<1x10x130xbf16>
    %139 = vector.shape_cast %58 : vector<10x130xbf16> to vector<1x10x130xbf16>
    %140 = vector.shape_cast %59 : vector<10x130xbf16> to vector<1x10x130xbf16>
    %141 = vector.shape_cast %60 : vector<10x130xbf16> to vector<1x10x130xbf16>
    %142 = vector.shape_cast %61 : vector<10x130xbf16> to vector<1x10x130xbf16>
    %143 = vector.shape_cast %62 : vector<10x130xbf16> to vector<1x10x130xbf16>
    %144 = vector.shape_cast %63 : vector<10x130xbf16> to vector<1x10x130xbf16>
    %145 = vector.shape_cast %64 : vector<10x130xbf16> to vector<1x10x130xbf16>
    %146 = vector.shape_cast %65 : vector<10x130xbf16> to vector<1x10x130xbf16>
    %147 = vector.shape_cast %66 : vector<10x130xbf16> to vector<1x10x130xbf16>
    %148 = vector.shape_cast %67 : vector<10x130xbf16> to vector<1x10x130xbf16>
    %149 = vector.shape_cast %68 : vector<10x130xbf16> to vector<1x10x130xbf16>
    %150 = vector.shape_cast %69 : vector<10x130xbf16> to vector<1x10x130xbf16>
    %151 = vector.shape_cast %70 : vector<10x130xbf16> to vector<1x10x130xbf16>
    %152 = vector.shape_cast %71 : vector<10x130xbf16> to vector<1x10x130xbf16>
    %153 = vector.shape_cast %72 : vector<10x130xbf16> to vector<1x10x130xbf16>
    %154 = vector.shape_cast %73 : vector<10x130xbf16> to vector<1x10x130xbf16>
    %155 = vector.shape_cast %74 : vector<10x130xbf16> to vector<1x10x130xbf16>
    %156 = vector.shape_cast %75 : vector<10x130xbf16> to vector<1x10x130xbf16>
    %157 = vector.shape_cast %76 : vector<10x130xbf16> to vector<1x10x130xbf16>
    %158 = vector.shape_cast %77 : vector<10x130xbf16> to vector<1x10x130xbf16>
    %159 = vector.shape_cast %78 : vector<10x130xbf16> to vector<1x10x130xbf16>
    %160 = vector.shape_cast %79 : vector<10x130xbf16> to vector<1x10x130xbf16>
    %161 = vector.shape_cast %80 : vector<10x130xbf16> to vector<1x10x130xbf16>
    %162 = vector.shape_cast %81 : vector<10x130xbf16> to vector<1x10x130xbf16>
    %163 = vector.shape_cast %82 : vector<10x130xbf16> to vector<1x10x130xbf16>
    %164 = tpu.concatenate %83, %84, %85, %86, %87, %88, %89, %90, %91, %92, %93, %94, %95, %96, %97, %98 in 0 : vector<1x10x130xbf16>, vector<1x10x130xbf16>, vector<1x10x130xbf16>, vector<1x10x130xbf16>, vector<1x10x130xbf16>, vector<1x10x130xbf16>, vector<1x10x130xbf16>, vector<1x10x130xbf16>, vector<1x10x130xbf16>, vector<1x10x130xbf16>, vector<1x10x130xbf16>, vector<1x10x130xbf16>, vector<1x10x130xbf16>, vector<1x10x130xbf16>, vector<1x10x130xbf16>, vector<1x10x130xbf16> -> vector<16x10x130xbf16>
    %165 = tpu.concatenate %99, %100, %101, %102, %103, %104, %105, %106, %107, %108, %109, %110, %111, %112, %113, %114 in 0 : vector<1x10x130xbf16>, vector<1x10x130xbf16>, vector<1x10x130xbf16>, vector<1x10x130xbf16>, vector<1x10x130xbf16>, vector<1x10x130xbf16>, vector<1x10x130xbf16>, vector<1x10x130xbf16>, vector<1x10x130xbf16>, vector<1x10x130xbf16>, vector<1x10x130xbf16>, vector<1x10x130xbf16>, vector<1x10x130xbf16>, vector<1x10x130xbf16>, vector<1x10x130xbf16>, vector<1x10x130xbf16> -> vector<16x10x130xbf16>
    %166 = tpu.concatenate %115, %116, %117, %118, %119, %120, %121, %122, %123, %124, %125, %126, %127, %128, %129, %130 in 0 : vector<1x10x130xbf16>, vector<1x10x130xbf16>, vector<1x10x130xbf16>, vector<1x10x130xbf16>, vector<1x10x130xbf16>, vector<1x10x130xbf16>, vector<1x10x130xbf16>, vector<1x10x130xbf16>, vector<1x10x130xbf16>, vector<1x10x130xbf16>, vector<1x10x130xbf16>, vector<1x10x130xbf16>, vector<1x10x130xbf16>, vector<1x10x130xbf16>, vector<1x10x130xbf16>, vector<1x10x130xbf16> -> vector<16x10x130xbf16>
    %167 = tpu.concatenate %131, %132, %133, %134, %135, %136, %137, %138, %139, %140, %141, %142, %143, %144, %145, %146 in 0 : vector<1x10x130xbf16>, vector<1x10x130xbf16>, vector<1x10x130xbf16>, vector<1x10x130xbf16>, vector<1x10x130xbf16>, vector<1x10x130xbf16>, vector<1x10x130xbf16>, vector<1x10x130xbf16>, vector<1x10x130xbf16>, vector<1x10x130xbf16>, vector<1x10x130xbf16>, vector<1x10x130xbf16>, vector<1x10x130xbf16>, vector<1x10x130xbf16>, vector<1x10x130xbf16>, vector<1x10x130xbf16> -> vector<16x10x130xbf16>
    %168 = tpu.concatenate %147, %148, %149, %150, %151, %152, %153, %154, %155, %156, %157, %158, %159, %160, %161, %162 in 0 : vector<1x10x130xbf16>, vector<1x10x130xbf16>, vector<1x10x130xbf16>, vector<1x10x130xbf16>, vector<1x10x130xbf16>, vector<1x10x130xbf16>, vector<1x10x130xbf16>, vector<1x10x130xbf16>, vector<1x10x130xbf16>, vector<1x10x130xbf16>, vector<1x10x130xbf16>, vector<1x10x130xbf16>, vector<1x10x130xbf16>, vector<1x10x130xbf16>, vector<1x10x130xbf16>, vector<1x10x130xbf16> -> vector<16x10x130xbf16>
    %169 = tpu.concatenate %164, %165, %166, %167, %168, %163 in 0 : vector<16x10x130xbf16>, vector<16x10x130xbf16>, vector<16x10x130xbf16>, vector<16x10x130xbf16>, vector<16x10x130xbf16>, vector<1x10x130xbf16> -> vector<81x10x130xbf16>
    %170 = vector.shape_cast %169 : vector<81x10x130xbf16> to vector<81x1300xbf16>
    %c0_3 = arith.constant 0 : index
    %c0_4 = arith.constant 0 : index
    %171 = vector.load %arg3[%c0_3, %c0_4] : memref<64x81xbf16, #tpu.memory_space<vmem>>, vector<64x81xbf16>
    %cst = arith.constant dense<0.000000e+00> : vector<64x1300xf32>
    %172 = tpu.matmul %171, %170, %cst {dimension_numbers = #tpu.dot_dimension_numbers<[1], [0], [0], [1], [0, 0, 1, 1], [], []>} : vector<64x81xbf16>, vector<81x1300xbf16>, vector<64x1300xf32> -> vector<64x1300xf32>
    %cst_5 = arith.constant 0.000000e+00 : f32
    %173 = vector.broadcast %cst_5 : f32 to vector<64x1300xf32>
    %174 = arith.maximumf %172, %173 : vector<64x1300xf32>
    %c0_6 = arith.constant 0 : index
    %c0_7 = arith.constant 0 : index
    %175 = vector.load %arg4[%c0_6, %c0_7] : memref<32x64xbf16, #tpu.memory_space<vmem>>, vector<32x64xbf16>
    %176 = arith.truncf %174 : vector<64x1300xf32> to vector<64x1300xbf16>
    %cst_8 = arith.constant dense<0.000000e+00> : vector<32x1300xf32>
    %177 = tpu.matmul %175, %176, %cst_8 {dimension_numbers = #tpu.dot_dimension_numbers<[1], [0], [0], [1], [0, 0, 1, 1], [], []>} : vector<32x64xbf16>, vector<64x1300xbf16>, vector<32x1300xf32> -> vector<32x1300xf32>
    %cst_9 = arith.constant 0.000000e+00 : f32
    %178 = vector.broadcast %cst_9 : f32 to vector<32x1300xf32>
    %179 = arith.maximumf %177, %178 : vector<32x1300xf32>
    %c0_10 = arith.constant 0 : index
    %c0_11 = arith.constant 0 : index
    %180 = vector.load %arg5[%c0_10, %c0_11] : memref<9x32xbf16, #tpu.memory_space<vmem>>, vector<9x32xbf16>
    %181 = arith.truncf %179 : vector<32x1300xf32> to vector<32x1300xbf16>
    %cst_12 = arith.constant dense<0.000000e+00> : vector<9x1300xf32>
    %182 = tpu.matmul %180, %181, %cst_12 {dimension_numbers = #tpu.dot_dimension_numbers<[1], [0], [0], [1], [0, 0, 1, 1], [], []>} : vector<9x32xbf16>, vector<32x1300xbf16>, vector<9x1300xf32> -> vector<9x1300xf32>
    %183 = vector.shape_cast %182 : vector<9x1300xf32> to vector<9x10x130xf32>
    %c8_i32 = arith.constant 8 : i32
    %184 = arith.muli %arg1, %c8_i32 : i32
    %185 = tpu.iota {dimensions = array<i32: 0>} : vector<10x130xi32>
    %c1_i32 = arith.constant 1 : i32
    %186 = arith.subi %184, %c1_i32 : i32
    %187 = vector.broadcast %186 : i32 to vector<10x130xi32>
    %188 = arith.addi %185, %187 : vector<10x130xi32>
    %189 = tpu.iota {dimensions = array<i32: 1>} : vector<10x130xi32>
    %c1_i32_13 = arith.constant 1 : i32
    %190 = vector.broadcast %c1_i32_13 : i32 to vector<10x130xi32>
    %191 = arith.subi %189, %190 : vector<10x130xi32>
    %c0_i32 = arith.constant 0 : i32
    %192 = vector.broadcast %c0_i32 : i32 to vector<10x130xi32>
    %193 = arith.cmpi sge, %188, %192 : vector<10x130xi32>
    %c16_i32 = arith.constant 16 : i32
    %194 = vector.broadcast %c16_i32 : i32 to vector<10x130xi32>
    %195 = arith.cmpi slt, %188, %194 : vector<10x130xi32>
    %196 = arith.andi %193, %195 : vector<10x130xi1>
    %c0_i32_14 = arith.constant 0 : i32
    %197 = vector.broadcast %c0_i32_14 : i32 to vector<10x130xi32>
    %198 = arith.cmpi sge, %191, %197 : vector<10x130xi32>
    %199 = arith.andi %196, %198 : vector<10x130xi1>
    %c16_i32_15 = arith.constant 16 : i32
    %200 = vector.broadcast %c16_i32_15 : i32 to vector<10x130xi32>
    %201 = arith.cmpi slt, %191, %200 : vector<10x130xi32>
    %202 = arith.andi %199, %201 : vector<10x130xi1>
    %203 = vector.shape_cast %202 : vector<10x130xi1> to vector<1x10x130xi1>
    %cst_16 = arith.constant 0.000000e+00 : f32
    %204 = vector.shape_cast %203 : vector<1x10x130xi1> to vector<1x10x130xi1>
    %205 = vector.broadcast %204 : vector<1x10x130xi1> to vector<9x10x130xi1>
    %206 = vector.broadcast %cst_16 : f32 to vector<9x10x130xf32>
    %207 = arith.select %205, %183, %206 : vector<9x10x130xi1>, vector<9x10x130xf32>
    %208 = vector.extract_strided_slice %207 {offsets = [0, 0, 0], sizes = [1, 8, 128], strides = [1, 1, 1]} : vector<9x10x130xf32> to vector<1x8x128xf32>
    %209 = vector.shape_cast %208 : vector<1x8x128xf32> to vector<8x128xf32>
    %210 = vector.extract_strided_slice %207 {offsets = [1, 0, 1], sizes = [1, 8, 128], strides = [1, 1, 1]} : vector<9x10x130xf32> to vector<1x8x128xf32>
    %211 = vector.shape_cast %210 : vector<1x8x128xf32> to vector<8x128xf32>
    %212 = arith.addf %209, %211 : vector<8x128xf32>
    %213 = vector.extract_strided_slice %207 {offsets = [2, 0, 2], sizes = [1, 8, 128], strides = [1, 1, 1]} : vector<9x10x130xf32> to vector<1x8x128xf32>
    %214 = vector.shape_cast %213 : vector<1x8x128xf32> to vector<8x128xf32>
    %215 = arith.addf %212, %214 : vector<8x128xf32>
    %216 = vector.extract_strided_slice %207 {offsets = [3, 1, 0], sizes = [1, 8, 128], strides = [1, 1, 1]} : vector<9x10x130xf32> to vector<1x8x128xf32>
    %217 = vector.shape_cast %216 : vector<1x8x128xf32> to vector<8x128xf32>
    %218 = arith.addf %215, %217 : vector<8x128xf32>
    %219 = vector.extract_strided_slice %207 {offsets = [4, 1, 1], sizes = [1, 8, 128], strides = [1, 1, 1]} : vector<9x10x130xf32> to vector<1x8x128xf32>
    %220 = vector.shape_cast %219 : vector<1x8x128xf32> to vector<8x128xf32>
    %221 = arith.addf %218, %220 : vector<8x128xf32>
    %222 = vector.extract_strided_slice %207 {offsets = [5, 1, 2], sizes = [1, 8, 128], strides = [1, 1, 1]} : vector<9x10x130xf32> to vector<1x8x128xf32>
    %223 = vector.shape_cast %222 : vector<1x8x128xf32> to vector<8x128xf32>
    %224 = arith.addf %221, %223 : vector<8x128xf32>
    %225 = vector.extract_strided_slice %207 {offsets = [6, 2, 0], sizes = [1, 8, 128], strides = [1, 1, 1]} : vector<9x10x130xf32> to vector<1x8x128xf32>
    %226 = vector.shape_cast %225 : vector<1x8x128xf32> to vector<8x128xf32>
    %227 = arith.addf %224, %226 : vector<8x128xf32>
    %228 = vector.extract_strided_slice %207 {offsets = [7, 2, 1], sizes = [1, 8, 128], strides = [1, 1, 1]} : vector<9x10x130xf32> to vector<1x8x128xf32>
    %229 = vector.shape_cast %228 : vector<1x8x128xf32> to vector<8x128xf32>
    %230 = arith.addf %227, %229 : vector<8x128xf32>
    %231 = vector.extract_strided_slice %207 {offsets = [8, 2, 2], sizes = [1, 8, 128], strides = [1, 1, 1]} : vector<9x10x130xf32> to vector<1x8x128xf32>
    %232 = vector.shape_cast %231 : vector<1x8x128xf32> to vector<8x128xf32>
    %233 = arith.addf %230, %232 : vector<8x128xf32>
    %cst_17 = arith.constant 0.000000e+00 : f32
    %234 = vector.broadcast %cst_17 : f32 to vector<8x128xf32>
    %235 = arith.maximumf %233, %234 : vector<8x128xf32>
    %c0_18 = arith.constant 0 : index
    %c0_19 = arith.constant 0 : index
    %c0_20 = arith.constant 0 : index
    %236 = vector.load %arg6[%c0_18, %c0_19, %c0_20] : memref<1x8x128xf32, #tpu.memory_space<vmem>>, vector<1x8x128xf32>
    %237 = vector.shape_cast %236 : vector<1x8x128xf32> to vector<8x128xf32>
    %238 = vector.shape_cast %235 : vector<8x128xf32> to vector<1x8x128xf32>
    tpu.vector_store %arg6[%c0_18, %c0_19, %c0_20], %238 {strides = array<i32>} : memref<1x8x128xf32, #tpu.memory_space<vmem>>, vector<1x8x128xf32>,
    return
  }
  func.func @transform_0(%arg0: i32, %arg1: i32) -> (i32, i32, i32, i32) {
    %c0_i32 = arith.constant 0 : i32
    %c0_i32_0 = arith.constant 0 : i32
    %c0_i32_1 = arith.constant 0 : i32
    return %arg0, %arg1, %c0_i32, %c0_i32_0 : i32, i32, i32, i32
  }
  func.func @transform_1(%arg0: i32, %arg1: i32) -> (i32, i32) {
    %c0_i32 = arith.constant 0 : i32
    %c0_i32_0 = arith.constant 0 : i32
    %c0_i32_1 = arith.constant 0 : i32
    return %c0_i32, %c0_i32_0 : i32, i32
  }
  func.func @transform_2(%arg0: i32, %arg1: i32) -> (i32, i32) {
    %c0_i32 = arith.constant 0 : i32
    %c0_i32_0 = arith.constant 0 : i32
    %c0_i32_1 = arith.constant 0 : i32
    return %c0_i32, %c0_i32_0 : i32, i32
  }
  func.func @transform_3(%arg0: i32, %arg1: i32) -> (i32, i32) {
    %c0_i32 = arith.constant 0 : i32
    %c0_i32_0 = arith.constant 0 : i32
    %c0_i32_1 = arith.constant 0 : i32
    return %c0_i32, %c0_i32_0 : i32, i32
  }
  func.func @transform_4(%arg0: i32, %arg1: i32) -> (i32, i32, i32) {
    %c0_i32 = arith.constant 0 : i32
    %c0_i32_0 = arith.constant 0 : i32
    return %arg0, %arg1, %c0_i32 : i32, i32, i32
  }
}

</mosaic_0001>

<bundles_post_ra>
// kernel: srcnn_forward.1
= control target key start
LH: loop header
LB: loop body
LE: loop exit
PB: predicated region body
PF: predicated region fallthrough
CT: control target
= control target key end

     0   :  { %s7378_s15 = smov 0   ;;  %s7380_s16 = smov 0   ;;  %s12955_s0 = inlined_call_operand.vmem [shape: bf16[2,2,18,138], index: 0, kind: input, shape index: {}]   ;;  %s12956_s1 = inlined_call_operand.vmem [shape: bf16[64,81], index: 1, kind: input, shape index: {}]   ;;  %s12957_s2 = inlined_call_operand.vmem [shape: bf16[32,64], index: 2, kind: input, shape index: {}]   ;;  %s12958_s3 = inlined_call_operand.vmem [shape: bf16[9,32], index: 3, kind: input, shape index: {}]   ;;  %s12959_s4 = inlined_call_operand.vmem [shape: f32[2,16,128], index: 4, kind: output, shape index: {}]  }
   0x1   :  { %s7382_s17 = smov 0   ;;  %s7384_s18 = smov 0  }
   0x2   :  { %s7386_s19 = smov 0  }
   0x3 LB: > { %s23_s20 = sadd.s32 1, %s7313_s17  ;;  %s26_s21 = sadd.s32 1, %s7317_s18  ;;  %s7321_s19 = sphi %s7386_s19, %s14_s19   ;;  %s7317_s18 = sphi %s7384_s18, %s14125_s18   ;;  %s7313_s17 = sphi %s7382_s17, %s14124_s17   ;;  %s7309_s16 = sphi %s7380_s16, %s14123_s16   ;;  %s7305_s15 = sphi %s7378_s15, %s14122_s15  }
   0x4   : > { %p24_p0 = scmp.ge.s32.totalorder %s23_s20, 2  ;;  %p7060_p1 = scmp.ge.s32.totalorder %s7321_s19, 1 }
   0x5   : > { %p182_p2 = scmp.lt.s32.totalorder %s7321_s19, 5 }
   0x6   : > { %s14127_s20 = smov (%p24_p0, %s23_s20), 0  ;;  %s14129_s21 = smov (!%p24_p0, %s26_s21), %s7317_s18 }
   0x7   : > { %p183_p3 = pnand %p7060_p1, %p182_p2  ;;  %p28_p4 = scmp.ge.s32.totalorder %s14129_s21, 2 }
   0x9   : > { %s14131_s21 = smov (%p28_p4, %s14129_s21), 0  ;;  %186 = sbr.rel (%p183_p3) target bundleno = 1985 (0x7c1), region = 36 }
   0xe   : > { %p215_p5 = scmp.lt.s32.totalorder %s7309_s16, 1  ;;  %p217_p6 = scmp.lt.s32.totalorder %s7305_s15, 1  ;;  %vm326_vm0 = vsmask.f32 3328  ;;  %vm327_vm1 = vsmask.f32 7440 }
   0xf   : > { %s7323_s30 = smov 125   ;;  %s7324_s5 = smov 126   ;;  %vm7478_vm2 = vmor %vm326_vm0, %vm327_vm1  ;;  %v13285_v13 = vmov 0  ;;  %vm473_vm3 = vcmask 1042432   ;;  %vm474_vm4 = vcmask 1046532   ;;  %vm288_vm6 = vcmask 1006592  }
  0x10   : > { %s14133_s16 = smov (!%p215_p5, %s7309_s16), 1  ;;  %s7325_s6 = smov 127   ;;  %v13286_v13 = vsel %vm7478_vm2, 4294967295, %v13285_v13  ;;  %vm7549_vm5 = vmor %vm473_vm3, %vm474_vm4  ;;  %vm244_vm7 = vcmask 1039360   ;;  %vm2199_vm8 = vcmask 1047556   ;;  %vm299_vm9 = vcmask 998400  }
  0x11   : > { %s7414_s22 = scalar_select %p217_p6, %s7305_s15, 1  ;;  %13287 = vst [vmem:[#allocation6_spill] sm:$0xff] %v13286_v13  ;;  %vm255_vm10 = vcmask 1031168   ;;  %v7338_v42 = vmov 1983009808   ;;  %vm13097_vm11 = vcmask 1014784  }
  0x12   : > { %s7200_s23 = smul.u32 12, %s14133_s16  ;;  %s7326_s7 = smov 123   ;;  %v2204_v43 = vunpack.c.l.s4 %v7338_v42  ;;  %vm266_vm12 = vcmask 1022976   ;;  %vm310_vm13 = vcmask 990208   ;;  %vm13052_vm14 = vcmask 982016  }
  0x13   : > { %s7199_s24 = smul.u32 6, %s7414_s22  ;;  %s7327_s8 = smov 124   ;;  %vm5325_vm15 = vcmask 1040384   ;;  %vm1793_vm0 = vsmask.f32 256  ;;  %vm416_vm4 = vcmask 56320  }
  0x14   : > { %s7328_s9 = smov 122   ;;  %s7329_s10 = smov 120   ;;  %v7597_v48 = vunpack.c.0.s8 %v2204_v43  ;;  %vm1794_vm1 = vsmask.f32 4368 }
  0x15   : > { %s221_s25 = sadd.s32 %s7200_s23, %s7199_s24  ;;  %s7330_s11 = smov 121   ;;  %vm7980_vm3 = vmor %vm1793_vm0, %vm1794_vm1  ;;  %vm452_vm0 = vcmask 23552   ;;  %vm1441_vm1 = vsmask.f32 1280 }
  0x16   : > { %s7061_s26 = sshll.u32 %s221_s25, 2  ;;  %s7331_s12 = smov 7   ;;  %13294 = vst [vmem:[#allocation11_spill] sm:$0xff] %v7597_v48 }
  0x17   : > { %s7421_s29 = scalar_lea.vmem %s12955_s0, %s7061_s26  ;;  %s7332_s13 = smov 5  }
  0x18   : > { %v7424_v0 = vld [vmem:[%s7421_s29] sm:$0xff]  ;;  %v7433_v1 = vld [vmem:[%s7421_s29 + $0x8] sm:$0xff]  ;;  %s7333_s14 = smov 6   ;;  %s7334_s23 = smov 4   ;;  %v7592_v45 = vld [vmem:[%s7421_s29 + $0x10] sm:$0x11] }
  0x19   : > { %260 = vrot.lane.b32.xlu2 %v7424_v0, %s7323_s30  ;;  %249 = vrot.lane.b32.xlu1 %v7424_v0, %s7324_s5  ;;  %v7448_v2 = vshrl.u32 %v7424_v0, 16  ;;  %v7451_v3 = vshll.u32 %v7424_v0, 16  ;;  %v7454_v4 = vshll.u32 %v7433_v1, 16  ;;  %v7457_v5 = vshrl.u32 %v7433_v1, 16  ;;  %s7335_s24 = smov 2   ;;  %s7336_s25 = smov 3  }
  0x1a   : > { %238 = vrot.lane.b32.xlu0 %v7424_v0, %s7325_s6  ;;  %s7337_s26 = smov 1   ;;  %v478_v18 = vrot.slane %v7433_v1, 5  ;;  %v7064_v19 = vrot.slane %v7424_v0, 9  ;;  %13293 = vst [vmem:[#allocation10_spill] sm:$0xff] %v7592_v45  ;;  %v522_v50 = vrot.slane %v7592_v45, 5  ;;  %v3359_v54 = vrot.slane %v7433_v1, 4 }
  0x1b   : > { %13281 = vst [vmem:[#allocation2_spill] sm:$0xff] %v7448_v2  ;;  %v332_v6 = vrot.slane %v7448_v2, 4  ;;  %v335_v7 = vrot.slane %v7451_v3, 5  ;;  %v7468_v8 = vrot.slane %v7454_v4, 5  ;;  %v345_v9 = vrot.slane %v7457_v5, 4  ;;  %s7341_s27 = smov 8  }
  0x1c   : > { %13282 = vst [vmem:[#allocation3_spill] sm:$0xff] %v7451_v3  ;;  %v7553_v22 = vrot.slane %v478_v18, 4  ;;  %v479_v24 = vsel %vm7549_vm5, %v7064_v19, %v478_v18  ;;  %v2201_v60 = vrot.slane %v7424_v0, 4  ;;  %s7342_s28 = smov 10  }
  0x1d   : > { %13283 = vst [vmem:[#allocation4_spill] sm:$0xff] %v7454_v4  ;;  %v336_v10 = vor.u32 %v335_v7, %v332_v6  ;;  %v346_v11 = vor.u32 %v345_v9, %v7468_v8 }
  0x1e   : > { %13284 = vst [vmem:[#allocation5_spill] sm:$0xff] %v7457_v5  ;;  %v523_v61 = vsel %vm7549_vm5, %v7553_v22, %v522_v50  ;;  %vm461_vm5 = vcmask 15360  }
  0x1f   : > { %v337_v12 = vrot.slane %v336_v10, 4  ;;  %v7482_v14 = vrot.slane %v346_v11, 4 }
  0x21   : > { %262 = vrot.lane.b32.xlu2 %v7433_v1, %s7323_s30  ;;  %251 = vrot.lane.b32.xlu1 %v7433_v1, %s7324_s5  ;;  %13288 = vst [vmem:[#allocation7_spill] sm:$0xff] %v7482_v14  ;;  %v7487_v15 = vsel %vm7478_vm2, %v337_v12, %v7468_v8 }
  0x22   : > { %240 = vrot.lane.b32.xlu0 %v7433_v1, %s7325_s6  ;;  %13289 = vst [vmem:[#allocation8_spill] sm:$0xff] %v7487_v15 }
  0x29   : > { %282 = vrot.lane.b32.xlu2 %v7424_v0, %s7326_s7  ;;  %273 = vrot.lane.b32.xlu1 %v7433_v1, %s7327_s8 }
  0x2a   : > { %271 = vrot.lane.b32.xlu0 %v7424_v0, %s7327_s8 }
  0x31   : > { %295 = vrot.lane.b32.xlu2 %v7433_v1, %s7328_s9  ;;  %293 = vrot.lane.b32.xlu1 %v7424_v0, %s7328_s9 }
  0x32   : > { %284 = vrot.lane.b32.xlu0 %v7433_v1, %s7326_s7 }
  0x39   : > { %315 = vrot.lane.b32.xlu2 %v7424_v0, %s7329_s10  ;;  %306 = vrot.lane.b32.xlu1 %v7433_v1, %s7330_s11 }
  0x3a   : > { %304 = vrot.lane.b32.xlu0 %v7424_v0, %s7330_s11 }
  0x41   : > { %352 = vrot.lane.b32.xlu2 %v7482_v14, %s7325_s6  ;;  %350 = vrot.lane.b32.xlu1 %v7487_v15, %s7325_s6 }
  0x42   : > { %317 = vrot.lane.b32.xlu0 %v7433_v1, %s7329_s10 }
  0x49   : > { %370 = vrot.lane.b32.xlu2 %v7487_v15, %s7323_s30  ;;  %362 = vrot.lane.b32.xlu1 %v7482_v14, %s7324_s5 }
  0x4a   : > { %360 = vrot.lane.b32.xlu0 %v7487_v15, %s7324_s5 }
  0x51   : > { %382 = vrot.lane.b32.xlu2 %v7482_v14, %s7327_s8  ;;  %380 = vrot.lane.b32.xlu1 %v7487_v15, %s7327_s8 }
  0x52   : > { %372 = vrot.lane.b32.xlu0 %v7482_v14, %s7323_s30 }
  0x59   : > { %400 = vrot.lane.b32.xlu2 %v7487_v15, %s7328_s9  ;;  %392 = vrot.lane.b32.xlu1 %v7482_v14, %s7326_s7 }
  0x5a   : > { %390 = vrot.lane.b32.xlu0 %v7487_v15, %s7326_s7 }
  0x61   : > { %412 = vrot.lane.b32.xlu2 %v7482_v14, %s7331_s12  ;;  %410 = vrot.lane.b32.xlu1 %v7487_v15, %s7331_s12 }
  0x62   : > { %402 = vrot.lane.b32.xlu0 %v7482_v14, %s7328_s9 }
  0x69   : > { %428 = vrot.lane.b32.xlu2 %v7487_v15, %s7332_s13  ;;  %421 = vrot.lane.b32.xlu1 %v7482_v14, %s7333_s14 }
  0x6a   : > { %419 = vrot.lane.b32.xlu0 %v7487_v15, %s7333_s14 }
  0x71   : > { %439 = vrot.lane.b32.xlu2 %v7482_v14, %s7334_s23  ;;  %437 = vrot.lane.b32.xlu1 %v7487_v15, %s7334_s23 }
  0x72   : > { %430 = vrot.lane.b32.xlu0 %v7482_v14, %s7332_s13 }
  0x73   : > { %v7531_v16 = vpop.permute.xlu2 %260 }
  0x79   : > { %455 = vrot.lane.b32.xlu2 %v7487_v15, %s7335_s24  ;;  %448 = vrot.lane.b32.xlu1 %v7482_v14, %s7336_s25 }
  0x7a   : > { %446 = vrot.lane.b32.xlu0 %v7487_v15, %s7336_s25 }
  0x7b   : > { %v7539_v17 = vpop.permute.xlu2 %262 }
  0x81   : > { %466 = vrot.lane.b32.xlu2 %v7482_v14, %s7337_s26  ;;  %464 = vrot.lane.b32.xlu1 %v7487_v15, %s7337_s26 }
  0x82   : > { %457 = vrot.lane.b32.xlu0 %v7482_v14, %s7335_s24 }
  0x83   : > { %v283_v20 = vpop.permute.xlu2 %282 }
  0x84   : > { %v286_v23 = vrot.slane %v283_v20, 4 }
  0x86   : > { %v7561_v25 = vsel %vm288_vm6, %v283_v20, %v286_v23 }
  0x87   : > { %13292 = vst [vmem:[#allocation9_spill] sm:$0xff] %v7561_v25  ;;  %v2255_v29 = vrot.slane %v7561_v25, 4 }
  0x89   : > { %489 = vrot.lane.b32.xlu2 %v479_v24, %s7333_s14  ;;  %483 = vrot.lane.b32.xlu1 %v7553_v22, %s7331_s12 }
  0x8a   : > { %481 = vrot.lane.b32.xlu0 %v479_v24, %s7331_s12  ;;  %s7343_s12 = smov 12  }
  0x8b   : > { %v296_v26 = vpop.permute.xlu2 %295  ;;  %v250_v27 = vpop.permute.xlu1 %249 }
  0x8c   : > { %v239_v28 = vpop.permute.xlu0 %238  ;;  %v298_v30 = vrot.slane %v296_v26, 4  ;;  %v253_v59 = vrot.slane %v250_v27, 4 }
  0x8d   : > { %v242_v31 = vrot.slane %v239_v28, 4 }
  0x8e   : > { %v7569_v33 = vsel %vm299_vm9, %v296_v26, %v298_v30  ;;  %v7629_v18 = vsel %vm255_vm10, %v250_v27, %v253_v59 }
  0x8f   : > { %v7566_v32 = vsel %vm244_vm7, %v239_v28, %v242_v31  ;;  %v3369_v38 = vrot.slane %v7569_v33, 4  ;;  %v2213_v30 = vrot.slane %v7629_v18, 4 }
  0x90   : > { %v7573_v34 = vsel %vm2199_vm8, %v2255_v29, %v7566_v32  ;;  %v2257_v35 = vrot.slane %v7566_v32, 4 }
  0x91   : > { %499 = vrot.lane.b32.xlu2 %v7553_v22, %s7332_s13  ;;  %497 = vrot.lane.b32.xlu1 %v479_v24, %s7332_s13 }
  0x92   : > { %491 = vrot.lane.b32.xlu0 %v7553_v22, %s7333_s14  ;;  %v7586_v39 = vsel %vm2199_vm8, %v7561_v25, %v2257_v35 }
  0x93   : > { %v7581_v36 = vpop.permute.xlu2 %315  ;;  %v252_v37 = vpop.permute.xlu1 %251 }
  0x94   : > { %v254_v40 = vrot.slane %v252_v37, 4  ;;  %v241_v41 = vpop.permute.xlu0 %240 }
  0x95   : > { %v243_v6 = vrot.slane %v241_v41, 4 }
  0x96   : > { %v7589_v44 = vsel %vm255_vm10, %v252_v37, %v254_v40 }
  0x97   : > { %v3370_v46 = vsel %vm2199_vm8, %v3369_v38, %v7589_v44  ;;  %v3371_v47 = vrot.slane %v7589_v44, 4  ;;  %v7644_v27 = vsel %vm244_vm7, %v241_v41, %v243_v6 }
  0x98   : > { %v3376_v57 = vperm.slane %v3370_v46, %v7597_v48  ;;  %v3397_v37 = vrot.slane %v7644_v27, 4 }
  0x99   : > { %513 = vrot.lane.b32.xlu2 %v479_v24, %s7336_s25  ;;  %507 = vrot.lane.b32.xlu1 %v7553_v22, %s7334_s23  ;;  %v3372_v49 = vsel %vm2199_vm8, %v7569_v33, %v3371_v47  ;;  %v264_v47 = vrot.slane %v7531_v16, 4 }
  0x9a   : > { %505 = vrot.lane.b32.xlu0 %v479_v24, %s7334_s23  ;;  %v3380_v51 = vperm.slane %v3372_v49, %v7597_v48  ;;  %v3381_v11 = vrot.slane %v3376_v57, 4 }
  0x9b   : > { %v7607_v52 = vpop.permute.xlu2 %352  ;;  %v274_v53 = vpop.permute.xlu1 %273 }
  0x9c   : > { %v276_v55 = vrot.slane %v274_v53, 4  ;;  %v272_v56 = vpop.permute.xlu0 %271  ;;  %v3387_v62 = vrot.slane %v3380_v51, 4  ;;  %v265_v51 = vrot.slane %v7539_v17, 4 }
  0x9d   : > { %v275_v58 = vrot.slane %v272_v56, 4 }
  0x9e   : > { %v7616_v63 = vsel %vm13097_vm11, %v274_v53, %v276_v55 }
  0x9f   : > { %13295 = vst [vmem:[#allocation12_spill] sm:$0xff] %v7616_v63  ;;  %v3357_v7 = vrot.slane %v7616_v63, 4  ;;  %v3360_v9 = vsel %vm2199_vm8, %v7616_v63, %v3359_v54  ;;  %v7622_v10 = vsel %vm13097_vm11, %v272_v56, %v275_v58 }
  0xa0   : > { %13296 = vst [vmem:[#allocation13_spill] sm:$0xff] %v7622_v10  ;;  %v3368_v12 = vperm.slane %v3360_v9, %v7597_v48  ;;  %v2202_v20 = vsel %vm2199_vm8, %v7622_v10, %v2201_v60  ;;  %v7691_v60 = vsel %vm266_vm12, %v7531_v16, %v264_v47 }
  0xa1   : > { %528 = vrot.lane.b32.xlu2 %v7592_v45, %s7325_s6  ;;  %524 = vrot.lane.b32.xlu1 %v523_v61, %s7336_s25  ;;  %v3358_v19 = vsel %vm2199_vm8, %v3357_v7, %v7433_v1  ;;  %v2210_v28 = vperm.slane %v2202_v20, %v7597_v48  ;;  %13301 = vst [vmem:[#allocation18_spill] sm:$0xff] %v7691_v60  ;;  %v12960_v7 = vshll.u32 %v7592_v45, 16 }
  0xa2   : > { %515 = vrot.lane.b32.xlu0 %v7553_v22, %s7336_s25  ;;  %v3364_v21 = vperm.slane %v3358_v19, %v7597_v48  ;;  %v7639_v23 = vsel %vm2199_vm8, %v3387_v62, %v3368_v12  ;;  %v7695_v61 = vsel %vm266_vm12, %v7539_v17, %v265_v51  ;;  %v2269_v19 = vrot.slane %v7691_v60, 4  ;;  %s7347_s25 = smov 116  }
  0xa3   : > { %v294_v24 = vpop.permute.xlu1 %293  ;;  %v7641_v26 = vpop.permute.xlu2 %370  ;;  %v2237_v42 = vrot.slane %v2210_v28, 4  ;;  %v3409_v9 = vrot.slane %v7695_v61, 4 }
  0xa4   : > { %v297_v1 = vrot.slane %v294_v24, 4  ;;  %v285_v29 = vpop.permute.xlu0 %284  ;;  %v7649_v31 = vsel %vm2199_vm8, %v3381_v11, %v3364_v21  ;;  %v2266_v11 = vperm.slane %v7586_v39, %v7597_v48 }
  0xa5   : > { %13297 = vst [vmem:[#allocation14_spill] sm:$0xff] %v7649_v31  ;;  %v287_v22 = vrot.slane %v285_v29, 4 }
  0xa6   : > { %v7652_v35 = vsel %vm299_vm9, %v294_v24, %v297_v1  ;;  %v559_v24 = vrot.slane %v12960_v7, 5 }
  0xa7   : > { %v2211_v38 = vrot.slane %v7652_v35, 4  ;;  %v2214_v40 = vsel %vm2199_vm8, %v7652_v35, %v2213_v30  ;;  %v7659_v41 = vsel %vm288_vm6, %v285_v29, %v287_v22 }
  0xa8   : > { %13298 = vst [vmem:[#allocation15_spill] sm:$0xff] %v7659_v41  ;;  %v2222_v43 = vperm.slane %v2214_v40, %v7597_v48  ;;  %v3395_v46 = vrot.slane %v7659_v41, 4  ;;  %v3398_v50 = vsel %vm2199_vm8, %v7659_v41, %v3397_v37  ;;  %v561_v37 = vshrl.u32 %v7592_v45, 16 }
  0xa9   : > { %v7666_v49 = vsel %vm2199_vm8, %v2211_v38, %v7629_v18  ;;  %540 = vrot.lane.b32.xlu2 %v7592_v45, %s7327_s8  ;;  %536 = vrot.lane.b32.xlu1 %v7592_v45, %s7323_s30  ;;  %v3406_v38 = vperm.slane %v3398_v50, %v7597_v48 }
  0xaa   : > { %v2235_v53 = vrot.slane %v2222_v43, 4  ;;  %v7676_v54 = vsel %vm2199_vm8, %v2222_v43, %v2237_v42  ;;  %v7680_v55 = vsel %vm2199_vm8, %v3395_v46, %v7644_v27  ;;  %532 = vrot.lane.b32.xlu0 %v7592_v45, %s7324_s5  ;;  %v563_v50 = vrot.slane %v561_v37, 4 }
  0xab   : > { %13299 = vst [vmem:[#allocation16_spill] sm:$0xff] %v7680_v55  ;;  %v307_v56 = vpop.permute.xlu1 %306  ;;  %v7684_v57 = vpop.permute.xlu2 %382 }
  0xac   : > { %v7687_v58 = vsel %vm2199_vm8, %v2235_v53, %v2210_v28  ;;  %v305_v59 = vpop.permute.xlu0 %304  ;;  %v309_v62 = vrot.slane %v307_v56, 4  ;;  %v2293_v28 = vrot.slane %v2266_v11, 4 }
  0xad   : > { %13300 = vst [vmem:[#allocation17_spill] sm:$0xff] %v7687_v58  ;;  %v308_v6 = vrot.slane %v305_v59, 4 }
  0xae   : > { %v7702_v12 = vsel %vm310_vm13, %v307_v56, %v309_v62  ;;  %v7745_v56 = vsel %vm7478_vm2, %v7482_v14, %v559_v24 }
  0xaf   : > { %v7705_v16 = vsel %vm310_vm13, %v305_v59, %v308_v6  ;;  %v3407_v17 = vrot.slane %v7702_v12, 4  ;;  %v3410_v20 = vsel %vm2199_vm8, %v7702_v12, %v3409_v9  ;;  %13305 = vst [vmem:[#allocation22_spill] sm:$0xff] %v7745_v56 }
  0xb0   : > { %v3418_v39 = vperm.slane %v3410_v20, %v7597_v48  ;;  %v2267_v21 = vrot.slane %v7705_v16, 4  ;;  %v2270_v29 = vsel %vm2199_vm8, %v7705_v16, %v2269_v19  ;;  %v7758_v19 = vrot.slane %v563_v50, 4 }
  0xb1   : > { %552 = vrot.lane.b32.xlu2 %v7592_v45, %s7330_s11  ;;  %548 = vrot.lane.b32.xlu1 %v7592_v45, %s7328_s9  ;;  %v7723_v1 = vsel %vm2199_vm8, %v3407_v17, %v7695_v61  ;;  %v2278_v43 = vperm.slane %v2270_v29, %v7597_v48 }
  0xb2   : > { %544 = vrot.lane.b32.xlu0 %v7592_v45, %s7326_s7  ;;  %13302 = vst [vmem:[#allocation19_spill] sm:$0xff] %v7723_v1  ;;  %v3425_v40 = vrot.slane %v3418_v39, 4  ;;  %v7733_v42 = vsel %vm2199_vm8, %v2267_v21, %v7691_v60  ;;  %v2369_v45 = vrot.slane %v7487_v15, 4 }
  0xb3   : > { %v401_v30 = vpop.permute.xlu2 %400  ;;  %v7727_v22 = vpop.permute.xlu1 %350  ;;  %v2291_v51 = vrot.slane %v2278_v43, 4  ;;  %v7740_v53 = vsel %vm2199_vm8, %v2278_v43, %v2293_v28  ;;  %13307 = vst [vmem:[#allocation24_spill] sm:$0xff] %v7758_v19 }
  0xb4   : > { %v318_v46 = vpop.permute.xlu0 %317  ;;  %v7737_v47 = vsel %vm2199_vm8, %v3425_v40, %v3406_v38  ;;  %13304 = vst [vmem:[#allocation21_spill] sm:$0xff] %v7740_v53  ;;  %v404_v37 = vrot.slane %v401_v30, 4 }
  0xb5   : > { %13303 = vst [vmem:[#allocation20_spill] sm:$0xff] %v7737_v47  ;;  %v7748_v59 = vsel %vm2199_vm8, %v2291_v51, %v2266_v11  ;;  %v320_v62 = vrot.slane %v318_v46, 4  ;;  %v7339_v11 = vmov 1934713408  }
  0xb6   : > { %13306 = vst [vmem:[#allocation23_spill] sm:$0xff] %v7748_v59  ;;  %v2228_v21 = vunpack.c.l.s4 %v7339_v11  ;;  %v7786_v11 = vsel %vm299_vm9, %v401_v30, %v404_v37 }
  0xb7   : > { %v323_v17 = vsel %vm13052_vm14, %v318_v46, %v320_v62 }
  0xb8   : > { %v3319_v39 = vrot.slane %v323_v17, 4  ;;  %v7771_v38 = vunpack.c.0.s8 %v2228_v21 }
  0xb9   : > { %567 = vrot.lane.b32.xlu1 %v7745_v56, %s7337_s26  ;;  %569 = vrot.lane.b32.xlu2 %v7758_v19, %s7337_s26 }
  0xba   : > { %565 = vrot.lane.b32.xlu0 %v7468_v8, %s7337_s26  ;;  %v3320_v24 = vsel %vm2199_vm8, 0, %v3319_v39  ;;  %13308 = vst [vmem:[#allocation25_spill] sm:$0xff] %v7771_v38  ;;  %s7348_s26 = smov 114  }
  0xbb   : > { %v7754_v6 = vpop.permute.xlu2 %412  ;;  %v7756_v9 = vpop.permute.xlu1 %362  ;;  %v7765_v29 = vperm.slane %v3320_v24, %v7597_v48 }
  0xbc   : > { %v361_v20 = vpop.permute.xlu0 %360 }
  0xbd   : > { %v364_v28 = vrot.slane %v361_v20, 4  ;;  %v7780_v50 = vperm.slane %v7765_v29, %v7771_v38 }
  0xbf   : > { %v7774_v40 = vsel %vm255_vm10, %v361_v20, %v364_v28  ;;  %13310 = vst [vmem:[#allocation27_spill] sm:$0xff] %v7780_v50  ;;  %v7789_v20 = vperm.slane %v323_v17, %v7597_v48  ;;  %v3349_v31 = vrot.slane %v7780_v50, 4 }
  0xc0   : > { %v2381_v62 = vrot.slane %v7774_v40, 4 }
  0xc1   : > { %579 = vrot.lane.b32.xlu1 %v7745_v56, %s7325_s6  ;;  %591 = vrot.lane.b32.xlu2 %v7745_v56, %s7324_s5 }
  0xc2   : > { %577 = vrot.lane.b32.xlu0 %v7468_v8, %s7325_s6  ;;  %v2382_v28 = vsel %vm2199_vm8, %v7786_v11, %v2381_v62 }
  0xc3   : > { %v7776_v43 = vpop.permute.xlu2 %428  ;;  %v381_v46 = vpop.permute.xlu1 %380  ;;  %v2390_v30 = vperm.slane %v2382_v28, %v7597_v48 }
  0xc4   : > { %13309 = vst [vmem:[#allocation26_spill] sm:$0xff] %v7776_v43  ;;  %v373_v51 = vpop.permute.xlu0 %372  ;;  %v384_v24 = vrot.slane %v381_v46, 4  ;;  %v7340_v43 = vmov 0  }
  0xc5   : > { %v375_v21 = vrot.slane %v373_v51, 4  ;;  %v2403_v50 = vrot.slane %v2390_v30, 4 }
  0xc6   : > { %v7807_v62 = vsel %vm13097_vm11, %v381_v46, %v384_v24 }
  0xc7   : > { %v7794_v7 = vsel %vm266_vm12, %v373_v51, %v375_v21  ;;  %13312 = vst [vmem:[#allocation29_spill] sm:$0xff] %v7807_v62  ;;  %v7813_v51 = vperm.slane %v7789_v20, %v7771_v38  ;;  %v2370_v46 = vsel %vm2199_vm8, %v7807_v62, %v2369_v45 }
  0xc8   : > { %13311 = vst [vmem:[#allocation28_spill] sm:$0xff] %v7794_v7  ;;  %v3433_v37 = vrot.slane %v7794_v7, 4  ;;  %v7804_v53 = vsel %vm2199_vm8, %v7794_v7, %v3319_v39  ;;  %v354_v39 = vrot.slane %v7727_v22, 4  ;;  %v2378_v55 = vperm.slane %v2370_v46, %v7597_v48 }
  0xc9   : > { %627 = vrot.lane.b32.xlu1 %v7745_v56, %s7326_s7  ;;  %13313 = vst [vmem:[#allocation30_spill] sm:$0xff] %v7813_v51  ;;  %v7825_v24 = vsel %vm2199_vm8, %v3349_v31, %v7813_v51  ;;  %639 = vrot.lane.b32.xlu2 %v7745_v56, %s7328_s9 }
  0xca   : > { %589 = vrot.lane.b32.xlu0 %v7468_v8, %s7324_s5  ;;  %v7818_v28 = vsel %vm2199_vm8, %v3433_v37, %v323_v17  ;;  %13316 = vst [vmem:[#allocation33_spill] sm:$0xff] %v7825_v24  ;;  %v12975_v17 = vpack.i.b16 0, %v7825_v24  ;;  %v355_v37 = vrot.slane %v7607_v52, 4  ;;  %v7833_v13 = vsel %vm2199_vm8, %v2403_v50, %v2378_v55 }
  0xcb   : > { %v7815_v21 = vpop.permute.xlu2 %439  ;;  %v393_v47 = vpop.permute.xlu1 %392  ;;  %13315 = vst [vmem:[#allocation32_spill] sm:$0xff] %v7818_v28  ;;  %v2405_v45 = vrot.slane %v2378_v55, 4  ;;  %v7839_v51 = vsel %vm244_vm7, %v7727_v22, %v354_v39 }
  0xcc   : > { %13314 = vst [vmem:[#allocation31_spill] sm:$0xff] %v7815_v21  ;;  %v391_v1 = vpop.permute.xlu0 %390  ;;  %v4462_v31 = vunpack.c.l.b16 %v12975_v17  ;;  %v7841_v21 = vsel %vm5325_vm15, 65535, %v7340_v43  ;;  %v2325_v50 = vrot.slane %v7839_v51, 4  ;;  %v395_v17 = vrot.slane %v393_v47, 4 }
  0xcd   : > { %v394_v28 = vrot.slane %v391_v1, 4  ;;  %13317 = vst [vmem:[#allocation34_spill] sm:$0xff] %v7833_v13  ;;  %v7850_v55 = vsel %vm2199_vm8, %v2390_v30, %v2405_v45  ;;  %v7856_v22 = vsel %vm244_vm7, %v7607_v52, %v355_v37  ;;  %vm13057_vm15 = vcmask 7168  }
  0xce   : > { %13318 = vst [vmem:[#allocation35_spill] sm:$0xff] %v7841_v21  ;;  %v4474_v24 = vpack.c.b16 %v4462_v31, %v4462_v31  ;;  %v385_v31 = vrot.slane %v7684_v57, 4  ;;  %v3446_v52 = vrot.slane %v7856_v22, 4 }
  0xcf   : > { %v7844_v46 = vsel %vm288_vm6, %v391_v1, %v394_v28  ;;  %13319 = vst [vmem:[#allocation36_spill] sm:$0xff] %v7850_v55  ;;  %v365_v55 = vrot.slane %v7756_v9, 4 }
  0xd0   : > { %v5329_v28 = vand.u32 %v7841_v21, %v4474_v24  ;;  %v2323_v39 = vrot.slane %v7844_v46, 4  ;;  %v7866_v30 = vsel %vm2199_vm8, %v7844_v46, %v2325_v50  ;;  %v7877_v24 = vsel %vm288_vm6, %v393_v47, %v395_v17 }
  0xd1   : > { %615 = vrot.lane.b32.xlu1 %v7745_v56, %s7327_s8  ;;  %625 = vrot.lane.b32.xlu2 %v7468_v8, %s7326_s7  ;;  %v3444_v50 = vrot.slane %v7877_v24, 4  ;;  %v3447_v21 = vsel %vm2199_vm8, %v7877_v24, %v3446_v52 }
  0xd2   : > { %603 = vrot.lane.b32.xlu0 %v7745_v56, %s7323_s30  ;;  %5354 = vmatpush.bf16.msra.mxu0 %v5329_v28  ;;  %v7874_v37 = vsel %vm2199_vm8, %v2323_v39, %v7839_v51  ;;  %v3472_v28 = vrot.slane %v7482_v14, 4  ;;  %v3455_v17 = vperm.slane %v3447_v21, %v7597_v48  ;;  %v7899_v39 = vsel %vm255_vm10, %v7756_v9, %v365_v55 }
  0xd3   : > { %v7858_v43 = vpop.permute.xlu2 %455  ;;  %v7860_v1 = vpop.permute.xlu1 %410  ;;  %v7892_v47 = vsel %vm2199_vm8, %v3444_v50, %v7856_v22  ;;  %v3484_v3 = vrot.slane %v7899_v39, 4  ;;  %v3443_v50 = vperm.slane %v7804_v53, %v7597_v48 }
  0xd4   : > { %13320 = vst [vmem:[#allocation37_spill] sm:$0xff] %v7860_v1  ;;  %v403_v45 = vpop.permute.xlu0 %402  ;;  %v7885_v1 = vsel %vm13097_vm11, %v7684_v57, %v385_v31  ;;  %v3462_v21 = vrot.slane %v3455_v17, 4 }
  0xd5   : > { %13321 = vst [vmem:[#allocation38_spill] sm:$0xff] %v7885_v1  ;;  %v405_v57 = vrot.slane %v403_v45, 4  ;;  %v3470_v13 = vrot.slane %v7885_v1, 4  ;;  %v3473_v9 = vsel %vm2199_vm8, %v7885_v1, %v3472_v28 }
  0xd6   : > { %13322 = vst [vmem:[#allocation39_spill] sm:$0xff] %v7892_v47  ;;  %v7917_v55 = vsel %vm2199_vm8, %v3462_v21, %v3443_v50  ;;  %v3481_v17 = vperm.slane %v3473_v9, %v7597_v48  ;;  %v7945_v50 = vshrl.u32 %v7589_v44, 16  ;;  %v7956_v9 = vshll.u32 %v7695_v61, 16 }
  0xd7   : > { %v407_v59 = vsel %vm299_vm9, %v403_v45, %v405_v57  ;;  %13325 = vst [vmem:[#allocation42_spill] sm:$0xff] %v7917_v55  ;;  %v3471_v53 = vsel %vm2199_vm8, %v3470_v13, %v7482_v14 }
  0xd8   : > { %v3485_v56 = vsel %vm2199_vm8, %v407_v59, %v3484_v3  ;;  %v3477_v3 = vperm.slane %v3471_v53, %v7597_v48  ;;  %13331 = vst [vmem:[#allocation48_spill] sm:$0xff] %v7945_v50  ;;  %v13340_v55 = vrot.slane %v7945_v50, 7 }
  0xd9   : > { %601 = vrot.lane.b32.xlu1 %v7468_v8, %s7323_s30  ;;  %613 = vrot.lane.b32.xlu2 %v7468_v8, %s7327_s8  ;;  %v3493_v58 = vperm.slane %v3485_v56, %v7597_v48  ;;  %13333 = vst [vmem:[#allocation50_spill] sm:$0xff] %v7956_v9 }
  0xda   : > { %637 = vrot.lane.b32.xlu0 %v7468_v8, %s7328_s9 }
  0xdb   : > { %v7901_v31 = vpop.permute.xlu2 %466  ;;  %v7903_v52 = vpop.permute.xlu1 %421 }
  0xdc   : > { %13323 = vst [vmem:[#allocation40_spill] sm:$0xff] %v7903_v52  ;;  %v7909_v47 = vpop.permute.xlu0 %419  ;;  %v3482_v52 = vrot.slane %v407_v59, 4 }
  0xdd   : > { %13324 = vst [vmem:[#allocation41_spill] sm:$0xff] %v7909_v47  ;;  %v3500_v47 = vrot.slane %v3493_v58, 4 }
  0xde   : > { %v3483_v45 = vsel %vm2199_vm8, %v3482_v52, %v7899_v39  ;;  %v7940_v52 = vshrl.u32 %v7695_v61, 16 }
  0xdf   : > { %v3489_v57 = vperm.slane %v3483_v45, %v7597_v48  ;;  %v7933_v59 = vsel %vm2199_vm8, %v3500_v47, %v3481_v17  ;;  %v7953_v47 = vshrl.u32 %v7691_v60, 16  ;;  %v7960_v45 = vshrl.u32 %v7629_v18, 16 }
  0xe0   : > { %13326 = vst [vmem:[#allocation43_spill] sm:$0xff] %v7933_v59  ;;  %v7963_v17 = vshll.u32 %v7589_v44, 16  ;;  %v13336_v44 = vrot.slane %v7940_v52, 7  ;;  %v13337_v59 = vmov 0 }
  0xe1   : > { %593 = vrot.lane.b32.xlu1 %v7758_v19, %s7324_s5  ;;  %v3494_v56 = vrot.slane %v3489_v57, 4  ;;  %13329 = vst [vmem:[#allocation46_spill] sm:$0xff] %v7940_v52  ;;  %605 = vrot.lane.b32.xlu2 %v7758_v19, %s7323_s30  ;;  %v7068_v53 = vrot.slane %v7953_v47, 11  ;;  %v13338_v59 = vsel %vm7980_vm3, 4294967295, %v13337_v59  ;;  %v7067_v57 = vrot.slane %v7960_v45, 11 }
  0xe2   : > { %581 = vrot.lane.b32.xlu0 %v7758_v19, %s7325_s6  ;;  %13334 = vst [vmem:[#allocation51_spill] sm:$0xff] %v7963_v17 }
  0xe3   : > { %v7935_v13 = vpop.permute.xlu2 %489  ;;  %v7937_v28 = vpop.permute.xlu1 %437  ;;  %v7948_v21 = vsel %vm2199_vm8, %v3494_v56, %v3477_v3  ;;  %13339 = vst [vmem:[#allocation53_spill] sm:$0xff] %v13338_v59 }
  0xe4   : > { %13327 = vst [vmem:[#allocation44_spill] sm:$0xff] %v7935_v13  ;;  %v7942_v58 = vpop.permute.xlu0 %430 }
  0xe5   : > { %13328 = vst [vmem:[#allocation45_spill] sm:$0xff] %v7937_v28  ;;  %v7065_v28 = vrot.slane %v7448_v2, 11 }
  0xe6   : > { %13330 = vst [vmem:[#allocation47_spill] sm:$0xff] %v7942_v58  ;;  %v12998_v58 = vrot.slane %v7457_v5, 7 }
  0xe7   : > { %13332 = vst [vmem:[#allocation49_spill] sm:$0xff] %v7948_v21  ;;  %v1826_v21 = vor.u32 %v13336_v44, %v7956_v9 }
  0xe9   : > { %629 = vrot.lane.b32.xlu1 %v7758_v19, %s7326_s7  ;;  %641 = vrot.lane.b32.xlu2 %v7758_v19, %s7328_s9  ;;  %v1827_v13 = vsel %vm7980_vm3, %v7068_v53, %v1826_v21 }
  0xea   : > { %617 = vrot.lane.b32.xlu0 %v7758_v19, %s7327_s8 }
  0xeb   : > { %v7970_v61 = vpop.permute.xlu2 %499  ;;  %v7972_v3 = vpop.permute.xlu1 %448 }
  0xec   : > { %13335 = vst [vmem:[#allocation52_spill] sm:$0xff] %v7970_v61  ;;  %v7974_v56 = vpop.permute.xlu0 %446  ;;  %v1816_v61 = vor.u32 %v13340_v55, %v7963_v17  ;;  %v1799_v55 = vor.u32 %v12998_v58, %v7454_v4  ;;  %v1877_v17 = vshrl.u32 %v7702_v12, 16 }
  0xee   : > { %v1817_v44 = vsel %vm7980_vm3, %v7067_v57, %v1816_v61  ;;  %v1800_v53 = vsel %vm7980_vm3, %v7065_v28, %v1799_v55  ;;  %v1880_v57 = vshll.u32 %v7702_v12, 16  ;;  %v1872_v61 = vshrl.u32 %v7705_v16, 16 }
  0xf0   : > { %v7072_v2 = vrot.slane %v1872_v61, 11 }
  0xf1   : > { %2045 = vrot.lane.b32.xlu1 %v1827_v13, %s7325_s6  ;;  %v8010_v13 = vrot.slane %v1877_v17, 7 }
  0xf2   : > { %2041 = vrot.lane.b32.xlu0 %v1817_v44, %s7325_s6 }
  0xf3   : > { %v8001_v14 = vpop.permute.xlu2 %513  ;;  %v8003_v19 = vpop.permute.xlu1 %464  ;;  %13341 = vst [vmem:[#allocation54_spill] sm:$0xff] %v8010_v13  ;;  %v1882_v5 = vor.u32 %v1880_v57, %v8010_v13  ;;  %v8049_v13 = vperm.slane %v7573_v34, %v7597_v48 }
  0xf4   : > { %v8006_v21 = vpop.permute.xlu0 %457 }
  0xf5   : > { %v1883_v28 = vsel %vm7980_vm3, %v7072_v2, %v1882_v5  ;;  %v2198_v2 = vrot.slane %v7622_v10, 4  ;;  %v1503_v5 = vshll.u32 %v7561_v25, 16  ;;  %13354 = vst [vmem:[#allocation67_spill] sm:$0xff] %v8049_v13 }
  0xf9   : > { %2033 = vrot.lane.b32.xlu1 %v1800_v53, %s7325_s6 }
  0xfb   : > { %v8015_v44 = vpop.permute.xlu2 %528  ;;  %v8017_v58 = vpop.permute.xlu1 %483 }
  0xfc   : > { %13342 = vst [vmem:[#allocation55_spill] sm:$0xff] %v8015_v44  ;;  %v8019_v4 = vpop.permute.xlu0 %481 }
  0xfd   : > { %13343 = vst [vmem:[#allocation56_spill] sm:$0xff] %v8017_v58 }
  0xfe   : > { %13344 = vst [vmem:[#allocation57_spill] sm:$0xff] %v8019_v4 }
 0x101   : > { %2061 = vrot.lane.b32.xlu1 %v1883_v28, %s7325_s6  ;;  %v319_v28 = vrot.slane %v7581_v36, 4 }
 0x103   : > { %v8025_v17 = vpop.permute.xlu1 %497  ;;  %v8029_v55 = vpop.permute.xlu2 %540  ;;  %v322_v34 = vsel %vm13052_vm14, %v7581_v36, %v319_v28  ;;  %v8085_v28 = vshrl.u32 %v7644_v27, 16  ;;  %vm1442_vm14 = vsmask.f32 5392 }
 0x104   : > { %13345 = vst [vmem:[#allocation58_spill] sm:$0xff] %v8025_v17  ;;  %v8027_v12 = vpop.permute.xlu0 %491  ;;  %v2200_v17 = vsel %vm2199_vm8, %v2198_v2, %v7424_v0  ;;  %v1484_v0 = vshll.u32 %v7622_v10, 16  ;;  %v8073_v2 = vshll.u32 %v7566_v32, 16  ;;  %v2313_v36 = vrot.slane %v322_v34, 4 }
 0x105   : > { %13346 = vst [vmem:[#allocation59_spill] sm:$0xff] %v8027_v12 }
 0x106   : > { %13347 = vst [vmem:[#allocation60_spill] sm:$0xff] %v8029_v55  ;;  %v1859_v55 = vshrl.u32 %v7569_v33, 16  ;;  %v8103_v25 = vrot.slane %v1484_v0, 7  ;;  %v8133_v0 = vperm.slane %v7676_v54, %v7771_v38 }
 0x107   : > { %13359 = vst [vmem:[#allocation72_spill] sm:$0xff] %v8073_v2 }
 0x108   : > { %13362 = vst [vmem:[#allocation75_spill] sm:$0xff] %v8085_v28 }
 0x109   : > { %13366 = vst [vmem:[#allocation79_spill] sm:$0xff] %v8103_v25  ;;  %v2367_v25 = vrot.slane %v7807_v62, 4 }
 0x10a   : > { %13373 = vst [vmem:[#allocation86_spill] sm:$0xff] %v8133_v0 }
 0x10b   : > { %v8031_v16 = vpop.permute.xlu1 %507  ;;  %v8035_v44 = vpop.permute.xlu2 %552 }
 0x10c   : > { %13348 = vst [vmem:[#allocation61_spill] sm:$0xff] %v8031_v16  ;;  %v8033_v53 = vpop.permute.xlu0 %505  ;;  %v3392_v16 = vperm.slane %v7639_v23, %v7771_v38 }
 0x10d   : > { %13349 = vst [vmem:[#allocation62_spill] sm:$0xff] %v8033_v53  ;;  %v8060_v53 = vrot.slane %v1503_v5, 7  ;;  %v8095_v5 = vshrl.u32 %v7856_v22, 16 }
 0x10e   : > { %13350 = vst [vmem:[#allocation63_spill] sm:$0xff] %v8035_v44 }
 0x10f   : > { %13357 = vst [vmem:[#allocation70_spill] sm:$0xff] %v8060_v53  ;;  %v415_v53 = vrot.slane %v7754_v6, 4 }
 0x110   : > { %13365 = vst [vmem:[#allocation78_spill] sm:$0xff] %v8095_v5 }
 0x113   : > { %v8037_v58 = vpop.permute.xlu1 %524  ;;  %v8041_v61 = vpop.permute.xlu2 %569 }
 0x114   : > { %13351 = vst [vmem:[#allocation64_spill] sm:$0xff] %v8037_v58  ;;  %v8039_v57 = vpop.permute.xlu0 %515  ;;  %v8065_v58 = vrot.slane %v1859_v55, 7  ;;  %v8082_v55 = vshll.u32 %v7644_v27, 16  ;;  %v8119_v27 = vshrl.u32 %v7839_v51, 16 }
 0x115   : > { %13352 = vst [vmem:[#allocation65_spill] sm:$0xff] %v8039_v57  ;;  %v8079_v57 = vperm.slane %v2200_v17, %v7597_v48  ;;  %v3329_v17 = vrot.slane %v7789_v20, 4 }
 0x116   : > { %13353 = vst [vmem:[#allocation66_spill] sm:$0xff] %v8041_v61  ;;  %v374_v61 = vrot.slane %v7641_v26, 4  ;;  %v823_v0 = vrot.slane %v8119_v27, 4 }
 0x117   : > { %13358 = vst [vmem:[#allocation71_spill] sm:$0xff] %v8065_v58 }
 0x118   : > { %13360 = vst [vmem:[#allocation73_spill] sm:$0xff] %v8079_v57  ;;  %v8089_v44 = vsel %vm266_vm12, %v7641_v26, %v374_v61  ;;  %v8107_v26 = vperm.slane %v7666_v49, %v7597_v48  ;;  %v8109_v61 = vrot.slane %v3392_v16, 4 }
 0x119   : > { %13361 = vst [vmem:[#allocation74_spill] sm:$0xff] %v8082_v55  ;;  %v2311_v23 = vrot.slane %v8089_v44, 4  ;;  %v2314_v16 = vsel %vm2199_vm8, %v8089_v44, %v2313_v36 }
 0x11a   : > { %13363 = vst [vmem:[#allocation76_spill] sm:$0xff] %v8089_v44 }
 0x11b   : > { %v8051_v12 = vpop.permute.xlu1 %536  ;;  %13367 = vst [vmem:[#allocation80_spill] sm:$0xff] %v8107_v26 }
 0x11c   : > { %13355 = vst [vmem:[#allocation68_spill] sm:$0xff] %v8051_v12  ;;  %v8057_v4 = vpop.permute.xlu0 %532  ;;  %v8069_v12 = vshrl.u32 %v7566_v32, 16  ;;  %v8092_v32 = vshll.u32 %v7856_v22, 16  ;;  %v3330_v22 = vsel %vm2199_vm8, 0, %v3329_v17  ;;  %v2312_v17 = vsel %vm2199_vm8, %v2311_v23, %v322_v34 }
 0x11d   : > { %13356 = vst [vmem:[#allocation69_spill] sm:$0xff] %v8057_v4  ;;  %v8099_v4 = vpop.permute.xlu2 %591  ;;  %v8148_v54 = vperm.slane %v3330_v22, %v7771_v38  ;;  %v655_v23 = vrot.slane %v8073_v2, 5 }
 0x11e   : > { %13364 = vst [vmem:[#allocation77_spill] sm:$0xff] %v8092_v32  ;;  %v8145_v32 = vperm.slane %v2314_v16, %v7597_v48  ;;  %v652_v34 = vrot.slane %v8069_v12, 4 }
 0x11f   : > { %13368 = vst [vmem:[#allocation81_spill] sm:$0xff] %v8109_v61  ;;  %v2379_v61 = vrot.slane %v7786_v11, 4  ;;  %v1591_v11 = vshrl.u32 %v7885_v1, 16 }
 0x120   : > { %13370 = vst [vmem:[#allocation83_spill] sm:$0xff] %v8119_v27  ;;  %v8172_v2 = vor.u32 %v655_v23, %v652_v34  ;;  %v1604_v34 = vshll.u32 %v7844_v46, 16  ;;  %v469_v23 = vrot.slane %v7901_v31, 4 }
 0x121   : > { %13375 = vst [vmem:[#allocation88_spill] sm:$0xff] %v8145_v32  ;;  %v8163_v44 = vrot.slane %v1591_v11, 6  ;;  %v8203_v11 = vperm.slane %v7866_v30, %v7597_v48 }
 0x122   : > { %13376 = vst [vmem:[#allocation89_spill] sm:$0xff] %v8148_v54 }
 0x123   : > { %v8113_v20 = vpop.permute.xlu1 %548  ;;  %13378 = vst [vmem:[#allocation91_spill] sm:$0xff] %v8163_v44  ;;  %v8199_v44 = vperm.slane %v7874_v37, %v7597_v48  ;;  %v8214_v37 = vrot.slane %v1604_v34, 7 }
 0x124   : > { %13369 = vst [vmem:[#allocation82_spill] sm:$0xff] %v8113_v20  ;;  %v8121_v49 = vpop.permute.xlu0 %544  ;;  %v8128_v20 = vshll.u32 %v7839_v51, 16  ;;  %v3339_v51 = vrot.slane %v7765_v29, 4  ;;  %v8158_v29 = vperm.slane %v2312_v17, %v7597_v48  ;;  %v8176_v17 = vsel %vm416_vm4, %v415_v53, %v7754_v6 }
 0x125   : > { %13371 = vst [vmem:[#allocation84_spill] sm:$0xff] %v8121_v49  ;;  %v8138_v49 = vperm.slane %v7733_v42, %v7597_v48  ;;  %v2380_v42 = vsel %vm2199_vm8, %v2379_v61, %v7774_v40  ;;  %v8168_v41 = vpop.permute.xlu2 %639  ;;  %v2368_v53 = vsel %vm2199_vm8, %v2367_v25, %v7487_v15  ;;  %v1610_v25 = vshrl.u32 %v7877_v24, 16 }
 0x126   : > { %13372 = vst [vmem:[#allocation85_spill] sm:$0xff] %v8128_v20  ;;  %v826_v36 = vrot.slane %v8128_v20, 5  ;;  %v3340_v32 = vsel %vm2199_vm8, 0, %v3339_v51  ;;  %v8179_v22 = vperm.slane %v2380_v42, %v7597_v48  ;;  %v459_v42 = vrot.slane %v7858_v43, 4 }
 0x127   : > { %13374 = vst [vmem:[#allocation87_spill] sm:$0xff] %v8138_v49  ;;  %v8190_v6 = vperm.slane %v3340_v32, %v7771_v38  ;;  %v450_v32 = vrot.slane %v7974_v56, 4 }
 0x128   : > { %13377 = vst [vmem:[#allocation90_spill] sm:$0xff] %v8158_v29  ;;  %v8170_v5 = vor.u32 %v826_v36, %v823_v0  ;;  %v1601_v36 = vshrl.u32 %v7844_v46, 16  ;;  %v1613_v0 = vshll.u32 %v7877_v24, 16  ;;  %v462_v30 = vsel %vm461_vm5, %v459_v42, %v7858_v43 }
 0x129   : > { %13380 = vst [vmem:[#allocation93_spill] sm:$0xff] %v8172_v2  ;;  %v8210_v2 = vperm.slane %v2368_v53, %v7597_v48  ;;  %v472_v46 = vsel %vm13057_vm15, %v469_v23, %v7901_v31  ;;  %v8225_v48 = vrot.slane %v1610_v25, 6  ;;  %v8230_v23 = vshrl.u32 %v462_v30, 16 }
 0x12a   : > { %13379 = vst [vmem:[#allocation92_spill] sm:$0xff] %v8170_v5  ;;  %v8212_v16 = vrot.slane %v1601_v36, 6  ;;  %v451_v5 = vrot.slane %v7972_v3, 4  ;;  %v596_v36 = vrot.slane %v8099_v4, 4  ;;  %v8232_v1 = vshll.u32 %v462_v30, 16 }
 0x12b   : > { %v8166_v61 = vpop.permute.xlu1 %567  ;;  %13381 = vst [vmem:[#allocation94_spill] sm:$0xff] %v8176_v17  ;;  %v8227_v17 = vrot.slane %v1613_v0, 7  ;;  %v8234_v62 = vshll.u32 %v472_v46, 16  ;;  %v453_v54 = vsel %vm452_vm0, %v450_v32, %v7974_v56  ;;  %v8244_v7 = vshrl.u32 %v472_v46, 16 }
 0x12c   : > { %13382 = vst [vmem:[#allocation95_spill] sm:$0xff] %v8179_v22  ;;  %v8183_v51 = vpop.permute.xlu0 %565  ;;  %v454_v25 = vsel %vm452_vm0, %v451_v5, %v7972_v3  ;;  %v599_v31 = vsel %vm255_vm10, %v8099_v4, %v596_v36  ;;  %v13393_v56 = vrot.slane %v8085_v28, 7  ;;  %v8250_v3 = vshrl.u32 %v453_v54, 16 }
 0x12d   : > { %13383 = vst [vmem:[#allocation96_spill] sm:$0xff] %v8190_v6  ;;  %v626_v53 = vpop.permute.xlu2 %625  ;;  %v8252_v5 = vshll.u32 %v453_v54, 16  ;;  %v13395_v4 = vshrl.u32 %v7652_v35, 16  ;;  %v8260_v36 = vshll.u32 %v454_v25, 16  ;;  %v1949_v46 = vshrl.u32 %v599_v31, 16 }
 0x12e   : > { %13384 = vst [vmem:[#allocation97_spill] sm:$0xff] %v8199_v44  ;;  %v1806_v32 = vor.u32 %v13393_v56, %v8082_v55  ;;  %v517_v35 = vrot.slane %v8001_v14, 4 }
 0x12f   : > { %13385 = vst [vmem:[#allocation98_spill] sm:$0xff] %v8203_v11 }
 0x130   : > { %13386 = vst [vmem:[#allocation99_spill] sm:$0xff] %v8210_v2 }
 0x131   : > { %13387 = vst [vmem:[#allocation100_spill] sm:$0xff] %v8212_v16  ;;  %v7066_v16 = vrot.slane %v8069_v12, 11 }
 0x132   : > { %13388 = vst [vmem:[#allocation101_spill] sm:$0xff] %v8214_v37 }
 0x133   : > { %v580_v34 = vpop.permute.xlu1 %579  ;;  %13389 = vst [vmem:[#allocation102_spill] sm:$0xff] %v8225_v48 }
 0x134   : > { %13390 = vst [vmem:[#allocation103_spill] sm:$0xff] %v8227_v17  ;;  %v578_v43 = vpop.permute.xlu0 %577  ;;  %v584_v42 = vrot.slane %v580_v34, 4  ;;  %v631_v17 = vrot.slane %v626_v53, 4 }
 0x135   : > { %13391 = vst [vmem:[#allocation104_spill] sm:$0xff] %v8234_v62  ;;  %v583_v24 = vrot.slane %v578_v43, 4 }
 0x136   : > { %v587_v0 = vsel %vm244_vm7, %v580_v34, %v584_v42  ;;  %13392 = vst [vmem:[#allocation105_spill] sm:$0xff] %v8244_v7  ;;  %v8264_v42 = vshrl.u32 %v454_v25, 16 }
 0x137   : > { %v586_v48 = vsel %vm244_vm7, %v578_v43, %v583_v24  ;;  %v1931_v30 = vshrl.u32 %v587_v0, 16  ;;  %v1934_v6 = vshll.u32 %v587_v0, 16  ;;  %v8258_v24 = vrot.slane %v13395_v4, 11  ;;  %13396 = vst [vmem:[#allocation107_spill] sm:$0xff] %v8260_v36 }
 0x138   : > { %v1926_v37 = vshrl.u32 %v586_v48, 16  ;;  %v572_v48 = vrot.slane %v8166_v61, 4  ;;  %v634_v43 = vsel %vm288_vm6, %v626_v53, %v631_v17  ;;  %13397 = vst [vmem:[#allocation108_spill] sm:$0xff] %v8264_v42  ;;  %v468_v4 = vrot.slane %v8003_v19, 4 }
 0x139   : > { %v8254_v34 = vrot.slane %v1931_v30, 7  ;;  %v13398_v30 = vshll.u32 %v7569_v33, 16  ;;  %v1807_v17 = vsel %vm7980_vm3, %v7066_v16, %v1806_v32  ;;  %v1998_v53 = vshrl.u32 %v634_v43, 16 }
 0x13a   : > { %v7075_v0 = vrot.slane %v1926_v37, 11  ;;  %v1952_v33 = vshll.u32 %v599_v31, 16  ;;  %v571_v31 = vrot.slane %v8183_v51, 4 }
 0x13b   : > { %13394 = vst [vmem:[#allocation106_spill] sm:$0xff] %v8254_v34  ;;  %v628_v56 = vpop.permute.xlu1 %627  ;;  %v1936_v54 = vor.u32 %v1934_v6, %v8254_v34  ;;  %v8270_v62 = vor.u32 %v13398_v30, %v8065_v58  ;;  %v1471_v6 = vrot.slane %v7953_v47, 6  ;;  %v8279_v34 = vrot.slane %v1949_v46, 7 }
 0x13c   : > { %v590_v7 = vpop.permute.xlu0 %589  ;;  %v632_v22 = vrot.slane %v628_v56, 4  ;;  %v575_v30 = vsel %vm13057_vm15, %v572_v48, %v8166_v61  ;;  %v7079_v48 = vrot.slane %v1998_v53, 11  ;;  %v13476_v59 = vld [vmem:[#allocation104_spill] sm:$0xff] }
 0x13d   : > { %v595_v25 = vrot.slane %v590_v7, 4  ;;  %v1937_v37 = vsel %vm7980_vm3, %v7075_v0, %v1936_v54  ;;  %13399 = vst [vmem:[#allocation109_spill] sm:$0xff] %v8279_v34  ;;  %v13400_v0 = vshll.u32 %v7691_v60, 16  ;;  %v1895_v61 = vshrl.u32 %v575_v30, 16 }
 0x13e   : > { %v635_v58 = vsel %vm288_vm6, %v628_v56, %v632_v22  ;;  %2073 = vrot.lane.b32.xlu2 %v1937_v37, %s7325_s6  ;;  %v1865_v22 = vsel %vm7980_vm3, %v8258_v24, %v8270_v62  ;;  %v1954_v37 = vor.u32 %v1952_v33, %v8279_v34  ;;  %v644_v62 = vrot.slane %v8168_v41, 4 }
 0x13f   : > { %v598_v16 = vsel %vm255_vm10, %v590_v7, %v595_v25  ;;  %v2003_v32 = vshrl.u32 %v635_v58, 16  ;;  %v2006_v43 = vshll.u32 %v635_v58, 16  ;;  %v1472_v54 = vrot.slane %v13400_v0, 7  ;;  %v13402_v7 = vld [vmem:[#allocation17_spill] sm:$0xff] }
 0x140   : > { %v1944_v2 = vshrl.u32 %v598_v16, 16  ;;  %v8298_v58 = vperm.slane %v13402_v7, %v7771_v38  ;;  %v1475_v0 = vrot.slane %v7940_v52, 6  ;;  %v13403_v16 = vrot.slane %v8107_v26, 4 }
 0x141   : > { %v8294_v56 = vrot.slane %v2003_v32, 7  ;;  %v1473_v53 = vor.u32 %v1472_v54, %v1471_v6  ;;  %v1476_v32 = vrot.slane %v7956_v9, 7  ;;  %v574_v7 = vsel %vm13057_vm15, %v571_v31, %v8183_v51 }
 0x142   : > { %v7076_v25 = vrot.slane %v1944_v2, 11  ;;  %v2224_v46 = vsel %vm2199_vm8, %v13403_v16, %v8079_v57  ;;  %v1898_v2 = vshll.u32 %v575_v30, 16  ;;  %v13404_v34 = vrot.slane %v8138_v49, 4 }
 0x143   : > { %13401 = vst [vmem:[#allocation110_spill] sm:$0xff] %v8294_v56  ;;  %v2008_v24 = vor.u32 %v2006_v43, %v8294_v56  ;;  %v8319_v26 = vrot.slane %v1895_v61, 7  ;;  %v8325_v51 = vperm.slane %v2224_v46, %v7771_v38  ;;  %v2247_v30 = vrot.slane %v8298_v58, 4  ;;  %v13407_v61 = vld [vmem:[#allocation23_spill] sm:$0xff] }
 0x144   : > { %v8311_v60 = vpop.permute.xlu0 %603  ;;  %v1955_v33 = vsel %vm7980_vm3, %v7076_v25, %v1954_v37  ;;  %v2280_v16 = vsel %vm2199_vm8, %v13404_v34, %v8049_v13  ;;  %v519_v43 = vsel %vm452_vm0, %v517_v35, %v8001_v14  ;;  %v8332_v54 = vsel %vm13057_vm15, %v468_v4, %v8003_v19  ;;  %v13406_v34 = vld [vmem:[#allocation22_spill] sm:$0xff]  ;;  %v616_v25 = vpop.permute.xlu1 %615  ;;  %vm8361_vm15 = vmor %vm1441_vm1, %vm1442_vm14 }
 0x145   : > { %13405 = vst [vmem:[#allocation17_spill] sm:$0xff] %v8319_v26  ;;  %2077 = vrot.lane.b32.xlu0 %v1955_v33, %s7325_s6  ;;  %v2009_v6 = vsel %vm7980_vm3, %v7079_v48, %v2008_v24  ;;  %v1913_v31 = vshrl.u32 %v13406_v34, 16  ;;  %v8339_v48 = vperm.slane %v13407_v61, %v7771_v38  ;;  %v1890_v46 = vshrl.u32 %v574_v7, 16 }
 0x146   : > { %2037 = vrot.lane.b32.xlu2 %v1807_v17, %s7325_s6  ;;  %2089 = vrot.lane.b32.xlu1 %v2009_v6, %s7325_s6  ;;  %v13408_v37 = vshrl.u32 %v7622_v10, 16  ;;  %v13409_v14 = vshrl.u32 %v7616_v63, 16  ;;  %v8350_v35 = vperm.slane %v2280_v16, %v7771_v38  ;;  %v647_v4 = vsel %vm299_vm9, %v8168_v41, %v644_v62 }
 0x147   : > { %v620_v17 = vrot.slane %v616_v25, 4  ;;  %v1474_v33 = vrot.slane %v1473_v53, 4  ;;  %v8354_v6 = vor.u32 %v1476_v32, %v1475_v0  ;;  %v8356_v7 = vshrl.u32 %v519_v43, 16 }
 0x148   : > { %v8343_v24 = vrot.slane %v13408_v37, 11  ;;  %v8347_v19 = vrot.slane %v13409_v14, 7  ;;  %v1900_v61 = vor.u32 %v1898_v2, %v8319_v26  ;;  %v8367_v16 = vsel %vm2199_vm8, %v2247_v30, %v8325_v51  ;;  %v614_v26 = vpop.permute.xlu2 %613 }
 0x149   : > { %13411 = vst [vmem:[#allocation23_spill] sm:$0xff] %v8354_v6  ;;  %v2303_v41 = vrot.slane %v8339_v48, 4  ;;  %v8370_v62 = vshll.u32 %v519_v43, 16  ;;  %v1908_v0 = vshrl.u32 %v7468_v8, 16  ;;  %v8373_v53 = vrot.slane %v1913_v31, 7 }
 0x14a   : > { %13410 = vst [vmem:[#allocation22_spill] sm:$0xff] %v8347_v19  ;;  %v1916_v32 = vshll.u32 %v13406_v34, 16  ;;  %v7073_v2 = vrot.slane %v1890_v46, 11  ;;  %v2021_v14 = vshrl.u32 %v647_v4, 16  ;;  %v1462_v56 = vrot.slane %v7960_v45, 6 }
 0x14b   : > { %13414 = vst [vmem:[#allocation111_spill] sm:$0xff] %v8370_v62  ;;  %v8379_v49 = vsel %vm2199_vm8, %v2303_v41, %v8350_v35  ;;  %v619_v30 = vrot.slane %v614_v26, 4  ;;  %v623_v13 = vsel %vm13097_vm11, %v616_v25, %v620_v17  ;;  %v1478_v8 = vsel %vm8361_vm15, %v1474_v33, %v8354_v6 }
 0x14c   : > { %13415 = vst [vmem:[#allocation112_spill] sm:$0xff] %v8373_v53  ;;  %v638_v43 = vpop.permute.xlu0 %637  ;;  %v13416_v31 = vshll.u32 %v7629_v18, 16  ;;  %v1901_v57 = vsel %vm7980_vm3, %v7073_v2, %v1900_v61  ;;  %v1554_v41 = vrot.slane %v8119_v27, 6  ;;  %v1555_v10 = vrot.slane %v8128_v20, 7 }
 0x14d   : > { %v643_v46 = vrot.slane %v638_v43, 4  ;;  %2057 = vrot.lane.b32.xlu0 %v1865_v22, %s7325_s6  ;;  %v13417_v25 = vrot.slane %v8006_v21, 4  ;;  %v7074_v33 = vrot.slane %v1908_v0, 11  ;;  %v13418_v22 = vshll.u32 %v7616_v63, 16  ;;  %v13422_v63 = vld [vmem:[#allocation77_spill] sm:$0xff] }
 0x14e   : > { %v1463_v34 = vrot.slane %v13416_v31, 7  ;;  %2065 = vrot.lane.b32.xlu2 %v1901_v57, %s7325_s6  ;;  %1645 = vrot.lane.b32.xlu1 %v1478_v8, %s7323_s30  ;;  %v1918_v31 = vor.u32 %v1916_v32, %v8373_v53  ;;  %v8402_v2 = vrot.slane %v2021_v14, 7  ;;  %v2024_v6 = vshll.u32 %v647_v4, 16  ;;  %v13421_v32 = vld [vmem:[#allocation78_spill] sm:$0xff] }
 0x14f   : > { %v463_v17 = vsel %vm461_vm5, %v13417_v25, %v8006_v21  ;;  %v1836_v61 = vor.u32 %v8347_v19, %v13418_v22  ;;  %v1985_v20 = vshrl.u32 %v623_v13, 16  ;;  %v646_v27 = vsel %vm299_vm9, %v638_v43, %v643_v46  ;;  %v13420_v25 = vld [vmem:[#allocation51_spill] sm:$0xff] }
 0x150   : > { %13419 = vst [vmem:[#allocation113_spill] sm:$0xff] %v8402_v2  ;;  %v622_v9 = vsel %vm13097_vm11, %v614_v26, %v619_v30  ;;  %v2016_v21 = vshrl.u32 %v646_v27, 16  ;;  %v1466_v57 = vrot.slane %v7945_v50, 6  ;;  %v1467_v8 = vrot.slane %v13420_v25, 7 }
 0x151   : > { %v1464_v0 = vor.u32 %v1463_v34, %v1462_v56  ;;  %v1556_v52 = vor.u32 %v1555_v10, %v1554_v41  ;;  %v1558_v53 = vrot.slane %v13421_v32, 6  ;;  %v1559_v62 = vrot.slane %v13422_v63, 7 }
 0x152   : > { %v7080_v22 = vrot.slane %v2016_v21, 11  ;;  %v1919_v4 = vsel %vm7980_vm3, %v7074_v33, %v1918_v31  ;;  %v13423_v14 = vshrl.u32 %v7774_v40, 16  ;;  %v13424_v26 = vshll.u32 %v7774_v40, 16  ;;  %v13427_v33 = vld [vmem:[#allocation15_spill] sm:$0xff] }
 0x153   : > { %v1980_v30 = vshrl.u32 %v622_v9, 16  ;;  %v8416_v46 = vrot.slane %v1985_v20, 7  ;;  %v1988_v19 = vshll.u32 %v623_v13, 16  ;;  %v2026_v10 = vor.u32 %v2024_v6, %v8402_v2 }
 0x154   : > { %v1563_v43 = vrot.slane %v13423_v14, 6  ;;  %v1564_v27 = vrot.slane %v13424_v26, 7  ;;  %v8419_v56 = vshll.u32 %v463_v17, 16  ;;  %v8422_v34 = vshrl.u32 %v8332_v54, 16 }
 0x155   : > { %13425 = vst [vmem:[#allocation51_spill] sm:$0xff] %v8416_v46  ;;  %v1837_v41 = vsel %vm7980_vm3, %v8343_v24, %v1836_v61  ;;  %v13428_v31 = vshrl.u32 %v13427_v33, 16  ;;  %2069 = vrot.lane.b32.xlu0 %v1919_v4, %s7325_s6  ;;  %v2027_v9 = vsel %vm7980_vm3, %v7080_v22, %v2026_v10  ;;  %v1465_v13 = vrot.slane %v1464_v0, 4  ;;  %v13435_v22 = vld [vmem:[#allocation72_spill] sm:$0xff]  ;;  %v13436_v10 = vld [vmem:[#allocation9_spill] sm:$0xff] }
 0x156   : > { %13426 = vst [vmem:[#allocation114_spill] sm:$0xff] %v8419_v56  ;;  %v8434_v20 = vor.u32 %v1467_v8, %v1466_v57  ;;  %v8436_v6 = vor.u32 %v1559_v62, %v1558_v53  ;;  %2093 = vrot.lane.b32.xlu2 %v2027_v9, %s7325_s6  ;;  %2049 = vrot.lane.b32.xlu1 %v1837_v41, %s7325_s6  ;;  %v1557_v14 = vrot.slane %v1556_v52, 4  ;;  %v13432_v61 = vshrl.u32 %v7899_v39, 16 }
 0x157   : > { %v8429_v21 = vrot.slane %v13428_v31, 7  ;;  %v1565_v24 = vor.u32 %v1564_v27, %v1563_v43  ;;  %v13433_v31 = vshll.u32 %v7899_v39, 16  ;;  %v8444_v2 = vshrl.u32 %v463_v17, 16 }
 0x158   : > { %13430 = vst [vmem:[#allocation116_spill] sm:$0xff] %v8434_v20  ;;  %v1567_v26 = vrot.slane %v13432_v61, 6  ;;  %v8447_v0 = vshll.u32 %v8332_v54, 16  ;;  %v7078_v57 = vrot.slane %v1980_v30, 11  ;;  %v1990_v62 = vor.u32 %v1988_v19, %v8416_v46 }
 0x159   : > { %13429 = vst [vmem:[#allocation115_spill] sm:$0xff] %v8429_v21  ;;  %v1568_v4 = vrot.slane %v13433_v31, 7  ;;  %v1518_v53 = vrot.slane %v8250_v3, 6  ;;  %v1519_v8 = vrot.slane %v8252_v5, 7  ;;  %v1453_v52 = vrot.slane %v8069_v12, 6 }
 0x15a   : > { %13431 = vst [vmem:[#allocation117_spill] sm:$0xff] %v8436_v6  ;;  %v1454_v43 = vrot.slane %v13435_v22, 7  ;;  %v608_v27 = vrot.slane %v8311_v60, 4  ;;  %v1469_v17 = vsel %vm8361_vm15, %v1465_v13, %v8434_v20  ;;  %v13437_v54 = vshrl.u32 %v13436_v10, 16  ;;  %v602_v20 = vpop.permute.xlu1 %601  ;;  %v13450_v10 = vld [vmem:[#allocation5_spill] sm:$0xff] }
 0x15b   : > { %13434 = vst [vmem:[#allocation118_spill] sm:$0xff] %v8444_v2  ;;  %v13438_v30 = vshll.u32 %v13427_v33, 16  ;;  %v1561_v9 = vsel %vm8361_vm15, %v1557_v14, %v8436_v6  ;;  %v1566_v61 = vrot.slane %v1565_v24, 4  ;;  %v8466_v31 = vor.u32 %v1568_v4, %v1567_v26 }
 0x15c   : > { %v7070_v41 = vrot.slane %v13437_v54, 11  ;;  %v1457_v46 = vrot.slane %v8085_v28, 6  ;;  %v1991_v63 = vsel %vm7980_vm3, %v7078_v57, %v1990_v62  ;;  %v8472_v13 = vshrl.u32 %v7487_v15, 16 }
 0x15d   : > { %v1846_v19 = vor.u32 %v8429_v21, %v13438_v30  ;;  %13439 = vst [vmem:[#allocation72_spill] sm:$0xff] %v8466_v31  ;;  %v8475_v54 = vshll.u32 %v7487_v15, 16  ;;  %v1458_v30 = vrot.slane %v8082_v55, 7  ;;  %v1520_v21 = vor.u32 %v1519_v8, %v1518_v53  ;;  %1641 = vrot.lane.b32.xlu0 %v1469_v17, %s7323_s30  ;;  %v13444_v8 = vld [vmem:[#allocation3_spill] sm:$0xff] }
 0x15e   : > { %13440 = vst [vmem:[#allocation119_spill] sm:$0xff] %v8472_v13  ;;  %v1455_v33 = vor.u32 %v1454_v43, %v1453_v52  ;;  %v1118_v14 = vrot.slane %v7960_v45, 5  ;;  %v13442_v24 = vshll.u32 %v7629_v18, 16  ;;  %v611_v4 = vsel %vm266_vm12, %v8311_v60, %v608_v27  ;;  %1673 = vrot.lane.b32.xlu2 %v1561_v9, %s7323_s30  ;;  %2085 = vrot.lane.b32.xlu1 %v1991_v63, %s7325_s6  ;;  %v13443_v18 = vld [vmem:[#allocation2_spill] sm:$0xff]  ;;  %v13445_v60 = vld [vmem:[#allocation7_spill] sm:$0xff] }
 0x15f   : > { %13441 = vst [vmem:[#allocation120_spill] sm:$0xff] %v8475_v54  ;;  %v607_v57 = vrot.slane %v602_v20, 4  ;;  %v1522_v62 = vrot.slane %v8264_v42, 6  ;;  %v1523_v6 = vrot.slane %v8260_v36, 7  ;;  %v1570_v45 = vsel %vm8361_vm15, %v1566_v61, %v8466_v31 }
 0x160   : > { %v1121_v26 = vrot.slane %v13442_v24, 6  ;;  %v1444_v53 = vrot.slane %v13443_v18, 6  ;;  %v1445_v52 = vrot.slane %v13444_v8, 7  ;;  %v8494_v43 = vshll.u32 %v13445_v60, 16 }
 0x161   : > { %v8497_v27 = vshrl.u32 %v13445_v60, 16  ;;  %v1545_v17 = vrot.slane %v8472_v13, 6  ;;  %v1546_v9 = vrot.slane %v8475_v54, 7  ;;  %v8501_v24 = vor.u32 %v1458_v30, %v1457_v46  ;;  %v13451_v13 = vld [vmem:[#allocation4_spill] sm:$0xff] }
 0x162   : > { %13446 = vst [vmem:[#allocation121_spill] sm:$0xff] %v8494_v43  ;;  %v1967_v63 = vshrl.u32 %v611_v4, 16  ;;  %v1456_v15 = vrot.slane %v1455_v33, 4  ;;  %v1127_v61 = vrot.slane %v7945_v50, 5  ;;  %v1130_v31 = vrot.slane %v13420_v25, 6 }
 0x163   : > { %13447 = vst [vmem:[#allocation122_spill] sm:$0xff] %v8497_v27  ;;  %v610_v36 = vsel %vm266_vm12, %v602_v20, %v607_v57  ;;  %v1521_v42 = vrot.slane %v1520_v21, 4  ;;  %v8506_v8 = vor.u32 %v1523_v6, %v1522_v62  ;;  %v1122_v18 = vor.u32 %v1121_v26, %v1118_v14  ;;  %v13453_v6 = vld [vmem:[#allocation88_spill] sm:$0xff] }
 0x164   : > { %13448 = vst [vmem:[#allocation123_spill] sm:$0xff] %v8501_v24  ;;  %v1446_v60 = vor.u32 %v1445_v52, %v1444_v53  ;;  %v1448_v55 = vrot.slane %v13450_v10, 6  ;;  %v1449_v28 = vrot.slane %v13451_v13, 7  ;;  %v1550_v46 = vrot.slane %v8494_v43, 7 }
 0x165   : > { %13449 = vst [vmem:[#allocation124_spill] sm:$0xff] %v8506_v8  ;;  %v1547_v30 = vor.u32 %v1546_v9, %v1545_v17  ;;  %v1549_v33 = vrot.slane %v8497_v27, 6  ;;  %v766_v50 = vrot.slane %v8230_v23, 4  ;;  %v769_v25 = vrot.slane %v8232_v1, 5  ;;  %1677 = vrot.lane.b32.xlu0 %v1570_v45, %s7323_s30 }
 0x166   : > { %v8514_v54 = vrot.slane %v1967_v63, 7  ;;  %v1970_v21 = vshll.u32 %v611_v4, 16  ;;  %v1962_v20 = vshrl.u32 %v610_v36, 16  ;;  %v13454_v14 = vrot.slane %v8203_v11, 4 }
 0x167   : > { %v1847_v57 = vsel %vm7980_vm3, %v7070_v41, %v1846_v19  ;;  %v1525_v62 = vsel %vm8361_vm15, %v1521_v42, %v8506_v8  ;;  %vm1094_vm14 = vsmask.f32 2304  ;;  %v8526_v53 = vor.u32 %v769_v25, %v766_v50 }
 0x168   : > { %13452 = vst [vmem:[#allocation4_spill] sm:$0xff] %v8514_v54  ;;  %v2348_v26 = vsel %vm2199_vm8, %v13454_v14, %v13453_v6  ;;  %2053 = vrot.lane.b32.xlu2 %v1847_v57, %s7325_s6  ;;  %1657 = vrot.lane.b32.xlu1 %v1525_v62, %s7323_s30  ;;  %v8530_v36 = vor.u32 %v1449_v28, %v1448_v55  ;;  %vm1095_vm1 = vsmask.f32 6416  ;;  %v13456_v41 = vrot.slane %v8199_v44, 4  ;;  %v13460_v14 = vld [vmem:[#allocation18_spill] sm:$0xff]  ;;  %v13487_v44 = vld [vmem:[#allocation103_spill] sm:$0xff] }
 0x169   : > { %v1460_v4 = vsel %vm8361_vm15, %v1456_v15, %v8501_v24  ;;  %v1447_v42 = vrot.slane %v1446_v60, 4  ;;  %v1548_v45 = vrot.slane %v1547_v30, 4  ;;  %v8539_v50 = vor.u32 %v1550_v46, %v1549_v33  ;;  %v13459_v46 = vld [vmem:[#allocation64_spill] sm:$0xff]  ;;  %vm8566_vm11 = vmor %vm1094_vm14, %vm1095_vm1 }
 0x16a   : > { %13455 = vst [vmem:[#allocation125_spill] sm:$0xff] %v8530_v36  ;;  %v2336_v19 = vsel %vm2199_vm8, %v13456_v41, %v8158_v29  ;;  %v8542_v52 = vperm.slane %v2348_v26, %v7771_v38  ;;  %v7077_v17 = vrot.slane %v1962_v20, 11  ;;  %v1972_v55 = vor.u32 %v1970_v21, %v8514_v54 }
 0x16b   : > { %13457 = vst [vmem:[#allocation126_spill] sm:$0xff] %v8539_v50  ;;  %v1123_v28 = vrot.slane %v1122_v18, 4  ;;  %v8545_v9 = vor.u32 %v1130_v31, %v1127_v61  ;;  %v747_v63 = vrot.slane %v8250_v3, 4  ;;  %v750_v25 = vrot.slane %v8252_v5, 5 }
 0x16c   : > { %v8551_v60 = vperm.slane %v2336_v19, %v7771_v38  ;;  %v526_v30 = vrot.slane %v13459_v46, 4  ;;  %v1527_v33 = vrot.slane %v8230_v23, 6  ;;  %v1528_v20 = vrot.slane %v8232_v1, 7 }
 0x16d   : > { %13458 = vst [vmem:[#allocation127_spill] sm:$0xff] %v8545_v9  ;;  %v13461_v21 = vshll.u32 %v13460_v14, 16  ;;  %v1451_v31 = vsel %vm8361_vm15, %v1447_v42, %v8530_v36  ;;  %v1552_v61 = vsel %vm8361_vm15, %v1548_v45, %v8539_v50  ;;  %v8570_v57 = vor.u32 %v750_v25, %v747_v63  ;;  %v13465_v14 = vld [vmem:[#allocation99_spill] sm:$0xff] }
 0x16e   : > { %v2359_v62 = vrot.slane %v8542_v52, 4  ;;  %v1973_v41 = vsel %vm7980_vm3, %v7077_v17, %v1972_v55  ;;  %v1132_v19 = vsel %vm8566_vm11, %v1123_v28, %v8545_v9  ;;  %v13464_v42 = vshrl.u32 %v7774_v40, 16 }
 0x16f   : > { %v1140_v18 = vrot.slane %v13461_v21, 6  ;;  %v13466_v21 = vld [vmem:[#allocation95_spill] sm:$0xff]  ;;  %2081 = vrot.lane.b32.xlu0 %v1973_v41, %s7325_s6  ;;  %v1531_v63 = vrot.slane %v8444_v2, 6  ;;  %v1532_v25 = vrot.slane %v8419_v56, 7  ;;  %v13468_v17 = vshll.u32 %v7774_v40, 16  ;;  %v13470_v40 = vld [vmem:[#allocation34_spill] sm:$0xff] }
 0x170   : > { %v1219_v45 = vrot.slane %v13464_v42, 5  ;;  %v13467_v15 = vrot.slane %v13466_v21, 4  ;;  %v2360_v28 = vsel %vm2199_vm8, %v2359_v62, %v8551_v60  ;;  %1633 = vrot.lane.b32.xlu2 %v1451_v31, %s7323_s30  ;;  %1669 = vrot.lane.b32.xlu1 %v1552_v61, %s7323_s30  ;;  %v2249_v42 = vrot.slane %v8325_v51, 4 }
 0x171   : > { %v1222_v55 = vrot.slane %v13468_v17, 6  ;;  %v4123_v41 = vshrl.u32 %v8367_v16, 16  ;;  %v4124_v9 = vshrl.u32 %v8379_v49, 16  ;;  %v1529_v8 = vor.u32 %v1528_v20, %v1527_v33 }
 0x172   : > { %v2392_v50 = vsel %vm2199_vm8, %v13467_v15, %v13465_v14  ;;  %v2305_v15 = vrot.slane %v8350_v35, 4  ;;  %v8602_v17 = vperm.slane %v13470_v40, %v7771_v38  ;;  %v8606_v31 = vpack.i.b16 %v8379_v49, %v8367_v16 }
 0x173   : > { %v8598_v24 = vperm.slane %v2392_v50, %v7771_v38  ;;  %v527_v51 = vsel %vm452_vm0, %v526_v30, %v13459_v46  ;;  %v1536_v35 = vrot.slane %v8422_v34, 6  ;;  %v1537_v61 = vrot.slane %v8447_v0, 7  ;;  %v13475_v30 = vld [vmem:[#allocation105_spill] sm:$0xff] }
 0x174   : > { %13471 = vst [vmem:[#allocation18_spill] sm:$0xff] %v8602_v17  ;;  %v8612_v62 = vpack.i.b16 %v4124_v9, %v4123_v41  ;;  %v8614_v33 = vor.u32 %v1532_v25, %v1531_v63  ;;  %v785_v50 = vrot.slane %v8422_v34, 4  ;;  %v788_v20 = vrot.slane %v8447_v0, 5 }
 0x175   : > { %13469 = vst [vmem:[#allocation64_spill] sm:$0xff] %v8598_v24  ;;  %v2415_v40 = vrot.slane %v8602_v17, 4  ;;  %v1223_v36 = vor.u32 %v1222_v55, %v1219_v45  ;;  %v4153_v49 = vshrl.u32 %v2360_v28, 16  ;;  %v8621_v16 = vsel %vm2199_vm8, %v8298_v58, %v2249_v42 }
 0x176   : > { %13472 = vst [vmem:[#allocation34_spill] sm:$0xff] %v8614_v33  ;;  %v8625_v46 = vsel %vm2199_vm8, %v8339_v48, %v2305_v15  ;;  %v1530_v9 = vrot.slane %v1529_v8, 4  ;;  %v1540_v63 = vrot.slane %v13475_v30, 6  ;;  %v8628_v25 = vor.u32 %v788_v20, %v785_v50  ;;  %v13477_v48 = vld [vmem:[#allocation100_spill] sm:$0xff]  ;;  %v13478_v8 = vld [vmem:[#allocation101_spill] sm:$0xff] }
 0x177   : > { %13473 = vst [vmem:[#allocation128_spill] sm:$0xff] %v8621_v16  ;;  %v2416_v41 = vsel %vm2199_vm8, %v2415_v40, %v8598_v24  ;;  %v1538_v54 = vor.u32 %v1537_v61, %v1536_v35  ;;  %v1541_v45 = vrot.slane %v13476_v59, 7  ;;  %1637 = vrot.lane.b32.xlu0 %v1460_v4, %s7323_s30  ;;  %v1607_v42 = vor.u32 %v13478_v8, %v13477_v48 }
 0x178   : > { %13474 = vst [vmem:[#allocation129_spill] sm:$0xff] %v8625_v46  ;;  %v8633_v55 = vpack.i.b16 %v2416_v41, %v2360_v28  ;;  %v4154_v21 = vshrl.u32 %v2416_v41, 16  ;;  %v1534_v58 = vsel %vm8361_vm15, %v1530_v9, %v8614_v33  ;;  %v13479_v15 = vshrl.u32 %v7899_v39, 16  ;;  %1289 = vrot.lane.b32.xlu1 %v1132_v19, %s7326_s7  ;;  %v13481_v9 = vld [vmem:[#allocation28_spill] sm:$0xff]  ;;  %v13490_v41 = vld [vmem:[#allocation111_spill] sm:$0xff] }
 0x179   : > { %v13480_v20 = vshll.u32 %v7899_v39, 16  ;;  %1661 = vrot.lane.b32.xlu2 %v1534_v58, %s7323_s30  ;;  %v2361_v28 = vrot.slane %v8551_v60, 4  ;;  %v4442_v61 = vunpack.c.l.b16 %v8606_v31  ;;  %v1624_v48 = vshrl.u32 %v527_v51, 16  ;;  %v13485_v19 = vld [vmem:[#allocation96_spill] sm:$0xff] }
 0x17a   : > { %v1228_v50 = vrot.slane %v13479_v15, 5  ;;  %v8648_v4 = vpack.i.b16 %v4154_v21, %v4153_v49  ;;  %v4444_v40 = vunpack.c.l.b16 %v8633_v55  ;;  %v1627_v8 = vshll.u32 %v527_v51, 16  ;;  %v13486_v49 = vld [vmem:[#allocation102_spill] sm:$0xff] }
 0x17b   : > { %v1231_v35 = vrot.slane %v13480_v20, 6  ;;  %v13482_v15 = vrot.slane %v7953_v47, 5  ;;  %v1539_v20 = vrot.slane %v1538_v54, 4  ;;  %v8655_v33 = vor.u32 %v1541_v45, %v1540_v63  ;;  %v13493_v45 = vld [vmem:[#allocation50_spill] sm:$0xff] }
 0x17c   : > { %v8657_v58 = vpack.c.b16 %v4444_v40, %v4442_v61  ;;  %v3353_v60 = vrot.slane %v13485_v19, 4  ;;  %v1608_v21 = vrot.slane %v1607_v42, 4  ;;  %v8662_v14 = vor.u32 %v13487_v44, %v13486_v49  ;;  %v13494_v42 = vld [vmem:[#allocation76_spill] sm:$0xff] }
 0x17d   : > { %v1141_v39 = vor.u32 %v1140_v18, %v13482_v15  ;;  %13483 = vst [vmem:[#allocation100_spill] sm:$0xff] %v8655_v33  ;;  %v1224_v46 = vrot.slane %v1223_v36, 4  ;;  %v8664_v16 = vor.u32 %v1231_v35, %v1228_v50  ;;  %v1619_v51 = vrot.slane %v8356_v7, 6  ;;  %v13491_v18 = vld [vmem:[#allocation46_spill] sm:$0xff]  ;;  %v13497_v50 = vld [vmem:[#allocation89_spill] sm:$0xff] }
 0x17e   : > { %13484 = vst [vmem:[#allocation101_spill] sm:$0xff] %v8657_v58  ;;  %v1620_v47 = vrot.slane %v13490_v41, 7  ;;  %v1146_v54 = vrot.slane %v13491_v18, 5  ;;  %v8671_v63 = vsel %vm2199_vm8, %v8542_v52, %v2361_v28  ;;  %v1149_v61 = vrot.slane %v13493_v45, 6  ;;  %v13499_v52 = vld [vmem:[#allocation13_spill] sm:$0xff] }
 0x17f   : > { %13488 = vst [vmem:[#allocation28_spill] sm:$0xff] %v8662_v14  ;;  %v13495_v40 = vshrl.u32 %v13494_v42, 16  ;;  %v13496_v44 = vshll.u32 %v13494_v42, 16  ;;  %v8680_v35 = vsel %vm2199_vm8, %v3353_v60, %v13497_v50  ;;  %v1626_v49 = vrot.slane %v1624_v48, 6 }
 0x180   : > { %13489 = vst [vmem:[#allocation96_spill] sm:$0xff] %v8664_v16  ;;  %v1629_v58 = vrot.slane %v1627_v8, 7  ;;  %v1543_v18 = vsel %vm8361_vm15, %v1539_v20, %v8655_v33  ;;  %v13500_v28 = vshrl.u32 %v13499_v52, 16  ;;  %vm443_vm14 = vcmask 31744   ;;  %v13504_v33 = vld [vmem:[#allocation31_spill] sm:$0xff] }
 0x181   : > { %13492 = vst [vmem:[#allocation102_spill] sm:$0xff] %v8671_v63  ;;  %v1572_v15 = vrot.slane %v13495_v40, 6  ;;  %v1573_v36 = vrot.slane %v13496_v44, 7  ;;  %1665 = vrot.lane.b32.xlu0 %v1543_v18, %s7323_s30  ;;  %v1617_v45 = vsel %vm8361_vm15, %v1608_v21, %v8662_v14  ;;  %v1233_v60 = vsel %vm8566_vm11, %v1224_v46, %v8664_v16  ;;  %v13503_v44 = vld [vmem:[#allocation29_spill] sm:$0xff] }
 0x182   : > { %13498 = vst [vmem:[#allocation103_spill] sm:$0xff] %v8680_v35  ;;  %v1483_v29 = vrot.slane %v13500_v28, 6  ;;  %v13501_v48 = vshrl.u32 %v13481_v9, 16  ;;  %v13502_v40 = vshll.u32 %v13481_v9, 16  ;;  %v1582_v52 = vshrl.u32 %v13503_v44, 16  ;;  %1689 = vrot.lane.b32.xlu2 %v1617_v45, %s7323_s30  ;;  %1325 = vrot.lane.b32.xlu1 %v1233_v60, %s7326_s7  ;;  %v13505_v35 = vld [vmem:[#allocation83_spill] sm:$0xff] }
 0x183   : > { %v1585_v28 = vshll.u32 %v13503_v44, 16  ;;  %v442_v18 = vrot.slane %v13504_v33, 4  ;;  %v1621_v21 = vor.u32 %v1620_v47, %v1619_v51  ;;  %v1574_v14 = vor.u32 %v1573_v36, %v1572_v15  ;;  %v13506_v16 = vld [vmem:[#allocation85_spill] sm:$0xff]  ;;  %v13513_v60 = vld [vmem:[#allocation79_spill] sm:$0xff] }
 0x184   : > { %v1576_v8 = vrot.slane %v13501_v48, 6  ;;  %v1577_v20 = vrot.slane %v13502_v40, 7  ;;  %v1207_v46 = vrot.slane %v13505_v35, 5  ;;  %v1208_v63 = vrot.slane %v13506_v16, 6  ;;  %v13507_v48 = vld [vmem:[#allocation12_spill] sm:$0xff] }
 0x185   : > { %v13508_v17 = vshrl.u32 %v13507_v48, 16  ;;  %v8707_v40 = vor.u32 %v1629_v58, %v1626_v49  ;;  %v1142_v11 = vrot.slane %v1141_v39, 4  ;;  %v8709_v6 = vor.u32 %v1149_v61, %v1146_v54  ;;  %v13514_v61 = vld [vmem:[#allocation77_spill] sm:$0xff] }
 0x186   : > { %v13511_v44 = vshll.u32 %v13507_v48, 16  ;;  %v8713_v45 = vor.u32 %v1577_v20, %v1576_v8  ;;  %v1487_v51 = vor.u32 %v13513_v60, %v1483_v29  ;;  %v1106_v47 = vrot.slane %v8069_v12, 5  ;;  %v13515_v12 = vld [vmem:[#allocation75_spill] sm:$0xff]  ;;  %v13516_v20 = vld [vmem:[#allocation74_spill] sm:$0xff] }
 0x187   : > { %v1492_v24 = vrot.slane %v13508_v17, 6  ;;  %13509 = vst [vmem:[#allocation111_spill] sm:$0xff] %v8707_v40  ;;  %v4483_v15 = vunpack.c.l.b16 %v8648_v4  ;;  %v1622_v16 = vrot.slane %v1621_v21, 4  ;;  %v1211_v36 = vrot.slane %v13421_v32, 5 }
 0x188   : > { %13510 = vst [vmem:[#allocation50_spill] sm:$0xff] %v8709_v6  ;;  %v1495_v38 = vrot.slane %v13511_v44, 7  ;;  %v1107_v17 = vrot.slane %v13435_v22, 6  ;;  %v4481_v39 = vunpack.c.l.b16 %v8612_v62  ;;  %v1575_v58 = vrot.slane %v1574_v14, 4 }
 0x189   : > { %13512 = vst [vmem:[#allocation76_spill] sm:$0xff] %v8713_v45  ;;  %v1209_v54 = vor.u32 %v1208_v63, %v1207_v46  ;;  %v1212_v35 = vrot.slane %v13514_v61, 6  ;;  %v4484_v49 = vunpack.c.h.b16 %v8648_v4  ;;  %v1631_v29 = vsel %vm8361_vm15, %v1622_v16, %v8707_v40  ;;  %v13519_v46 = vld [vmem:[#allocation65_spill] sm:$0xff] }
 0x18a   : > { %v1110_v8 = vrot.slane %v13515_v12, 5  ;;  %v1111_v21 = vrot.slane %v13516_v20, 6  ;;  %v8728_v48 = vpack.c.b16 %v4483_v15, %v4481_v39  ;;  %v1584_v44 = vrot.slane %v1582_v52, 6  ;;  %1693 = vrot.lane.b32.xlu0 %v1631_v29, %s7323_s30  ;;  %v8743_v15 = vpop.permute.xlu2 %605 }
 0x18b   : > { %v1151_v22 = vsel %vm8566_vm11, %v1142_v11, %v8709_v6  ;;  %v1579_v14 = vsel %vm8361_vm15, %v1575_v58, %v8713_v45  ;;  %v4482_v4 = vunpack.c.h.b16 %v8612_v62  ;;  %v8740_v63 = vsel %vm443_vm14, %v442_v18, %v13504_v33  ;;  %13520 = vst [vmem:[#allocation29_spill] sm:$0xff] %v8743_v15  ;;  %v8753_v33 = vpop.permute.xlu1 %593  ;;  %v13526_v45 = vld [vmem:[#allocation38_spill] sm:$0xff] }
 0x18c   : > { %13517 = vst [vmem:[#allocation89_spill] sm:$0xff] %v8728_v48  ;;  %v518_v60 = vrot.slane %v13519_v46, 4  ;;  %1293 = vrot.lane.b32.xlu2 %v1151_v22, %s7326_s7  ;;  %1681 = vrot.lane.b32.xlu1 %v1579_v14, %s7323_s30  ;;  %v8747_v52 = vor.u32 %v1495_v38, %v1492_v24  ;;  %v1108_v11 = vor.u32 %v1107_v17, %v1106_v47  ;;  %v1210_v16 = vrot.slane %v1209_v54, 4  ;;  %v13528_v24 = vld [vmem:[#allocation94_spill] sm:$0xff]  ;;  %v13530_v54 = vld [vmem:[#allocation37_spill] sm:$0xff] }
 0x18d   : > { %13518 = vst [vmem:[#allocation13_spill] sm:$0xff] %v8740_v63  ;;  %v8749_v39 = vor.u32 %v1212_v35, %v1211_v36  ;;  %v1488_v58 = vrot.slane %v1487_v51, 4  ;;  %v8751_v62 = vpack.c.b16 %v4484_v49, %v4482_v4  ;;  %v1587_v29 = vrot.slane %v1585_v28, 7  ;;  %v13529_v17 = vld [vmem:[#allocation26_spill] sm:$0xff]  ;;  %v13531_v49 = vld [vmem:[#allocation9_spill] sm:$0xff] }
 0x18e   : > { %13521 = vst [vmem:[#allocation31_spill] sm:$0xff] %v8747_v52  ;;  %v8755_v18 = vor.u32 %v1111_v21, %v1110_v8  ;;  %v1189_v32 = vrot.slane %v8422_v34, 5  ;;  %v1190_v22 = vrot.slane %v8447_v0, 6  ;;  %v13527_v14 = vshll.u32 %v13526_v45, 16 }
 0x18f   : > { %13522 = vst [vmem:[#allocation83_spill] sm:$0xff] %v8749_v39  ;;  %v13124_v51 = vshll.u32 %v8740_v63, 16  ;;  %v414_v35 = vrot.slane %v13530_v54, 4  ;;  %v1109_v28 = vrot.slane %v1108_v11, 4  ;;  %v13532_v4 = vshrl.u32 %v13531_v49, 16 }
 0x190   : > { %13523 = vst [vmem:[#allocation85_spill] sm:$0xff] %v8751_v62  ;;  %v1596_v38 = vrot.slane %v13527_v14, 7  ;;  %v13533_v21 = vrot.slane %v13497_v50, 4  ;;  %v8775_v0 = vsel %vm452_vm0, %v518_v60, %v13519_v46  ;;  %v1214_v45 = vsel %vm8566_vm11, %v1210_v16, %v8749_v39  ;;  %v13536_v14 = vld [vmem:[#allocation15_spill] sm:$0xff] }
 0x191   : > { %13524 = vst [vmem:[#allocation12_spill] sm:$0xff] %v8753_v33  ;;  %v1502_v8 = vrot.slane %v13532_v4, 6  ;;  %v1497_v11 = vsel %vm8361_vm15, %v1488_v58, %v8747_v52  ;;  %v13537_v49 = vshrl.u32 %v13536_v14, 16  ;;  %v13538_v50 = vshll.u32 %v13536_v14, 16  ;;  %v13549_v52 = vld [vmem:[#allocation62_spill] sm:$0xff] }
 0x192   : > { %13525 = vst [vmem:[#allocation79_spill] sm:$0xff] %v8755_v18  ;;  %v8771_v34 = vsel %vm2199_vm8, %v13485_v19, %v13533_v21  ;;  %v1113_v19 = vsel %vm8566_vm11, %v1109_v28, %v8755_v18  ;;  %v1588_v46 = vor.u32 %v1587_v29, %v1584_v44  ;;  %v1191_v60 = vor.u32 %v1190_v22, %v1189_v32  ;;  %v13539_v28 = vld [vmem:[#allocation70_spill] sm:$0xff]  ;;  %v13541_v29 = vld [vmem:[#allocation3_spill] sm:$0xff] }
 0x193   : > { %13534 = vst [vmem:[#allocation65_spill] sm:$0xff] %v8771_v34  ;;  %v1511_v4 = vrot.slane %v13537_v49, 6  ;;  %v1514_v21 = vrot.slane %v13538_v50, 7  ;;  %1321 = vrot.lane.b32.xlu0 %v1214_v45, %s7326_s7  ;;  %v1193_v16 = vrot.slane %v13475_v30, 5  ;;  %v1194_v36 = vrot.slane %v13476_v59, 6  ;;  %v13540_v44 = vld [vmem:[#allocation2_spill] sm:$0xff]  ;;  %v8824_v49 = vpop.permute.xlu1 %629 }
 0x194   : > { %13535 = vst [vmem:[#allocation38_spill] sm:$0xff] %v8775_v0  ;;  %v918_v58 = vrot.slane %v8356_v7, 4  ;;  %v921_v47 = vrot.slane %v13490_v41, 5  ;;  %1649 = vrot.lane.b32.xlu2 %v1497_v11, %s7323_s30  ;;  %1285 = vrot.lane.b32.xlu1 %v1113_v19, %s7326_s7  ;;  %v1506_v14 = vor.u32 %v13539_v28, %v1502_v8  ;;  %v1097_v32 = vrot.slane %v13540_v44, 5  ;;  %v8813_v19 = vpop.permute.xlu2 %641  ;;  %v13544_v44 = vld [vmem:[#allocation91_spill] sm:$0xff] }
 0x195   : > { %v1098_v22 = vrot.slane %v13541_v29, 6  ;;  %v8803_v45 = vrot.slane %v13124_v51, 6  ;;  %v8807_v50 = vsel %vm416_vm4, %v414_v35, %v13530_v54  ;;  %13542 = vst [vmem:[#allocation26_spill] sm:$0xff] %v8813_v19  ;;  %v8815_v8 = vor.u32 %v1514_v21, %v1511_v4  ;;  %v13548_v21 = vld [vmem:[#allocation45_spill] sm:$0xff]  ;;  %v13579_v34 = vld [vmem:[#allocation11_spill] sm:$0xff] }
 0x196   : > { %v8810_v30 = vor.u32 %v921_v47, %v918_v58  ;;  %v1589_v28 = vrot.slane %v1588_v46, 4  ;;  %v8818_v29 = vor.u32 %v1596_v38, %v13544_v44  ;;  %v1192_v51 = vrot.slane %v1191_v60, 4  ;;  %13547 = vst [vmem:[#allocation70_spill] sm:$0xff] %v8824_v49 }
 0x197   : > { %13543 = vst [vmem:[#allocation37_spill] sm:$0xff] %v8815_v8  ;;  %v8820_v18 = vor.u32 %v1194_v36, %v1193_v16  ;;  %v1171_v54 = vrot.slane %v8250_v3, 5  ;;  %v1172_v35 = vrot.slane %v8252_v5, 6  ;;  %v1507_v47 = vrot.slane %v1506_v14, 4 }
 0x198   : > { %13545 = vst [vmem:[#allocation9_spill] sm:$0xff] %v8818_v29  ;;  %v1099_v58 = vor.u32 %v1098_v22, %v1097_v32  ;;  %v1101_v11 = vrot.slane %v13450_v10, 5  ;;  %v1102_v4 = vrot.slane %v13451_v13, 6  ;;  %v441_v46 = vrot.slane %v13548_v21, 4  ;;  %v13552_v32 = vld [vmem:[#allocation108_spill] sm:$0xff] }
 0x199   : > { %13546 = vst [vmem:[#allocation15_spill] sm:$0xff] %v8820_v18  ;;  %v509_v38 = vrot.slane %v13549_v52, 4  ;;  %v1272_v60 = vrot.slane %v8356_v7, 5  ;;  %v1273_v36 = vrot.slane %v13490_v41, 6  ;;  %v13550_v3 = vshrl.u32 %v8775_v0, 16 }
 0x19a   : > { %v13551_v5 = vshll.u32 %v8775_v0, 16  ;;  %v1516_v14 = vsel %vm8361_vm15, %v1507_v47, %v8815_v8  ;;  %v1598_v13 = vsel %vm8361_vm15, %v1589_v28, %v8818_v29  ;;  %v1196_v7 = vsel %vm8566_vm11, %v1192_v51, %v8820_v18  ;;  %v13556_v47 = vld [vmem:[#allocation41_spill] sm:$0xff]  ;;  %v13557_v8 = vld [vmem:[#allocation119_spill] sm:$0xff] }
 0x19b   : > { %v1276_v16 = vrot.slane %v13550_v3, 5  ;;  %1653 = vrot.lane.b32.xlu0 %v1516_v14, %s7323_s30  ;;  %v1173_v41 = vor.u32 %v1172_v35, %v1171_v54  ;;  %v1175_v22 = vrot.slane %v13552_v32, 5  ;;  %v13553_v3 = vld [vmem:[#allocation107_spill] sm:$0xff]  ;;  %vm425_vm0 = vcmask 48128   ;;  %v13558_v54 = vld [vmem:[#allocation120_spill] sm:$0xff] }
 0x19c   : > { %v1277_v44 = vrot.slane %v13551_v5, 6  ;;  %v1176_v6 = vrot.slane %v13553_v3, 6  ;;  %v13554_v5 = vld [vmem:[#allocation61_spill] sm:$0xff]  ;;  %1685 = vrot.lane.b32.xlu2 %v1598_v13, %s7323_s30  ;;  %1313 = vrot.lane.b32.xlu1 %v1196_v7, %s7326_s7  ;;  %v1100_v37 = vrot.slane %v1099_v58, 4  ;;  %v8851_v28 = vor.u32 %v1102_v4, %v1101_v11  ;;  %v8863_v58 = vpop.permute.xlu2 %2073 }
 0x19d   : > { %v510_v39 = vrot.slane %v13554_v5, 4  ;;  %v423_v14 = vrot.slane %v13556_v47, 4  ;;  %v1274_v29 = vor.u32 %v1273_v36, %v1272_v60  ;;  %v1198_v51 = vrot.slane %v13557_v8, 5  ;;  %v13559_v13 = vld [vmem:[#allocation57_spill] sm:$0xff] }
 0x19e   : > { %13555 = vst [vmem:[#allocation2_spill] sm:$0xff] %v8851_v28  ;;  %v1199_v35 = vrot.slane %v13558_v54, 6  ;;  %v669_v32 = vshrl.u32 %v8807_v50, 16  ;;  %v672_v18 = vshll.u32 %v8807_v50, 16  ;;  %v8860_v40 = vsel %vm443_vm14, %v441_v46, %v13548_v21 }
 0x19f   : > { %v485_v7 = vrot.slane %v13559_v13, 4  ;;  %v8867_v11 = vsel %vm443_vm14, %v509_v38, %v13549_v52  ;;  %v1174_v4 = vrot.slane %v1173_v41, 4  ;;  %v8869_v60 = vor.u32 %v1176_v6, %v1175_v22  ;;  %v8882_v52 = vpop.permute.xlu0 %581  ;;  %v8888_v22 = vpop.permute.xlu1 %2045 }
 0x1a0   : > { %v8871_v36 = vor.u32 %v1277_v44, %v1276_v16  ;;  %v8875_v50 = vsel %vm443_vm14, %v510_v39, %v13554_v5  ;;  %v1104_v21 = vsel %vm8566_vm11, %v1100_v37, %v8851_v28  ;;  %v1180_v46 = vrot.slane %v8230_v23, 5  ;;  %13563 = vst [vmem:[#allocation62_spill] sm:$0xff] %v8882_v52 }
 0x1a1   : > { %13560 = vst [vmem:[#allocation3_spill] sm:$0xff] %v8869_v60  ;;  %v1181_v15 = vrot.slane %v8232_v1, 6  ;;  %vm434_vm15 = vcmask 39936   ;;  %v1275_v38 = vrot.slane %v1274_v29, 4  ;;  %v1200_v6 = vor.u32 %v1199_v35, %v1198_v51 }
 0x1a2   : > { %13561 = vst [vmem:[#allocation91_spill] sm:$0xff] %v8871_v36  ;;  %v1202_v16 = vrot.slane %v8497_v27, 5  ;;  %v1203_v44 = vrot.slane %v8494_v43, 6  ;;  %v1184_v5 = vrot.slane %v8444_v2, 5  ;;  %v1185_v23 = vrot.slane %v8419_v56, 6  ;;  %v13572_v2 = vld [vmem:[#allocation40_spill] sm:$0xff] }
 0x1a3   : > { %13562 = vst [vmem:[#allocation45_spill] sm:$0xff] %v8875_v50  ;;  %v671_v1 = vrot.slane %v669_v32, 4  ;;  %v426_v37 = vsel %vm425_vm0, %v423_v14, %v13556_v47  ;;  %1281 = vrot.lane.b32.xlu0 %v1104_v21, %s7326_s7  ;;  %v1178_v29 = vsel %vm8566_vm11, %v1174_v4, %v8869_v60  ;;  %v1279_v51 = vsel %vm8566_vm11, %v1275_v38, %v8871_v36 }
 0x1a4   : > { %v674_v35 = vrot.slane %v672_v18, 5  ;;  %1305 = vrot.lane.b32.xlu2 %v1178_v29, %s7326_s7  ;;  %1341 = vrot.lane.b32.xlu1 %v1279_v51, %s7326_s7  ;;  %v1182_v32 = vor.u32 %v1181_v15, %v1180_v46  ;;  %v487_v47 = vsel %vm416_vm4, %v485_v7, %v13559_v13  ;;  %v1201_v4 = vrot.slane %v1200_v6, 4  ;;  %v8915_v29 = vpop.permute.xlu2 %2037  ;;  %v13570_v6 = vld [vmem:[#allocation92_spill] sm:$0xff] }
 0x1a5   : > { %v8908_v21 = vor.u32 %v1203_v44, %v1202_v16  ;;  %v13565_v38 = vshrl.u32 %v8867_v11, 16  ;;  %v13566_v41 = vshll.u32 %v8867_v11, 16  ;;  %v8917_v51 = vor.u32 %v1185_v23, %v1184_v5  ;;  %v13573_v23 = vld [vmem:[#allocation56_spill] sm:$0xff] }
 0x1a6   : > { %v13568_v15 = vshrl.u32 %v8860_v40, 16  ;;  %v13569_v7 = vshll.u32 %v8860_v40, 16  ;;  %v828_v16 = vrot.slane %v13570_v6, 4  ;;  %v424_v39 = vrot.slane %v13572_v2, 4 }
 0x1a7   : > { %13564 = vst [vmem:[#allocation61_spill] sm:$0xff] %v8908_v21  ;;  %v1263_v18 = vrot.slane %v13565_v38, 5  ;;  %v1264_v27 = vrot.slane %v13566_v41, 6  ;;  %v13571_v38 = vshrl.u32 %v8740_v63, 16  ;;  %v688_v41 = vshrl.u32 %v426_v37, 16 }
 0x1a8   : > { %13567 = vst [vmem:[#allocation41_spill] sm:$0xff] %v8917_v51  ;;  %v1162_v13 = vrot.slane %v13568_v15, 5  ;;  %v1163_v46 = vrot.slane %v13569_v7, 6  ;;  %v1183_v60 = vrot.slane %v1182_v32, 4  ;;  %v691_v36 = vshll.u32 %v426_v37, 16  ;;  %v8939_v37 = vpop.permute.xlu0 %617 }
 0x1a9   : > { %v1166_v14 = vrot.slane %v13571_v38, 5  ;;  %v840_v5 = vshrl.u32 %v487_v47, 16  ;;  %v486_v28 = vrot.slane %v13573_v23, 4  ;;  %v1205_v15 = vsel %vm8566_vm11, %v1201_v4, %v8908_v21  ;;  %13576 = vst [vmem:[#allocation119_spill] sm:$0xff] %v8939_v37 }
 0x1aa   : > { %v13574_v7 = vshrl.u32 %v8875_v50, 16  ;;  %v13575_v44 = vshll.u32 %v8875_v50, 16  ;;  %v1187_v38 = vsel %vm8566_vm11, %v1183_v60, %v8917_v51  ;;  %v1265_v12 = vor.u32 %v1264_v27, %v1263_v18  ;;  %v8960_v18 = vpop.permute.xlu1 %2033 }
 0x1ab   : > { %v843_v32 = vshll.u32 %v487_v47, 16  ;;  %1309 = vrot.lane.b32.xlu0 %v1187_v38, %s7326_s7  ;;  %v13577_v49 = vrot.slane %v13514_v61, 5  ;;  %v1164_v21 = vor.u32 %v1163_v46, %v1162_v13  ;;  %v13581_v62 = vshll.u32 %v13528_v24, 16  ;;  %v13586_v13 = vld [vmem:[#allocation47_spill] sm:$0xff] }
 0x1ac   : > { %v1267_v6 = vrot.slane %v13574_v7, 5  ;;  %v1268_v19 = vrot.slane %v13575_v44, 6  ;;  %v675_v7 = vor.u32 %v674_v35, %v671_v1  ;;  %v13583_v27 = vrot.slane %v13529_v17, 4  ;;  %1317 = vrot.lane.b32.xlu2 %v1205_v15, %s7326_s7  ;;  %v13585_v35 = vld [vmem:[#allocation44_spill] sm:$0xff]  ;;  %v8970_v38 = vpop.permute.xlu2 %2065 }
 0x1ad   : > { %v833_v4 = vsel %vm7478_vm2, %v828_v16, %v13577_v49  ;;  %v8950_v48 = vrot.slane %v13581_v62, 5  ;;  %v8958_v47 = vsel %vm425_vm0, %v424_v39, %v13572_v2  ;;  %v690_v49 = vrot.slane %v688_v41, 4  ;;  %v13590_v41 = vld [vmem:[#allocation30_spill] sm:$0xff] }
 0x1ae   : > { %v435_v60 = vsel %vm434_vm15, %v13583_v27, %v13529_v17  ;;  %13584 = vst [vmem:[#allocation57_spill] sm:$0xff] %v8958_v47  ;;  %974 = vrot.lane.b32.xlu1 %v833_v4, %s7330_s11  ;;  %v693_v1 = vrot.slane %v691_v36, 5  ;;  %v493_v62 = vrot.slane %v13585_v35, 4  ;;  %v433_v46 = vrot.slane %v13586_v13, 4 }
 0x1af   : > { %13582 = vst [vmem:[#allocation120_spill] sm:$0xff] %v8950_v48  ;;  %v842_v16 = vrot.slane %v840_v5, 4  ;;  %v8968_v17 = vsel %vm416_vm4, %v486_v28, %v13573_v23  ;;  %v1266_v2 = vrot.slane %v1265_v12, 4  ;;  %v8972_v39 = vor.u32 %v1268_v19, %v1267_v6 }
 0x1b0   : > { %13587 = vst [vmem:[#allocation92_spill] sm:$0xff] %v8968_v17  ;;  %v845_v27 = vrot.slane %v843_v32, 5  ;;  %v1165_v4 = vrot.slane %v1164_v21, 4  ;;  %v8975_v15 = vor.u32 %v8803_v45, %v1166_v14  ;;  %v676_v36 = vrot.slane %v675_v7, 4  ;;  %v13592_v45 = vld [vmem:[#allocation52_spill] sm:$0xff] }
 0x1b1   : > { %13588 = vst [vmem:[#allocation40_spill] sm:$0xff] %v8972_v39  ;;  %v707_v61 = vshrl.u32 %v435_v60, 16  ;;  %v710_v24 = vshll.u32 %v435_v60, 16  ;;  %v697_v5 = vshll.u32 %v8958_v47, 16  ;;  %v495_v28 = vsel %vm425_vm0, %v493_v62, %v13585_v35 }
 0x1b2   : > { %13589 = vst [vmem:[#allocation56_spill] sm:$0xff] %v8975_v15  ;;  %v8983_v12 = vsel %vm434_vm15, %v433_v46, %v13586_v13  ;;  %v4443_v19 = vunpack.c.h.b16 %v8606_v31  ;;  %v4445_v21 = vunpack.c.h.b16 %v8633_v55  ;;  %v502_v14 = vrot.slane %v13592_v45, 4  ;;  %v13594_v46 = vld [vmem:[#allocation58_spill] sm:$0xff]  ;;  %v9019_v44 = vpop.permute.xlu1 %2061 }
 0x1b3   : > { %13591 = vst [vmem:[#allocation6_spill] sm:$0xff] %v8983_v12  ;;  %v849_v23 = vshll.u32 %v8968_v17, 16  ;;  %v1270_v6 = vsel %vm8566_vm11, %v1266_v2, %v8972_v39  ;;  %v694_v32 = vor.u32 %v693_v1, %v690_v49  ;;  %v1169_v7 = vsel %vm8566_vm11, %v1165_v4, %v8975_v15 }
 0x1b4   : > { %1337 = vrot.lane.b32.xlu0 %v1270_v6, %s7326_s7  ;;  %v681_v31 = vsel %vm7478_vm2, %v676_v36, %v8950_v48  ;;  %v846_v55 = vor.u32 %v845_v27, %v842_v16  ;;  %v8999_v60 = vpack.c.b16 %v4445_v21, %v4443_v19  ;;  %v9001_v35 = vrot.slane %v707_v61, 4  ;;  %v9010_v16 = vpop.permute.xlu0 %2041  ;;  %v13597_v21 = vld [vmem:[#allocation59_spill] sm:$0xff] }
 0x1b5   : > { %v9003_v62 = vrot.slane %v710_v24, 5  ;;  %v859_v13 = vshrl.u32 %v495_v28, 16  ;;  %v501_v49 = vrot.slane %v13594_v46, 4  ;;  %942 = vrot.lane.b32.xlu2 %v681_v31, %s7330_s11  ;;  %v1153_v1 = vrot.slane %v707_v61, 5  ;;  %v13598_v31 = vld [vmem:[#allocation33_spill] sm:$0xff] }
 0x1b6   : > { %13593 = vst [vmem:[#allocation11_spill] sm:$0xff] %v8999_v60  ;;  %1301 = vrot.lane.b32.xlu1 %v1169_v7, %s7326_s7  ;;  %v862_v2 = vshll.u32 %v495_v28, 16  ;;  %v9012_v27 = vrot.slane %v697_v5, 5  ;;  %v9016_v19 = vsel %vm434_vm15, %v502_v14, %v13592_v45  ;;  %v494_v6 = vrot.slane %v13597_v21, 4  ;;  %v9021_v7 = vpop.permute.xlu2 %2093 }
 0x1b7   : > { %13596 = vst [vmem:[#allocation47_spill] sm:$0xff] %v9016_v19  ;;  %v695_v61 = vrot.slane %v694_v32, 4  ;;  %v1154_v28 = vrot.slane %v710_v24, 6  ;;  %v4423_v4 = vshrl.u32 %v13598_v31, 16  ;;  %v9024_v15 = vrot.slane %v849_v23, 5 }
 0x1b8   : > { %13595 = vst [vmem:[#allocation44_spill] sm:$0xff] %v9012_v27  ;;  %v847_v36 = vrot.slane %v846_v55, 4  ;;  %v9026_v48 = vrot.slane %v859_v13, 4  ;;  %v503_v5 = vsel %vm434_vm15, %v501_v49, %v13594_v46  ;;  %v13600_v45 = vshrl.u32 %v13494_v42, 16 }
 0x1b9   : > { %13599 = vst [vmem:[#allocation30_spill] sm:$0xff] %v9024_v15  ;;  %v13601_v17 = vshll.u32 %v13494_v42, 16  ;;  %v9034_v39 = vrot.slane %v862_v2, 5  ;;  %v13602_v24 = vshrl.u32 %v8983_v12, 16  ;;  %v13603_v23 = vshll.u32 %v8983_v12, 16 }
 0x1ba   : > { %v1238_v14 = vrot.slane %v13600_v45, 5  ;;  %v9043_v13 = vsel %vm425_vm0, %v494_v6, %v13597_v21  ;;  %v700_v46 = vsel %vm7478_vm2, %v695_v61, %v9012_v27  ;;  %v13605_v42 = vshrl.u32 %v13481_v9, 16 }
 0x1bb   : > { %v1241_v47 = vrot.slane %v13601_v17, 6  ;;  %v1157_v32 = vrot.slane %v13602_v24, 5  ;;  %v1158_v51 = vrot.slane %v13603_v23, 6  ;;  %13604 = vst [vmem:[#allocation52_spill] sm:$0xff] %v9043_v13  ;;  %v13606_v49 = vshll.u32 %v13481_v9, 16  ;;  %v13609_v9 = vld [vmem:[#allocation8_spill] sm:$0xff] }
 0x1bc   : > { %v1247_v17 = vrot.slane %v13605_v42, 5  ;;  %v13607_v45 = vshrl.u32 %v8860_v40, 16  ;;  %v878_v23 = vshrl.u32 %v503_v5, 16  ;;  %v881_v55 = vshll.u32 %v503_v5, 16  ;;  %946 = vrot.lane.b32.xlu0 %v700_v46, %s7330_s11 }
 0x1bd   : > { %v1250_v2 = vrot.slane %v13606_v49, 6  ;;  %v852_v21 = vsel %vm7478_vm2, %v847_v36, %v9024_v15  ;;  %v13608_v6 = vshll.u32 %v8860_v40, 16  ;;  %v1155_v49 = vor.u32 %v1154_v28, %v1153_v1  ;;  %v9069_v36 = vpop.permute.xlu0 %2077  ;;  %v9075_v15 = vpop.permute.xlu1 %2089 }
 0x1be   : > { %v9054_v24 = vrot.slane %v13607_v45, 4  ;;  %934 = vrot.lane.b32.xlu1 %v13609_v9, %s7330_s11  ;;  %978 = vrot.lane.b32.xlu2 %v852_v21, %s7330_s11  ;;  %v1242_v45 = vor.u32 %v1241_v47, %v1238_v14  ;;  %v13610_v5 = vshrl.u32 %v9016_v19, 16  ;;  %v868_v46 = vshll.u32 %v9043_v13, 16  ;;  %v9073_v42 = vpop.permute.xlu2 %1673 }
 0x1bf   : > { %v731_v61 = vrot.slane %v13608_v6, 5  ;;  %v1254_v60 = vrot.slane %v878_v23, 5  ;;  %v1255_v37 = vrot.slane %v881_v55, 6  ;;  %v13611_v40 = vshrl.u32 %v8867_v11, 16 }
 0x1c0   : > { %v1258_v27 = vrot.slane %v13610_v5, 5  ;;  %v9077_v9 = vor.u32 %v1158_v51, %v1157_v32  ;;  %v9079_v1 = vor.u32 %v1250_v2, %v1247_v17  ;;  %v9081_v47 = vpack.i.b16 0, %v4423_v4  ;;  %v13616_v32 = vld [vmem:[#allocation27_spill] sm:$0xff] }
 0x1c1   : > { %v899_v6 = vrot.slane %v13611_v40, 4  ;;  %v13614_v28 = vshll.u32 %v8867_v11, 16  ;;  %v2103_v21 = vrot.slane %v8888_v22, 4  ;;  %v771_v5 = vrot.slane %v8526_v53, 4  ;;  %v13618_v53 = vld [vmem:[#allocation93_spill] sm:$0xff] }
 0x1c2   : > { %13612 = vst [vmem:[#allocation58_spill] sm:$0xff] %v9077_v9  ;;  %v13158_v13 = vrot.slane %v8419_v56, 5  ;;  %v1156_v40 = vrot.slane %v1155_v49, 4  ;;  %v1243_v52 = vrot.slane %v1242_v45, 4  ;;  %v13615_v51 = vrot.slane %v13590_v41, 4 }
 0x1c3   : > { %13613 = vst [vmem:[#allocation59_spill] sm:$0xff] %v9079_v1  ;;  %v902_v14 = vrot.slane %v13614_v28, 5  ;;  %v13617_v4 = vshll.u32 %v9016_v19, 16  ;;  %v9097_v2 = vrot.slane %v878_v23, 4  ;;  %v2111_v28 = vrot.slane %v9019_v44, 4 }
 0x1c4   : > { %v9093_v17 = vsel %vm2199_vm8, %v13616_v32, %v13615_v51  ;;  %v657_v31 = vrot.slane %v13618_v53, 4  ;;  %v1160_v49 = vsel %vm8566_vm11, %v1156_v40, %v9077_v9  ;;  %v1252_v41 = vsel %vm8566_vm11, %v1243_v52, %v9079_v1 }
 0x1c5   : > { %v1259_v11 = vrot.slane %v13617_v4, 6  ;;  %v1256_v45 = vor.u32 %v1255_v37, %v1254_v60  ;;  %v4501_v51 = vunpack.c.l.b16 %v9081_v47  ;;  %v2135_v32 = vsel %vm244_vm7, %v8888_v22, %v2103_v21  ;;  %1297 = vrot.lane.b32.xlu0 %v1160_v49, %s7326_s7 }
 0x1c6   : > { %v776_v23 = vsel %vm7478_vm2, %v771_v5, %v13158_v13  ;;  %v903_v4 = vor.u32 %v902_v14, %v899_v6  ;;  %v13159_v40 = vpack.i.b16 0, %v9093_v17  ;;  %v9116_v53 = vrot.slane %v868_v46, 5  ;;  %1329 = vrot.lane.b32.xlu2 %v1252_v41, %s7326_s7  ;;  %v2058_v46 = vpop.permute.xlu0 %2057  ;;  %v9134_v49 = vpop.permute.xlu2 %2053 }
 0x1c7   : > { %v9118_v33 = vrot.slane %v881_v55, 5  ;;  %962 = vrot.lane.b32.xlu1 %v776_v23, %s7330_s11  ;;  %v13620_v52 = vrot.slane %v13516_v20, 5  ;;  %v732_v37 = vor.u32 %v731_v61, %v9054_v24  ;;  %v2101_v60 = vrot.slane %v9010_v16, 4  ;;  %v9136_v41 = vpop.permute.xlu1 %1645 }
 0x1c8   : > { %13619 = vst [vmem:[#allocation8_spill] sm:$0xff] %v9116_v53  ;;  %v2143_v6 = vsel %vm244_vm7, %v9019_v44, %v2111_v28  ;;  %v713_v55 = vor.u32 %v9003_v62, %v9001_v35  ;;  %v4502_v14 = vunpack.c.h.b16 %v9081_v47  ;;  %v3165_v21 = vrot.slane %v2135_v32, 4 }
 0x1c9   : > { %v662_v22 = vsel %vm7478_vm2, %v657_v31, %v13620_v52  ;;  %v2097_v5 = vrot.slane %v8960_v18, 4  ;;  %v1257_v31 = vrot.slane %v1256_v45, 4  ;;  %v9138_v24 = vor.u32 %v1259_v11, %v1258_v27 }
 0x1ca   : > { %v904_v61 = vrot.slane %v903_v4, 4  ;;  %v13622_v23 = vshll.u32 %v8875_v50, 16  ;;  %v9144_v28 = vpack.c.b16 %v4501_v51, %v4501_v51  ;;  %v9148_v35 = vunpack.c.l.b16 %v13159_v40 }
 0x1cb   : > { %13621 = vst [vmem:[#allocation27_spill] sm:$0xff] %v9138_v24  ;;  %v3163_v62 = vrot.slane %v2143_v6, 4  ;;  %v3166_v47 = vsel %vm2199_vm8, %v2143_v6, %v3165_v21  ;;  %v733_v52 = vrot.slane %v732_v37, 4  ;;  %v13624_v13 = vshll.u32 %v8983_v12, 16 }
 0x1cc   : > { %v9142_v44 = vrot.slane %v13622_v23, 5  ;;  %v2133_v27 = vsel %vm244_vm7, %v9010_v16, %v2101_v60  ;;  %v2109_v11 = vrot.slane %v2058_v46, 4  ;;  %v13626_v4 = vshll.u32 %v8740_v63, 16 }
 0x1cd   : > { %v9153_v45 = vrot.slane %v13624_v13, 5  ;;  %v9161_v23 = vrot.slane %v713_v55, 4  ;;  %v2129_v40 = vsel %vm244_vm7, %v8960_v18, %v2097_v5  ;;  %v1261_v37 = vsel %vm8566_vm11, %v1257_v31, %v9138_v24 }
 0x1ce   : > { %13623 = vst [vmem:[#allocation93_spill] sm:$0xff] %v9142_v44  ;;  %v9159_v51 = vrot.slane %v13626_v4, 5  ;;  %v752_v13 = vrot.slane %v8570_v57, 4  ;;  %v13160_v6 = vrot.slane %v13553_v3, 5  ;;  %v9171_v16 = vperm.slane %v3166_v47, %v13579_v34  ;;  %1333 = vrot.lane.b32.xlu0 %v1261_v37, %s7326_s7  ;;  %938 = vrot.lane.b32.xlu2 %v662_v22, %s7330_s11  ;;  %v2070_v47 = vpop.permute.xlu0 %2069 }
 0x1cf   : > { %13625 = vst [vmem:[#allocation130_spill] sm:$0xff] %v9153_v45  ;;  %v909_v60 = vsel %vm7478_vm2, %v904_v61, %v9142_v44  ;;  %v790_v55 = vrot.slane %v8628_v25, 4  ;;  %v13164_v18 = vrot.slane %v13476_v59, 5  ;;  %v3164_v26 = vsel %vm2199_vm8, %v3163_v62, %v2135_v32  ;;  %v9191_v62 = vpop.permute.xlu2 %1633  ;;  %v2050_v22 = vpop.permute.xlu1 %2049 }
 0x1d0   : > { %13627 = vst [vmem:[#allocation131_spill] sm:$0xff] %v9159_v51  ;;  %990 = vrot.lane.b32.xlu1 %v909_v60, %s7330_s11  ;;  %v804_v57 = vrot.slane %v13557_v8, 4  ;;  %v807_v21 = vrot.slane %v13558_v54, 5  ;;  %v865_v5 = vor.u32 %v9034_v39, %v9026_v48  ;;  %v3109_v31 = vrot.slane %v2133_v27, 4 }
 0x1d1   : > { %v2141_v61 = vsel %vm244_vm7, %v2058_v46, %v2109_v11  ;;  %v9189_v4 = vpack.c.b16 %v4502_v14, %v4502_v14  ;;  %v3097_v32 = vrot.slane %v2129_v40, 4  ;;  %v757_v8 = vsel %vm7478_vm2, %v752_v13, %v13160_v6 }
 0x1d2   : > { %v738_v48 = vsel %vm7478_vm2, %v733_v52, %v9159_v51  ;;  %v9205_v39 = vperm.slane %v3164_v26, %v13579_v34  ;;  %v2119_v46 = vrot.slane %v9069_v36, 4  ;;  %v2105_v14 = vrot.slane %v2050_v22, 4 }
 0x1d3   : > { %v795_v11 = vsel %vm7478_vm2, %v790_v55, %v13164_v18  ;;  %v3107_v13 = vrot.slane %v2141_v61, 4  ;;  %v808_v52 = vor.u32 %v807_v21, %v804_v57  ;;  %v9213_v60 = vrot.slane %v865_v5, 4 }
 0x1d4   : > { %13628 = vst [vmem:[#allocation132_spill] sm:$0xff] %v9205_v39  ;;  %v2127_v6 = vrot.slane %v9021_v7, 4  ;;  %v2137_v25 = vsel %vm244_vm7, %v2050_v22, %v2105_v14  ;;  %v923_v26 = vrot.slane %v8810_v30, 4  ;;  %v13629_v54 = vshll.u32 %v8775_v0, 16 }
 0x1d5   : > { %v3110_v3 = vsel %vm2199_vm8, %v2141_v61, %v3109_v31  ;;  %v2115_v59 = vrot.slane %v2070_v47, 4  ;;  %v3095_v55 = vrot.slane %v2137_v25, 4  ;;  %v3098_v18 = vsel %vm2199_vm8, %v2137_v25, %v3097_v32 }
 0x1d6   : > { %v9220_v44 = vrot.slane %v13629_v54, 5  ;;  %v2117_v57 = vrot.slane %v8863_v58, 4  ;;  %v2099_v21 = vrot.slane %v8915_v29, 4  ;;  %v2151_v5 = vsel %vm244_vm7, %v9069_v36, %v2119_v46  ;;  %958 = vrot.lane.b32.xlu0 %v757_v8, %s7330_s11  ;;  %966 = vrot.lane.b32.xlu2 %v795_v11, %s7330_s11 }
 0x1d7   : > { %v9229_v22 = vperm.slane %v3098_v18, %v13579_v34  ;;  %v3108_v30 = vsel %vm2199_vm8, %v3107_v13, %v2133_v27  ;;  %v3096_v31 = vsel %vm2199_vm8, %v3095_v55, %v2129_v40  ;;  %v809_v61 = vrot.slane %v808_v52, 4  ;;  %v9245_v27 = vpop.permute.xlu0 %1641  ;;  %v9251_v14 = vpop.permute.xlu2 %1661 }
 0x1d8   : > { %13630 = vst [vmem:[#allocation133_spill] sm:$0xff] %v9220_v44  ;;  %954 = vrot.lane.b32.xlu1 %v738_v48, %s7330_s11  ;;  %v13165_v25 = vrot.slane %v8494_v43, 5  ;;  %v2125_v32 = vrot.slane %v9075_v15, 4  ;;  %v9239_v36 = vperm.slane %v3110_v3, %v13579_v34  ;;  %v9242_v18 = vperm.slane %v3096_v31, %v13579_v34  ;;  %v2086_v11 = vpop.permute.xlu1 %2085 }
 0x1d9   : > { %v3133_v8 = vrot.slane %v9229_v22, 4  ;;  %v2159_v40 = vsel %vm244_vm7, %v9021_v7, %v2127_v6  ;;  %v3277_v48 = vrot.slane %v2151_v5, 4  ;;  %v2107_v54 = vrot.slane %v9134_v49, 4 }
 0x1da   : > { %v2147_v46 = vsel %vm244_vm7, %v2070_v47, %v2115_v59  ;;  %v9254_v3 = vperm.slane %v3108_v30, %v13579_v34  ;;  %v3121_v13 = vrot.slane %v9242_v18, 4  ;;  %v2123_v55 = vrot.slane %v2086_v11, 4 }
 0x1db   : > { %v9259_v52 = vsel %vm2199_vm8, %v9239_v36, %v3133_v8  ;;  %v2131_v7 = vsel %vm244_vm7, %v8915_v29, %v2099_v21  ;;  %v814_v59 = vsel %vm7478_vm2, %v809_v61, %v13165_v25  ;;  %v928_v6 = vsel %vm7478_vm2, %v923_v26, %v9220_v44 }
 0x1dc   : > { %v884_v47 = vor.u32 %v9118_v33, %v9097_v2  ;;  %v2157_v30 = vsel %vm244_vm7, %v9075_v15, %v2125_v32  ;;  %v3265_v31 = vrot.slane %v2147_v46, 4  ;;  %v9276_v8 = vsel %vm2199_vm8, %v9254_v3, %v3121_v13 }
 0x1dd   : > { %13631 = vst [vmem:[#allocation134_spill] sm:$0xff] %v9276_v8  ;;  %v2155_v29 = vsel %vm244_vm7, %v2086_v11, %v2123_v55  ;;  %v2149_v21 = vsel %vm244_vm7, %v8863_v58, %v2117_v57  ;;  %v3275_v61 = vrot.slane %v2159_v40, 4  ;;  %v2139_v26 = vsel %vm244_vm7, %v9134_v49, %v2107_v54 }
 0x1de   : > { %v3263_v25 = vrot.slane %v2155_v29, 4  ;;  %v3153_v37 = vrot.slane %v2131_v7, 4  ;;  %v2113_v33 = vrot.slane %v8970_v38, 4  ;;  %v3278_v15 = vsel %vm2199_vm8, %v2159_v40, %v3277_v48  ;;  %970 = vrot.lane.b32.xlu0 %v814_v59, %s7330_s11  ;;  %994 = vrot.lane.b32.xlu2 %v928_v6, %s7330_s11 }
 0x1df   : > { %v3266_v2 = vsel %vm2199_vm8, %v2155_v29, %v3265_v31  ;;  %v3276_v32 = vsel %vm2199_vm8, %v3275_v61, %v2151_v5  ;;  %v3219_v11 = vrot.slane %v2157_v30, 4  ;;  %v3221_v49 = vrot.slane %v2149_v21, 4  ;;  %v9295_v54 = vpop.permute.xlu0 %1677  ;;  %v9298_v59 = vpop.permute.xlu2 %1689 }
 0x1e0   : > { %v3264_v13 = vsel %vm2199_vm8, %v3263_v25, %v2147_v46  ;;  %v3274_v58 = vperm.slane %v3266_v2, %v13579_v34  ;;  %4535 = vrot.lane.b32.xlu1 %v9144_v28, %s7335_s24  ;;  %v3151_v57 = vrot.slane %v2139_v26, 4  ;;  %v3154_v40 = vsel %vm2199_vm8, %v2139_v26, %v3153_v37  ;;  %v1658_v25 = vpop.permute.xlu1 %1657 }
 0x1e1   : > { %v3270_v48 = vperm.slane %v3264_v13, %v13579_v34  ;;  %v3286_v5 = vperm.slane %v3278_v15, %v13579_v34  ;;  %v885_v46 = vrot.slane %v884_v47, 4  ;;  %v13632_v31 = vshll.u32 %v9016_v19, 16 }
 0x1e2   : > { %v3301_v55 = vrot.slane %v3274_v58, 4  ;;  %v2145_v6 = vsel %vm244_vm7, %v8970_v38, %v2113_v33  ;;  %v3282_v37 = vperm.slane %v3276_v32, %v13579_v34  ;;  %v3222_v29 = vsel %vm2199_vm8, %v2157_v30, %v3221_v49 }
 0x1e3   : > { %v9302_v28 = vrot.slane %v13632_v31, 5  ;;  %v3289_v61 = vrot.slane %v3270_v48, 4  ;;  %v3220_v26 = vsel %vm2199_vm8, %v3219_v11, %v2149_v21  ;;  %v3131_v15 = vrot.slane %v9239_v36, 4 }
 0x1e4   : > { %v9311_v2 = vperm.slane %v3154_v40, %v13579_v34  ;;  %v9314_v47 = vsel %vm2199_vm8, %v3286_v5, %v3301_v55  ;;  %v1717_v13 = vrot.slane %v9073_v42, 4  ;;  %v3152_v31 = vsel %vm2199_vm8, %v3151_v57, %v2131_v7 }
 0x1e5   : > { %13633 = vst [vmem:[#allocation135_spill] sm:$0xff] %v9302_v28  ;;  %v1701_v38 = vrot.slane %v9245_v27, 4  ;;  %v9320_v33 = vsel %vm2199_vm8, %v3282_v37, %v3289_v61  ;;  %v3175_v30 = vrot.slane %v9205_v39, 4  ;;  %v3230_v21 = vperm.slane %v3222_v29, %v13579_v34 }
 0x1e6   : > { %13634 = vst [vmem:[#allocation136_spill] sm:$0xff] %v9320_v33  ;;  %v3132_v36 = vsel %vm2199_vm8, %v3131_v15, %v9229_v22  ;;  %v871_v32 = vsel %vm7478_vm2, %v9213_v60, %v9116_v53  ;;  %v3209_v11 = vrot.slane %v2145_v6, 4  ;;  %v9331_v7 = vperm.slane %v3220_v26, %v13579_v34  ;;  %v13644_v53 = vld [vmem:[#allocation80_spill] sm:$0xff] }
 0x1e7   : > { %v1697_v49 = vrot.slane %v9191_v62, 4  ;;  %v13635_v57 = vsel %vm7478_vm2, %v9161_v23, %v9153_v45  ;;  %v890_v22 = vsel %vm7478_vm2, %v885_v46, %v9302_v28  ;;  %v3119_v40 = vrot.slane %v9254_v3, 4  ;;  %982 = vrot.lane.b32.xlu2 %v871_v32, %s7330_s11  ;;  %v13638_v46 = vld [vmem:[#allocation25_spill] sm:$0xff]  ;;  %v9365_v28 = vpop.permute.xlu2 %1293 }
 0x1e8   : > { %950 = vrot.lane.b32.xlu0 %v13635_v57, %s7330_s11  ;;  %v9345_v60 = vperm.slane %v3152_v31, %v13579_v34  ;;  %v13636_v55 = vrot.slane %v9171_v16, 4  ;;  %v1709_v61 = vrot.slane %v1658_v25, 4  ;;  %v13637_v23 = vpack.c.b16 %v9148_v35, %v9148_v35  ;;  %v2082_v31 = vpop.permute.xlu0 %2081  ;;  %v1670_v35 = vpop.permute.xlu1 %1669 }
 0x1e9   : > { %v3299_v10 = vrot.slane %v3286_v5, 4  ;;  %v9358_v3 = vsel %vm266_vm12, %v9073_v42, %v1717_v13  ;;  %v9361_v26 = vperm.slane %v3132_v36, %v13638_v46  ;;  %v1733_v15 = vsel %vm266_vm12, %v9245_v27, %v1701_v38 }
 0x1ea   : > { %v3188_v29 = vsel %vm2199_vm8, %v13636_v55, %v9311_v2  ;;  %4599 = vrot.lane.b32.xlu1 %v13637_v23, %s7334_s23  ;;  %v3287_v57 = vrot.slane %v3282_v37, 4  ;;  %v3243_v55 = vrot.slane %v3230_v21, 4  ;;  %v2121_v43 = vrot.slane %v2082_v31, 4 }
 0x1eb   : > { %v3120_v5 = vsel %vm2199_vm8, %v3119_v40, %v9242_v18  ;;  %v3231_v32 = vrot.slane %v9331_v7, 4  ;;  %v9371_v42 = vperm.slane %v3188_v29, %v13638_v46  ;;  %v1729_v13 = vsel %vm266_vm12, %v9191_v62, %v1697_v49 }
 0x1ec   : > { %v3300_v27 = vsel %vm2199_vm8, %v3299_v10, %v3274_v58  ;;  %v2885_v38 = vrot.slane %v1733_v15, 4  ;;  %v1741_v37 = vsel %vm266_vm12, %v1658_v25, %v1709_v61  ;;  %v2153_v36 = vsel %vm244_vm7, %v2082_v31, %v2121_v43 }
 0x1ed   : > { %v3176_v23 = vsel %vm2199_vm8, %v3175_v30, %v9345_v60  ;;  %v3207_v44 = vrot.slane %v2153_v36, 4  ;;  %v3210_v18 = vsel %vm2199_vm8, %v2153_v36, %v3209_v11  ;;  %v9382_v40 = vperm.slane %v3120_v5, %v13638_v46 }
 0x1ee   : > { %v3143_v29 = vrot.slane %v9361_v26, 4  ;;  %v2873_v24 = vrot.slane %v1729_v13, 4  ;;  %v9386_v62 = vperm.slane %v3300_v27, %v13638_v46  ;;  %v3218_v58 = vperm.slane %v3210_v18, %v13579_v34 }
 0x1ef   : > { %v3288_v25 = vsel %vm2199_vm8, %v3287_v57, %v3270_v48  ;;  %v2883_v43 = vrot.slane %v1741_v37, 4  ;;  %v2886_v49 = vsel %vm2199_vm8, %v1741_v37, %v2885_v38  ;;  %v3208_v30 = vsel %vm2199_vm8, %v3207_v44, %v2145_v6  ;;  %4537 = vrot.lane.b32.xlu2 %v9189_v4, %s7335_s24  ;;  %v1650_v38 = vpop.permute.xlu2 %1649 }
 0x1f0   : > { %986 = vrot.lane.b32.xlu0 %v890_v22, %s7330_s11  ;;  %v9394_v11 = vperm.slane %v3176_v23, %v13638_v46  ;;  %v3214_v61 = vperm.slane %v3208_v30, %v13579_v34  ;;  %v3244_v10 = vsel %vm2199_vm8, %v3243_v55, %v3218_v58  ;;  %v3245_v31 = vrot.slane %v3218_v58, 4  ;;  %v9404_v44 = vpop.permute.xlu0 %1637  ;;  %v9414_v4 = vpop.permute.xlu1 %1289 }
 0x1f1   : > { %v3199_v48 = vrot.slane %v9371_v42, 4  ;;  %v9402_v57 = vperm.slane %v3244_v10, %v13638_v46  ;;  %v1715_v5 = vrot.slane %v1670_v35, 4  ;;  %v3144_v6 = vsel %vm2199_vm8, %v3143_v29, %v9382_v40 }
 0x1f2   : > { %v9409_v22 = vperm.slane %v3288_v25, %v13638_v46  ;;  %v3233_v27 = vrot.slane %v3214_v61, 4  ;;  %v9412_v55 = vsel %vm2199_vm8, %v3230_v21, %v3245_v31  ;;  %v3232_v37 = vsel %vm2199_vm8, %v3231_v32, %v3214_v61 }
 0x1f3   : > { %v3311_v36 = vrot.slane %v9386_v62, 4  ;;  %v1719_v23 = vrot.slane %v9295_v54, 4  ;;  %v1725_v18 = vrot.slane %v9298_v59, 4  ;;  %v1705_v58 = vrot.slane %v1650_v38, 4 }
 0x1f4   : > { %v3238_v29 = vperm.slane %v3232_v37, %v13638_v46  ;;  %v2884_v25 = vsel %vm2199_vm8, %v2883_v43, %v1733_v15  ;;  %v9424_v21 = vsel %vm2199_vm8, %v9331_v7, %v3233_v27  ;;  %v3200_v30 = vsel %vm2199_vm8, %v3199_v48, %v9394_v11 }
 0x1f5   : > { %13639 = vst [vmem:[#allocation137_spill] sm:$0xff] %v9424_v21  ;;  %v3255_v32 = vrot.slane %v9402_v57, 4  ;;  %v9430_v61 = vperm.slane %v2886_v49, %v13579_v34  ;;  %v1747_v10 = vsel %vm266_vm12, %v1670_v35, %v1715_v5  ;;  %v1737_v31 = vsel %vm266_vm12, %v1650_v38, %v1705_v58 }
 0x1f6   : > { %v9434_v51 = vpack.i.b16 %v3200_v30, %v3144_v6  ;;  %v2871_v37 = vrot.slane %v1737_v31, 4  ;;  %v2874_v15 = vsel %vm2199_vm8, %v1737_v31, %v2873_v24  ;;  %v3312_v43 = vsel %vm2199_vm8, %v3311_v36, %v9409_v22 }
 0x1f7   : > { %v3256_v7 = vsel %vm2199_vm8, %v3255_v32, %v3238_v29  ;;  %v9441_v48 = vperm.slane %v2884_v25, %v13579_v34  ;;  %v9444_v49 = vperm.slane %v2874_v15, %v13579_v34  ;;  %v3145_v35 = vrot.slane %v9382_v40, 4  ;;  %v1686_v56 = vpop.permute.xlu2 %1685 }
 0x1f8   : > { %v9447_v5 = vpack.i.b16 %v3312_v43, %v3256_v7  ;;  %v3041_v27 = vrot.slane %v1747_v10, 4  ;;  %v2872_v38 = vsel %vm2199_vm8, %v2871_v37, %v1729_v13  ;;  %v4363_v58 = vshrl.u32 %v3144_v6, 16  ;;  %v1666_v31 = vpop.permute.xlu0 %1665  ;;  %v9456_v45 = vpop.permute.xlu1 %1325 }
 0x1f9   : > { %v4393_v24 = vshrl.u32 %v3256_v7, 16  ;;  %v9451_v32 = vperm.slane %v2872_v38, %v13579_v34  ;;  %v2909_v36 = vrot.slane %v9444_v49, 4  ;;  %v3201_v25 = vrot.slane %v9394_v11, 4 }
 0x1fa   : > { %v4460_v15 = vunpack.c.l.b16 %v9447_v5  ;;  %v3313_v40 = vrot.slane %v9409_v22, 4  ;;  %v4364_v1 = vshrl.u32 %v3200_v30, 16  ;;  %v4394_v0 = vshrl.u32 %v3312_v43, 16  ;;  %v13642_v30 = vld [vmem:[#allocation73_spill] sm:$0xff] }
 0x1fb   : > { %v4458_v13 = vunpack.c.l.b16 %v9434_v51  ;;  %v2897_v6 = vrot.slane %v9451_v32, 4  ;;  %v9463_v37 = vsel %vm2199_vm8, %v9430_v61, %v2909_v36  ;;  %v1723_v7 = vrot.slane %v1686_v56, 4 }
 0x1fc   : > { %13640 = vst [vmem:[#allocation138_spill] sm:$0xff] %v9463_v37  ;;  %v3257_v38 = vrot.slane %v3238_v29, 4  ;;  %v9465_v11 = vpack.i.b16 %v4364_v1, %v4363_v58  ;;  %v9467_v9 = vpack.i.b16 %v4394_v0, %v4393_v24  ;;  %v9471_v22 = vsel %vm2199_vm8, %v9361_v26, %v3145_v35 }
 0x1fd   : > { %v4472_v50 = vpack.c.b16 %v4460_v15, %v4458_v13  ;;  %13641 = vst [vmem:[#allocation139_spill] sm:$0xff] %v9471_v22  ;;  %v13643_v43 = vrot.slane %v13642_v30, 4  ;;  %v9479_v36 = vsel %vm2199_vm8, %v9441_v48, %v2897_v6  ;;  %v1713_v19 = vrot.slane %v1666_v31, 4 }
 0x1fe   : > { %13645 = vst [vmem:[#allocation73_spill] sm:$0xff] %v9479_v36  ;;  %v1755_v1 = vsel %vm266_vm12, %v1686_v56, %v1723_v7  ;;  %v2997_v0 = vrot.slane %v9358_v3, 4  ;;  %v9486_v26 = vsel %vm2199_vm8, %v9371_v42, %v3201_v25  ;;  %v9492_v35 = vsel %vm2199_vm8, %v9402_v57, %v3257_v38 }
 0x1ff   : > { %v2226_v20 = vsel %vm2199_vm8, %v13644_v53, %v13643_v43  ;;  %v3039_v29 = vrot.slane %v1755_v1, 4  ;;  %v3042_v58 = vsel %vm2199_vm8, %v1755_v1, %v3041_v27  ;;  %5355 = vmatpush.bf16.msra.mxu0 %v4472_v50  ;;  %13646 = vst [vmem:[#allocation80_spill] sm:$0xff] %v9486_v26  ;;  %v1751_v53 = vsel %vm266_vm12, %v9295_v54, %v1719_v23  ;;  %v9518_v6 = vpop.permute.xlu2 %1305 }
 0x200   : > { %13647 = vst [vmem:[#allocation140_spill] sm:$0xff] %v9492_v35  ;;  %v9496_v56 = vsel %vm2199_vm8, %v9386_v62, %v3313_v40  ;;  %v9500_v24 = vpack.i.b16 %v9486_v26, %v9471_v22  ;;  %v1757_v50 = vsel %vm266_vm12, %v9298_v59, %v1725_v18  ;;  %v4497_v54 = vunpack.c.l.b16 %v9465_v11  ;;  %v1694_v15 = vpop.permute.xlu0 %1693  ;;  %v1682_v7 = vpop.permute.xlu1 %1681 }
 0x201   : > { %13648 = vst [vmem:[#allocation141_spill] sm:$0xff] %v9496_v56  ;;  %v9506_v42 = vpack.i.b16 %v9496_v56, %v9492_v35  ;;  %v4499_v57 = vunpack.c.l.b16 %v9467_v9  ;;  %v1703_v23 = vrot.slane %v9136_v41, 4  ;;  %v1745_v62 = vsel %vm266_vm12, %v1666_v31, %v1713_v19 }
 0x202   : > { %13649 = vst [vmem:[#allocation142_spill] sm:$0xff] %v9500_v24  ;;  %v3040_v27 = vsel %vm2199_vm8, %v3039_v29, %v1747_v10  ;;  %v9514_v25 = vperm.slane %v3042_v58, %v13579_v34  ;;  %v4561_v59 = vunpack.c.l.b16 %v9500_v24  ;;  %v1727_v13 = vrot.slane %v1694_v15, 4 }
 0x203   : > { %13650 = vst [vmem:[#allocation143_spill] sm:$0xff] %v9506_v42  ;;  %v4563_v18 = vunpack.c.l.b16 %v9506_v42  ;;  %v4511_v40 = vpack.c.b16 %v4499_v57, %v4497_v54  ;;  %v1711_v38 = vrot.slane %v9251_v14, 4  ;;  %v3053_v30 = vrot.slane %v1751_v53, 4  ;;  %v13658_v42 = vld [vmem:[#allocation67_spill] sm:$0xff] }
 0x204   : > { %v2995_v43 = vrot.slane %v1757_v50, 4  ;;  %v1721_v19 = vrot.slane %v1682_v7, 4  ;;  %v2998_v10 = vsel %vm2199_vm8, %v1757_v50, %v2997_v0  ;;  %v9523_v31 = vperm.slane %v3040_v27, %v13579_v34 }
 0x205   : > { %v4575_v1 = vpack.c.b16 %v4563_v18, %v4561_v59  ;;  %4531 = vrot.lane.b32.xlu0 %v4511_v40, %s7335_s24  ;;  %v1759_v29 = vsel %vm266_vm12, %v1694_v15, %v1727_v13  ;;  %v2985_v58 = vrot.slane %v1745_v62, 4  ;;  %v3077_v63 = vrot.slane %v9514_v25, 4 }
 0x206   : > { %v3051_v54 = vrot.slane %v1759_v29, 4  ;;  %v3054_v57 = vsel %vm2199_vm8, %v1759_v29, %v3053_v30  ;;  %v1753_v12 = vsel %vm266_vm12, %v1682_v7, %v1721_v19  ;;  %v4500_v27 = vunpack.c.h.b16 %v9467_v9 }
 0x207   : > { %4595 = vrot.lane.b32.xlu1 %v4575_v1, %s7334_s23  ;;  %v3062_v0 = vperm.slane %v3054_v57, %v13579_v34  ;;  %v2983_v50 = vrot.slane %v1753_v12, 4  ;;  %v1735_v59 = vsel %vm266_vm12, %v9136_v41, %v1703_v23  ;;  %v3006_v15 = vperm.slane %v2998_v10, %v13579_v34  ;;  %v13652_v1 = vld [vmem:[#allocation86_spill] sm:$0xff] }
 0x208   : > { %v3052_v18 = vsel %vm2199_vm8, %v3051_v54, %v1751_v53  ;;  %v4498_v40 = vunpack.c.h.b16 %v9465_v11  ;;  %v3065_v13 = vrot.slane %v9523_v31, 4  ;;  %v2986_v19 = vsel %vm2199_vm8, %v1753_v12, %v2985_v58  ;;  %v9551_v11 = vpop.permute.xlu0 %1321  ;;  %v9561_v58 = vpop.permute.xlu2 %1317  ;;  %v13654_v54 = vld [vmem:[#allocation88_spill] sm:$0xff] }
 0x209   : > { %v3058_v7 = vperm.slane %v3052_v18, %v13579_v34  ;;  %v9541_v30 = vsel %vm2199_vm8, %v3062_v0, %v3077_v63  ;;  %v9545_v9 = vperm.slane %v2226_v20, %v13638_v46  ;;  %v2996_v23 = vsel %vm2199_vm8, %v2995_v43, %v9358_v3  ;;  %v9559_v20 = vpop.permute.xlu1 %1285 }
 0x20a   : > { %13651 = vst [vmem:[#allocation144_spill] sm:$0xff] %v9541_v30  ;;  %v2984_v53 = vsel %vm2199_vm8, %v2983_v50, %v1745_v62  ;;  %v1743_v10 = vsel %vm266_vm12, %v9251_v14, %v1711_v38  ;;  %v4512_v29 = vpack.c.b16 %v4500_v27, %v4498_v40  ;;  %v2349_v57 = vrot.slane %v13654_v54, 4  ;;  %v13655_v27 = vld [vmem:[#allocation19_spill] sm:$0xff]  ;;  %v13656_v54 = vld [vmem:[#allocation20_spill] sm:$0xff] }
 0x20b   : > { %v9556_v63 = vsel %vm2199_vm8, %v3058_v7, %v3065_v13  ;;  %v2990_v12 = vperm.slane %v2984_v53, %v13579_v34  ;;  %v2941_v3 = vrot.slane %v1735_v59, 4  ;;  %v3075_v43 = vrot.slane %v3062_v0, 4 }
 0x20c   : > { %13653 = vst [vmem:[#allocation86_spill] sm:$0xff] %v9556_v63  ;;  %v2994_v62 = vperm.slane %v2986_v19, %v13579_v34  ;;  %v3002_v50 = vperm.slane %v2996_v23, %v13579_v34  ;;  %v3019_v18 = vrot.slane %v3006_v15, 4  ;;  %v1699_v14 = vrot.slane %v9404_v44, 4 }
 0x20d   : > { %v3009_v38 = vrot.slane %v2990_v12, 4  ;;  %4533 = vrot.lane.b32.xlu0 %v4512_v29, %s7335_s24  ;;  %v2939_v13 = vrot.slane %v1743_v10, 4  ;;  %v2942_v53 = vsel %vm2199_vm8, %v1743_v10, %v2941_v3  ;;  %v2907_v19 = vrot.slane %v9430_v61, 4  ;;  %v13660_v29 = vld [vmem:[#allocation87_spill] sm:$0xff] }
 0x20e   : > { %v3021_v41 = vrot.slane %v2994_v62, 4  ;;  %v3020_v24 = vsel %vm2199_vm8, %v3019_v18, %v2994_v62  ;;  %v13659_v36 = vrot.slane %v13658_v42, 4  ;;  %v3063_v40 = vrot.slane %v3058_v7, 4  ;;  %v13662_v62 = vld [vmem:[#allocation98_spill] sm:$0xff] }
 0x20f   : > { %v9575_v23 = vsel %vm2199_vm8, %v3002_v50, %v3009_v38  ;;  %v3076_v10 = vsel %vm2199_vm8, %v3075_v43, %v9514_v25  ;;  %v2950_v61 = vperm.slane %v2942_v53, %v13579_v34  ;;  %v3007_v0 = vrot.slane %v3002_v50, 4 }
 0x210   : > { %13657 = vst [vmem:[#allocation88_spill] sm:$0xff] %v9575_v23  ;;  %v9582_v63 = vsel %vm2199_vm8, %v13660_v29, %v13659_v36  ;;  %v9587_v3 = vsel %vm2199_vm8, %v3006_v15, %v3021_v41  ;;  %v1731_v38 = vsel %vm266_vm12, %v9404_v44, %v1699_v14  ;;  %v2908_v42 = vsel %vm2199_vm8, %v2907_v19, %v9444_v49  ;;  %v1654_v41 = vpop.permute.xlu0 %1653  ;;  %v9606_v44 = vpop.permute.xlu2 %942 }
 0x211   : > { %13661 = vst [vmem:[#allocation19_spill] sm:$0xff] %v9587_v3  ;;  %v9596_v36 = vsel %vm2199_vm8, %v13662_v62, %v2349_v57  ;;  %v2940_v7 = vsel %vm2199_vm8, %v2939_v13, %v1735_v59  ;;  %v1351_v25 = vrot.slane %v9365_v28, 4  ;;  %v9601_v15 = vperm.slane %v3020_v24, %v13638_v46  ;;  %v9604_v18 = vpop.permute.xlu1 %1313  ;;  %v13663_v13 = vld [vmem:[#allocation33_spill] sm:$0xff] }
 0x212   : > { %v2895_v43 = vrot.slane %v9441_v48, 4  ;;  %v1707_v50 = vrot.slane %v1654_v41, 4  ;;  %v3008_v49 = vsel %vm2199_vm8, %v3007_v0, %v2990_v12  ;;  %v3082_v57 = vperm.slane %v3076_v10, %v13638_v46 }
 0x213   : > { %v2929_v14 = vrot.slane %v1731_v38, 4  ;;  %v9611_v59 = vperm.slane %v2908_v42, %v13638_v46  ;;  %v3064_v24 = vsel %vm2199_vm8, %v3063_v40, %v9523_v31  ;;  %v13664_v53 = vpack.i.b16 0, %v13663_v13 }
 0x214   : > { %v2946_v48 = vperm.slane %v2940_v7, %v13579_v34  ;;  %v2963_v29 = vrot.slane %v2950_v61, 4  ;;  %v1739_v62 = vsel %vm266_vm12, %v1654_v41, %v1707_v50  ;;  %v2896_v12 = vsel %vm2199_vm8, %v2895_v43, %v9451_v32 }
 0x215   : > { %v9617_v19 = vunpack.c.h.b16 %v13664_v53  ;;  %v2927_v0 = vrot.slane %v1739_v62, 4  ;;  %v2930_v10 = vsel %vm2199_vm8, %v1739_v62, %v2929_v14  ;;  %v3014_v42 = vperm.slane %v3008_v49, %v13638_v46 }
 0x216   : > { %v3031_v23 = vrot.slane %v9601_v15, 4  ;;  %v9628_v31 = vsel %vm288_vm6, %v9365_v28, %v1351_v25  ;;  %v2938_v40 = vperm.slane %v2930_v10, %v13579_v34  ;;  %v3070_v7 = vperm.slane %v3064_v24, %v13638_v46 }
 0x217   : > { %v3087_v13 = vrot.slane %v3082_v57, 4  ;;  %v1349_v41 = vrot.slane %v9414_v4, 4  ;;  %v2928_v32 = vsel %vm2199_vm8, %v2927_v0, %v1731_v38  ;;  %v2902_v43 = vperm.slane %v2896_v12, %v13638_v46 }
 0x218   : > { %v2919_v50 = vrot.slane %v9611_v59, 4  ;;  %v2951_v49 = vrot.slane %v2946_v48, 4  ;;  %v2934_v14 = vperm.slane %v2928_v32, %v13579_v34  ;;  %v2964_v53 = vsel %vm2199_vm8, %v2963_v29, %v2938_v40  ;;  %v9641_v10 = vpop.permute.xlu0 %1281  ;;  %v9649_v32 = vpop.permute.xlu2 %978 }
 0x219   : > { %v2965_v28 = vrot.slane %v2938_v40, 4  ;;  %v1357_v62 = vrot.slane %v9518_v6, 4  ;;  %v2970_v24 = vperm.slane %v2964_v53, %v13638_v46  ;;  %v3032_v38 = vsel %vm2199_vm8, %v3031_v23, %v3014_v42  ;;  %v9647_v3 = vpop.permute.xlu1 %1341 }
 0x21a   : > { %v2953_v0 = vrot.slane %v2934_v14, 4  ;;  %v2952_v29 = vsel %vm2199_vm8, %v2951_v49, %v2934_v14  ;;  %v3088_v40 = vsel %vm2199_vm8, %v3087_v13, %v3070_v7  ;;  %v1381_v25 = vsel %vm288_vm6, %v9414_v4, %v1349_v41 }
 0x21b   : > { %v9645_v12 = vsel %vm2199_vm8, %v2950_v61, %v2965_v28  ;;  %v1367_v53 = vrot.slane %v9456_v45, 4  ;;  %v2920_v30 = vsel %vm2199_vm8, %v2919_v50, %v2902_v43  ;;  %v2958_v23 = vperm.slane %v2952_v29, %v13638_v46 }
 0x21c   : > { %13665 = vst [vmem:[#allocation20_spill] sm:$0xff] %v9645_v12  ;;  %v9659_v61 = vsel %vm2199_vm8, %v2946_v48, %v2953_v0  ;;  %v2975_v28 = vrot.slane %v2970_v24, 4  ;;  %v3033_v12 = vrot.slane %v3014_v42, 4  ;;  %v3089_v37 = vrot.slane %v3070_v7, 4 }
 0x21d   : > { %13666 = vst [vmem:[#allocation67_spill] sm:$0xff] %v9659_v61  ;;  %v1389_v49 = vsel %vm288_vm6, %v9518_v6, %v1357_v62  ;;  %v9663_v14 = vpack.i.b16 %v3088_v40, %v3032_v38  ;;  %v4333_v13 = vshrl.u32 %v3032_v38, 16  ;;  %v4334_v33 = vshrl.u32 %v3088_v40, 16 }
 0x21e   : > { %v2661_v4 = vrot.slane %v1381_v25, 4  ;;  %v1361_v41 = vrot.slane %v9604_v18, 4  ;;  %v2921_v8 = vrot.slane %v2902_v43, 4  ;;  %v2976_v50 = vsel %vm2199_vm8, %v2975_v28, %v2958_v23 }
 0x21f   : > { %v2977_v29 = vrot.slane %v2958_v23, 4  ;;  %v9667_v26 = vpack.i.b16 %v2976_v50, %v2920_v30  ;;  %v4303_v48 = vshrl.u32 %v2920_v30, 16  ;;  %v4304_v0 = vshrl.u32 %v2976_v50, 16 }
 0x220   : > { %v9671_v42 = vsel %vm288_vm6, %v9456_v45, %v1367_v53  ;;  %v2659_v6 = vrot.slane %v1389_v49, 4  ;;  %v9675_v7 = vsel %vm2199_vm8, %v9601_v15, %v3033_v12  ;;  %v9678_v62 = vsel %vm2199_vm8, %v3082_v57, %v3089_v37  ;;  %v1310_v43 = vpop.permute.xlu0 %1309  ;;  %v1330_v15 = vpop.permute.xlu2 %1329 }
 0x221   : > { %13667 = vst [vmem:[#allocation87_spill] sm:$0xff] %v9675_v7  ;;  %v4305_v38 = vpack.i.b16 %v4304_v0, %v4303_v48  ;;  %v4335_v40 = vpack.i.b16 %v4334_v33, %v4333_v13  ;;  %v4454_v23 = vunpack.c.l.b16 %v9667_v26  ;;  %v4456_v30 = vunpack.c.l.b16 %v9663_v14  ;;  %v9686_v50 = vpop.permute.xlu1 %974 }
 0x222   : > { %13668 = vst [vmem:[#allocation98_spill] sm:$0xff] %v9678_v62  ;;  %v2662_v28 = vsel %vm2199_vm8, %v1389_v49, %v2661_v4  ;;  %v1365_v45 = vrot.slane %v9551_v11, 4  ;;  %v1393_v53 = vsel %vm288_vm6, %v9604_v18, %v1361_v41  ;;  %v9689_v37 = vsel %vm2199_vm8, %v2970_v24, %v2977_v29 }
 0x223   : > { %13669 = vst [vmem:[#allocation33_spill] sm:$0xff] %v9689_v37  ;;  %v1369_v57 = vrot.slane %v1330_v15, 4  ;;  %v4470_v12 = vpack.c.b16 %v4456_v30, %v4454_v23  ;;  %v9693_v33 = vsel %vm2199_vm8, %v9611_v59, %v2921_v8  ;;  %v9697_v49 = vpack.i.b16 %v9678_v62, %v9675_v7 }
 0x224   : > { %13670 = vst [vmem:[#allocation145_spill] sm:$0xff] %v9693_v33  ;;  %v1347_v13 = vrot.slane %v9559_v20, 4  ;;  %v1359_v4 = vrot.slane %v1310_v43, 4  ;;  %v9702_v18 = vpack.i.b16 %v9689_v37, %v9693_v33  ;;  %v4493_v41 = vunpack.c.l.b16 %v4305_v38 }
 0x225   : > { %13671 = vst [vmem:[#allocation146_spill] sm:$0xff] %v9697_v49  ;;  %v2761_v24 = vrot.slane %v1393_v53, 4  ;;  %v1375_v29 = vrot.slane %v9647_v3, 4  ;;  %v1401_v48 = vsel %vm288_vm6, %v1330_v15, %v1369_v57  ;;  %5356 = vmatpush.bf16.msra.mxu0 %v4470_v12  ;;  %v4495_v8 = vunpack.c.l.b16 %v4335_v40 }
 0x226   : > { %13672 = vst [vmem:[#allocation147_spill] sm:$0xff] %v9702_v18  ;;  %v2829_v59 = vrot.slane %v9671_v42, 4  ;;  %v9708_v0 = vperm.slane %v2662_v28, %v13579_v34  ;;  %v1397_v23 = vsel %vm288_vm6, %v9551_v11, %v1365_v45  ;;  %v2759_v30 = vrot.slane %v1401_v48, 4 }
 0x227   : > { %v2762_v61 = vsel %vm2199_vm8, %v1401_v48, %v2761_v24  ;;  %v4557_v62 = vunpack.c.l.b16 %v9702_v18  ;;  %v4559_v7 = vunpack.c.l.b16 %v9697_v49  ;;  %v4509_v33 = vpack.c.b16 %v4495_v8, %v4493_v41 }
 0x228   : > { %v1379_v15 = vsel %vm288_vm6, %v9559_v20, %v1347_v13  ;;  %v1391_v57 = vsel %vm288_vm6, %v1310_v43, %v1359_v4  ;;  %v4494_v12 = vunpack.c.h.b16 %v4305_v38  ;;  %v4496_v37 = vunpack.c.h.b16 %v4335_v40  ;;  %v1338_v48 = vpop.permute.xlu0 %1337  ;;  %v9727_v40 = vpop.permute.xlu2 %938 }
 0x229   : > { %v2660_v28 = vsel %vm2199_vm8, %v2659_v6, %v1381_v25  ;;  %v1407_v11 = vsel %vm288_vm6, %v9647_v3, %v1375_v29  ;;  %v2760_v45 = vsel %vm2199_vm8, %v2759_v30, %v1393_v53  ;;  %v4573_v24 = vpack.c.b16 %v4559_v7, %v4557_v62  ;;  %4527 = vrot.lane.b32.xlu2 %v4509_v33, %s7335_s24  ;;  %v1302_v38 = vpop.permute.xlu1 %1301 }
 0x22a   : > { %v1363_v41 = vrot.slane %v9561_v58, 4  ;;  %v9725_v8 = vperm.slane %v2762_v61, %v13579_v34  ;;  %v4510_v20 = vpack.c.b16 %v4496_v37, %v4494_v12  ;;  %v1373_v43 = vrot.slane %v1338_v48, 4 }
 0x22b   : > { %v2773_v25 = vrot.slane %v1397_v23, 4  ;;  %v2705_v6 = vrot.slane %v1379_v15, 4  ;;  %v2715_v13 = vrot.slane %v1391_v57, 4  ;;  %4591 = vrot.lane.b32.xlu1 %v4573_v24, %s7334_s23  ;;  %v1355_v3 = vrot.slane %v1302_v38, 4 }
 0x22c   : > { %v1002_v7 = vrot.slane %v9606_v44, 4  ;;  %v2827_v62 = vrot.slane %v1407_v11, 4  ;;  %v9732_v53 = vperm.slane %v2760_v45, %v13579_v34  ;;  %4529 = vrot.lane.b32.xlu0 %v4510_v20, %s7335_s24  ;;  %v1405_v61 = vsel %vm288_vm6, %v1338_v48, %v1373_v43 }
 0x22d   : > { %v13673_v37 = vrot.slane %v9628_v31, 4  ;;  %v2771_v4 = vrot.slane %v1405_v61, 4  ;;  %v2774_v29 = vsel %vm2199_vm8, %v1405_v61, %v2773_v25  ;;  %v1387_v30 = vsel %vm288_vm6, %v1302_v38, %v1355_v3 }
 0x22e   : > { %v2797_v12 = vrot.slane %v9725_v8, 4  ;;  %v2782_v24 = vperm.slane %v2774_v29, %v13579_v34  ;;  %v2703_v49 = vrot.slane %v1387_v30, 4  ;;  %v2706_v45 = vsel %vm2199_vm8, %v1387_v30, %v2705_v6 }
 0x22f   : > { %v2718_v33 = vsel %vm2199_vm8, %v1391_v57, %v13673_v37  ;;  %v1345_v20 = vrot.slane %v9641_v10, 4  ;;  %v2716_v48 = vsel %vm2199_vm8, %v2715_v13, %v9628_v31  ;;  %v2772_v43 = vsel %vm2199_vm8, %v2771_v4, %v1397_v23 }
 0x230   : > { %v2714_v57 = vperm.slane %v2706_v45, %v13579_v34  ;;  %v2785_v25 = vrot.slane %v9732_v53, 4  ;;  %v2778_v38 = vperm.slane %v2772_v43, %v13579_v34  ;;  %v9752_v3 = vsel %vm2199_vm8, %v2782_v24, %v2797_v12  ;;  %v947_v23 = vpop.permute.xlu0 %946 }
 0x231   : > { %13674 = vst [vmem:[#allocation148_spill] sm:$0xff] %v9752_v3  ;;  %v2704_v61 = vsel %vm2199_vm8, %v2703_v49, %v1379_v15  ;;  %v9756_v6 = vperm.slane %v2660_v28, %v13579_v34  ;;  %v2726_v37 = vperm.slane %v2718_v33, %v13579_v34  ;;  %v2828_v4 = vsel %vm2199_vm8, %v2827_v62, %v9671_v42  ;;  %v935_v49 = vpop.permute.xlu1 %934  ;;  %v967_v15 = vpop.permute.xlu2 %966 }
 0x232   : > { %v2710_v31 = vperm.slane %v2704_v61, %v13579_v34  ;;  %v2741_v13 = vrot.slane %v2714_v57, 4  ;;  %v2830_v29 = vsel %vm2199_vm8, %v1407_v11, %v2829_v59  ;;  %v1020_v30 = vrot.slane %v9649_v32, 4 }
 0x233   : > { %v9765_v12 = vsel %vm2199_vm8, %v2778_v38, %v2785_v25  ;;  %v9769_v28 = vsel %vm288_vm6, %v9561_v58, %v1363_v41  ;;  %v2722_v33 = vperm.slane %v2716_v48, %v13579_v34  ;;  %v9778_v59 = vsel %vm310_vm13, %v9606_v44, %v1002_v7 }
 0x234   : > { %13675 = vst [vmem:[#allocation149_spill] sm:$0xff] %v9765_v12  ;;  %v2729_v45 = vrot.slane %v2710_v31, 4  ;;  %v9773_v43 = vsel %vm2199_vm8, %v2726_v37, %v2741_v13  ;;  %v1377_v11 = vsel %vm288_vm6, %v9641_v10, %v1345_v20  ;;  %v9785_v58 = vperm.slane %v2828_v4, %v13579_v34 }
 0x235   : > { %13676 = vst [vmem:[#allocation150_spill] sm:$0xff] %v9773_v43  ;;  %v9788_v41 = vperm.slane %v2830_v29, %v13579_v34  ;;  %v2739_v48 = vrot.slane %v2726_v37, 4  ;;  %v9797_v10 = vsel %vm310_vm13, %v9649_v32, %v1020_v30  ;;  %v2795_v7 = vrot.slane %v2782_v24, 4 }
 0x236   : > { %v9791_v25 = vsel %vm2199_vm8, %v2722_v33, %v2729_v45  ;;  %v1018_v13 = vrot.slane %v9686_v50, 4  ;;  %v1000_v37 = vrot.slane %v9727_v40, 4  ;;  %v2649_v29 = vrot.slane %v1377_v11, 4 }
 0x237   : > { %13677 = vst [vmem:[#allocation151_spill] sm:$0xff] %v9791_v25  ;;  %v2740_v4 = vsel %vm2199_vm8, %v2739_v48, %v2714_v57  ;;  %v2783_v45 = vrot.slane %v2778_v38, 4  ;;  %v1004_v62 = vrot.slane %v947_v23, 4  ;;  %v998_v42 = vrot.slane %v935_v49, 4 }
 0x238   : > { %v2605_v32 = vrot.slane %v9797_v10, 4  ;;  %v2727_v30 = vrot.slane %v2722_v33, 4  ;;  %v1298_v24 = vpop.permute.xlu0 %1297  ;;  %v2796_v20 = vsel %vm2199_vm8, %v2795_v7, %v9725_v8  ;;  %v9809_v18 = vperm.slane %v2740_v4, %v13638_v46 }
 0x239   : > { %v1014_v57 = vrot.slane %v967_v15, 4  ;;  %v1353_v48 = vrot.slane %v1298_v24, 4  ;;  %v963_v25 = vpop.permute.xlu1 %962  ;;  %v995_v38 = vpop.permute.xlu2 %994  ;;  %v1050_v12 = vsel %vm310_vm13, %v9686_v50, %v1018_v13  ;;  %v9815_v61 = vsel %vm310_vm13, %v9727_v40, %v1000_v37 }
 0x23a   : > { %v1012_v44 = vrot.slane %v963_v25, 4  ;;  %v2728_v33 = vsel %vm2199_vm8, %v2727_v30, %v2710_v31  ;;  %v1036_v43 = vsel %vm310_vm13, %v947_v23, %v1004_v62  ;;  %v9820_v8 = vsel %vm310_vm13, %v935_v49, %v998_v42 }
 0x23b   : > { %v1385_v7 = vsel %vm288_vm6, %v1298_v24, %v1353_v48  ;;  %v2784_v4 = vsel %vm2199_vm8, %v2783_v45, %v9732_v53  ;;  %v1028_v13 = vrot.slane %v995_v38, 4  ;;  %v9827_v40 = vperm.slane %v2796_v20, %v13638_v46 }
 0x23c   : > { %v2647_v3 = vrot.slane %v1385_v7, 4  ;;  %v2650_v50 = vsel %vm2199_vm8, %v1385_v7, %v2649_v29  ;;  %v1046_v37 = vsel %vm310_vm13, %v967_v15, %v1014_v57  ;;  %v9832_v23 = vperm.slane %v2728_v33, %v13638_v46 }
 0x23d   : > { %v2658_v31 = vperm.slane %v2650_v50, %v13579_v34  ;;  %v2751_v49 = vrot.slane %v9809_v18, 4  ;;  %v2549_v42 = vrot.slane %v1050_v12, 4  ;;  %v1044_v29 = vsel %vm310_vm13, %v963_v25, %v1012_v44 }
 0x23e   : > { %v2648_v53 = vsel %vm2199_vm8, %v2647_v3, %v1377_v11  ;;  %v2493_v45 = vrot.slane %v1036_v43, 4  ;;  %v9840_v15 = vperm.slane %v2784_v4, %v13638_v46  ;;  %v2537_v57 = vrot.slane %v1046_v37, 4 }
 0x23f   : > { %v2654_v20 = vperm.slane %v2648_v53, %v13579_v34  ;;  %v2685_v30 = vrot.slane %v2658_v31, 4  ;;  %v1060_v48 = vsel %vm310_vm13, %v995_v38, %v1028_v13  ;;  %v2807_v7 = vrot.slane %v9827_v40, 4 }
 0x240   : > { %v1334_v33 = vpop.permute.xlu0 %1333  ;;  %v2494_v11 = vsel %vm2199_vm8, %v1044_v29, %v2493_v45  ;;  %v9852_v4 = vsel %vm2199_vm8, %v2751_v49, %v9832_v23  ;;  %v2491_v53 = vrot.slane %v1044_v29, 4  ;;  %v2603_v21 = vrot.slane %v1060_v48, 4 }
 0x241   : > { %v2673_v50 = vrot.slane %v2654_v20, 4  ;;  %v9847_v3 = vsel %vm2199_vm8, %v9708_v0, %v2685_v30  ;;  %v983_v44 = vpop.permute.xlu2 %982  ;;  %v1371_v24 = vrot.slane %v1334_v33, 4  ;;  %v13680_v45 = vrot.slane %v9708_v0, 4 }
 0x242   : > { %13678 = vst [vmem:[#allocation152_spill] sm:$0xff] %v9847_v3  ;;  %v991_v25 = vpop.permute.xlu1 %990  ;;  %v1022_v30 = vrot.slane %v983_v44, 4  ;;  %v9864_v49 = vperm.slane %v2494_v11, %v13579_v34  ;;  %v13681_v39 = vrot.slane %v9769_v28, 4  ;;  %v2492_v3 = vsel %vm2199_vm8, %v2491_v53, %v1036_v43 }
 0x243   : > { %v1026_v62 = vrot.slane %v991_v25, 4  ;;  %v9857_v13 = vsel %vm2199_vm8, %v9756_v6, %v2673_v50  ;;  %v2684_v56 = vsel %vm2199_vm8, %v13680_v45, %v2658_v31  ;;  %v1403_v29 = vsel %vm288_vm6, %v1334_v33, %v1371_v24 }
 0x244   : > { %13679 = vst [vmem:[#allocation153_spill] sm:$0xff] %v9857_v13  ;;  %v2815_v38 = vrot.slane %v1403_v29, 4  ;;  %v2818_v50 = vsel %vm2199_vm8, %v1403_v29, %v13681_v39  ;;  %v2606_v0 = vsel %vm2199_vm8, %v1060_v48, %v2605_v32  ;;  %v1054_v11 = vsel %vm310_vm13, %v983_v44, %v1022_v30 }
 0x245   : > { %v1058_v22 = vsel %vm310_vm13, %v991_v25, %v1026_v62  ;;  %v2826_v31 = vperm.slane %v2818_v50, %v13579_v34  ;;  %v9877_v24 = vperm.slane %v2684_v56, %v13638_v46  ;;  %v2535_v33 = vrot.slane %v1054_v11, 4 }
 0x246   : > { %v2547_v13 = vrot.slane %v1058_v22, 4  ;;  %v2550_v35 = vsel %vm2199_vm8, %v1058_v22, %v2549_v42  ;;  %v2816_v62 = vsel %vm2199_vm8, %v2815_v38, %v9769_v28  ;;  %v2538_v39 = vsel %vm2199_vm8, %v1054_v11, %v2537_v57 }
 0x247   : > { %v2822_v25 = vperm.slane %v2816_v62, %v13579_v34  ;;  %v2853_v22 = vrot.slane %v2826_v31, 4  ;;  %v2558_v32 = vperm.slane %v2550_v35, %v13579_v34  ;;  %v9886_v48 = vperm.slane %v2492_v3, %v13579_v34 }
 0x248   : > { %v2548_v43 = vsel %vm2199_vm8, %v2547_v13, %v1050_v12  ;;  %v959_v42 = vpop.permute.xlu0 %958  ;;  %v2604_v56 = vsel %vm2199_vm8, %v2603_v21, %v9797_v10  ;;  %v2536_v44 = vsel %vm2199_vm8, %v2535_v33, %v1046_v37  ;;  %v2546_v28 = vperm.slane %v2538_v39, %v13579_v34 }
 0x249   : > { %v2841_v57 = vrot.slane %v2822_v25, 4  ;;  %v9894_v38 = vsel %vm2199_vm8, %v9788_v41, %v2853_v22  ;;  %v9897_v12 = vperm.slane %v2536_v44, %v13579_v34  ;;  %v13683_v35 = vrot.slane %v9756_v6, 4 }
 0x24a   : > { %v955_v53 = vpop.permute.xlu1 %954  ;;  %13682 = vst [vmem:[#allocation154_spill] sm:$0xff] %v9894_v38  ;;  %v13684_v13 = vrot.slane %v9788_v41, 4  ;;  %v9906_v10 = vperm.slane %v2548_v43, %v13579_v34  ;;  %v2573_v37 = vrot.slane %v2546_v28, 4  ;;  %v1010_v30 = vrot.slane %v959_v42, 4 }
 0x24b   : > { %v2672_v3 = vsel %vm2199_vm8, %v13683_v35, %v2654_v20  ;;  %v9910_v45 = vsel %vm2199_vm8, %v9785_v58, %v2841_v57  ;;  %v2571_v29 = vrot.slane %v2558_v32, 4  ;;  %v2561_v50 = vrot.slane %v9897_v12, 4 }
 0x24c   : > { %v2852_v21 = vsel %vm2199_vm8, %v13684_v13, %v2826_v31  ;;  %13685 = vst [vmem:[#allocation155_spill] sm:$0xff] %v9910_v45  ;;  %v1008_v11 = vrot.slane %v955_v53, 4  ;;  %v9914_v6 = vsel %vm2199_vm8, %v2558_v32, %v2573_v37  ;;  %v1042_v41 = vsel %vm310_vm13, %v959_v42, %v1010_v30 }
 0x24d   : > { %13686 = vst [vmem:[#allocation156_spill] sm:$0xff] %v9914_v6  ;;  %v2678_v20 = vperm.slane %v2672_v3, %v13638_v46  ;;  %v2695_v31 = vrot.slane %v9877_v24, 4  ;;  %v2858_v62 = vperm.slane %v2852_v21, %v13638_v46  ;;  %v9922_v33 = vsel %vm2199_vm8, %v9906_v10, %v2561_v50 }
 0x24e   : > { %13687 = vst [vmem:[#allocation157_spill] sm:$0xff] %v9922_v33  ;;  %v2435_v39 = vrot.slane %v1042_v41, 4  ;;  %v2808_v22 = vsel %vm2199_vm8, %v2807_v7, %v9840_v15  ;;  %v2515_v43 = vrot.slane %v9864_v49, 4  ;;  %v9928_v32 = vperm.slane %v2604_v56, %v13579_v34 }
 0x24f   : > { %v9931_v42 = vperm.slane %v2606_v0, %v13579_v34  ;;  %v1040_v44 = vsel %vm310_vm13, %v955_v53, %v1008_v11  ;;  %v2572_v57 = vsel %vm2199_vm8, %v2571_v29, %v2546_v28  ;;  %v13688_v35 = vrot.slane %v9778_v59, 4 }
 0x250   : > { %v2479_v13 = vrot.slane %v1040_v44, 4  ;;  %v13689_v21 = vrot.slane %v9815_v61, 4  ;;  %v971_v37 = vpop.permute.xlu0 %970  ;;  %v2696_v53 = vsel %vm2199_vm8, %v2695_v31, %v2678_v20  ;;  %v2436_v28 = vsel %vm2199_vm8, %v2435_v39, %v9778_v59 }
 0x251   : > { %v2438_v3 = vsel %vm2199_vm8, %v1042_v41, %v13688_v35  ;;  %v13690_v11 = vrot.slane %v9785_v58, 4  ;;  %v9953_v35 = vperm.slane %v2572_v57, %v13638_v46  ;;  %v2697_v30 = vrot.slane %v2678_v20, 4 }
 0x252   : > { %v2482_v7 = vsel %vm2199_vm8, %v1040_v44, %v13689_v21  ;;  %v4536_v50 = vpop.permute.xlu1 %4535  ;;  %v2480_v29 = vsel %vm2199_vm8, %v2479_v13, %v9815_v61  ;;  %v2863_v44 = vrot.slane %v2858_v62, 4  ;;  %v9956_v21 = vperm.slane %v2438_v3, %v13579_v34 }
 0x253   : > { %v2490_v0 = vperm.slane %v2482_v7, %v13579_v34  ;;  %v2840_v41 = vsel %vm2199_vm8, %v13690_v11, %v2822_v25  ;;  %v2486_v7 = vperm.slane %v2480_v29, %v13579_v34  ;;  %v9961_v39 = vpack.i.b16 %v9852_v4, %v2696_v53 }
 0x254   : > { %v2846_v59 = vperm.slane %v2840_v41, %v13638_v46  ;;  %v4243_v61 = vshrl.u32 %v2696_v53, 16  ;;  %v9964_v58 = vperm.slane %v2436_v28, %v13579_v34  ;;  %v4244_v3 = vshrl.u32 %v9852_v4, 16 }
 0x255   : > { %v2517_v31 = vrot.slane %v2490_v0, 4  ;;  %v2505_v25 = vrot.slane %v2486_v7, 4  ;;  %v1016_v13 = vrot.slane %v971_v37, 4  ;;  %v4273_v11 = vshrl.u32 %v2808_v22, 16 }
 0x256   : > { %v2864_v29 = vsel %vm2199_vm8, %v2863_v44, %v2846_v59  ;;  %v2865_v20 = vrot.slane %v2846_v59, 4  ;;  %v4245_v53 = vpack.i.b16 %v4244_v3, %v4243_v61  ;;  %v2516_v33 = vsel %vm2199_vm8, %v2515_v43, %v2490_v0 }
 0x257   : > { %v9968_v57 = vsel %vm2199_vm8, %v9864_v49, %v2517_v31  ;;  %v9974_v41 = vsel %vm2199_vm8, %v9886_v48, %v2505_v25  ;;  %v9976_v56 = vpack.i.b16 %v2864_v29, %v2808_v22  ;;  %v4274_v28 = vshrl.u32 %v2864_v29, 16 }
 0x258   : > { %13691 = vst [vmem:[#allocation158_spill] sm:$0xff] %v9968_v57  ;;  %v4450_v49 = vunpack.c.l.b16 %v9961_v39  ;;  %v9982_v4 = vsel %vm2199_vm8, %v9877_v24, %v2697_v30  ;;  %v13694_v44 = vrot.slane %v9832_v23, 4  ;;  %v13696_v61 = vrot.slane %v9840_v15, 4 }
 0x259   : > { %13692 = vst [vmem:[#allocation159_spill] sm:$0xff] %v9974_v41  ;;  %v4275_v25 = vpack.i.b16 %v4274_v28, %v4273_v11  ;;  %v4452_v22 = vunpack.c.l.b16 %v9976_v56  ;;  %v9998_v0 = vsel %vm2199_vm8, %v2858_v62, %v2865_v20  ;;  %v4489_v24 = vunpack.c.l.b16 %v4245_v53  ;;  %v4538_v20 = vpop.permute.xlu2 %4537 }
 0x25a   : > { %13693 = vst [vmem:[#allocation160_spill] sm:$0xff] %v9982_v4  ;;  %v9988_v31 = vsel %vm2199_vm8, %v9809_v18, %v13694_v44  ;;  %v951_v59 = vpop.permute.xlu0 %950  ;;  %v9995_v43 = vsel %vm2199_vm8, %v9827_v40, %v13696_v61  ;;  %v4490_v30 = vunpack.c.h.b16 %v4245_v53  ;;  %v13700_v40 = vpack.c.b16 %v9617_v19, %v9617_v19  ;;  %v13702_v61 = vld [vmem:[#allocation35_spill] sm:$0xff] }
 0x25b   : > { %13695 = vst [vmem:[#allocation161_spill] sm:$0xff] %v9988_v31  ;;  %v10002_v23 = vpack.i.b16 %v9988_v31, %v9982_v4  ;;  %v10006_v18 = vpack.i.b16 %v9998_v0, %v9995_v43  ;;  %v4468_v3 = vpack.c.b16 %v4452_v22, %v4450_v49  ;;  %v4491_v29 = vunpack.c.l.b16 %v4275_v25 }
 0x25c   : > { %13697 = vst [vmem:[#allocation162_spill] sm:$0xff] %v9995_v43  ;;  %v4492_v15 = vunpack.c.h.b16 %v4275_v25  ;;  %v5091_v11 = vsel %vm461_vm5, %v13700_v40, %v4536_v50  ;;  %v10012_v62 = vpop.permute.xlu1 %4599  ;;  %v1006_v57 = vrot.slane %v951_v59, 4  ;;  %v10018_v53 = vperm.slane %v2516_v33, %v13638_v46 }
 0x25d   : > { %13698 = vst [vmem:[#allocation163_spill] sm:$0xff] %v10002_v23  ;;  %v4553_v28 = vunpack.c.l.b16 %v10002_v23  ;;  %v4555_v44 = vunpack.c.l.b16 %v10006_v18  ;;  %v5331_v41 = vand.u32 %v13702_v61, %v5091_v11  ;;  %5357 = vmatpush.bf16.msra.mxu0 %v4468_v3  ;;  %v4507_v49 = vpack.c.b16 %v4491_v29, %v4489_v24 }
 0x25e   : > { %13699 = vst [vmem:[#allocation164_spill] sm:$0xff] %v10006_v18  ;;  %v4508_v25 = vpack.c.b16 %v4492_v15, %v4490_v30  ;;  %v4544_v19 = vsel %vm461_vm5, %v4536_v50, %v4538_v20  ;;  %v1048_v22 = vsel %vm310_vm13, %v971_v37, %v1016_v13  ;;  %v1038_v6 = vsel %vm310_vm13, %v951_v59, %v1006_v57 }
 0x25f   : > { %13701 = vst [vmem:[#allocation165_spill] sm:$0xff] %v10012_v62  ;;  %v4571_v40 = vpack.c.b16 %v4555_v44, %v4553_v28  ;;  %5383 = vmatpush.bf16.msra.mxu1 %v5331_v41  ;;  %v5115_v23 = vsel %vm443_vm14, %v4544_v19, %v10012_v62  ;;  %4523 = vrot.lane.b32.xlu2 %v4507_v49, %s7335_s24  ;;  %v2423_v33 = vrot.slane %v1038_v6, 4  ;;  %v13703_v3 = vrot.slane %v9820_v8, 4 }
 0x260   : > { %4525 = vrot.lane.b32.xlu0 %v4508_v25, %s7335_s24  ;;  %v5333_v50 = vand.u32 %v13702_v61, %v5115_v23  ;;  %v13704_v37 = vrot.slane %v9886_v48, 4  ;;  %v2627_v57 = vrot.slane %v9931_v42, 4  ;;  %v2447_v41 = vrot.slane %v9964_v58, 4  ;;  %v13778_v61 = vld [vmem:[#allocation145_spill] sm:$0xff] }
 0x261   : > { %v2426_v24 = vsel %vm2199_vm8, %v1038_v6, %v13703_v3  ;;  %v2459_v59 = vrot.slane %v9956_v21, 4  ;;  %4587 = vrot.lane.b32.xlu1 %v4571_v40, %s7334_s23  ;;  %v2593_v15 = vrot.slane %v1048_v22, 4  ;;  %v2424_v6 = vsel %vm2199_vm8, %v2423_v33, %v9820_v8 }
 0x262   : > { %v2504_v13 = vsel %vm2199_vm8, %v13704_v37, %v2486_v7  ;;  %v2434_v30 = vperm.slane %v2426_v24, %v13579_v34  ;;  %v987_v29 = vpop.permute.xlu0 %986  ;;  %5412 = vmatpush.bf16.msra.mxu2 %v5333_v50  ;;  %v2430_v7 = vperm.slane %v2424_v6, %v13579_v34  ;;  %v13705_v28 = vrot.slane %v9906_v10, 4 }
 0x263   : > { %v1024_v23 = vrot.slane %v987_v29, 4  ;;  %v2510_v48 = vperm.slane %v2504_v13, %v13638_v46  ;;  %v2527_v8 = vrot.slane %v10018_v53, 4  ;;  %v2583_v19 = vrot.slane %v9953_v35, 4 }
 0x264   : > { %v2460_v11 = vsel %vm2199_vm8, %v2459_v59, %v2434_v30  ;;  %v2461_v20 = vrot.slane %v2434_v30, 4  ;;  %v2560_v44 = vsel %vm2199_vm8, %v13705_v28, %v9897_v12  ;;  %v2449_v40 = vrot.slane %v2430_v7, 4 }
 0x265   : > { %v2466_v49 = vperm.slane %v2460_v11, %v13638_v46  ;;  %v1056_v25 = vsel %vm310_vm13, %v987_v29, %v1024_v23  ;;  %v2448_v12 = vsel %vm2199_vm8, %v2447_v41, %v2430_v7  ;;  %v2566_v37 = vperm.slane %v2560_v44, %v13638_v46 }
 0x266   : > { %v10054_v33 = vsel %vm2199_vm8, %v9956_v21, %v2461_v20  ;;  %v2591_v3 = vrot.slane %v1056_v25, 4  ;;  %v2594_v24 = vsel %vm2199_vm8, %v1056_v25, %v2593_v15  ;;  %v2615_v13 = vrot.slane %v9928_v32, 4 }
 0x267   : > { %13706 = vst [vmem:[#allocation166_spill] sm:$0xff] %v10054_v33  ;;  %v2602_v10 = vperm.slane %v2594_v24, %v13579_v34  ;;  %v2471_v50 = vrot.slane %v2466_v49, 4  ;;  %v10063_v59 = vsel %vm2199_vm8, %v9964_v58, %v2449_v40  ;;  %v2454_v21 = vperm.slane %v2448_v12, %v13638_v46 }
 0x268   : > { %13707 = vst [vmem:[#allocation167_spill] sm:$0xff] %v10063_v59  ;;  %v2592_v30 = vsel %vm2199_vm8, %v2591_v3, %v1048_v22  ;;  %v2528_v41 = vsel %vm2199_vm8, %v2527_v8, %v2510_v48  ;;  %v2529_v20 = vrot.slane %v2510_v48, 4  ;;  %v2584_v22 = vsel %vm2199_vm8, %v2583_v19, %v2566_v37 }
 0x269   : > { %v2598_v29 = vperm.slane %v2592_v30, %v13579_v34  ;;  %v2628_v15 = vsel %vm2199_vm8, %v2627_v57, %v2602_v10  ;;  %v2629_v6 = vrot.slane %v2602_v10, 4  ;;  %v2472_v7 = vsel %vm2199_vm8, %v2471_v50, %v2454_v21  ;;  %v13710_v10 = vld [vmem:[#allocation64_spill] sm:$0xff] }
 0x26a   : > { %v2634_v23 = vperm.slane %v2628_v15, %v13638_v46  ;;  %v2473_v11 = vrot.slane %v2454_v21, 4  ;;  %v2585_v25 = vrot.slane %v2566_v37, 4  ;;  %v4183_v8 = vshrl.u32 %v2472_v7, 16 }
 0x26b   : > { %v2617_v28 = vrot.slane %v2598_v29, 4  ;;  %v10074_v58 = vsel %vm2199_vm8, %v9931_v42, %v2629_v6  ;;  %v2616_v44 = vsel %vm2199_vm8, %v2615_v13, %v2598_v29  ;;  %v10083_v24 = vpack.i.b16 %v2528_v41, %v2472_v7 }
 0x26c   : > { %13708 = vst [vmem:[#allocation168_spill] sm:$0xff] %v10074_v58  ;;  %v2622_v57 = vperm.slane %v2616_v44, %v13638_v46  ;;  %v2639_v40 = vrot.slane %v2634_v23, 4  ;;  %v4184_v48 = vshrl.u32 %v2528_v41, 16  ;;  %v2417_v12 = vrot.slane %v13710_v10, 4  ;;  %v13755_v58 = vld [vmem:[#allocation134_spill] sm:$0xff] }
 0x26d   : > { %v10081_v3 = vsel %vm2199_vm8, %v9928_v32, %v2617_v28  ;;  %v4213_v19 = vshrl.u32 %v2584_v22, 16  ;;  %v10088_v13 = vsel %vm2199_vm8, %v2466_v49, %v2473_v11  ;;  %v10094_v32 = vsel %vm2199_vm8, %v10018_v53, %v2529_v20 }
 0x26e   : > { %13709 = vst [vmem:[#allocation169_spill] sm:$0xff] %v10081_v3  ;;  %v2640_v42 = vsel %vm2199_vm8, %v2639_v40, %v2622_v57  ;;  %v2641_v50 = vrot.slane %v2622_v57, 4  ;;  %v4185_v37 = vpack.i.b16 %v4184_v48, %v4183_v8  ;;  %v10098_v29 = vsel %vm2199_vm8, %v9953_v35, %v2585_v25  ;;  %v13717_v40 = vld [vmem:[#allocation21_spill] sm:$0xff] }
 0x26f   : > { %13711 = vst [vmem:[#allocation64_spill] sm:$0xff] %v10088_v13  ;;  %v10090_v30 = vpack.i.b16 %v2640_v42, %v2584_v22  ;;  %v4214_v21 = vshrl.u32 %v2640_v42, 16  ;;  %v10105_v6 = vpack.i.b16 %v10094_v32, %v10088_v13  ;;  %v4428_v49 = vshrl.u32 %v9093_v17, 16  ;;  %v13718_v42 = vld [vmem:[#allocation18_spill] sm:$0xff] }
 0x270   : > { %13712 = vst [vmem:[#allocation170_spill] sm:$0xff] %v10094_v32  ;;  %v10101_v15 = vsel %vm2199_vm8, %v2634_v23, %v2641_v50  ;;  %v4446_v7 = vunpack.c.l.b16 %v10083_v24  ;;  %v4461_v35 = vunpack.c.h.b16 %v9447_v5  ;;  %v4486_v20 = vunpack.c.h.b16 %v4185_v37 }
 0x271   : > { %13713 = vst [vmem:[#allocation171_spill] sm:$0xff] %v10098_v29  ;;  %v4215_v41 = vpack.i.b16 %v4214_v21, %v4213_v19  ;;  %v4448_v11 = vunpack.c.l.b16 %v10090_v30  ;;  %v10112_v53 = vpack.i.b16 %v10101_v15, %v10098_v29  ;;  %v4549_v23 = vunpack.c.l.b16 %v10105_v6  ;;  %v13720_v21 = vld [vmem:[#allocation102_spill] sm:$0xff]  ;;  %v13751_v29 = vld [vmem:[#allocation141_spill] sm:$0xff] }
 0x272   : > { %13714 = vst [vmem:[#allocation172_spill] sm:$0xff] %v10101_v15  ;;  %v4485_v28 = vunpack.c.l.b16 %v4185_v37  ;;  %v10119_v8 = vperm.slane %v13717_v40, %v13638_v46  ;;  %v4459_v48 = vunpack.c.h.b16 %v9434_v51  ;;  %v10122_v10 = vpack.i.b16 0, %v4428_v49  ;;  %v13723_v49 = vld [vmem:[#allocation103_spill] sm:$0xff] }
 0x273   : > { %13715 = vst [vmem:[#allocation173_spill] sm:$0xff] %v10105_v6  ;;  %v4466_v22 = vpack.c.b16 %v4448_v11, %v4446_v7  ;;  %v4551_v44 = vunpack.c.l.b16 %v10112_v53  ;;  %v4488_v25 = vunpack.c.h.b16 %v4215_v41  ;;  %v4487_v57 = vunpack.c.l.b16 %v4215_v41  ;;  %v13722_v41 = vld [vmem:[#allocation90_spill] sm:$0xff] }
 0x274   : > { %13716 = vst [vmem:[#allocation174_spill] sm:$0xff] %v10112_v53  ;;  %v10126_v5 = vsel %vm2199_vm8, %v13718_v42, %v2417_v12  ;;  %v2337_v11 = vrot.slane %v13722_v41, 4  ;;  %v10135_v40 = vperm.slane %v9596_v36, %v13638_v46  ;;  %v4473_v51 = vpack.c.b16 %v4461_v35, %v4459_v48  ;;  %v13726_v36 = vld [vmem:[#allocation128_spill] sm:$0xff]  ;;  %v13727_v35 = vld [vmem:[#allocation129_spill] sm:$0xff]  ;;  %v13729_v48 = vld [vmem:[#allocation99_spill] sm:$0xff] }
 0x275   : > { %13719 = vst [vmem:[#allocation21_spill] sm:$0xff] %v10126_v5  ;;  %5358 = vmatpush.bf16.msra.mxu0 %v4466_v22  ;;  %v4569_v50 = vpack.c.b16 %v4551_v44, %v4549_v23  ;;  %v4506_v19 = vpack.c.b16 %v4488_v25, %v4486_v20  ;;  %v4505_v37 = vpack.c.b16 %v4487_v57, %v4485_v28  ;;  %v4431_v6 = vpack.i.b16 0, %v13723_v49 }
 0x276   : > { %v10130_v7 = vpack.i.b16 %v10126_v5, %v13720_v21  ;;  %v13724_v12 = vperm.slane %v13655_v27, %v13579_v34  ;;  %v13725_v23 = vperm.slane %v13656_v54, %v13638_v46  ;;  %v10150_v28 = vperm.slane %v9582_v63, %v13638_v46  ;;  %v13736_v21 = vld [vmem:[#allocation69_spill] sm:$0xff] }
 0x277   : > { %v4532_v44 = vpop.permute.xlu0 %4531  ;;  %4583 = vrot.lane.b32.xlu1 %v4569_v50, %s7334_s23  ;;  %4521 = vrot.lane.b32.xlu0 %v4506_v19, %s7335_s24  ;;  %v10156_v25 = vpack.i.b16 %v13727_v35, %v13726_v36  ;;  %v2307_v27 = vrot.slane %v10119_v8, 4  ;;  %v3189_v57 = vrot.slane %v9311_v2, 4  ;;  %v4629_v63 = vunpack.c.l.b16 %v10122_v10  ;;  %v13730_v50 = vld [vmem:[#allocation36_spill] sm:$0xff]  ;;  %v13731_v19 = vld [vmem:[#allocation97_spill] sm:$0xff]  ;;  %v13734_v36 = vld [vmem:[#allocation42_spill] sm:$0xff] }
 0x278   : > { %13721 = vst [vmem:[#allocation18_spill] sm:$0xff] %v10130_v7  ;;  %v10141_v22 = vrot.slane %v13724_v12, 4  ;;  %v10146_v20 = vrot.slane %v13725_v23, 4  ;;  %v5087_v54 = vsel %vm461_vm5, %v4473_v51, %v4532_v44  ;;  %4519 = vrot.lane.b32.xlu2 %v4505_v37, %s7335_s24  ;;  %v2393_v42 = vrot.slane %v13729_v48, 4  ;;  %v13732_v23 = vld [vmem:[#allocation101_spill] sm:$0xff]  ;;  %v13733_v37 = vld [vmem:[#allocation39_spill] sm:$0xff] }
 0x279   : > { %13728 = vst [vmem:[#allocation90_spill] sm:$0xff] %v10156_v25  ;;  %v10166_v41 = vperm.slane %v13730_v50, %v13638_v46  ;;  %v2338_v12 = vsel %vm2199_vm8, %v13731_v19, %v2337_v11  ;;  %5384 = vmatpush.bf16.msra.mxu1 %v5087_v54  ;;  %5359 = vmatpush.bf16.msra.mxu0 %v13732_v23  ;;  %v4547_v2 = vunpack.c.l.b16 %v10130_v7  ;;  %v2363_v51 = vrot.slane %v10135_v40, 4  ;;  %v13735_v50 = vld [vmem:[#allocation43_spill] sm:$0xff]  ;;  %v13737_v11 = vld [vmem:[#allocation68_spill] sm:$0xff] }
 0x27a   : > { %v4694_v5 = vunpack.c.h.b16 %v4431_v6  ;;  %v4545_v19 = vunpack.c.l.b16 %v10156_v25  ;;  %v13738_v23 = vld [vmem:[#allocation12_spill] sm:$0xff]  ;;  %v3190_v59 = vsel %vm2199_vm8, %v9171_v16, %v3189_v57  ;;  %v4641_v3 = vpack.c.b16 %v4629_v63, %v4629_v63  ;;  %v13741_v16 = vld [vmem:[#allocation95_spill] sm:$0xff]  ;;  %v13747_v63 = vld [vmem:[#allocation89_spill] sm:$0xff] }
 0x27b   : > { %v13739_v53 = vpack.i.b16 0, %v9093_v17  ;;  %v4693_v33 = vunpack.c.l.b16 %v4431_v6  ;;  %v2308_v18 = vsel %vm2199_vm8, %v2307_v27, %v10150_v28  ;;  %v3177_v54 = vrot.slane %v9345_v60, 4  ;;  %v10217_v27 = vpop.permute.xlu1 %4595 }
 0x27c   : > { %v4567_v48 = vpack.c.b16 %v4547_v2, %v4545_v19  ;;  %v10195_v7 = vperm.slane %v9412_v55, %v13638_v46  ;;  %v4706_v25 = vpack.c.b16 %v4694_v5, %v4694_v5  ;;  %v2394_v57 = vsel %vm2199_vm8, %v13741_v16, %v2393_v42  ;;  %13746 = vst [vmem:[#allocation101_spill] sm:$0xff] %v10217_v27  ;;  %v13748_v2 = vld [vmem:[#allocation140_spill] sm:$0xff] }
 0x27d   : > { %v10187_v32 = vunpack.c.h.b16 %v13739_v53  ;;  %v10200_v17 = vperm.slane %v3190_v59, %v13638_v46  ;;  %v10204_v6 = vperm.slane %v9259_v52, %v13638_v46  ;;  %v4455_v60 = vunpack.c.h.b16 %v9667_v26  ;;  %v13749_v16 = vld [vmem:[#allocation132_spill] sm:$0xff] }
 0x27e   : > { %13740 = vst [vmem:[#allocation103_spill] sm:$0xff] %v10195_v7  ;;  %v13744_v55 = vrot.slane %v13652_v1, 4  ;;  %v10215_v59 = vperm.slane %v9314_v47, %v13638_v46  ;;  %v10229_v19 = vperm.slane %v2394_v57, %v13638_v46  ;;  %v2419_v47 = vrot.slane %v10166_v41, 4 }
 0x27f   : > { %13742 = vst [vmem:[#allocation99_spill] sm:$0xff] %v10200_v17  ;;  %v4534_v53 = vpop.permute.xlu0 %4533  ;;  %4663 = vrot.lane.b32.xlu1 %v4641_v3, %s7333_s14  ;;  %4579 = vrot.lane.b32.xlu0 %v4567_v48, %s7334_s23  ;;  %v4457_v3 = vunpack.c.h.b16 %v9663_v14  ;;  %v4399_v48 = vshrl.u32 %v13748_v2, 16  ;;  %v13750_v14 = vld [vmem:[#allocation139_spill] sm:$0xff]  ;;  %v4400_v13 = vshrl.u32 %v13751_v29, 16  ;;  %v10242_v57 = vperm.slane %v2338_v12, %v13638_v46 }
 0x280   : > { %13743 = vst [vmem:[#allocation36_spill] sm:$0xff] %v10204_v6  ;;  %v2252_v5 = vsel %vm2199_vm8, %v13744_v55, %v9545_v9  ;;  %v4543_v52 = vsel %vm461_vm5, %v4532_v44, %v4534_v53  ;;  %4515 = vrot.lane.b32.xlu2 %v13747_v63, %s7335_s24  ;;  %v3178_v44 = vsel %vm2199_vm8, %v13749_v16, %v3177_v54  ;;  %v3259_v53 = vrot.slane %v10195_v7, 4 }
 0x281   : > { %13745 = vst [vmem:[#allocation97_spill] sm:$0xff] %v10215_v59  ;;  %v10223_v42 = vpack.i.b16 %v2308_v18, %v2252_v5  ;;  %v5111_v26 = vsel %vm443_vm14, %v4543_v52, %v10217_v27  ;;  %v4705_v55 = vpack.c.b16 %v4693_v33, %v4693_v33  ;;  %v4369_v63 = vshrl.u32 %v13750_v14, 16  ;;  %v13752_v52 = vld [vmem:[#allocation137_spill] sm:$0xff]  ;;  %v13754_v33 = vld [vmem:[#allocation80_spill] sm:$0xff] }
 0x282   : > { %5413 = vmatpush.bf16.msra.mxu2 %v5111_v26  ;;  %v4471_v35 = vpack.c.b16 %v4457_v3, %v4455_v60  ;;  %v10239_v2 = vperm.slane %v13752_v52, %v13638_v46  ;;  %v3203_v27 = vrot.slane %v10200_v17, 4  ;;  %v3147_v54 = vrot.slane %v10204_v6, 4 }
 0x283   : > { %v3315_v16 = vrot.slane %v10215_v59, 4  ;;  %v10247_v26 = vpop.permute.xlu2 %4527  ;;  %v4370_v14 = vshrl.u32 %v13754_v33, 16  ;;  %v10252_v60 = vpack.i.b16 %v4400_v13, %v4399_v48  ;;  %v10256_v3 = vsel %vm2199_vm8, %v2363_v51, %v10242_v57  ;;  %v13757_v33 = vld [vmem:[#allocation136_spill] sm:$0xff] }
 0x284   : > { %13753 = vst [vmem:[#allocation39_spill] sm:$0xff] %v10239_v2  ;;  %v5083_v29 = vsel %vm461_vm5, %v4471_v35, %v10247_v26  ;;  %v10260_v12 = vsel %vm2199_vm8, %v2419_v47, %v10229_v19  ;;  %v10266_v15 = vperm.slane %v13755_v58, %v13638_v46  ;;  %v10270_v35 = vperm.slane %v13757_v33, %v13638_v46 }
 0x285   : > { %5385 = vmatpush.bf16.msra.mxu1 %v5083_v29  ;;  %v10262_v52 = vpack.i.b16 %v4370_v14, %v4369_v63  ;;  %v10274_v13 = vpack.i.b16 %v10260_v12, %v10256_v3  ;;  %v10280_v51 = vsel %vm2199_vm8, %v3259_v53, %v10239_v2  ;;  %v4135_v48 = vshrl.u32 %v2252_v5, 16  ;;  %v13759_v63 = vld [vmem:[#allocation85_spill] sm:$0xff] }
 0x286   : > { %13756 = vst [vmem:[#allocation42_spill] sm:$0xff] %v10266_v15  ;;  %v4136_v58 = vshrl.u32 %v2308_v18, 16  ;;  %v2253_v47 = vrot.slane %v9545_v9, 4  ;;  %v4673_v14 = vunpack.c.l.b16 %v10223_v42  ;;  %v2309_v33 = vrot.slane %v10150_v28, 4 }
 0x287   : > { %13758 = vst [vmem:[#allocation43_spill] sm:$0xff] %v10270_v35  ;;  %4729 = vrot.lane.b32.xlu1 %v4706_v25, %s7341_s27  ;;  %4727 = vrot.lane.b32.xlu0 %v4705_v55, %s7341_s27  ;;  %v4675_v29 = vunpack.c.l.b16 %v10274_v13  ;;  %v13760_v25 = vld [vmem:[#allocation14_spill] sm:$0xff]  ;;  %v4627_v17 = vunpack.c.l.b16 %v10252_v60  ;;  %v10292_v53 = vperm.slane %v3178_v44, %v13638_v46  ;;  %v10300_v5 = vsel %vm2199_vm8, %v3315_v16, %v10270_v35 }
 0x288   : > { %4517 = vrot.lane.b32.xlu2 %v13759_v63, %s7335_s24  ;;  %v3386_v55 = vperm.slane %v13760_v25, %v13638_v46  ;;  %v10294_v18 = vpack.i.b16 %v4136_v58, %v4135_v48  ;;  %v2254_v9 = vsel %vm2199_vm8, %v13652_v1, %v2253_v47  ;;  %v4432_v63 = vshrl.u32 %v13723_v49, 16  ;;  %v13763_v47 = vld [vmem:[#allocation81_spill] sm:$0xff] }
 0x289   : > { %13761 = vst [vmem:[#allocation69_spill] sm:$0xff] %v10292_v53  ;;  %v10303_v28 = vpack.c.b16 %v4675_v29, %v4673_v14  ;;  %v2310_v25 = vsel %vm2199_vm8, %v10119_v8, %v2309_v33  ;;  %v4625_v59 = vunpack.c.l.b16 %v10262_v52  ;;  %v4578_v44 = vpack.c.b16 %v10187_v32, %v10187_v32 }
 0x28a   : > { %v10312_v48 = vsel %vm2199_vm8, %v3147_v54, %v10266_v15  ;;  %v4404_v1 = vpack.i.b16 %v10300_v5, %v10280_v51  ;;  %v10316_v16 = vpack.i.b16 %v2310_v25, %v2254_v9  ;;  %v4141_v49 = vshrl.u32 %v2254_v9, 16  ;;  %v13765_v54 = vld [vmem:[#allocation16_spill] sm:$0xff]  ;;  %v13777_v15 = vld [vmem:[#allocation65_spill] sm:$0xff] }
 0x28b   : > { %13762 = vst [vmem:[#allocation68_spill] sm:$0xff] %v10303_v28  ;;  %v4142_v58 = vshrl.u32 %v2310_v25, 16  ;;  %v3394_v14 = vsel %vm2199_vm8, %v13763_v47, %v3386_v55  ;;  %v4639_v8 = vpack.c.b16 %v4627_v17, %v4625_v59  ;;  %v13764_v29 = vunpack.c.h.b16 %v10122_v10  ;;  %v13767_v17 = vld [vmem:[#allocation32_spill] sm:$0xff] }
 0x28c   : > { %v10325_v32 = vsel %vm2199_vm8, %v3203_v27, %v10292_v53  ;;  %v13766_v28 = vperm.slane %v13765_v54, %v13579_v34  ;;  %v4433_v25 = vpack.i.b16 0, %v4432_v63  ;;  %v13768_v27 = vperm.slane %v13733_v37, %v13579_v34  ;;  %v13770_v63 = vld [vmem:[#allocation49_spill] sm:$0xff] }
 0x28d   : > { %v4642_v33 = vpack.c.b16 %v13764_v29, %v13764_v29  ;;  %v4374_v9 = vpack.i.b16 %v10325_v32, %v10312_v48  ;;  %v10334_v55 = vpack.i.b16 %v4142_v58, %v4141_v49  ;;  %v13769_v29 = vperm.slane %v13734_v36, %v13638_v46 }
 0x28e   : > { %v3420_v6 = vsel %vm2199_vm8, %v10141_v22, %v13766_v28  ;;  %v10342_v47 = vrot.slane %v13768_v27, 4  ;;  %v13771_v28 = vperm.slane %v13735_v50, %v13638_v46  ;;  %v4692_v37 = vunpack.c.h.b16 %v4404_v1  ;;  %v13774_v27 = vld [vmem:[#allocation62_spill] sm:$0xff] }
 0x28f   : > { %v3424_v10 = vperm.slane %v3420_v6, %v13638_v46  ;;  %v10347_v22 = vrot.slane %v13769_v29, 4  ;;  %4659 = vrot.lane.b32.xlu1 %v4639_v8, %s7333_s14  ;;  %4601 = vrot.lane.b32.xlu0 %v4578_v44, %s7334_s23  ;;  %v4691_v58 = vunpack.c.l.b16 %v4404_v1  ;;  %v13772_v36 = vrot.slane %v13736_v21, 4 }
 0x290   : > { %v10356_v49 = vrot.slane %v13771_v28, 4  ;;  %4665 = vrot.lane.b32.xlu2 %v4642_v33, %s7333_s14  ;;  %v13773_v8 = vrot.slane %v13737_v11, 4  ;;  %v585_v29 = vrot.slane %v13774_v27, 4  ;;  %v13775_v50 = vrot.slane %v13738_v23, 4 }
 0x291   : > { %v535_v54 = vsel %vm255_vm10, %v13736_v21, %v13772_v36  ;;  %v4690_v33 = vunpack.c.h.b16 %v4374_v9  ;;  %v4689_v1 = vunpack.c.l.b16 %v4374_v9  ;;  %v4758_v6 = vunpack.c.l.b16 %v4433_v25  ;;  %v13776_v21 = vld [vmem:[#allocation33_spill] sm:$0xff]  ;;  %v13780_v9 = vld [vmem:[#allocation98_spill] sm:$0xff] }
 0x292   : > { %v539_v44 = vsel %vm266_vm12, %v13737_v11, %v13773_v8  ;;  %v10372_v28 = vsel %vm255_vm10, %v13738_v23, %v13775_v50  ;;  %v3432_v59 = vsel %vm2199_vm8, %v10146_v20, %v3424_v10  ;;  %v4310_v36 = vshrl.u32 %v13776_v21, 16  ;;  %v13779_v50 = vld [vmem:[#allocation87_spill] sm:$0xff]  ;;  %v13781_v21 = vld [vmem:[#allocation109_spill] sm:$0xff] }
 0x293   : > { %v10377_v7 = vpack.i.b16 %v3432_v59, %v3394_v14  ;;  %v4147_v53 = vshrl.u32 %v3394_v14, 16  ;;  %v4148_v11 = vshrl.u32 %v3432_v59, 16  ;;  %v4704_v8 = vpack.c.b16 %v4692_v37, %v4690_v33  ;;  %v13782_v14 = vld [vmem:[#allocation106_spill] sm:$0xff] }
 0x294   : > { %v4703_v62 = vpack.c.b16 %v4691_v58, %v4689_v1  ;;  %v4759_v35 = vunpack.c.h.b16 %v4433_v25  ;;  %v13222_v2 = vpack.i.b16 0, %v13777_v15  ;;  %v4309_v23 = vshrl.u32 %v13778_v61, 16  ;;  %v13783_v37 = vld [vmem:[#allocation138_spill] sm:$0xff] }
 0x295   : > { %v4339_v45 = vshrl.u32 %v13779_v50, 16  ;;  %v4340_v31 = vshrl.u32 %v13780_v9, 16  ;;  %v10383_v43 = vpack.i.b16 %v4148_v11, %v4147_v53  ;;  %v1820_v20 = vshll.u32 %v535_v54, 16  ;;  %v13788_v11 = vld [vmem:[#allocation144_spill] sm:$0xff] }
 0x296   : > { %v1830_v10 = vshll.u32 %v539_v44, 16  ;;  %v1956_v4 = vrot.slane %v13781_v21, 4  ;;  %v4770_v38 = vpack.c.b16 %v4758_v6, %v4758_v6  ;;  %v10389_v25 = vsel %vm244_vm7, %v13774_v27, %v585_v29  ;;  %v13784_v6 = vld [vmem:[#allocation46_spill] sm:$0xff]  ;;  %v13786_v27 = vld [vmem:[#allocation48_spill] sm:$0xff] }
 0x297   : > { %v10393_v61 = vperm.slane %v13783_v37, %v13638_v46  ;;  %4725 = vrot.lane.b32.xlu1 %v4704_v8, %s7341_s27  ;;  %4723 = vrot.lane.b32.xlu0 %v4703_v62, %s7341_s27  ;;  %v10397_v53 = vpack.i.b16 %v4310_v36, %v4309_v23  ;;  %v1958_v58 = vshll.u32 %v10372_v28, 16  ;;  %v13785_v54 = vrot.slane %v13784_v6, 7  ;;  %v13789_v36 = vld [vmem:[#allocation19_spill] sm:$0xff]  ;;  %v13790_v23 = vld [vmem:[#allocation20_spill] sm:$0xff] }
 0x298   : > { %4792 = vrot.lane.b32.xlu2 %v4770_v38, %s7342_s28  ;;  %v13787_v29 = vrot.slane %v13786_v27, 7  ;;  %v10407_v1 = vunpack.c.l.b16 %v13222_v2  ;;  %v10411_v62 = vperm.slane %v13788_v11, %v13638_v46  ;;  %v10415_v28 = vperm.slane %v13789_v36, %v13638_v46 }
 0x299   : > { %v1828_v44 = vrot.slane %v13785_v54, 4  ;;  %v10417_v8 = vpack.i.b16 %v4340_v31, %v4339_v45  ;;  %v10419_v38 = vpack.c.b16 %v4759_v35, %v4759_v35  ;;  %v10423_v50 = vperm.slane %v13790_v23, %v13638_v46 }
 0x29a   : > { %v1818_v33 = vrot.slane %v13787_v29, 4  ;;  %v4628_v9 = vunpack.c.h.b16 %v10252_v60  ;;  %v4375_v21 = vshrl.u32 %v10312_v48, 16  ;;  %v2421_v37 = vrot.slane %v10229_v19, 4  ;;  %v13792_v19 = vld [vmem:[#allocation86_spill] sm:$0xff] }
 0x29b   : > { %v2923_v6 = vrot.slane %v10393_v61, 4  ;;  %v1832_v27 = vsel %vm7980_vm3, %v1828_v44, %v1830_v10  ;;  %v4621_v45 = vunpack.c.l.b16 %v10397_v53  ;;  %v4405_v31 = vshrl.u32 %v10280_v51, 16 }
 0x29c   : > { %v1822_v35 = vsel %vm7980_vm3, %v1818_v33, %v1820_v20  ;;  %v4626_v29 = vunpack.c.h.b16 %v10262_v52  ;;  %v4376_v60 = vshrl.u32 %v10325_v32, 16  ;;  %v2422_v48 = vsel %vm2199_vm8, %v10166_v41, %v2421_v37 }
 0x29d   : > { %v10441_v11 = vperm.slane %v13792_v19, %v13638_v46  ;;  %v3091_v10 = vrot.slane %v10411_v62, 4  ;;  %v4623_v44 = vunpack.c.l.b16 %v10417_v8  ;;  %v4406_v51 = vshrl.u32 %v10300_v5, 16  ;;  %v10448_v52 = vpop.permute.xlu1 %4591 }
 0x29e   : > { %v3035_v36 = vrot.slane %v10415_v28, 4  ;;  %v2979_v20 = vrot.slane %v10423_v50, 4  ;;  %v4640_v32 = vpack.c.b16 %v4628_v9, %v4626_v29  ;;  %v10450_v33 = vpack.i.b16 %v4376_v60, %v4375_v21  ;;  %v4530_v41 = vpop.permute.xlu0 %4529 }
 0x29f   : > { %2047 = vrot.lane.b32.xlu1 %v1832_v27, %s7325_s6  ;;  %2043 = vrot.lane.b32.xlu0 %v1822_v35, %s7325_s6  ;;  %v4637_v23 = vpack.c.b16 %v4623_v44, %v4621_v45  ;;  %v1960_v37 = vsel %vm7980_vm3, %v1956_v4, %v1958_v58  ;;  %v10456_v19 = vpack.i.b16 %v4406_v51, %v4405_v31  ;;  %v4674_v5 = vunpack.c.h.b16 %v10223_v42 }
 0x2a0   : > { %v4542_v2 = vsel %vm461_vm5, %v10247_v26, %v4530_v41  ;;  %4661 = vrot.lane.b32.xlu2 %v4640_v32, %s7333_s14  ;;  %v4738_v9 = vunpack.c.l.b16 %v10294_v18  ;;  %v4739_v21 = vunpack.c.h.b16 %v10294_v18  ;;  %v4803_v27 = vunpack.c.l.b16 %v10316_v16 }
 0x2a1   : > { %v5107_v45 = vsel %vm443_vm14, %v4542_v2, %v10448_v52  ;;  %v4165_v4 = vshrl.u32 %v10256_v3, 16  ;;  %v4166_v58 = vshrl.u32 %v10260_v12, 16  ;;  %v2365_v42 = vrot.slane %v10242_v57, 4 }
 0x2a2   : > { %5414 = vmatpush.bf16.msra.mxu2 %v5107_v45  ;;  %v4754_v26 = vunpack.c.l.b16 %v10450_v33  ;;  %v4868_v31 = vunpack.c.l.b16 %v10334_v55  ;;  %v13793_v35 = vperm.slane %v13767_v17, %v13579_v34  ;;  %v4869_v29 = vunpack.c.h.b16 %v10334_v55  ;;  %v13794_v17 = vld [vmem:[#allocation67_spill] sm:$0xff] }
 0x2a3   : > { %v4756_v2 = vunpack.c.l.b16 %v10456_v19  ;;  %v4676_v3 = vunpack.c.h.b16 %v10274_v13  ;;  %v4167_v12 = vpack.i.b16 %v4166_v58, %v4165_v4  ;;  %v2366_v57 = vsel %vm2199_vm8, %v10135_v40, %v2365_v42  ;;  %v13796_v40 = vld [vmem:[#allocation88_spill] sm:$0xff] }
 0x2a4   : > { %v3457_v18 = vsel %vm2199_vm8, %v10342_v47, %v13793_v35  ;;  %v4170_v60 = vpack.i.b16 %v2422_v48, %v2366_v57  ;;  %v4171_v44 = vshrl.u32 %v2366_v57, 16  ;;  %v4172_v51 = vshrl.u32 %v2422_v48, 16 }
 0x2a5   : > { %v3461_v32 = vperm.slane %v3457_v18, %v13638_v46  ;;  %v10485_v41 = vperm.slane %v13794_v17, %v13638_v46  ;;  %v10487_v47 = vpack.c.b16 %v4676_v3, %v4674_v5  ;;  %v4740_v55 = vunpack.c.l.b16 %v4167_v12 }
 0x2a6   : > { %v4741_v45 = vunpack.c.h.b16 %v4167_v12  ;;  %v4805_v35 = vunpack.c.l.b16 %v4170_v60  ;;  %v4173_v59 = vpack.i.b16 %v4172_v51, %v4171_v44  ;;  %v4806_v4 = vunpack.c.h.b16 %v4170_v60 }
 0x2a7   : > { %13795 = vst [vmem:[#allocation12_spill] sm:$0xff] %v10487_v47  ;;  %v3469_v13 = vsel %vm2199_vm8, %v10347_v22, %v3461_v32  ;;  %4655 = vrot.lane.b32.xlu1 %v4637_v23, %s7333_s14  ;;  %2079 = vrot.lane.b32.xlu0 %v1960_v37, %s7325_s6  ;;  %v10495_v48 = vperm.slane %v13796_v40, %v13638_v46  ;;  %v4804_v42 = vunpack.c.h.b16 %v10316_v16  ;;  %v13799_v22 = vld [vmem:[#allocation73_spill] sm:$0xff]  ;;  %v1940_v12 = vshll.u32 %v10389_v25, 16 }
 0x2a8   : > { %v10497_v58 = vpack.c.b16 %v4740_v55, %v4738_v9  ;;  %v10499_v5 = vpack.c.b16 %v4741_v45, %v4739_v21  ;;  %4794 = vrot.lane.b32.xlu2 %v10419_v38, %s7342_s28  ;;  %v10506_v18 = vperm.slane %v13799_v22, %v13638_v46  ;;  %v10508_v23 = vpack.c.b16 %v4805_v35, %v4803_v27 }
 0x2a9   : > { %v4870_v37 = vunpack.c.l.b16 %v4173_v59  ;;  %v4871_v3 = vunpack.c.h.b16 %v4173_v59  ;;  %v4835_v9 = vpack.c.b16 %v10407_v1, %v10407_v1  ;;  %v4768_v21 = vpack.c.b16 %v4756_v2, %v4754_v26 }
 0x2aa   : > { %13797 = vst [vmem:[#allocation95_spill] sm:$0xff] %v10497_v58  ;;  %v10513_v57 = vpack.c.b16 %v4806_v4, %v4804_v42  ;;  %v10517_v16 = vsel %vm2199_vm8, %v2979_v20, %v10485_v41  ;;  %v13803_v27 = vperm.slane %v13770_v63, %v13638_v46  ;;  %v10530_v25 = vsel %vm2199_vm8, %v3035_v36, %v10495_v48 }
 0x2ab   : > { %13798 = vst [vmem:[#allocation89_spill] sm:$0xff] %v10499_v5  ;;  %v10519_v38 = vpack.c.b16 %v4870_v37, %v4868_v31  ;;  %v10526_v60 = vpack.c.b16 %v4871_v3, %v4869_v29  ;;  %v4177_v26 = vshrl.u32 %v3469_v13, 16  ;;  %v10536_v20 = vsel %vm2199_vm8, %v2923_v6, %v10506_v18  ;;  %v13812_v3 = vld [vmem:[#allocation63_spill] sm:$0xff] }
 0x2ac   : > { %13800 = vst [vmem:[#allocation140_spill] sm:$0xff] %v10508_v23  ;;  %v3507_v59 = vsel %vm2199_vm8, %v10356_v49, %v13803_v27  ;;  %v10542_v63 = vsel %vm2199_vm8, %v3091_v10, %v10441_v11  ;;  %v4933_v49 = vunpack.c.l.b16 %v10377_v7  ;;  %v4934_v36 = vunpack.c.h.b16 %v10377_v7  ;;  %v13909_v23 = vld [vmem:[#allocation31_spill] sm:$0xff] }
 0x2ad   : > { %13801 = vst [vmem:[#allocation132_spill] sm:$0xff] %v10513_v57  ;;  %v4176_v1 = vpack.i.b16 %v3507_v59, %v3469_v13  ;;  %v4178_v2 = vshrl.u32 %v3507_v59, 16  ;;  %v10548_v31 = vpack.i.b16 %v10517_v16, %v10536_v20  ;;  %v13805_v6 = vrot.slane %v13782_v14, 4  ;;  %v13808_v13 = vld [vmem:[#allocation5_spill] sm:$0xff]  ;;  %v13814_v59 = vld [vmem:[#allocation10_spill] sm:$0xff] }
 0x2ae   : > { %13802 = vst [vmem:[#allocation139_spill] sm:$0xff] %v10519_v38  ;;  %v10556_v10 = vpack.i.b16 %v10542_v63, %v10530_v25  ;;  %v4998_v17 = vunpack.c.l.b16 %v10383_v43  ;;  %v4999_v7 = vunpack.c.h.b16 %v10383_v43  ;;  %v13809_v4 = vrot.slane %v13808_v13, 7 }
 0x2af   : > { %13804 = vst [vmem:[#allocation141_spill] sm:$0xff] %v10526_v60  ;;  %v4935_v29 = vunpack.c.l.b16 %v4176_v1  ;;  %v4936_v44 = vunpack.c.h.b16 %v4176_v1  ;;  %v4179_v51 = vpack.i.b16 %v4178_v2, %v4177_v26  ;;  %v1942_v32 = vsel %vm7980_vm3, %v13805_v6, %v1940_v12  ;;  %4857 = vrot.lane.b32.xlu1 %v4835_v9, %s7343_s12  ;;  %4788 = vrot.lane.b32.xlu0 %v4768_v21, %s7342_s28  ;;  %v13813_v9 = vld [vmem:[#allocation82_spill] sm:$0xff] }
 0x2b0   : > { %2075 = vrot.lane.b32.xlu2 %v1942_v32, %s7325_s6  ;;  %v1801_v40 = vrot.slane %v13809_v4, 4  ;;  %v4685_v42 = vunpack.c.l.b16 %v10548_v31  ;;  %v4622_v37 = vunpack.c.h.b16 %v10397_v53  ;;  %v554_v12 = vrot.slane %v13812_v3, 4  ;;  %v13818_v4 = vld [vmem:[#allocation54_spill] sm:$0xff] }
 0x2b1   : > { %v10562_v55 = vpack.c.b16 %v4935_v29, %v4933_v49  ;;  %v10564_v45 = vpack.c.b16 %v4936_v44, %v4934_v36  ;;  %v5000_v14 = vunpack.c.l.b16 %v4179_v51  ;;  %v5001_v35 = vunpack.c.h.b16 %v4179_v51  ;;  %v13894_v60 = vld [vmem:[#allocation146_spill] sm:$0xff] }
 0x2b2   : > { %v550_v21 = vrot.slane %v13813_v9, 4  ;;  %v4687_v27 = vunpack.c.l.b16 %v10556_v10  ;;  %v13815_v1 = vshll.u32 %v13814_v59, 16  ;;  %v4624_v2 = vunpack.c.h.b16 %v10417_v8 }
 0x2b3   : > { %13806 = vst [vmem:[#allocation137_spill] sm:$0xff] %v10562_v55  ;;  %v10570_v22 = vpack.c.b16 %v5000_v14, %v4998_v17  ;;  %v10572_v43 = vpack.c.b16 %v5001_v35, %v4999_v7  ;;  %v4453_v36 = vunpack.c.h.b16 %v9976_v56  ;;  %v555_v53 = vsel %vm310_vm13, %v13812_v3, %v554_v12  ;;  %v13816_v56 = vld [vmem:[#allocation70_spill] sm:$0xff]  ;;  %v13817_v14 = vld [vmem:[#allocation55_spill] sm:$0xff] }
 0x2b4   : > { %13807 = vst [vmem:[#allocation80_spill] sm:$0xff] %v10564_v45  ;;  %v1802_v26 = vsel %vm7980_vm3, %v1801_v40, %v13815_v1  ;;  %v4701_v49 = vpack.c.b16 %v4687_v27, %v4685_v42  ;;  %v4638_v29 = vpack.c.b16 %v4624_v2, %v4622_v37  ;;  %v551_v44 = vsel %vm299_vm9, %v13813_v9, %v550_v21  ;;  %v13819_v42 = vld [vmem:[#allocation71_spill] sm:$0xff]  ;;  %v7281_v21 = vld [vmem:[%s7421_s29 + $0x10] sm:$0x11]  ;;  %v13904_v55 = vld [vmem:[#allocation158_spill] sm:$0xff]  ;;  %s7344_s29 = smov 14  }
 0x2b5   : > { %13810 = vst [vmem:[#allocation134_spill] sm:$0xff] %v10570_v22  ;;  %v4451_v51 = vunpack.c.h.b16 %v9961_v39  ;;  %v1886_v6 = vshll.u32 %v555_v53, 16  ;;  %v1868_v8 = vshll.u32 %v551_v44, 16  ;;  %v633_v17 = vrot.slane %v13816_v56, 4  ;;  %v13820_v27 = vld [vmem:[#allocation112_spill] sm:$0xff]  ;;  %v13823_v53 = vld [vmem:[#allocation110_spill] sm:$0xff] }
 0x2b6   : > { %13811 = vst [vmem:[#allocation136_spill] sm:$0xff] %v10572_v43  ;;  %v530_v35 = vrot.slane %v13817_v14, 4  ;;  %v1884_v40 = vrot.slane %v13818_v4, 4  ;;  %v1866_v37 = vrot.slane %v13819_v42, 4  ;;  %v1920_v59 = vrot.slane %v13820_v27, 4  ;;  %v13821_v1 = vld [vmem:[#allocation24_spill] sm:$0xff] }
 0x2b7   : > { %2035 = vrot.lane.b32.xlu1 %v1802_v26, %s7325_s6  ;;  %4719 = vrot.lane.b32.xlu0 %v4701_v49, %s7341_s27  ;;  %v4469_v32 = vpack.c.b16 %v4453_v36, %v4451_v51  ;;  %v636_v12 = vsel %vm288_vm6, %v13816_v56, %v633_v17  ;;  %v1922_v26 = vshll.u32 %v13821_v1, 16  ;;  %v13822_v36 = vld [vmem:[#allocation66_spill] sm:$0xff]  ;;  %v2010_v44 = vrot.slane %v13823_v53, 4  ;;  %v13828_v42 = vld [vmem:[#allocation17_spill] sm:$0xff]  ;;  %v13885_v43 = vld [vmem:[#allocation111_spill] sm:$0xff] }
 0x2b8   : > { %4657 = vrot.lane.b32.xlu2 %v4638_v29, %s7333_s14  ;;  %v1888_v39 = vsel %vm7980_vm3, %v1884_v40, %v1886_v6  ;;  %v1870_v3 = vsel %vm7980_vm3, %v1866_v37, %v1868_v8  ;;  %v531_v9 = vsel %vm244_vm7, %v13817_v14, %v530_v35  ;;  %v2012_v2 = vshll.u32 %v636_v12, 16  ;;  %v13824_v6 = vld [vmem:[#allocation75_spill] sm:$0xff] }
 0x2b9   : > { %v4524_v7 = vpop.permute.xlu2 %4523  ;;  %v1810_v49 = vshll.u32 %v531_v9, 16  ;;  %v573_v29 = vrot.slane %v13822_v36, 4  ;;  %v1924_v51 = vsel %vm7980_vm3, %v1920_v59, %v1922_v26  ;;  %v13825_v8 = vrot.slane %v13824_v6, 7  ;;  %v13830_v9 = vld [vmem:[#allocation26_spill] sm:$0xff] }
 0x2ba   : > { %v5079_v13 = vsel %vm461_vm5, %v4469_v32, %v4524_v7  ;;  %v2014_v56 = vsel %vm7980_vm3, %v2010_v44, %v2012_v2  ;;  %vm13826_vm2 = vcmask 7168   ;;  %v4686_v35 = vunpack.c.h.b16 %v10548_v31  ;;  %v13833_v44 = vld [vmem:[#allocation113_spill] sm:$0xff] }
 0x2bb   : > { %5386 = vmatpush.bf16.msra.mxu1 %v5079_v13  ;;  %v1808_v32 = vrot.slane %v13825_v8, 4  ;;  %v576_v14 = vsel %vm13826_vm2, %v573_v29, %v13822_v36  ;;  %v13827_v13 = vld [vmem:[#allocation143_spill] sm:$0xff]  ;;  %v1902_v37 = vrot.slane %v13828_v42, 4  ;;  %v4449_v1 = vunpack.c.h.b16 %v10090_v30  ;;  %v13832_v30 = vld [vmem:[#allocation60_spill] sm:$0xff] }
 0x2bc   : > { %v4564_v4 = vunpack.c.h.b16 %v13827_v13  ;;  %v1904_v40 = vshll.u32 %v576_v14, 16  ;;  %v4447_v26 = vunpack.c.h.b16 %v10083_v24  ;;  %v542_v53 = vrot.slane %v13832_v30, 4 }
 0x2bd   : > { %v1812_v17 = vsel %vm7980_vm3, %v1808_v32, %v1810_v49  ;;  %v13831_v49 = vld [vmem:[#allocation84_spill] sm:$0xff]  ;;  %vm13837_vm11 = vcmask 1014784   ;;  %v4560_v45 = vunpack.c.h.b16 %v13894_v60  ;;  %v10898_v38 = vperm.slane %v13904_v55, %v13638_v46 }
 0x2be   : > { %v1906_v31 = vsel %vm7980_vm3, %v1902_v37, %v1904_v40  ;;  %v4467_v2 = vpack.c.b16 %v4449_v1, %v4447_v26  ;;  %v546_v36 = vrot.slane %v13831_v49, 4  ;;  %v543_v37 = vsel %vm13837_vm11, %v13832_v30, %v542_v53  ;;  %v13844_v30 = vld [vmem:[#allocation162_spill] sm:$0xff]  ;;  %vm13856_vm4 = vmmov %vm13837_vm11 }
 0x2bf   : > { %2063 = vrot.lane.b32.xlu1 %v1888_v39, %s7325_s6  ;;  %2059 = vrot.lane.b32.xlu0 %v1870_v3, %s7325_s6  ;;  %v4688_v39 = vunpack.c.h.b16 %v10556_v10  ;;  %v13829_v3 = vld [vmem:[#allocation142_spill] sm:$0xff]  ;;  %v4279_v53 = vshrl.u32 %v13844_v30, 16  ;;  %v13859_v30 = vld [vmem:[#allocation153_spill] sm:$0xff]  ;;  %13905 = vst [vmem:[#allocation20_spill] sm:$0xff] %v10898_v38  ;;  %vm4861_vm1 = vcmask 97280   ;;  %vm13980_vm15 = vcmask 982016   ;;  %vm14115_vm11 = vmmov %vm13856_vm4 }
 0x2c0   : > { %2193 = vrot.lane.b32.xlu2 %v7281_v21, %s7329_s10  ;;  %v4562_v12 = vunpack.c.h.b16 %v13829_v3  ;;  %v645_v21 = vrot.slane %v13830_v9, 4  ;;  %v547_v42 = vsel %vm288_vm6, %v13831_v49, %v546_v36  ;;  %v4280_v3 = vshrl.u32 %v9998_v0, 16  ;;  %v13843_v49 = vld [vmem:[#allocation160_spill] sm:$0xff] }
 0x2c1   : > { %v4702_v27 = vpack.c.b16 %v4688_v39, %v4686_v35  ;;  %v13835_v35 = vld [vmem:[#allocation117_spill] sm:$0xff]  ;;  %v1850_v39 = vshll.u32 %v547_v42, 16  ;;  %v4249_v36 = vshrl.u32 %v13843_v49, 16  ;;  %v13845_v0 = vld [vmem:[#allocation148_spill] sm:$0xff]  ;;  %v13852_v42 = vld [vmem:[#allocation150_spill] sm:$0xff]  ;;  %vm6106_vm2 = vcmask 261120  }
 0x2c2   : > { %v4576_v59 = vpack.c.b16 %v4564_v4, %v4562_v12  ;;  %v648_v10 = vsel %vm299_vm9, %v13830_v9, %v645_v21  ;;  %v1562_v13 = vrot.slane %v13835_v35, 4  ;;  %v13836_v4 = vld [vmem:[#allocation23_spill] sm:$0xff]  ;;  %v1840_v12 = vshll.u32 %v543_v37, 16 }
 0x2c3   : > { %v2030_v8 = vshll.u32 %v648_v10, 16  ;;  %v1479_v40 = vrot.slane %v13836_v4, 4  ;;  %v13838_v9 = vld [vmem:[#allocation119_spill] sm:$0xff]  ;;  %v10695_v37 = vperm.slane %v13852_v42, %v13638_v46 }
 0x2c4   : > { %v621_v21 = vrot.slane %v13838_v9, 4  ;;  %v13842_v10 = vld [vmem:[#allocation115_spill] sm:$0xff] }
 0x2c5   : > { %13853 = vst [vmem:[#allocation32_spill] sm:$0xff] %v10695_v37 }
 0x2c7   : > { %2091 = vrot.lane.b32.xlu1 %v2014_v56, %s7325_s6  ;;  %2071 = vrot.lane.b32.xlu0 %v1924_v51, %s7325_s6  ;;  %v2028_v51 = vrot.slane %v13833_v44, 4  ;;  %v10680_v44 = vperm.slane %v13845_v0, %v13638_v46 }
 0x2c8   : > { %2039 = vrot.lane.b32.xlu2 %v1812_v17, %s7325_s6 }
 0x2c9   : > { %13846 = vst [vmem:[#allocation81_spill] sm:$0xff] %v10680_v44  ;;  %v2811_v49 = vrot.slane %v10680_v44, 4 }
 0x2cf   : > { %4721 = vrot.lane.b32.xlu1 %v4702_v27, %s7341_s27  ;;  %4597 = vrot.lane.b32.xlu0 %v4576_v59, %s7334_s23  ;;  %v13839_v27 = vld [vmem:[#allocation154_spill] sm:$0xff] }
 0x2d0   : > { %2067 = vrot.lane.b32.xlu2 %v1906_v31, %s7325_s6  ;;  %v10668_v59 = vperm.slane %v13839_v27, %v13638_v46  ;;  %v13841_v31 = vld [vmem:[#allocation11_spill] sm:$0xff] }
 0x2d2   : > { %v10642_v29 = vpop.permute.xlu2 %4519  ;;  %v4526_v32 = vpop.permute.xlu0 %4525  ;;  %13840 = vst [vmem:[#allocation14_spill] sm:$0xff] %v10668_v59 }
 0x2d3   : > { %v5075_v56 = vsel %vm461_vm5, %v4467_v2, %v10642_v29  ;;  %v10648_v24 = vpop.permute.xlu1 %4587  ;;  %v4541_v17 = vsel %vm461_vm5, %v4524_v7, %v4526_v32  ;;  %v2032_v7 = vsel %vm7980_vm3, %v2028_v51, %v2030_v8  ;;  %v1848_v2 = vrot.slane %v13842_v10, 4  ;;  %v13847_v51 = vld [vmem:[#allocation152_spill] sm:$0xff]  ;;  %v13849_v32 = vld [vmem:[#allocation22_spill] sm:$0xff]  ;;  %v13857_v10 = vld [vmem:[#allocation149_spill] sm:$0xff] }
 0x2d4   : > { %13834 = vst [vmem:[#allocation85_spill] sm:$0xff] %v10648_v24  ;;  %5387 = vmatpush.bf16.msra.mxu1 %v5075_v56  ;;  %v5103_v14 = vsel %vm443_vm14, %v4541_v17, %v10648_v24  ;;  %v10684_v8 = vperm.slane %v13847_v51, %v13638_v46  ;;  %v1838_v56 = vrot.slane %v13849_v32, 4  ;;  %v2755_v32 = vrot.slane %v10695_v37, 4  ;;  %v13910_v24 = vld [vmem:[#allocation170_spill] sm:$0xff]  ;;  %v13954_v37 = vld [vmem:[#allocation129_spill] sm:$0xff] }
 0x2d5   : > { %5415 = vmatpush.bf16.msra.mxu2 %v5103_v14  ;;  %v1852_v17 = vsel %vm7980_vm3, %v1848_v2, %v1850_v39  ;;  %v13850_v14 = vld [vmem:[#allocation116_spill] sm:$0xff]  ;;  %v624_v39 = vsel %vm13856_vm4, %v13838_v9, %v621_v21  ;;  %v10710_v2 = vperm.slane %v13857_v10, %v13638_v46  ;;  %v13861_v9 = vld [vmem:[#allocation51_spill] sm:$0xff]  ;;  %v4130_v44 = vshrl.u32 %v13954_v37, 16 }
 0x2d6   : > { %13848 = vst [vmem:[#allocation16_spill] sm:$0xff] %v10684_v8  ;;  %v1470_v35 = vrot.slane %v13850_v14, 4  ;;  %v1842_v27 = vsel %vm7980_vm3, %v1838_v56, %v1840_v12  ;;  %v2699_v12 = vrot.slane %v10684_v8, 4  ;;  %v1992_v21 = vrot.slane %v13861_v9, 4  ;;  %v13966_v8 = vld [vmem:[#allocation47_spill] sm:$0xff] }
 0x2d7   : > { %1675 = vrot.lane.b32.xlu1 %v1562_v13, %s7323_s30  ;;  %1647 = vrot.lane.b32.xlu0 %v1479_v40, %s7323_s30  ;;  %v13851_v13 = vld [vmem:[#allocation161_spill] sm:$0xff]  ;;  %v10691_v40 = vpack.i.b16 %v4280_v3, %v4279_v53  ;;  %13858 = vst [vmem:[#allocation62_spill] sm:$0xff] %v10710_v2  ;;  %v10717_v53 = vperm.slane %v13859_v30, %v13638_v46  ;;  %v1994_v51 = vshll.u32 %v624_v39, 16  ;;  %v4346_v9 = vshrl.u32 %v10542_v63, 16 }
 0x2d8   : > { %2095 = vrot.lane.b32.xlu2 %v2032_v7, %s7325_s6  ;;  %v4250_v4 = vshrl.u32 %v13851_v13, 16  ;;  %v2867_v7 = vrot.slane %v10668_v59, 4  ;;  %v13864_v13 = vld [vmem:[#allocation29_spill] sm:$0xff]  ;;  %v10740_v39 = vsel %vm2199_vm8, %v2811_v49, %v10710_v2  ;;  %v13967_v59 = vshrl.u32 %v13966_v8, 16 }
 0x2d9   : > { %13860 = vst [vmem:[#allocation33_spill] sm:$0xff] %v10717_v53  ;;  %v4619_v0 = vunpack.c.l.b16 %v10691_v40  ;;  %v13975_v8 = vld [vmem:[#allocation45_spill] sm:$0xff] }
 0x2da   : > { %v10670_v1 = vpop.permute.xlu2 %4515  ;;  %v4251_v3 = vpack.i.b16 %v4250_v4, %v4249_v36  ;;  %v4316_v36 = vshrl.u32 %v10517_v16, 16  ;;  %v609_v4 = vrot.slane %v13864_v13, 4  ;;  %v10736_v16 = vsel %vm2199_vm8, %v2699_v12, %v10717_v53  ;;  %v13974_v53 = vld [vmem:[#allocation8_spill] sm:$0xff] }
 0x2db   : > { %v5071_v26 = vsel %vm461_vm5, %v13841_v31, %v10670_v1  ;;  %v13854_v31 = vld [vmem:[#allocation155_spill] sm:$0xff] }
 0x2dc   : > { %5388 = vmatpush.bf16.msra.mxu1 %v5071_v26  ;;  %v10702_v26 = vperm.slane %v13854_v31, %v13638_v46  ;;  %v4617_v42 = vunpack.c.l.b16 %v4251_v3  ;;  %v4345_v31 = vshrl.u32 %v10530_v25, 16  ;;  %v1996_v25 = vsel %vm7980_vm3, %v1992_v21, %v1994_v51 }
 0x2dd   : > { %v612_v49 = vsel %vm266_vm12, %v13864_v13, %v609_v4  ;;  %v4618_v54 = vunpack.c.h.b16 %v4251_v3 }
 0x2de   : > { %13855 = vst [vmem:[#allocation49_spill] sm:$0xff] %v10702_v26  ;;  %v4635_v10 = vpack.c.b16 %v4619_v0, %v4617_v42  ;;  %v10764_v63 = vpack.i.b16 %v4346_v9, %v4345_v31  ;;  %v1976_v13 = vshll.u32 %v612_v49, 16 }
 0x2df   : > { %2055 = vrot.lane.b32.xlu1 %v1852_v17, %s7325_s6  ;;  %2051 = vrot.lane.b32.xlu0 %v1842_v27, %s7325_s6  ;;  %v13862_v17 = vld [vmem:[#allocation151_spill] sm:$0xff]  ;;  %v4315_v27 = vshrl.u32 %v10536_v20, 16  ;;  %v13865_v20 = vld [vmem:[#allocation72_spill] sm:$0xff] }
 0x2e0   : > { %1643 = vrot.lane.b32.xlu2 %v1470_v35, %s7323_s30  ;;  %v10725_v14 = vperm.slane %v13862_v17, %v13638_v46  ;;  %v10729_v35 = vsel %vm2199_vm8, %v2867_v7, %v10702_v26  ;;  %v1571_v17 = vrot.slane %v13865_v20, 4 }
 0x2e1   : > { %v10744_v7 = vpack.i.b16 %v10729_v35, %v10740_v39  ;;  %v10746_v30 = vpack.i.b16 %v4316_v36, %v4315_v27  ;;  %v13867_v27 = vld [vmem:[#allocation4_spill] sm:$0xff] }
 0x2e2   : > { %v4518_v56 = vpop.permute.xlu2 %4517  ;;  %13863 = vst [vmem:[#allocation65_spill] sm:$0xff] %v10725_v14  ;;  %v10754_v12 = vsel %vm2199_vm8, %v2755_v32, %v10725_v14  ;;  %v13971_v14 = vld [vmem:[#allocation118_spill] sm:$0xff] }
 0x2e3   : > { %v10762_v0 = vpack.i.b16 %v10754_v12, %v10736_v16  ;;  %v4683_v51 = vunpack.c.l.b16 %v10744_v7  ;;  %v4750_v32 = vunpack.c.l.b16 %v10746_v30 }
 0x2e5   : > { %v4681_v9 = vunpack.c.l.b16 %v10762_v0 }
 0x2e7   : > { %4651 = vrot.lane.b32.xlu1 %v4635_v10, %s7333_s14  ;;  %2087 = vrot.lane.b32.xlu0 %v1996_v25, %s7325_s6  ;;  %v1974_v10 = vrot.slane %v13867_v27, 4  ;;  %v4752_v25 = vunpack.c.l.b16 %v10764_v63  ;;  %v4699_v20 = vpack.c.b16 %v4683_v51, %v4681_v9 }
 0x2e8   : > { %1679 = vrot.lane.b32.xlu2 %v1571_v17, %s7323_s30 }
 0x2e9   : > { %v10767_v21 = vpop.permute.xlu1 %4583  ;;  %v4522_v36 = vpop.permute.xlu0 %4521  ;;  %v4766_v17 = vpack.c.b16 %v4752_v25, %v4750_v32  ;;  %v1978_v49 = vsel %vm7980_vm3, %v1974_v10, %v1976_v13  ;;  %v4620_v32 = vunpack.c.h.b16 %v10691_v40  ;;  %v13870_v13 = vld [vmem:[#allocation123_spill] sm:$0xff]  ;;  %vm4731_vm3 = vcmask 64512  }
 0x2ea   : > { %13866 = vst [vmem:[#allocation145_spill] sm:$0xff] %v10767_v21  ;;  %v4666_v4 = vpop.permute.xlu2 %4665  ;;  %v4540_v42 = vsel %vm461_vm5, %v10642_v29, %v4522_v36  ;;  %v4539_v29 = vsel %vm461_vm5, %v10670_v1, %v4518_v56  ;;  %v1461_v10 = vrot.slane %v13870_v13, 4  ;;  %vm4796_vm5 = vcmask 80896   ;;  %v13873_v13 = vld [vmem:[#allocation34_spill] sm:$0xff] }
 0x2eb   : > { %v5099_v31 = vsel %vm443_vm14, %v4540_v42, %v10767_v21  ;;  %v4636_v25 = vpack.c.b16 %v4620_v32, %v4618_v54 }
 0x2ec   : > { %5416 = vmatpush.bf16.msra.mxu2 %v5099_v31  ;;  %v13869_v31 = vld [vmem:[#allocation125_spill] sm:$0xff] }
 0x2ed   : > { %v1452_v9 = vrot.slane %v13869_v31, 4 }
 0x2ef   : > { %4715 = vrot.lane.b32.xlu1 %v4699_v20, %s7341_s27  ;;  %4784 = vrot.lane.b32.xlu0 %v4766_v17, %s7342_s28 }
 0x2f0   : > { %2083 = vrot.lane.b32.xlu2 %v1978_v49, %s7325_s6  ;;  %v4757_v49 = vunpack.c.h.b16 %v10456_v19  ;;  %v13875_v19 = vld [vmem:[#allocation42_spill] sm:$0xff] }
 0x2f1   : > { %v4664_v36 = vpop.permute.xlu1 %4663  ;;  %v10785_v42 = vpop.permute.xlu0 %4579 }
 0x2f2   : > { %13868 = vst [vmem:[#allocation87_spill] sm:$0xff] %v10785_v42  ;;  %v10787_v27 = vpop.permute.xlu2 %4792  ;;  %v5095_v51 = vsel %vm443_vm14, %v4539_v29, %v10785_v42  ;;  %v4672_v1 = vsel %vm425_vm0, %v4664_v36, %v4666_v4  ;;  %v13871_v29 = vld [vmem:[#allocation35_spill] sm:$0xff]  ;;  %v13872_v4 = vld [vmem:[#allocation100_spill] sm:$0xff] }
 0x2f3   : > { %5417 = vmatpush.bf16.msra.mxu2 %v5095_v51  ;;  %v1544_v54 = vrot.slane %v13872_v4, 4  ;;  %v13877_v4 = vld [vmem:[#allocation165_spill] sm:$0xff]  ;;  %v13895_v42 = vld [vmem:[#allocation83_spill] sm:$0xff] }
 0x2f7   : > { %1639 = vrot.lane.b32.xlu1 %v1461_v10, %s7323_s30  ;;  %1635 = vrot.lane.b32.xlu0 %v1452_v9, %s7323_s30  ;;  %v4755_v9 = vunpack.c.h.b16 %v10450_v33  ;;  %v1535_v10 = vrot.slane %v13873_v13, 4  ;;  %v13879_v13 = vld [vmem:[#allocation103_spill] sm:$0xff] }
 0x2f8   : > { %4653 = vrot.lane.b32.xlu2 %v4636_v25, %s7333_s14 }
 0x2f9   : > { %v4730_v56 = vpop.permute.xlu1 %4729  ;;  %v4728_v20 = vpop.permute.xlu0 %4727  ;;  %v4769_v25 = vpack.c.b16 %v4757_v49, %v4755_v9 }
 0x2fa   : > { %v4662_v40 = vpop.permute.xlu2 %4661  ;;  %v4737_v17 = vsel %vm4731_vm3, %v4728_v20, %v4730_v56  ;;  %v5163_v3 = vsel %vm4731_vm3, %v4672_v1, %v4728_v20  ;;  %v13874_v56 = vld [vmem:[#allocation39_spill] sm:$0xff]  ;;  %v3149_v20 = vrot.slane %v13875_v19, 4 }
 0x2fb   : > { %v5337_v51 = vand.u32 %v13871_v29, %v5163_v3  ;;  %v5187_v32 = vsel %vm4796_vm5, %v4737_v17, %v10787_v27  ;;  %v3261_v1 = vrot.slane %v13874_v56, 4  ;;  %v13876_v17 = vld [vmem:[#allocation43_spill] sm:$0xff]  ;;  %v13881_v56 = vld [vmem:[#allocation36_spill] sm:$0xff] }
 0x2fc   : > { %v5339_v31 = vand.u32 %v13871_v29, %v5187_v32  ;;  %v3317_v3 = vrot.slane %v13876_v17, 4  ;;  %v10829_v19 = vsel %vm2199_vm8, %v13881_v56, %v3149_v20  ;;  %v13883_v17 = vld [vmem:[#allocation97_spill] sm:$0xff]  ;;  %v4684_v56 = vunpack.c.h.b16 %v10744_v7 }
 0x2fd   : > { %5470 = vmatpush.bf16.msrb.mxu0 %v5337_v51  ;;  %13882 = vst [vmem:[#allocation109_spill] sm:$0xff] %v10829_v19 }
 0x2fe   : > { %5499 = vmatpush.bf16.msrb.mxu1 %v5339_v31  ;;  %v13878_v31 = vld [vmem:[#allocation69_spill] sm:$0xff]  ;;  %v10833_v57 = vsel %vm2199_vm8, %v13883_v17, %v3317_v3 }
 0x2ff   : > { %1667 = vrot.lane.b32.xlu1 %v1544_v54, %s7323_s30  ;;  %1663 = vrot.lane.b32.xlu0 %v1535_v10, %s7323_s30  ;;  %v3205_v9 = vrot.slane %v13878_v31, 4  ;;  %v10823_v54 = vsel %vm2199_vm8, %v13879_v13, %v3261_v1  ;;  %13884 = vst [vmem:[#allocation106_spill] sm:$0xff] %v10833_v57  ;;  %v13889_v13 = vld [vmem:[#allocation99_spill] sm:$0xff] }
 0x300   : > { %4790 = vrot.lane.b32.xlu2 %v4769_v25, %s7342_s28  ;;  %13880 = vst [vmem:[#allocation98_spill] sm:$0xff] %v10823_v54  ;;  %v10839_v1 = vpack.i.b16 %v10833_v57, %v10823_v54  ;;  %v13911_v57 = vld [vmem:[#allocation127_spill] sm:$0xff] }
 0x301   : > { %v10814_v33 = vpop.permute.xlu1 %4659  ;;  %v4602_v51 = vpop.permute.xlu0 %4601 }
 0x302   : > { %v10816_v32 = vpop.permute.xlu2 %4794  ;;  %v4608_v49 = vsel %vm443_vm14, %v13877_v4, %v4602_v51  ;;  %v1632_v51 = vrot.slane %v13885_v43, 4  ;;  %v13886_v4 = vld [vmem:[#allocation28_spill] sm:$0xff]  ;;  %13887 = vst [vmem:[#allocation138_spill] sm:$0xff] %v10839_v1 }
 0x303   : > { %v5139_v10 = vsel %vm425_vm0, %v4608_v49, %v4664_v36  ;;  %v1618_v31 = vrot.slane %v13886_v4, 4  ;;  %v13888_v36 = vld [vmem:[#allocation124_spill] sm:$0xff]  ;;  %v4682_v4 = vunpack.c.h.b16 %v10762_v0 }
 0x304   : > { %v5335_v25 = vand.u32 %v13871_v29, %v5139_v10  ;;  %v1526_v49 = vrot.slane %v13888_v36, 4  ;;  %v10844_v10 = vsel %vm2199_vm8, %v13889_v13, %v3205_v9  ;;  %v4821_v9 = vunpack.c.l.b16 %v10839_v1  ;;  %v13892_v36 = vld [vmem:[#allocation126_spill] sm:$0xff] }
 0x305   : > { %13890 = vst [vmem:[#allocation46_spill] sm:$0xff] %v10844_v10  ;;  %v10850_v43 = vpack.i.b16 %v10844_v10, %v10829_v19  ;;  %v4700_v13 = vpack.c.b16 %v4684_v56, %v4682_v4  ;;  %v13896_v56 = vld [vmem:[#allocation50_spill] sm:$0xff]  ;;  %v4190_v10 = vshrl.u32 %v13910_v24, 16  ;;  %v13912_v19 = vld [vmem:[#allocation169_spill] sm:$0xff]  ;;  %v2531_v24 = vrot.slane %v10898_v38, 4 }
 0x306   : > { %5441 = vmatpush.bf16.msra.mxu3 %v5335_v25  ;;  %v4671_v25 = vsel %vm425_vm0, %v10814_v33, %v4662_v40  ;;  %v10913_v55 = vperm.slane %v13912_v19, %v13638_v46  ;;  %v13916_v19 = vld [vmem:[#allocation157_spill] sm:$0xff]  ;;  %v4285_v38 = vshrl.u32 %v10740_v39, 16  ;;  %v13923_v39 = vld [vmem:[#allocation96_spill] sm:$0xff] }
 0x307   : > { %1695 = vrot.lane.b32.xlu1 %v1632_v51, %s7323_s30  ;;  %1691 = vrot.lane.b32.xlu0 %v1618_v31, %s7323_s30  ;;  %13891 = vst [vmem:[#allocation48_spill] sm:$0xff] %v10850_v43  ;;  %v4819_v31 = vunpack.c.l.b16 %v10850_v43  ;;  %v1498_v43 = vrot.slane %v13909_v23, 4 }
 0x308   : > { %1659 = vrot.lane.b32.xlu2 %v1526_v49, %s7323_s30  ;;  %v1553_v49 = vrot.slane %v13892_v36, 4  ;;  %v1215_v36 = vrot.slane %v13895_v42, 4  ;;  %13913 = vst [vmem:[#allocation86_spill] sm:$0xff] %v10913_v55 }
 0x309   : > { %v4726_v20 = vpop.permute.xlu1 %4725  ;;  %v4724_v3 = vpop.permute.xlu0 %4723  ;;  %v4833_v22 = vpack.c.b16 %v4821_v9, %v4819_v31  ;;  %v1152_v9 = vrot.slane %v13896_v56, 4 }
 0x30a   : > { %v10857_v17 = vpop.permute.xlu2 %2075  ;;  %v5159_v51 = vsel %vm4731_vm3, %v4671_v25, %v4724_v3 }
 0x30b   : > { %5471 = vmatpush.bf16.msrb.mxu0 %v5159_v51  ;;  %v13893_v51 = vld [vmem:[#allocation147_spill] sm:$0xff] }
 0x30c   : > { %v4558_v0 = vunpack.c.h.b16 %v13893_v51  ;;  %v13898_v51 = vld [vmem:[#allocation168_spill] sm:$0xff] }
 0x30d   : > { %v10886_v60 = vperm.slane %v13898_v51, %v13638_v46  ;;  %v13908_v51 = vld [vmem:[#allocation37_spill] sm:$0xff] }
 0x30e   : > { %v4574_v4 = vpack.c.b16 %v4560_v45, %v4558_v0  ;;  %v13900_v45 = vld [vmem:[#allocation156_spill] sm:$0xff]  ;;  %v1517_v1 = vrot.slane %v13908_v51, 4 }
 0x30f   : > { %4717 = vrot.lane.b32.xlu1 %v4700_v13, %s7341_s27  ;;  %4853 = vrot.lane.b32.xlu0 %v4833_v22, %s7343_s12  ;;  %13899 = vst [vmem:[#allocation144_spill] sm:$0xff] %v10886_v60  ;;  %v10892_v0 = vperm.slane %v13900_v45, %v13638_v46 }
 0x310   : > { %1671 = vrot.lane.b32.xlu2 %v1553_v49, %s7323_s30  ;;  %v13897_v49 = vld [vmem:[#allocation172_spill] sm:$0xff] }
 0x311   : > { %v10866_v7 = vpop.permute.xlu1 %2047  ;;  %v10868_v40 = vpop.permute.xlu0 %2043  ;;  %v4220_v13 = vshrl.u32 %v13897_v49, 16  ;;  %13901 = vst [vmem:[#allocation19_spill] sm:$0xff] %v10892_v0  ;;  %v13906_v49 = vld [vmem:[#allocation166_spill] sm:$0xff]  ;;  %v2587_v54 = vrot.slane %v10892_v0, 4 }
 0x312   : > { %v10870_v25 = vpop.permute.xlu2 %4657  ;;  %v10902_v21 = vperm.slane %v13906_v49, %v13638_v46  ;;  %v10927_v49 = vperm.slane %v13916_v19, %v13638_v46 }
 0x314   : > { %13907 = vst [vmem:[#allocation53_spill] sm:$0xff] %v10902_v21 }
 0x315   : > { %13917 = vst [vmem:[#allocation88_spill] sm:$0xff] %v10927_v49 }
 0x317   : > { %1323 = vrot.lane.b32.xlu1 %v1215_v36, %s7326_s7  ;;  %1295 = vrot.lane.b32.xlu0 %v1152_v9, %s7326_s7  ;;  %v13902_v36 = vld [vmem:[#allocation64_spill] sm:$0xff]  ;;  %v13903_v9 = vld [vmem:[#allocation171_spill] sm:$0xff] }
 0x318   : > { %4593 = vrot.lane.b32.xlu2 %v4574_v4, %s7334_s23  ;;  %v4189_v56 = vshrl.u32 %v13902_v36, 16  ;;  %v4219_v4 = vshrl.u32 %v13903_v9, 16  ;;  %v2643_v36 = vrot.slane %v10886_v60, 4  ;;  %v1133_v9 = vrot.slane %v13911_v57, 4  ;;  %v13914_v57 = vld [vmem:[#allocation167_spill] sm:$0xff] }
 0x319   : > { %v10879_v22 = vpop.permute.xlu1 %4655  ;;  %v10881_v31 = vpop.permute.xlu0 %2079 }
 0x31a   : > { %v10888_v42 = vpop.permute.xlu2 %2193  ;;  %v10907_v45 = vpack.i.b16 %v4220_v13, %v4219_v4  ;;  %v4191_v23 = vpack.i.b16 %v4190_v10, %v4189_v56  ;;  %v2475_v13 = vrot.slane %v10902_v21, 4  ;;  %v10923_v4 = vperm.slane %v13914_v57, %v13638_v46  ;;  %v13926_v21 = vld [vmem:[#allocation2_spill] sm:$0xff] }
 0x31b   : > { %v4736_v56 = vsel %vm4731_vm3, %v4724_v3, %v4726_v20  ;;  %v10951_v58 = vsel %vm2199_vm8, %v2643_v36, %v10913_v55  ;;  %v4255_v3 = vshrl.u32 %v10736_v16, 16  ;;  %v4256_v16 = vshrl.u32 %v10754_v12, 16  ;;  %v13953_v55 = vld [vmem:[#allocation52_spill] sm:$0xff] }
 0x31c   : > { %13915 = vst [vmem:[#allocation67_spill] sm:$0xff] %v10923_v4  ;;  %v4615_v51 = vunpack.c.l.b16 %v10907_v45  ;;  %v1105_v60 = vrot.slane %v13926_v21, 4  ;;  %v4753_v21 = vunpack.c.h.b16 %v10764_v63  ;;  %v3037_v63 = vrot.slane %v10495_v48, 4 }
 0x31d   : > { %v872_v47 = vshrl.u32 %v13953_v55, 16 }
 0x31f   : > { %1655 = vrot.lane.b32.xlu1 %v1517_v1, %s7323_s30  ;;  %1651 = vrot.lane.b32.xlu0 %v1498_v43, %s7323_s30  ;;  %v4802_v1 = vsel %vm4796_vm5, %v10787_v27, %v10816_v32  ;;  %v13920_v27 = vld [vmem:[#allocation159_spill] sm:$0xff] }
 0x320   : > { %1291 = vrot.lane.b32.xlu2 %v1133_v9, %s7326_s7  ;;  %v4286_v9 = vshrl.u32 %v10729_v35, 16  ;;  %v10947_v32 = vperm.slane %v13920_v27, %v13638_v46  ;;  %v4613_v35 = vunpack.c.l.b16 %v4191_v23  ;;  %v10963_v27 = vsel %vm2199_vm8, %v2587_v54, %v10927_v49 }
 0x321   : > { %v10932_v43 = vpop.permute.xlu1 %4857  ;;  %v10934_v10 = vpop.permute.xlu0 %4788 }
 0x322   : > { %13918 = vst [vmem:[#allocation73_spill] sm:$0xff] %v10932_v43  ;;  %v10939_v57 = vpop.permute.xlu2 %2039  ;;  %v5183_v19 = vsel %vm4796_vm5, %v4736_v56, %v10934_v10  ;;  %v5211_v5 = vsel %vm4861_vm1, %v4802_v1, %v10932_v43  ;;  %v13922_v56 = vld [vmem:[#allocation9_spill] sm:$0xff]  ;;  %v10959_v1 = vsel %vm2199_vm8, %v2475_v13, %v10923_v4  ;;  %v4633_v36 = vpack.c.b16 %v4615_v51, %v4613_v35  ;;  %v13952_v4 = vld [vmem:[#allocation163_spill] sm:$0xff] }
 0x323   : > { %13919 = vst [vmem:[#allocation5_spill] sm:$0xff] %v10934_v10  ;;  %5500 = vmatpush.bf16.msrb.mxu1 %v5183_v19  ;;  %v5341_v20 = vand.u32 %v13871_v29, %v5211_v5  ;;  %v1599_v0 = vrot.slane %v13922_v56, 4  ;;  %v10967_v5 = vpack.i.b16 %v10951_v58, %v10963_v27  ;;  %v10970_v19 = vpack.i.b16 %v4286_v9, %v4285_v38 }
 0x324   : > { %13921 = vst [vmem:[#allocation63_spill] sm:$0xff] %v10947_v32  ;;  %v1234_v56 = vrot.slane %v13923_v39, 4  ;;  %v10975_v13 = vsel %vm2199_vm8, %v2531_v24, %v10947_v32  ;;  %v10983_v51 = vpack.i.b16 %v4256_v16, %v4255_v3  ;;  %v4670_v24 = vsel %vm425_vm0, %v10879_v22, %v10870_v25 }
 0x325   : > { %5528 = vmatpush.bf16.msrb.mxu2 %v5341_v20  ;;  %v10981_v54 = vpack.i.b16 %v10975_v13, %v10959_v1  ;;  %v4679_v9 = vunpack.c.l.b16 %v10967_v5  ;;  %v13976_v10 = vshrl.u32 %v13975_v8, 16  ;;  %v13982_v8 = vld [vmem:[#allocation90_spill] sm:$0xff] }
 0x326   : > { %13924 = vst [vmem:[#allocation82_spill] sm:$0xff] %v10983_v51 }
 0x327   : > { %4647 = vrot.lane.b32.xlu1 %v4633_v36, %s7333_s14  ;;  %1687 = vrot.lane.b32.xlu0 %v1599_v0, %s7323_s30  ;;  %v4748_v0 = vunpack.c.l.b16 %v10970_v19  ;;  %v4677_v3 = vunpack.c.l.b16 %v10981_v54  ;;  %v4746_v36 = vunpack.c.l.b16 %v10983_v51 }
 0x328   : > { %1327 = vrot.lane.b32.xlu2 %v1234_v56, %s7326_s7  ;;  %v13925_v56 = vld [vmem:[#allocation76_spill] sm:$0xff] }
 0x329   : > { %v10986_v38 = vpop.permute.xlu1 %2035  ;;  %v10988_v12 = vpop.permute.xlu0 %4719  ;;  %v4697_v16 = vpack.c.b16 %v4679_v9, %v4677_v3  ;;  %v4764_v39 = vpack.c.b16 %v4748_v0, %v4746_v36  ;;  %v1580_v29 = vrot.slane %v13925_v56, 4  ;;  %v4614_v9 = vunpack.c.h.b16 %v4191_v23  ;;  %v13927_v0 = vld [vmem:[#allocation79_spill] sm:$0xff] }
 0x32a   : > { %v10995_v20 = vpop.permute.xlu2 %2067  ;;  %v5155_v35 = vsel %vm4731_vm3, %v4670_v24, %v10988_v12  ;;  %v1114_v3 = vrot.slane %v13927_v0, 4  ;;  %v13928_v23 = vld [vmem:[#allocation15_spill] sm:$0xff]  ;;  %v13929_v0 = vld [vmem:[#allocation41_spill] sm:$0xff] }
 0x32b   : > { %5472 = vmatpush.bf16.msrb.mxu0 %v5155_v35  ;;  %v4616_v35 = vunpack.c.h.b16 %v10907_v45  ;;  %v4751_v45 = vunpack.c.h.b16 %v10746_v30  ;;  %v1197_v56 = vrot.slane %v13928_v23, 4  ;;  %v2925_v30 = vrot.slane %v10506_v18, 4  ;;  %v13930_v23 = vld [vmem:[#allocation101_spill] sm:$0xff] }
 0x32c   : > { %v11053_v18 = vsel %vm2199_vm8, %v10415_v28, %v3037_v63  ;;  %v13942_v63 = vld [vmem:[#allocation57_spill] sm:$0xff] }
 0x32d   : > { %v4634_v36 = vpack.c.b16 %v4616_v35, %v4614_v9  ;;  %v1188_v35 = vrot.slane %v13929_v0, 4  ;;  %v4767_v9 = vpack.c.b16 %v4753_v21, %v4751_v45  ;;  %v13932_v0 = vld [vmem:[#allocation91_spill] sm:$0xff]  ;;  %v11049_v48 = vsel %vm2199_vm8, %v10393_v61, %v2925_v30  ;;  %13934 = vst [vmem:[#allocation55_spill] sm:$0xff] %v11053_v18 }
 0x32e   : > { %13933 = vst [vmem:[#allocation70_spill] sm:$0xff] %v11049_v48  ;;  %v4680_v30 = vunpack.c.h.b16 %v10967_v5  ;;  %v13945_v5 = vld [vmem:[#allocation94_spill] sm:$0xff] }
 0x32f   : > { %4711 = vrot.lane.b32.xlu1 %v4697_v16, %s7341_s27  ;;  %4780 = vrot.lane.b32.xlu0 %v4764_v39, %s7342_s28 }
 0x330   : > { %1683 = vrot.lane.b32.xlu2 %v1580_v29, %s7323_s30  ;;  %s7345_s30 = smov 18  }
 0x331   : > { %v11005_v25 = vpop.permute.xlu1 %2063  ;;  %v11007_v43 = vpop.permute.xlu0 %2059 }
 0x332   : > { %v11009_v24 = vpop.permute.xlu2 %2095 }
 0x337   : > { %1287 = vrot.lane.b32.xlu1 %v1114_v3, %s7326_s7  ;;  %1283 = vrot.lane.b32.xlu0 %v1105_v60, %s7326_s7  ;;  %v2981_v60 = vrot.slane %v10485_v41, 4 }
 0x338   : > { %4649 = vrot.lane.b32.xlu2 %v4634_v36, %s7333_s14 }
 0x339   : > { %v11017_v29 = vpop.permute.xlu1 %2091  ;;  %v11019_v16 = vpop.permute.xlu0 %2071  ;;  %v11043_v41 = vsel %vm2199_vm8, %v10423_v50, %v2981_v60 }
 0x33a   : > { %v11021_v39 = vpop.permute.xlu2 %1643  ;;  %13931 = vst [vmem:[#allocation10_spill] sm:$0xff] %v11043_v41  ;;  %v11059_v50 = vpack.i.b16 %v11043_v41, %v11049_v48 }
 0x33c   : > { %13937 = vst [vmem:[#allocation54_spill] sm:$0xff] %v11059_v50 }
 0x33f   : > { %1315 = vrot.lane.b32.xlu1 %v1197_v56, %s7326_s7  ;;  %1311 = vrot.lane.b32.xlu0 %v1188_v35, %s7326_s7  ;;  %v3093_v56 = vrot.slane %v10441_v11, 4  ;;  %v1280_v35 = vrot.slane %v13932_v0, 4 }
 0x340   : > { %4786 = vrot.lane.b32.xlu2 %v4767_v9, %s7342_s28  ;;  %v13935_v9 = vld [vmem:[#allocation40_spill] sm:$0xff] }
 0x341   : > { %v11031_v3 = vpop.permute.xlu1 %4721  ;;  %v4598_v36 = vpop.permute.xlu0 %4597  ;;  %v11064_v11 = vsel %vm2199_vm8, %v10411_v62, %v3093_v56  ;;  %v4815_v62 = vunpack.c.l.b16 %v11059_v50  ;;  %v4678_v56 = vunpack.c.h.b16 %v10981_v54 }
 0x342   : > { %v11035_v32 = vpop.permute.xlu2 %1679  ;;  %v4607_v45 = vsel %vm443_vm14, %v13930_v23, %v4598_v36  ;;  %v1271_v36 = vrot.slane %v13935_v9, 4  ;;  %13938 = vst [vmem:[#allocation71_spill] sm:$0xff] %v11064_v11  ;;  %v11070_v61 = vpack.i.b16 %v11064_v11, %v11053_v18 }
 0x343   : > { %v5135_v21 = vsel %vm425_vm0, %v4607_v45, %v10814_v33  ;;  %v13936_v33 = vld [vmem:[#allocation3_spill] sm:$0xff]  ;;  %v701_v45 = vshrl.u32 %v13942_v63, 16  ;;  %v682_v63 = vshrl.u32 %v13945_v5, 16  ;;  %v4554_v5 = vunpack.c.h.b16 %v13952_v4 }
 0x344   : > { %5442 = vmatpush.bf16.msra.mxu3 %v5135_v21  ;;  %v1179_v23 = vrot.slane %v13936_v33, 4  ;;  %13939 = vst [vmem:[#allocation112_spill] sm:$0xff] %v11070_v61  ;;  %v4817_v0 = vunpack.c.l.b16 %v11070_v61  ;;  %v13944_v33 = vld [vmem:[#allocation78_spill] sm:$0xff]  ;;  %v13946_v61 = vld [vmem:[#allocation77_spill] sm:$0xff]  ;;  %v4436_v4 = vshrl.u32 %v13777_v15, 16 }
 0x345   : > { %v703_v11 = vrot.slane %v701_v45, 4  ;;  %v13947_v48 = vrot.slane %v13946_v61, 5  ;;  %v13949_v45 = vld [vmem:[#allocation164_spill] sm:$0xff]  ;;  %v684_v41 = vrot.slane %v682_v63, 4  ;;  %v13955_v61 = vld [vmem:[#allocation21_spill] sm:$0xff] }
 0x346   : > { %v4831_v18 = vpack.c.b16 %v4817_v0, %v4815_v62  ;;  %v4556_v62 = vunpack.c.h.b16 %v13949_v45  ;;  %v13950_v0 = vld [vmem:[#allocation102_spill] sm:$0xff]  ;;  %v4437_v2 = vpack.i.b16 0, %v4436_v4  ;;  %v4195_v4 = vshrl.u32 %v10959_v1, 16 }
 0x347   : > { %1343 = vrot.lane.b32.xlu1 %v1280_v35, %s7326_s7  ;;  %1339 = vrot.lane.b32.xlu0 %v1271_v36, %s7326_s7  ;;  %v13943_v35 = vld [vmem:[#allocation61_spill] sm:$0xff]  ;;  %v4698_v36 = vpack.c.b16 %v4680_v30, %v4678_v56  ;;  %v13948_v30 = vld [vmem:[#allocation44_spill] sm:$0xff] }
 0x348   : > { %1307 = vrot.lane.b32.xlu2 %v1179_v23, %s7326_s7  ;;  %v1206_v9 = vrot.slane %v13943_v35, 4  ;;  %v836_v23 = vrot.slane %v13944_v33, 4  ;;  %v704_v56 = vor.u32 %v703_v11, %v13948_v30  ;;  %v4572_v11 = vpack.c.b16 %v4556_v62, %v4554_v5 }
 0x349   : > { %v11072_v28 = vpop.permute.xlu1 %1675  ;;  %v11074_v60 = vpop.permute.xlu0 %1647 }
 0x34a   : > { %13940 = vst [vmem:[#allocation24_spill] sm:$0xff] %v11072_v28  ;;  %v11078_v21 = vpop.permute.xlu2 %2083  ;;  %v837_v35 = vor.u32 %v836_v23, %v13947_v48  ;;  %v705_v46 = vrot.slane %v704_v56, 4  ;;  %v4160_v48 = vshrl.u32 %v13955_v61, 16  ;;  %v13956_v23 = vld [vmem:[#allocation128_spill] sm:$0xff]  ;;  %v13964_v61 = vld [vmem:[#allocation6_spill] sm:$0xff] }
 0x34b   : > { %13941 = vst [vmem:[#allocation66_spill] sm:$0xff] %v11074_v60  ;;  %v4129_v30 = vshrl.u32 %v13956_v23, 16  ;;  %v13959_v56 = vld [vmem:[#allocation120_spill] sm:$0xff]  ;;  %v2195_v23 = vrot.slane %v10888_v42, 4  ;;  %v13972_v60 = vld [vmem:[#allocation30_spill] sm:$0xff] }
 0x34c   : > { %v685_v62 = vor.u32 %v684_v41, %v13959_v56  ;;  %v11134_v41 = vrot.slane %v13967_v59, 4  ;;  %v4546_v59 = vunpack.c.h.b16 %v13982_v8  ;;  %v4888_v8 = vunpack.c.l.b16 %v4437_v2 }
 0x34f   : > { %4713 = vrot.lane.b32.xlu1 %v4698_v36, %s7341_s27  ;;  %4849 = vrot.lane.b32.xlu0 %v4831_v18, %s7343_s12  ;;  %v4159_v36 = vshrl.u32 %v13950_v0, 16  ;;  %v13951_v18 = vld [vmem:[#allocation92_spill] sm:$0xff]  ;;  %v11118_v0 = vrot.slane %v872_v47, 4 }
 0x350   : > { %1319 = vrot.lane.b32.xlu2 %v1206_v9, %s7326_s7  ;;  %v853_v49 = vshrl.u32 %v13951_v18, 16  ;;  %v838_v9 = vrot.slane %v837_v35, 4  ;;  %v665_v35 = vrot.slane %v13824_v6, 4  ;;  %v13961_v18 = vld [vmem:[#allocation13_spill] sm:$0xff]  ;;  %v13968_v47 = vld [vmem:[#allocation108_spill] sm:$0xff] }
 0x351   : > { %v11089_v50 = vpop.permute.xlu1 %2055  ;;  %v11091_v54 = vpop.permute.xlu0 %2051  ;;  %v11106_v63 = vpack.i.b16 %v4160_v48, %v4159_v36  ;;  %v4131_v36 = vpack.i.b16 %v4130_v44, %v4129_v30  ;;  %v13965_v48 = vshrl.u32 %v13964_v61, 16  ;;  %v760_v56 = vrot.slane %v13968_v47, 4  ;;  %v13969_v30 = vld [vmem:[#allocation74_spill] sm:$0xff] }
 0x352   : > { %v4654_v33 = vpop.permute.xlu2 %4653  ;;  %v11109_v45 = vrot.slane %v853_v49, 4  ;;  %v13963_v49 = vld [vmem:[#allocation105_spill] sm:$0xff]  ;;  %v11150_v47 = vrot.slane %v13976_v10, 4  ;;  %v14002_v1 = vor.u32 %v11118_v0, %v13974_v53  ;;  %v2126_v0 = vrot.slane %v11017_v29, 4 }
 0x353   : > { %v798_v5 = vrot.slane %v13963_v49, 4  ;;  %v4611_v44 = vunpack.c.l.b16 %v11106_v63  ;;  %v779_v49 = vrot.slane %v13971_v14, 4  ;;  %v11159_v14 = vsel %vm13980_vm15, %v10888_v42, %v2195_v23 }
 0x354   : > { %v856_v61 = vor.u32 %v11109_v45, %v13972_v60  ;;  %v686_v60 = vrot.slane %v685_v62, 4  ;;  %v13981_v45 = vld [vmem:[#allocation59_spill] sm:$0xff]  ;;  %v13985_v23 = vpack.i.b16 0, %v13777_v15 }
 0x357   : > { %976 = vrot.lane.b32.xlu1 %v838_v9, %s7330_s11  ;;  %948 = vrot.lane.b32.xlu0 %v705_v46, %s7330_s11  ;;  %v13962_v9 = vshrl.u32 %v13961_v18, 16  ;;  %v13970_v18 = vrot.slane %v13969_v30, 5  ;;  %v4609_v30 = vunpack.c.l.b16 %v4131_v36 }
 0x358   : > { %4589 = vrot.lane.b32.xlu2 %v4572_v11, %s7334_s23  ;;  %v11129_v11 = vrot.slane %v13965_v48, 4  ;;  %v13973_v48 = vld [vmem:[#allocation56_spill] sm:$0xff] }
 0x359   : > { %v11112_v55 = vpop.permute.xlu1 %4651  ;;  %v11114_v37 = vpop.permute.xlu0 %2087  ;;  %v11124_v6 = vrot.slane %v13962_v9, 4  ;;  %v11140_v9 = vor.u32 %v665_v35, %v13970_v18  ;;  %v1170_v28 = vrot.slane %v13973_v48, 4  ;;  %v13978_v35 = vld [vmem:[#allocation38_spill] sm:$0xff]  ;;  %v4631_v10 = vpack.c.b16 %v4611_v44, %v4609_v30 }
 0x35a   : > { %13957 = vst [vmem:[#allocation110_spill] sm:$0xff] %v11112_v55  ;;  %v11120_v46 = vpop.permute.xlu2 %4790  ;;  %v13979_v18 = vshrl.u32 %v13978_v35, 16  ;;  %v4735_v35 = vsel %vm4731_vm3, %v10988_v12, %v11031_v3  ;;  %v4669_v62 = vsel %vm425_vm0, %v11112_v55, %v4654_v33  ;;  %v11178_v44 = vunpack.c.h.b16 %v13985_v23  ;;  %v13989_v23 = vld [vmem:[#allocation18_spill] sm:$0xff] }
 0x35b   : > { %13958 = vst [vmem:[#allocation75_spill] sm:$0xff] %v11114_v37  ;;  %v4612_v33 = vunpack.c.h.b16 %v11106_v63  ;;  %v4548_v48 = vunpack.c.h.b16 %v13989_v23  ;;  %v4225_v55 = vshrl.u32 %v10963_v27, 16  ;;  %v13994_v63 = vld [vmem:[#allocation104_spill] sm:$0xff]  ;;  %v857_v23 = vrot.slane %v856_v61, 4 }
 0x35c   : > { %13960 = vst [vmem:[#allocation143_spill] sm:$0xff] %v11120_v46  ;;  %v13977_v46 = vld [vmem:[#allocation58_spill] sm:$0xff]  ;;  %v11155_v37 = vrot.slane %v13979_v18, 4  ;;  %v4226_v18 = vshrl.u32 %v10951_v58, 16  ;;  %v2102_v61 = vrot.slane %v10868_v40, 4 }
 0x35d   : > { %v1161_v26 = vrot.slane %v13977_v46, 4  ;;  %v4610_v46 = vunpack.c.h.b16 %v4131_v36  ;;  %13986 = vst [vmem:[#allocation26_spill] sm:$0xff] %v11178_v44  ;;  %v4116_v36 = vrot.slane %v11159_v14, 4  ;;  %v14021_v44 = vld [vmem:[#allocation14_spill] sm:$0xff] }
 0x35f   : > { %1303 = vrot.lane.b32.xlu1 %v1170_v28, %s7326_s7  ;;  %1299 = vrot.lane.b32.xlu0 %v1161_v26, %s7326_s7  ;;  %v4889_v26 = vunpack.c.h.b16 %v4437_v2  ;;  %v4117_v27 = vsel %vm2199_vm8, 0, %v4116_v36 }
 0x360   : > { %944 = vrot.lane.b32.xlu2 %v686_v60, %s7330_s11  ;;  %v13988_v60 = vld [vmem:[#allocation130_spill] sm:$0xff] }
 0x361   : > { %v11170_v42 = vpop.permute.xlu1 %4715  ;;  %v11172_v28 = vpop.permute.xlu0 %4784  ;;  %v723_v15 = vor.u32 %v11129_v11, %v13988_v60  ;;  %v11205_v2 = vpack.c.b16 %v4889_v26, %v4889_v26  ;;  %v4196_v11 = vshrl.u32 %v10975_v13, 16  ;;  %v11222_v26 = vpack.c.b16 %v4548_v48, %v4546_v59 }
 0x362   : > { %13983 = vst [vmem:[#allocation17_spill] sm:$0xff] %v11170_v42  ;;  %v11181_v30 = vpop.permute.xlu2 %1659  ;;  %v5151_v12 = vsel %vm4731_vm3, %v4669_v62, %v11170_v42  ;;  %v5179_v3 = vsel %vm4796_vm5, %v4735_v35, %v11172_v28  ;;  %v13990_v62 = vld [vmem:[#allocation114_spill] sm:$0xff]  ;;  %v13992_v35 = vld [vmem:[#allocation131_spill] sm:$0xff] }
 0x363   : > { %13984 = vst [vmem:[#allocation142_spill] sm:$0xff] %v11172_v28  ;;  %5473 = vmatpush.bf16.msrb.mxu0 %v5151_v12  ;;  %5501 = vmatpush.bf16.msrb.mxu1 %v5179_v3  ;;  %v13991_v42 = vrot.slane %v13990_v62, 5  ;;  %v742_v58 = vor.u32 %v11124_v6, %v13992_v35  ;;  %v13993_v12 = vld [vmem:[#allocation27_spill] sm:$0xff]  ;;  %v13995_v28 = vrot.slane %v13994_v63, 5  ;;  %v11225_v36 = vpack.i.b16 %v4196_v11, %v4195_v4 }
 0x364   : > { %13987 = vst [vmem:[#allocation84_spill] sm:$0xff] %v11181_v30  ;;  %v1262_v3 = vrot.slane %v13993_v12, 4  ;;  %v2112_v4 = vrot.slane %v11005_v25, 4  ;;  %v2118_v35 = vrot.slane %v10857_v17, 4  ;;  %v11259_v62 = vrot.slane %v14002_v1, 4 }
 0x365   : > { %v11196_v30 = vor.u32 %v779_v49, %v13991_v42  ;;  %v11203_v51 = vor.u32 %v798_v5, %v13995_v28  ;;  %v11211_v49 = vpack.i.b16 %v4226_v18, %v4225_v55  ;;  %v13996_v42 = vld [vmem:[#allocation107_spill] sm:$0xff]  ;;  %v11218_v5 = vpack.c.b16 %v4612_v33, %v4610_v46  ;;  %13998 = vst [vmem:[#allocation60_spill] sm:$0xff] %v11222_v26 }
 0x366   : > { %v13997_v60 = vrot.slane %v13996_v42, 5  ;;  %v11220_v28 = vpack.c.b16 %v4888_v8, %v4888_v8  ;;  %v11228_v55 = vrot.slane %v742_v58, 4  ;;  %v11230_v18 = vrot.slane %v723_v15, 4  ;;  %v13999_v58 = vld [vmem:[#allocation133_spill] sm:$0xff] }
 0x367   : > { %4643 = vrot.lane.b32.xlu1 %v4631_v10, %s7333_s14  ;;  %1335 = vrot.lane.b32.xlu0 %v1262_v3, %s7326_s7  ;;  %v4118_v10 = vrot.slane %v4117_v27, 4  ;;  %v2120_v46 = vrot.slane %v10881_v31, 4  ;;  %v4744_v15 = vunpack.c.l.b16 %v11211_v49  ;;  %v800_v8 = vrot.slane %v11203_v51, 4  ;;  %v14000_v3 = vld [vmem:[#allocation93_spill] sm:$0xff]  ;;  %v14001_v27 = vld [vmem:[#allocation135_spill] sm:$0xff] }
 0x368   : > { %v11215_v6 = vor.u32 %v760_v56, %v13997_v60  ;;  %v2104_v56 = vrot.slane %v10866_v7, 4  ;;  %980 = vrot.lane.b32.xlu2 %v857_v23, %s7330_s11  ;;  %v932_v12 = vor.u32 %v11155_v37, %v13999_v58  ;;  %v913_v63 = vor.u32 %v11150_v47, %v14000_v3  ;;  %v14014_v51 = vld [vmem:[#allocation5_spill] sm:$0xff] }
 0x369   : > { %v11236_v59 = vpop.permute.xlu1 %1639  ;;  %v11238_v48 = vpop.permute.xlu0 %1635  ;;  %v894_v11 = vor.u32 %v11134_v41, %v14001_v27  ;;  %v2128_v42 = vrot.slane %v11009_v24, 4  ;;  %v2110_v60 = vrot.slane %v11007_v43, 4  ;;  %v4742_v23 = vunpack.c.l.b16 %v11225_v36 }
 0x36a   : > { %v11241_v33 = vpop.permute.xlu2 %1671  ;;  %v2136_v37 = vsel %vm244_vm7, %v10866_v7, %v2104_v56  ;;  %v2134_v47 = vsel %vm244_vm7, %v10868_v40, %v2102_v61  ;;  %v11267_v41 = vsel %vm2199_vm8, %v4118_v10, %v11159_v14  ;;  %v2152_v58 = vsel %vm244_vm7, %v10881_v31, %v2120_v46  ;;  %v14004_v40 = vld [vmem:[#allocation68_spill] sm:$0xff] }
 0x36b   : > { %14003 = vst [vmem:[#allocation113_spill] sm:$0xff] %v11267_v41  ;;  %v2100_v3 = vrot.slane %v10939_v57, 4  ;;  %v2144_v53 = vsel %vm244_vm7, %v11005_v25, %v2112_v4  ;;  %v4762_v1 = vpack.c.b16 %v4744_v15, %v4742_v23  ;;  %v2150_v7 = vsel %vm244_vm7, %v10857_v17, %v2118_v35 }
 0x36c   : > { %v11279_v56 = vrot.slane %v932_v12, 4  ;;  %v11281_v14 = vrot.slane %v913_v63, 4  ;;  %v11283_v61 = vrot.slane %v894_v11, 4  ;;  %v4016_v31 = vrot.slane %v2136_v37, 4 }
 0x36d   : > { %v4440_v10 = vshrl.u32 %v11267_v41, 16  ;;  %v2160_v25 = vsel %vm244_vm7, %v11009_v24, %v2128_v42  ;;  %v2142_v46 = vsel %vm244_vm7, %v11007_v43, %v2110_v60  ;;  %v3978_v17 = vrot.slane %v2134_v47, 4 }
 0x36e   : > { %v4092_v4 = vrot.slane %v2152_v58, 4  ;;  %v2098_v15 = vrot.slane %v10986_v38, 4  ;;  %v4014_v35 = vrot.slane %v2144_v53, 4  ;;  %v14005_v12 = vrot.slane %v13981_v45, 4 }
 0x36f   : > { %4707 = vrot.lane.b32.xlu1 %v14004_v40, %s7341_s27  ;;  %4776 = vrot.lane.b32.xlu0 %v4762_v1, %s7342_s28  ;;  %v11301_v24 = vsel %vm244_vm7, %v10939_v57, %v2100_v3  ;;  %v2114_v43 = vrot.slane %v10995_v20, 4  ;;  %v4017_v11 = vsel %vm2199_vm8, %v2144_v53, %v4016_v31  ;;  %v2158_v42 = vsel %vm244_vm7, %v11017_v29, %v2126_v0 }
 0x370   : > { %1331 = vrot.lane.b32.xlu2 %v14005_v12, %s7326_s7  ;;  %v4090_v23 = vrot.slane %v2160_v25, 4  ;;  %v4093_v45 = vsel %vm2199_vm8, %v2160_v25, %v4092_v4  ;;  %v3976_v1 = vrot.slane %v2142_v46, 4  ;;  %v4054_v12 = vrot.slane %v2150_v7, 4  ;;  %s7346_s7 = smov 16  }
 0x371   : > { %v11295_v63 = vpop.permute.xlu1 %1667  ;;  %v11297_v27 = vpop.permute.xlu0 %1663  ;;  %v11311_v57 = vpack.i.b16 0, %v4440_v10  ;;  %v11317_v53 = vsel %vm244_vm7, %v10986_v38, %v2098_v15  ;;  %v4015_v29 = vsel %vm2199_vm8, %v4014_v35, %v2136_v37  ;;  %v3979_v0 = vsel %vm2199_vm8, %v2142_v46, %v3978_v17  ;;  %v14019_v15 = vld [vmem:[#allocation66_spill] sm:$0xff] }
 0x372   : > { %v4594_v60 = vpop.permute.xlu2 %4593  ;;  %v4052_v31 = vrot.slane %v2158_v42, 4  ;;  %v11324_v25 = vsel %vm244_vm7, %v10995_v20, %v2114_v43  ;;  %v4025_v10 = vperm.slane %v4017_v11, %v13579_v34  ;;  %v4091_v4 = vsel %vm2199_vm8, %v4090_v23, %v2152_v58  ;;  %v14008_v58 = vld [vmem:[#allocation7_spill] sm:$0xff] }
 0x373   : > { %v4606_v40 = vsel %vm443_vm14, %v10448_v52, %v4594_v60  ;;  %14006 = vst [vmem:[#allocation117_spill] sm:$0xff] %v11311_v57  ;;  %v3977_v38 = vsel %vm2199_vm8, %v3976_v1, %v2134_v47  ;;  %v1702_v37 = vrot.slane %v11021_v39, 4  ;;  %v2116_v46 = vrot.slane %v11019_v16, 4  ;;  %v14020_v52 = vld [vmem:[#allocation65_spill] sm:$0xff] }
 0x374   : > { %v5131_v3 = vsel %vm425_vm0, %v4606_v40, %v10879_v22  ;;  %v4101_v22 = vperm.slane %v4093_v45, %v13579_v34  ;;  %v14007_v17 = vrot.slane %v11140_v9, 4  ;;  %v4021_v20 = vperm.slane %v4015_v29, %v13579_v34 }
 0x375   : > { %5443 = vmatpush.bf16.msra.mxu3 %v5131_v3  ;;  %v3987_v35 = vperm.slane %v3979_v0, %v13579_v34  ;;  %v4055_v43 = vsel %vm2199_vm8, %v2158_v42, %v4054_v12  ;;  %v4042_v47 = vrot.slane %v11324_v25, 4  ;;  %v4053_v11 = vsel %vm2199_vm8, %v4052_v31, %v2150_v7 }
 0x376   : > { %v1720_v60 = vrot.slane %v11035_v32, 4  ;;  %v2122_v9 = vrot.slane %v11078_v21, 4  ;;  %v11351_v1 = vrot.slane %v4025_v10, 4  ;;  %v4097_v42 = vperm.slane %v4091_v4, %v13579_v34 }
 0x377   : > { %940 = vrot.lane.b32.xlu1 %v14007_v17, %s7330_s11  ;;  %936 = vrot.lane.b32.xlu0 %v14008_v58, %s7330_s11  ;;  %v11354_v40 = vrot.slane %v4101_v22, 4  ;;  %v3983_v12 = vperm.slane %v3977_v38, %v13579_v34  ;;  %v4063_v3 = vperm.slane %v4055_v43, %v13579_v34  ;;  %v11362_v29 = vsel %vm266_vm12, %v11021_v39, %v1702_v37  ;;  %v14009_v37 = vld [vmem:[#allocation82_spill] sm:$0xff]  ;;  %v14010_v58 = vld [vmem:[#allocation75_spill] sm:$0xff] }
 0x378   : > { %4645 = vrot.lane.b32.xlu2 %v11218_v5, %s7333_s14  ;;  %v11366_v5 = vsel %vm244_vm7, %v11019_v16, %v2116_v46  ;;  %v4749_v0 = vunpack.c.h.b16 %v10970_v19  ;;  %v11369_v31 = vrot.slane %v4021_v20, 4  ;;  %v11371_v10 = vrot.slane %v3987_v35, 4  ;;  %v14013_v20 = vld [vmem:[#allocation143_spill] sm:$0xff] }
 0x379   : > { %v11347_v23 = vpop.permute.xlu1 %1695  ;;  %v11349_v45 = vpop.permute.xlu0 %1691  ;;  %v4059_v22 = vperm.slane %v4053_v11, %v13579_v34  ;;  %v2108_v4 = vrot.slane %v11089_v50, 4  ;;  %v11377_v38 = vsel %vm266_vm12, %v11035_v32, %v1720_v60  ;;  %v2154_v39 = vsel %vm244_vm7, %v11078_v21, %v2122_v9  ;;  %v14011_v21 = vld [vmem:[#allocation49_spill] sm:$0xff] }
 0x37a   : > { %v11357_v7 = vpop.permute.xlu2 %1291  ;;  %v2106_v16 = vrot.slane %v11091_v54, 4  ;;  %v4747_v46 = vunpack.c.h.b16 %v14009_v37  ;;  %v11383_v19 = vrot.slane %v4097_v42, 4  ;;  %v11385_v17 = vrot.slane %v3983_v12, 4  ;;  %v14018_v42 = vld [vmem:[#allocation24_spill] sm:$0xff] }
 0x37b   : > { %v4080_v35 = vrot.slane %v11366_v5, 4  ;;  %v4070_v43 = vrot.slane %v4063_v3, 4  ;;  %v2124_v11 = vrot.slane %v14010_v58, 4  ;;  %v2869_v60 = vrot.slane %v14011_v21, 4 }
 0x37c   : > { %v4765_v32 = vpack.c.b16 %v4749_v0, %v4747_v46  ;;  %v4064_v9 = vrot.slane %v4059_v22, 4  ;;  %v4040_v37 = vrot.slane %v2154_v39, 4  ;;  %v2140_v12 = vsel %vm244_vm7, %v11089_v50, %v2108_v4  ;;  %v14016_v46 = vld [vmem:[#allocation33_spill] sm:$0xff]  ;;  %v14017_v50 = vld [vmem:[#allocation62_spill] sm:$0xff] }
 0x37d   : > { %v14012_v13 = vrot.slane %v11196_v30, 4  ;;  %v2138_v3 = vsel %vm244_vm7, %v11091_v54, %v2106_v16  ;;  %v2701_v21 = vrot.slane %v14016_v46, 4  ;;  %v2813_v4 = vrot.slane %v14017_v50, 4 }
 0x37e   : > { %v1718_v30 = vrot.slane %v14018_v42, 4  ;;  %v1704_v54 = vrot.slane %v14019_v15, 4  ;;  %v2757_v46 = vrot.slane %v14020_v52, 4  ;;  %v11424_v50 = vsel %vm2199_vm8, %v14021_v44, %v2869_v60  ;;  %v14026_v44 = vld [vmem:[#allocation81_spill] sm:$0xff] }
 0x37f   : > { %968 = vrot.lane.b32.xlu1 %v800_v8, %s7330_s11  ;;  %964 = vrot.lane.b32.xlu0 %v14012_v13, %s7330_s11  ;;  %v4801_v8 = vsel %vm4796_vm5, %v14014_v51, %v14013_v20  ;;  %v4043_v13 = vsel %vm2199_vm8, %v2154_v39, %v4042_v47  ;;  %v2156_v51 = vsel %vm244_vm7, %v14010_v58, %v2124_v11  ;;  %v14022_v39 = vrot.slane %v11301_v24, 4  ;;  %v14025_v11 = vld [vmem:[#allocation16_spill] sm:$0xff] }
 0x380   : > { %4782 = vrot.lane.b32.xlu2 %v4765_v32, %s7342_s28  ;;  %v4002_v32 = vrot.slane %v2140_v12, 4  ;;  %v4041_v47 = vsel %vm2199_vm8, %v4040_v37, %v11324_v25  ;;  %v3964_v57 = vrot.slane %v2138_v3, 4  ;;  %v14024_v26 = vrot.slane %v11317_v53, 4  ;;  %v14027_v25 = vld [vmem:[#allocation122_spill] sm:$0xff] }
 0x381   : > { %v11406_v0 = vpop.permute.xlu1 %4717  ;;  %v11408_v22 = vpop.permute.xlu0 %4853  ;;  %v4005_v41 = vsel %vm2199_vm8, %v2140_v12, %v14022_v39  ;;  %v11437_v52 = vsel %vm2199_vm8, %v14025_v11, %v2701_v21  ;;  %v11441_v60 = vsel %vm2199_vm8, %v14026_v44, %v2813_v4  ;;  %v817_v37 = vrot.slane %v14027_v25, 4  ;;  %v14029_v11 = vld [vmem:[#allocation32_spill] sm:$0xff] }
 0x382   : > { %14015 = vst [vmem:[#allocation23_spill] sm:$0xff] %v11408_v22  ;;  %v11415_v16 = vpop.permute.xlu2 %1327  ;;  %v5207_v20 = vsel %vm4861_vm1, %v4801_v8, %v11408_v22  ;;  %v14023_v8 = vld [vmem:[#allocation84_spill] sm:$0xff]  ;;  %v3967_v58 = vsel %vm2199_vm8, %v2138_v3, %v14024_v26  ;;  %v11446_v12 = vsel %vm266_vm12, %v14018_v42, %v1718_v30  ;;  %v4078_v39 = vrot.slane %v2156_v51, 4 }
 0x383   : > { %5529 = vmatpush.bf16.msrb.mxu2 %v5207_v20  ;;  %v1710_v22 = vrot.slane %v14023_v8, 4  ;;  %v4051_v20 = vperm.slane %v4043_v13, %v13579_v34  ;;  %v11451_v26 = vpack.i.b16 %v11424_v50, %v11441_v60  ;;  %v4047_v3 = vperm.slane %v4041_v47, %v13579_v34 }
 0x384   : > { %v4003_v21 = vsel %vm2199_vm8, %v4002_v32, %v11301_v24  ;;  %v4013_v4 = vperm.slane %v4005_v41, %v13579_v34  ;;  %v11461_v42 = vsel %vm2199_vm8, %v14029_v11, %v2757_v46  ;;  %v3975_v30 = vperm.slane %v3967_v58, %v13579_v34 }
 0x385   : > { %14028 = vst [vmem:[#allocation119_spill] sm:$0xff] %v11451_v26  ;;  %v4081_v13 = vsel %vm2199_vm8, %v2156_v51, %v4080_v35  ;;  %v1742_v44 = vsel %vm266_vm12, %v14023_v8, %v1710_v22  ;;  %v11471_v41 = vpack.i.b16 %v11461_v42, %v11437_v52  ;;  %v11476_v24 = vsel %vm266_vm12, %v14019_v15, %v1704_v54  ;;  %v14032_v51 = vld [vmem:[#allocation121_spill] sm:$0xff] }
 0x386   : > { %v3965_v32 = vsel %vm2199_vm8, %v3964_v57, %v11317_v53  ;;  %v14031_v35 = vrot.slane %v11215_v6, 4  ;;  %v14033_v46 = vrot.slane %v14032_v51, 5  ;;  %v4071_v8 = vsel %vm2199_vm8, %v4070_v43, %v4051_v20 }
 0x387   : > { %996 = vrot.lane.b32.xlu1 %v11279_v56, %s7330_s11  ;;  %992 = vrot.lane.b32.xlu0 %v11281_v14, %s7330_s11  ;;  %14030 = vst [vmem:[#allocation154_spill] sm:$0xff] %v11471_v41  ;;  %v4009_v58 = vperm.slane %v4003_v21, %v13579_v34  ;;  %v4079_v15 = vsel %vm2199_vm8, %v4078_v39, %v11366_v5  ;;  %v4813_v57 = vunpack.c.l.b16 %v11451_v26  ;;  %v1712_v5 = vrot.slane %v11297_v27, 4  ;;  %v14034_v21 = vld [vmem:[#allocation25_spill] sm:$0xff] }
 0x388   : > { %960 = vrot.lane.b32.xlu2 %v14031_v35, %s7330_s11  ;;  %v818_v47 = vor.u32 %v817_v37, %v14033_v46  ;;  %v11497_v6 = vsel %vm2199_vm8, %v4064_v9, %v4047_v3  ;;  %v4033_v53 = vsel %vm2199_vm8, %v11351_v1, %v4013_v4  ;;  %v4089_v25 = vperm.slane %v4081_v13, %v13579_v34 }
 0x389   : > { %v11483_v22 = vpop.permute.xlu1 %1323  ;;  %v11485_v14 = vpop.permute.xlu0 %1295  ;;  %v3824_v37 = vrot.slane %v1742_v44, 4  ;;  %v3971_v43 = vperm.slane %v3965_v32, %v13579_v34  ;;  %v3995_v20 = vsel %vm2199_vm8, %v11371_v10, %v3975_v30  ;;  %v4811_v39 = vunpack.c.l.b16 %v11471_v41 }
 0x38a   : > { %v11493_v54 = vpop.permute.xlu2 %1683  ;;  %v4075_v11 = vperm.slane %v4071_v8, %v14034_v21  ;;  %v3864_v9 = vrot.slane %v11476_v24, 4  ;;  %v4085_v3 = vperm.slane %v4079_v15, %v13579_v34  ;;  %v819_v35 = vrot.slane %v818_v47, 4  ;;  %v14036_v8 = vld [vmem:[#allocation12_spill] sm:$0xff] }
 0x38b   : > { %v11514_v4 = vsel %vm2199_vm8, %v11369_v31, %v4009_v58  ;;  %v4037_v10 = vperm.slane %v4033_v53, %v14034_v21  ;;  %v4829_v30 = vpack.c.b16 %v4813_v57, %v4811_v39  ;;  %v3999_v13 = vperm.slane %v3995_v20, %v14034_v21 }
 0x38c   : > { %v4109_v32 = vsel %vm2199_vm8, %v11354_v40, %v4089_v25  ;;  %v3825_v51 = vsel %vm2199_vm8, %v3824_v37, %v11362_v29  ;;  %v14035_v46 = vrot.slane %v11362_v29, 4  ;;  %v11529_v31 = vsel %vm2199_vm8, %v11385_v17, %v3971_v43 }
 0x38d   : > { %v1700_v58 = vrot.slane %v11236_v59, 4  ;;  %v1698_v15 = vrot.slane %v11238_v48, 4  ;;  %v1744_v40 = vsel %vm266_vm12, %v11297_v27, %v1712_v5  ;;  %v11536_v57 = vrot.slane %v4075_v11, 4 }
 0x38e   : > { %v3827_v47 = vsel %vm2199_vm8, %v1742_v44, %v14035_v46  ;;  %v11542_v44 = vsel %vm2199_vm8, %v11383_v19, %v4085_v3  ;;  %v1716_v17 = vrot.slane %v11241_v33, 4  ;;  %v4113_v27 = vperm.slane %v4109_v32, %v14034_v21  ;;  %v14037_v3 = vld [vmem:[#allocation174_spill] sm:$0xff] }
 0x38f   : > { %4709 = vrot.lane.b32.xlu1 %v14036_v8, %s7341_s27  ;;  %4845 = vrot.lane.b32.xlu0 %v4829_v30, %s7343_s12  ;;  %v3831_v37 = vperm.slane %v3825_v51, %v13579_v34  ;;  %v3835_v43 = vperm.slane %v3827_v47, %v13579_v34  ;;  %v1714_v20 = vrot.slane %v11295_v63, 4  ;;  %v11556_v19 = vrot.slane %v4037_v10, 4  ;;  %v14038_v8 = vld [vmem:[#allocation173_spill] sm:$0xff]  ;;  %s7351_s27 = smov 110  }
 0x390   : > { %972 = vrot.lane.b32.xlu2 %v819_v35, %s7330_s11  ;;  %v3862_v11 = vrot.slane %v1744_v40, 4  ;;  %v4552_v35 = vunpack.c.h.b16 %v14037_v3  ;;  %v11561_v30 = vrot.slane %v3999_v13, 4  ;;  %v11567_v51 = vsel %vm266_vm12, %v11236_v59, %v1700_v58 }
 0x391   : > { %v11546_v53 = vpop.permute.xlu1 %1655  ;;  %v11548_v25 = vpop.permute.xlu0 %1651  ;;  %v11571_v46 = vsel %vm266_vm12, %v11238_v48, %v1698_v15  ;;  %v11575_v10 = vsel %vm266_vm12, %v11241_v33, %v1716_v17  ;;  %v3865_v47 = vsel %vm2199_vm8, %v1744_v40, %v3864_v9  ;;  %v1728_v13 = vrot.slane %v11347_v23, 4  ;;  %v14039_v15 = vld [vmem:[#allocation86_spill] sm:$0xff] }
 0x392   : > { %v11554_v5 = vpop.permute.xlu2 %4649  ;;  %v4550_v3 = vunpack.c.h.b16 %v14038_v8  ;;  %v11580_v1 = vrot.slane %v4113_v27, 4  ;;  %v11582_v29 = vrot.slane %v3831_v37, 4  ;;  %v11584_v59 = vrot.slane %v3835_v43, 4  ;;  %v14042_v8 = vld [vmem:[#allocation88_spill] sm:$0xff] }
 0x393   : > { %v11588_v48 = vsel %vm266_vm12, %v11295_v63, %v1714_v20  ;;  %v3863_v33 = vsel %vm2199_vm8, %v3862_v11, %v11476_v24  ;;  %v1726_v58 = vrot.slane %v11349_v45, 4  ;;  %v2645_v40 = vrot.slane %v14039_v15, 4  ;;  %v14041_v11 = vld [vmem:[#allocation67_spill] sm:$0xff] }
 0x394   : > { %v4570_v9 = vpack.c.b16 %v4552_v35, %v4550_v3  ;;  %v3873_v63 = vperm.slane %v3865_v47, %v13579_v34  ;;  %v1760_v24 = vsel %vm266_vm12, %v11347_v23, %v1728_v13  ;;  %v4745_v20 = vunpack.c.h.b16 %v11211_v49  ;;  %v14043_v49 = vld [vmem:[#allocation63_spill] sm:$0xff] }
 0x395   : > { %v2477_v35 = vrot.slane %v14041_v11, 4  ;;  %v2589_v3 = vrot.slane %v14042_v8, 4  ;;  %v3890_v15 = vrot.slane %v11588_v48, 4  ;;  %v3869_v47 = vperm.slane %v3863_v33, %v13579_v34  ;;  %v14044_v11 = vld [vmem:[#allocation144_spill] sm:$0xff] }
 0x396   : > { %v1722_v39 = vrot.slane %v11493_v54, 4  ;;  %v1758_v13 = vsel %vm266_vm12, %v11349_v45, %v1726_v58  ;;  %v2533_v32 = vrot.slane %v14043_v49, 4  ;;  %v11622_v8 = vsel %vm2199_vm8, %v14044_v11, %v2645_v40  ;;  %v14046_v58 = vld [vmem:[#allocation53_spill] sm:$0xff]  ;;  %v14047_v49 = vld [vmem:[#allocation19_spill] sm:$0xff] }
 0x397   : > { %984 = vrot.lane.b32.xlu1 %v11259_v62, %s7330_s11  ;;  %956 = vrot.lane.b32.xlu0 %v11228_v55, %s7330_s11  ;;  %v1350_v55 = vrot.slane %v11357_v7, 4  ;;  %v11624_v27 = vrot.slane %v3873_v63, 4  ;;  %v3938_v33 = vrot.slane %v1760_v24, 4  ;;  %v14045_v37 = vrot.slane %v11377_v38, 4 }
 0x398   : > { %4585 = vrot.lane.b32.xlu2 %v4570_v9, %s7334_s23  ;;  %v4743_v9 = vunpack.c.h.b16 %v11225_v36  ;;  %v1708_v56 = vrot.slane %v11546_v53, 4  ;;  %v1706_v41 = vrot.slane %v11548_v25, 4  ;;  %v11633_v36 = vsel %vm2199_vm8, %v14046_v58, %v2477_v35 }
 0x399   : > { %v11605_v62 = vpop.permute.xlu1 %4647  ;;  %v1688_v43 = vpop.permute.xlu0 %1687  ;;  %v3941_v17 = vsel %vm2199_vm8, %v1760_v24, %v14045_v37  ;;  %v11637_v40 = vsel %vm2199_vm8, %v14047_v49, %v2589_v3  ;;  %v11639_v63 = vrot.slane %v3869_v47, 4  ;;  %v3900_v11 = vrot.slane %v1758_v13, 4  ;;  %v14050_v47 = vld [vmem:[#allocation20_spill] sm:$0xff] }
 0x39a   : > { %14040 = vst [vmem:[#allocation11_spill] sm:$0xff] %v11605_v62  ;;  %v11614_v23 = vpop.permute.xlu2 %4786  ;;  %v4763_v45 = vpack.c.b16 %v4745_v20, %v4743_v9  ;;  %v1754_v26 = vsel %vm266_vm12, %v11493_v54, %v1722_v39  ;;  %v11645_v37 = vpack.i.b16 %v11622_v8, %v11637_v40  ;;  %v3949_v24 = vperm.slane %v3941_v17, %v13579_v34  ;;  %v14052_v39 = vld [vmem:[#allocation17_spill] sm:$0xff] }
 0x39b   : > { %v11650_v20 = vsel %vm288_vm6, %v11357_v7, %v1350_v55  ;;  %v14049_v35 = vrot.slane %v11446_v12, 4  ;;  %v11658_v9 = vsel %vm2199_vm8, %v14050_v47, %v2533_v32  ;;  %v3939_v54 = vsel %vm2199_vm8, %v3938_v33, %v11377_v38  ;;  %v14053_v55 = vld [vmem:[#allocation95_spill] sm:$0xff] }
 0x39c   : > { %14048 = vst [vmem:[#allocation115_spill] sm:$0xff] %v11645_v37  ;;  %v4734_v17 = vsel %vm4731_vm3, %v14052_v39, %v11406_v0  ;;  %v1740_v7 = vsel %vm266_vm12, %v11546_v53, %v1708_v56  ;;  %v1738_v32 = vsel %vm266_vm12, %v11548_v25, %v1706_v41  ;;  %v4668_v38 = vsel %vm425_vm0, %v11605_v62, %v11554_v5 }
 0x39d   : > { %v3903_v3 = vsel %vm2199_vm8, %v1758_v13, %v14049_v35  ;;  %14051 = vst [vmem:[#allocation160_spill] sm:$0xff] %v11658_v9  ;;  %v11671_v13 = vpack.i.b16 %v11658_v9, %v11633_v36  ;;  %v1724_v33 = vrot.slane %v1688_v43, 4  ;;  %v3901_v53 = vsel %vm2199_vm8, %v3900_v11, %v11446_v12 }
 0x39e   : > { %v4809_v25 = vunpack.c.l.b16 %v11645_v37  ;;  %v3891_v35 = vsel %vm2199_vm8, %v1754_v26, %v3890_v15  ;;  %v3850_v47 = vrot.slane %v1740_v7, 4  ;;  %v3945_v12 = vperm.slane %v3939_v54, %v13579_v34 }
 0x39f   : > { %4778 = vrot.lane.b32.xlu1 %v4763_v45, %s7342_s28  ;;  %4772 = vrot.lane.b32.xlu0 %v14053_v55, %s7342_s28  ;;  %14054 = vst [vmem:[#allocation162_spill] sm:$0xff] %v11671_v13  ;;  %v3888_v45 = vrot.slane %v1754_v26, 4  ;;  %v14056_v11 = vrot.slane %v11567_v51, 4  ;;  %v3812_v55 = vrot.slane %v1738_v32, 4  ;;  %v1756_v15 = vsel %vm266_vm12, %v1688_v43, %v1724_v33 }
 0x3a0   : > { %952 = vrot.lane.b32.xlu2 %v11230_v18, %s7330_s11  ;;  %v3911_v18 = vperm.slane %v3903_v3, %v13579_v34  ;;  %v14057_v3 = vrot.slane %v11571_v46, 4  ;;  %v1368_v54 = vrot.slane %v11415_v16, 4  ;;  %vm5312_vm12 = vcmask 662528  }
 0x3a1   : > { %v11680_v0 = vpop.permute.xlu1 %4711  ;;  %v11682_v56 = vpop.permute.xlu0 %4780  ;;  %v3853_v39 = vsel %vm2199_vm8, %v1740_v7, %v14056_v11  ;;  %v3889_v5 = vsel %vm2199_vm8, %v3888_v45, %v11588_v48  ;;  %v3899_v7 = vperm.slane %v3891_v35, %v13579_v34  ;;  %v14058_v45 = vld [vmem:[#allocation89_spill] sm:$0xff]  ;;  %v3926_v35 = vrot.slane %v1756_v15, 4 }
 0x3a2   : > { %14055 = vst [vmem:[#allocation148_spill] sm:$0xff] %v11682_v56  ;;  %v1308_v58 = vpop.permute.xlu2 %1307  ;;  %v5147_v49 = vsel %vm4731_vm3, %v4668_v38, %v11680_v0  ;;  %v5175_v41 = vsel %vm4796_vm5, %v4734_v17, %v11682_v56  ;;  %v4807_v17 = vunpack.c.l.b16 %v11671_v13  ;;  %v3907_v38 = vperm.slane %v3901_v53, %v13579_v34  ;;  %v14078_v56 = vld [vmem:[#allocation71_spill] sm:$0xff] }
 0x3a3   : > { %5474 = vmatpush.bf16.msrb.mxu0 %v5147_v49  ;;  %5502 = vmatpush.bf16.msrb.mxu1 %v5175_v41  ;;  %v3815_v26 = vsel %vm2199_vm8, %v1738_v32, %v14057_v3  ;;  %v1366_v49 = vrot.slane %v11483_v22, 4  ;;  %v3918_v11 = vrot.slane %v3911_v18, 4  ;;  %v1352_v13 = vrot.slane %v11485_v14, 4 }
 0x3a4   : > { %v4827_v41 = vpack.c.b16 %v4809_v25, %v4807_v17  ;;  %v3851_v53 = vsel %vm2199_vm8, %v3850_v47, %v11567_v51  ;;  %v3861_v48 = vperm.slane %v3853_v39, %v13579_v34  ;;  %v3895_v43 = vperm.slane %v3889_v5, %v13579_v34 }
 0x3a5   : > { %v3813_v32 = vsel %vm2199_vm8, %v3812_v55, %v11571_v46  ;;  %v3823_v33 = vperm.slane %v3815_v26, %v13579_v34  ;;  %v3956_v25 = vrot.slane %v3949_v24, 4  ;;  %v3912_v18 = vrot.slane %v3907_v38, 4 }
 0x3a6   : > { %v14059_v17 = vrot.slane %v11575_v10, 4  ;;  %v1358_v47 = vrot.slane %v1308_v58, 4  ;;  %v11729_v46 = vsel %vm288_vm6, %v11415_v16, %v1368_v54  ;;  %v11733_v5 = vsel %vm288_vm6, %v11483_v22, %v1366_v49 }
 0x3a7   : > { %4774 = vrot.lane.b32.xlu1 %v14058_v45, %s7342_s28  ;;  %4841 = vrot.lane.b32.xlu0 %v4827_v41, %s7343_s12  ;;  %v3919_v24 = vsel %vm2199_vm8, %v3918_v11, %v3899_v7  ;;  %v3857_v55 = vperm.slane %v3851_v53, %v13579_v34  ;;  %v3950_v26 = vrot.slane %v3945_v12, 4  ;;  %v3881_v16 = vsel %vm2199_vm8, %v11624_v27, %v3861_v48  ;;  %v14060_v53 = vld [vmem:[#allocation98_spill] sm:$0xff] }
 0x3a8   : > { %v3929_v51 = vsel %vm2199_vm8, %v1756_v15, %v14059_v17  ;;  %988 = vrot.lane.b32.xlu2 %v11283_v61, %s7330_s11  ;;  %v11743_v61 = vsel %vm288_vm6, %v11485_v14, %v1352_v13  ;;  %v3819_v15 = vperm.slane %v3813_v32, %v13579_v34  ;;  %v11749_v22 = vsel %vm2199_vm8, %v3912_v18, %v3895_v43  ;;  %v14062_v18 = vld [vmem:[#allocation106_spill] sm:$0xff] }
 0x3a9   : > { %v11725_v39 = vpop.permute.xlu1 %1287  ;;  %v11739_v3 = vpop.permute.xlu0 %1283  ;;  %v3843_v54 = vsel %vm2199_vm8, %v11584_v59, %v3823_v33  ;;  %v3927_v49 = vsel %vm2199_vm8, %v3926_v35, %v11575_v10  ;;  %v3937_v12 = vperm.slane %v3929_v51, %v13579_v34  ;;  %v3923_v13 = vperm.slane %v3919_v24, %v14034_v21  ;;  %v14061_v33 = vld [vmem:[#allocation109_spill] sm:$0xff]  ;;  %v14069_v51 = vld [vmem:[#allocation142_spill] sm:$0xff] }
 0x3aa   : > { %v11737_v38 = vpop.permute.xlu2 %1319  ;;  %v1390_v27 = vsel %vm288_vm6, %v1308_v58, %v1358_v47  ;;  %v11763_v11 = vsel %vm2199_vm8, %v11639_v63, %v3857_v55  ;;  %v3885_v59 = vperm.slane %v3881_v16, %v14034_v21  ;;  %v4411_v10 = vshrl.u32 %v14060_v53, 16  ;;  %v14063_v47 = vld [vmem:[#allocation60_spill] sm:$0xff]  ;;  %v14065_v55 = vld [vmem:[#allocation113_spill] sm:$0xff] }
 0x3ab   : > { %v11771_v45 = vsel %vm2199_vm8, %v11582_v29, %v3819_v15  ;;  %v3847_v43 = vperm.slane %v3843_v54, %v14034_v21  ;;  %v3933_v58 = vperm.slane %v3927_v49, %v13579_v34  ;;  %v3957_v63 = vsel %vm2199_vm8, %v3956_v25, %v3937_v12  ;;  %v14067_v12 = vld [vmem:[#allocation46_spill] sm:$0xff] }
 0x3ac   : > { %v3672_v32 = vrot.slane %v1390_v27, 4  ;;  %v4381_v35 = vshrl.u32 %v14061_v33, 16  ;;  %v4412_v17 = vshrl.u32 %v14062_v18, 16  ;;  %v11782_v29 = vrot.slane %v3923_v13, 4 }
 0x3ad   : > { %v14066_v16 = vpack.i.b16 0, %v14065_v55  ;;  %v4382_v13 = vshrl.u32 %v14067_v12, 16  ;;  %v11798_v33 = vrot.slane %v3847_v43, 4  ;;  %v11801_v18 = vsel %vm2199_vm8, %v3950_v26, %v3933_v58  ;;  %v14070_v43 = vld [vmem:[#allocation85_spill] sm:$0xff]  ;;  %v14071_v58 = vld [vmem:[#allocation110_spill] sm:$0xff] }
 0x3ae   : > { %v4413_v53 = vpack.i.b16 %v4412_v17, %v4411_v10  ;;  %v14068_v48 = vrot.slane %v11650_v20, 4  ;;  %v11810_v54 = vsel %vm4796_vm5, %v14069_v51, %v11614_v23  ;;  %v3673_v10 = vsel %vm2199_vm8, %v3672_v32, %v11650_v20 }
 0x3af   : > { %4924 = vrot.lane.b32.xlu1 %v11205_v2, %s7344_s29  ;;  %4922 = vrot.lane.b32.xlu0 %v11220_v28, %s7344_s29  ;;  %v14064_v2 = vld [vmem:[#allocation117_spill] sm:$0xff]  ;;  %v4954_v15 = vunpack.c.h.b16 %v14066_v16  ;;  %v11793_v28 = vrot.slane %v3885_v59, 4  ;;  %v4383_v26 = vpack.i.b16 %v4382_v13, %v4381_v35  ;;  %v3679_v35 = vperm.slane %v3673_v10, %v13579_v34 }
 0x3b0   : > { %4581 = vrot.lane.b32.xlu2 %v14063_v47, %s7334_s23  ;;  %v5018_v25 = vunpack.c.l.b16 %v14064_v2  ;;  %v3961_v47 = vperm.slane %v3957_v63, %v14034_v21  ;;  %v3675_v16 = vsel %vm2199_vm8, %v1390_v27, %v14068_v48  ;;  %v14072_v27 = vpack.i.b16 0, %v14065_v55 }
 0x3b1   : > { %v11788_v24 = vpop.permute.xlu1 %1315  ;;  %v1312_v49 = vpop.permute.xlu0 %1311  ;;  %v4966_v14 = vpack.c.b16 %v4954_v15, %v4954_v15  ;;  %v3683_v23 = vperm.slane %v3675_v16, %v13579_v34  ;;  %v4887_v51 = vunpack.c.h.b16 %v4413_v53  ;;  %v4886_v20 = vunpack.c.l.b16 %v4413_v53 }
 0x3b2   : > { %v4590_v59 = vpop.permute.xlu2 %4589  ;;  %v5030_v12 = vpack.c.b16 %v5018_v25, %v5018_v25  ;;  %v4953_v48 = vunpack.c.l.b16 %v14072_v27  ;;  %v11823_v32 = vrot.slane %v3961_v47, 4  ;;  %v1360_v13 = vrot.slane %v1312_v49, 4  ;;  %v14073_v25 = vld [vmem:[#allocation10_spill] sm:$0xff]  ;;  %v14075_v47 = vld [vmem:[#allocation140_spill] sm:$0xff]  ;;  %v14077_v27 = vld [vmem:[#allocation55_spill] sm:$0xff] }
 0x3b3   : > { %v4605_v17 = vsel %vm443_vm14, %v14070_v43, %v4590_v59  ;;  %v4322_v15 = vshrl.u32 %v14073_v25, 16  ;;  %v1348_v55 = vrot.slane %v11725_v39, 4  ;;  %v4885_v59 = vunpack.c.h.b16 %v4383_v26  ;;  %v14074_v43 = vld [vmem:[#allocation48_spill] sm:$0xff] }
 0x3b4   : > { %v5127_v63 = vsel %vm425_vm0, %v4605_v17, %v14071_v58  ;;  %v4884_v16 = vunpack.c.l.b16 %v4383_v26  ;;  %v1364_v53 = vrot.slane %v11737_v38, 4  ;;  %v4965_v58 = vpack.c.b16 %v4953_v48, %v4953_v48 }
 0x3b5   : > { %5444 = vmatpush.bf16.msra.mxu3 %v5127_v63  ;;  %v14076_v63 = vld [vmem:[#allocation70_spill] sm:$0xff]  ;;  %v4351_v25 = vshrl.u32 %v14077_v27, 16  ;;  %v11836_v7 = vrot.slane %v3683_v23, 4  ;;  %v4899_v37 = vpack.c.b16 %v4887_v51, %v4885_v59  ;;  %v4352_v26 = vshrl.u32 %v14078_v56, 16 }
 0x3b6   : > { %v11839_v62 = vrot.slane %v3679_v35, 4  ;;  %v1392_v17 = vsel %vm288_vm6, %v1312_v49, %v1360_v13  ;;  %v14079_v48 = vperm.slane %v11542_v44, %v14034_v21  ;;  %v11853_v51 = vsel %vm288_vm6, %v11725_v39, %v1348_v55 }
 0x3b7   : > { %5052 = vrot.lane.b32.xlu1 %v5030_v12, %s7345_s30  ;;  %4989 = vrot.lane.b32.xlu0 %v4966_v14, %s7346_s7  ;;  %v4321_v12 = vshrl.u32 %v14076_v63, 16  ;;  %v4898_v14 = vpack.c.b16 %v4886_v20, %v4884_v16  ;;  %v1346_v56 = vrot.slane %v11739_v3, 4  ;;  %v14080_v20 = vperm.slane %v11529_v31, %v14034_v21 }
 0x3b8   : > { %4837 = vrot.lane.b32.xlu2 %v14075_v47, %s7343_s12  ;;  %v4115_v23 = vsel %vm2199_vm8, %v11580_v1, %v14079_v48  ;;  %v14081_v35 = vperm.slane %v11514_v4, %v14034_v21  ;;  %v11868_v1 = vsel %vm288_vm6, %v11737_v38, %v1364_v53  ;;  %v11870_v13 = vpack.i.b16 %v4352_v26, %v4351_v25 }
 0x3b9   : > { %v1344_v10 = vpop.permute.xlu1 %1343  ;;  %v1340_v41 = vpop.permute.xlu0 %1339  ;;  %v11844_v47 = vpack.i.b16 %v4322_v15, %v4321_v12  ;;  %v4001_v49 = vsel %vm2199_vm8, %v11561_v30, %v14080_v20  ;;  %v14082_v15 = vperm.slane %v11497_v6, %v14034_v21  ;;  %v1362_v30 = vrot.slane %v11788_v24, 4 }
 0x3ba   : > { %v11842_v9 = vpop.permute.xlu2 %944  ;;  %v4039_v44 = vsel %vm2199_vm8, %v11556_v19, %v14081_v35  ;;  %v1376_v39 = vrot.slane %v1344_v10, 4  ;;  %v3710_v55 = vrot.slane %v1392_v17, 4  ;;  %v4418_v59 = vshrl.u32 %v4115_v23, 16 }
 0x3bb   : > { %v4077_v31 = vsel %vm2199_vm8, %v11536_v57, %v14082_v15  ;;  %v3700_v19 = vrot.slane %v11853_v51, 4  ;;  %v4880_v38 = vunpack.c.l.b16 %v11844_v47  ;;  %v4387_v16 = vshrl.u32 %v4001_v49, 16 }
 0x3bc   : > { %v4416_v4 = vpack.i.b16 %v4115_v23, %v4077_v31  ;;  %v4388_v53 = vshrl.u32 %v4039_v44, 16  ;;  %v11883_v63 = vsel %vm288_vm6, %v11739_v3, %v1346_v56  ;;  %v14083_v6 = vrot.slane %v11743_v61, 4 }
 0x3bd   : > { %v4386_v12 = vpack.i.b16 %v4039_v44, %v4001_v49  ;;  %v4417_v27 = vshrl.u32 %v4077_v31, 16  ;;  %v3776_v25 = vrot.slane %v11868_v1, 4  ;;  %v1374_v26 = vrot.slane %v1340_v41, 4 }
 0x3be   : > { %v3713_v57 = vsel %vm2199_vm8, %v1392_v17, %v14083_v6  ;;  %v4882_v3 = vunpack.c.l.b16 %v11870_v13  ;;  %v11897_v23 = vsel %vm288_vm6, %v11788_v24, %v1362_v30  ;;  %v3711_v17 = vsel %vm2199_vm8, %v3710_v55, %v11743_v61 }
 0x3bf   : > { %4920 = vrot.lane.b32.xlu1 %v4899_v37, %s7344_s29  ;;  %4918 = vrot.lane.b32.xlu0 %v4898_v14, %s7344_s29  ;;  %v1408_v37 = vsel %vm288_vm6, %v1344_v10, %v1376_v39  ;;  %v4952_v56 = vunpack.c.h.b16 %v4416_v4  ;;  %v11903_v20 = vpack.i.b16 %v4418_v59, %v4417_v27  ;;  %v3721_v10 = vperm.slane %v3713_v57, %v13579_v34  ;;  %v14084_v59 = vld [vmem:[#allocation138_spill] sm:$0xff] }
 0x3c0   : > { %4987 = vrot.lane.b32.xlu2 %v4965_v58, %s7346_s7  ;;  %v5019_v35 = vunpack.c.h.b16 %v14064_v2  ;;  %v11912_v24 = vpack.i.b16 %v4388_v53, %v4387_v16  ;;  %v3662_v44 = vrot.slane %v11883_v63, 4  ;;  %v3786_v61 = vrot.slane %v1408_v37, 4 }
 0x3c1   : > { %v11892_v48 = vpop.permute.xlu1 %4713  ;;  %v11901_v14 = vpop.permute.xlu0 %4849  ;;  %v4896_v39 = vpack.c.b16 %v4882_v3, %v4880_v38  ;;  %v4950_v15 = vunpack.c.h.b16 %v4386_v12  ;;  %v3717_v31 = vperm.slane %v3711_v17, %v13579_v34  ;;  %v1406_v30 = vsel %vm288_vm6, %v1340_v41, %v1374_v26 }
 0x3c2   : > { %v11906_v49 = vpop.permute.xlu2 %980  ;;  %v5203_v58 = vsel %vm4861_vm1, %v11810_v54, %v11901_v14  ;;  %v4951_v55 = vunpack.c.l.b16 %v4416_v4  ;;  %v4822_v6 = vunpack.c.h.b16 %v14084_v59  ;;  %v3738_v57 = vrot.slane %v11897_v23, 4 }
 0x3c3   : > { %5530 = vmatpush.bf16.msrb.mxu2 %v5203_v58  ;;  %v14085_v54 = vrot.slane %v11729_v46, 4  ;;  %v4964_v16 = vpack.c.b16 %v4952_v56, %v4950_v15  ;;  %v5016_v53 = vunpack.c.l.b16 %v11903_v20  ;;  %v11923_v27 = vrot.slane %v3721_v10, 4 }
 0x3c4   : > { %v5031_v38 = vpack.c.b16 %v5019_v35, %v5019_v35  ;;  %v5014_v3 = vunpack.c.l.b16 %v11912_v24  ;;  %v4949_v41 = vunpack.c.l.b16 %v4386_v12  ;;  %v3787_v4 = vsel %vm2199_vm8, %v3786_v61, %v11729_v46  ;;  %v14088_v35 = vld [vmem:[#allocation26_spill] sm:$0xff] }
 0x3c5   : > { %v3789_v2 = vsel %vm2199_vm8, %v1408_v37, %v14085_v54  ;;  %v3748_v26 = vrot.slane %v1406_v30, 4  ;;  %v14086_v17 = vrot.slane %v11733_v5, 4  ;;  %v14087_v37 = vperm.slane %v11801_v18, %v14034_v21 }
 0x3c6   : > { %v11938_v10 = vrot.slane %v3717_v31, 4  ;;  %v3797_v12 = vperm.slane %v3789_v2, %v13579_v34  ;;  %v14089_v46 = vpack.c.b16 %v14088_v35, %v14088_v35  ;;  %v14090_v15 = vunpack.c.h.b16 %v14074_v43 }
 0x3c7   : > { %4914 = vrot.lane.b32.xlu1 %v4896_v39, %s7344_s29  ;;  %v3751_v58 = vsel %vm2199_vm8, %v1406_v30, %v14086_v17  ;;  %4985 = vrot.lane.b32.xlu0 %v4964_v16, %s7346_s7  ;;  %v3963_v56 = vsel %vm2199_vm8, %v11823_v32, %v14087_v37  ;;  %v4963_v39 = vpack.c.b16 %v4951_v55, %v4949_v41  ;;  %v4262_v17 = vshrl.u32 %v11461_v42, 16 }
 0x3c8   : > { %4859 = vrot.lane.b32.xlu2 %v14089_v46, %s7343_s12  ;;  %v11949_v30 = vpack.c.b16 %v4822_v6, %v14090_v15  ;;  %v5028_v59 = vpack.c.b16 %v5016_v53, %v5014_v3  ;;  %v14091_v32 = vperm.slane %v11771_v45, %v14034_v21  ;;  %v14092_v54 = vperm.slane %v11763_v11, %v14034_v21 }
 0x3c9   : > { %v11945_v61 = vpop.permute.xlu1 %976  ;;  %v11951_v18 = vpop.permute.xlu0 %948  ;;  %v14093_v43 = vperm.slane %v11749_v22, %v14034_v21  ;;  %v3793_v6 = vperm.slane %v3787_v4, %v13579_v34  ;;  %v3759_v16 = vperm.slane %v3751_v58, %v13579_v34  ;;  %v4881_v53 = vunpack.c.h.b16 %v11844_v47 }
 0x3ca   : > { %v3849_v31 = vsel %vm2199_vm8, %v11798_v33, %v14091_v32  ;;  %v3887_v2 = vsel %vm2199_vm8, %v11793_v28, %v14092_v54  ;;  %v1332_v45 = vpop.permute.xlu2 %1331  ;;  %v3749_v11 = vsel %vm2199_vm8, %v3748_v26, %v11733_v5  ;;  %v4261_v28 = vshrl.u32 %v11437_v52, 16 }
 0x3cb   : > { %v3925_v55 = vsel %vm2199_vm8, %v11782_v29, %v14093_v43  ;;  %v1370_v3 = vrot.slane %v1332_v45, 4  ;;  %v4292_v22 = vshrl.u32 %v11424_v50, 16  ;;  %v11977_v41 = vrot.slane %v3797_v12, 4 }
 0x3cc   : > { %v11971_v33 = vpack.i.b16 %v3963_v56, %v3925_v55  ;;  %v4883_v29 = vunpack.c.h.b16 %v11870_v13  ;;  %v11980_v4 = vpack.i.b16 %v3887_v2, %v3849_v31  ;;  %v4291_v58 = vshrl.u32 %v11441_v60, 16  ;;  %v11991_v13 = vld [vmem:[%s12956_s1] sm:$0xff] }
 0x3cd   : > { %v1402_v47 = vsel %vm288_vm6, %v1332_v45, %v1370_v3  ;;  %v4327_v37 = vshrl.u32 %v3849_v31, 16  ;;  %v4328_v35 = vshrl.u32 %v3887_v2, 16  ;;  %v3755_v5 = vperm.slane %v3749_v11, %v13579_v34  ;;  %7097 = vmatmul.msk.bf16.vlgmr.msra.gmra.mxu0 %vm5312_vm12, %v11991_v13  ;;  %7105 = vmatmul.msk.bf16.vlgmr.msra.gmra.mxu2 %vm5312_vm12, %v11991_v13 }
 0x3ce   : > { %v3766_v26 = vrot.slane %v3759_v16, 4  ;;  %v4948_v50 = vunpack.c.h.b16 %v11971_v33  ;;  %v4358_v52 = vshrl.u32 %v3963_v56, 16  ;;  %v11993_v42 = vrot.slane %v3793_v6, 4  ;;  %7101 = vmatmul.msk.bf16.vlgmr.msra.gmra.mxu1 %vm5312_vm12, %v11991_v13 }
 0x3cf   : > { %5054 = vrot.lane.b32.xlu1 %v5031_v38, %s7345_s30  ;;  %5048 = vrot.lane.b32.xlu0 %v5028_v59, %s7345_s30  ;;  %v11996_v60 = vpack.i.b16 %v4262_v17, %v4261_v28  ;;  %v11998_v12 = vpack.i.b16 %v4292_v22, %v4291_v58  ;;  %v12003_v38 = vsel %vm4731_vm3, %v11680_v0, %v11892_v48  ;;  %v3736_v56 = vrot.slane %v1402_v47, 4 }
 0x3d0   : > { %4983 = vrot.lane.b32.xlu2 %v4963_v39, %s7346_s7  ;;  %v4946_v15 = vunpack.c.h.b16 %v11980_v4  ;;  %v4357_v32 = vshrl.u32 %v3925_v55, 16  ;;  %v3739_v59 = vsel %vm2199_vm8, %v1402_v47, %v3738_v57  ;;  %v4897_v2 = vpack.c.b16 %v4883_v29, %v4881_v53 }
 0x3d1   : > { %v1304_v46 = vpop.permute.xlu1 %1303  ;;  %v1300_v54 = vpop.permute.xlu0 %1299  ;;  %v12010_v43 = vpack.i.b16 %v4328_v35, %v4327_v37  ;;  %v3760_v0 = vrot.slane %v3755_v5, 4  ;;  %v4877_v16 = vunpack.c.h.b16 %v11996_v60  ;;  %v4879_v45 = vunpack.c.h.b16 %v11998_v12 }
 0x3d2   : > { %v1356_v31 = vrot.slane %v1304_v46, 4  ;;  %v12016_v48 = vpop.permute.xlu2 %4645  ;;  %v1354_v39 = vrot.slane %v1300_v54, 4  ;;  %v4962_v55 = vpack.c.b16 %v4948_v50, %v4946_v15  ;;  %v12018_v6 = vpack.i.b16 %v4358_v52, %v4357_v32 }
 0x3d3   : > { %v4945_v53 = vunpack.c.l.b16 %v11980_v4  ;;  %v3737_v11 = vsel %vm2199_vm8, %v3736_v56, %v11897_v23  ;;  %v3747_v3 = vperm.slane %v3739_v59, %v13579_v34  ;;  %v5010_v47 = vunpack.c.l.b16 %v12010_v43 }
 0x3d4   : > { %v1388_v57 = vsel %vm288_vm6, %v1304_v46, %v1356_v31  ;;  %v1386_v17 = vsel %vm288_vm6, %v1300_v54, %v1354_v39  ;;  %v4947_v58 = vunpack.c.l.b16 %v11971_v33  ;;  %v3743_v35 = vperm.slane %v3737_v11, %v13579_v34 }
 0x3d5   : > { %v3698_v28 = vrot.slane %v1388_v57, 4  ;;  %v3701_v22 = vsel %vm2199_vm8, %v1388_v57, %v3700_v19  ;;  %v3660_v37 = vrot.slane %v1386_v17, 4  ;;  %v3663_v23 = vsel %vm2199_vm8, %v1386_v17, %v3662_v44 }
 0x3d6   : > { %v3709_v29 = vperm.slane %v3701_v22, %v13579_v34  ;;  %v5012_v19 = vunpack.c.l.b16 %v12018_v6  ;;  %v3671_v33 = vperm.slane %v3663_v23, %v13579_v34  ;;  %v4895_v46 = vpack.c.b16 %v4879_v45, %v4877_v16  ;;  %v14095_v22 = vld [vmem:[#allocation112_spill] sm:$0xff] }
 0x3d7   : > { %v3699_v4 = vsel %vm2199_vm8, %v3698_v28, %v11853_v51  ;;  %4981 = vrot.lane.b32.xlu1 %v4962_v55, %s7346_s7  ;;  %4855 = vrot.lane.b32.xlu0 %v11949_v30, %s7343_s12  ;;  %v3767_v51 = vsel %vm2199_vm8, %v3766_v26, %v3747_v3  ;;  %v3661_v52 = vsel %vm2199_vm8, %v3660_v37, %v11883_v63  ;;  %v14094_v28 = vld [vmem:[#allocation54_spill] sm:$0xff] }
 0x3d8   : > { %v3705_v5 = vperm.slane %v3699_v4, %v13579_v34  ;;  %v3729_v50 = vsel %vm2199_vm8, %v11923_v27, %v3709_v29  ;;  %4916 = vrot.lane.b32.xlu2 %v4897_v2, %s7344_s29  ;;  %v3667_v15 = vperm.slane %v3661_v52, %v13579_v34  ;;  %v3691_v30 = vsel %vm2199_vm8, %v11836_v7, %v3671_v33 }
 0x3d9   : > { %v3733_v44 = vperm.slane %v3729_v50, %v14034_v21  ;;  %v12053_v56 = vpop.permute.xlu1 %4643  ;;  %v1336_v32 = vpop.permute.xlu0 %1335  ;;  %v4961_v26 = vpack.c.b16 %v4947_v58, %v4945_v53  ;;  %v3695_v63 = vperm.slane %v3691_v30, %v14034_v21  ;;  %v3761_v39 = vsel %vm2199_vm8, %v3760_v0, %v3743_v35 }
 0x3da   : > { %v3723_v27 = vsel %vm2199_vm8, %v11938_v10, %v3705_v5  ;;  %v12062_v54 = vpop.permute.xlu2 %4782  ;;  %v1372_v2 = vrot.slane %v1336_v32, 4  ;;  %v3771_v55 = vperm.slane %v3767_v51, %v14034_v21  ;;  %v3685_v10 = vsel %vm2199_vm8, %v11839_v62, %v3667_v15 }
 0x3db   : > { %v3727_v59 = vperm.slane %v3723_v27, %v14034_v21  ;;  %v3734_v31 = vrot.slane %v3733_v44, 4  ;;  %v5026_v57 = vpack.c.b16 %v5012_v19, %v5010_v47  ;;  %v3689_v7 = vperm.slane %v3685_v10, %v14034_v21 }
 0x3dc   : > { %v3696_v16 = vrot.slane %v3695_v63, 4  ;;  %v1404_v45 = vsel %vm288_vm6, %v1336_v32, %v1372_v2  ;;  %v4816_v0 = vunpack.c.h.b16 %v14094_v28  ;;  %v4818_v29 = vunpack.c.h.b16 %v14095_v22 }
 0x3dd   : > { %v3735_v53 = vsel %vm2199_vm8, %v3734_v31, %v3727_v59  ;;  %v3774_v11 = vrot.slane %v1404_v45, 4  ;;  %v3777_v3 = vsel %vm2199_vm8, %v1404_v45, %v3776_v25  ;;  %v5015_v62 = vunpack.c.h.b16 %v11912_v24 }
 0x3de   : > { %v3785_v17 = vperm.slane %v3777_v3, %v13579_v34  ;;  %v5017_v47 = vunpack.c.h.b16 %v11903_v20  ;;  %v3697_v58 = vsel %vm2199_vm8, %v3696_v16, %v3689_v7  ;;  %v3765_v4 = vperm.slane %v3761_v39, %v14034_v21 }
 0x3df   : > { %5044 = vrot.lane.b32.xlu1 %v5026_v57, %s7345_s30  ;;  %v3775_v37 = vsel %vm2199_vm8, %v3774_v11, %v11868_v1  ;;  %4912 = vrot.lane.b32.xlu0 %v4895_v46, %s7344_s29  ;;  %v4232_v25 = vshrl.u32 %v11622_v8, 16  ;;  %v4266_v23 = vpack.i.b16 %v3735_v53, %v3697_v58  ;;  %v3772_v19 = vrot.slane %v3771_v55, 4 }
 0x3e0   : > { %v4667_v35 = vsel %vm425_vm0, %v12053_v56, %v12016_v48  ;;  %v3781_v24 = vperm.slane %v3775_v37, %v13579_v34  ;;  %v3805_v20 = vsel %vm2199_vm8, %v11977_v41, %v3785_v17  ;;  %4979 = vrot.lane.b32.xlu2 %v4961_v26, %s7346_s7  ;;  %v4878_v33 = vunpack.c.l.b16 %v11998_v12  ;;  %v12115_v26 = vld [vmem:[%s12956_s1 + $0x8] sm:$0xff] }
 0x3e1   : > { %v12093_v5 = vpop.permute.xlu1 %4707  ;;  %v3809_v1 = vperm.slane %v3805_v20, %v14034_v21  ;;  %v12096_v50 = vpop.permute.xlu0 %4776  ;;  %v4231_v48 = vshrl.u32 %v11637_v40, 16  ;;  %v4876_v52 = vunpack.c.l.b16 %v11996_v60  ;;  %v4201_v46 = vshrl.u32 %v11633_v36, 16  ;;  %v14096_v40 = vld [vmem:[#allocation160_spill] sm:$0xff]  ;;  %7098 = vmatmul.msk.bf16.gmra.mxu0 %vm5312_vm12, %v12115_v26  ;;  %7106 = vmatmul.msk.bf16.gmra.mxu2 %vm5312_vm12, %v12115_v26 }
 0x3e2   : > { %v5143_v8 = vsel %vm4731_vm3, %v4667_v35, %v12093_v5  ;;  %v3799_v51 = vsel %vm2199_vm8, %v11993_v42, %v3781_v24  ;;  %v961_v44 = vpop.permute.xlu2 %960  ;;  %v5171_v41 = vsel %vm4796_vm5, %v12003_v38, %v12096_v50  ;;  %v5029_v12 = vpack.c.b16 %v5017_v47, %v5015_v62  ;;  %7102 = vmatmul.msk.bf16.gmra.mxu1 %vm5312_vm12, %v12115_v26 }
 0x3e3   : > { %5475 = vmatpush.bf16.msrb.mxu0 %v5143_v8  ;;  %v3803_v27 = vperm.slane %v3799_v51, %v14034_v21  ;;  %v3810_v15 = vrot.slane %v3809_v1, 4  ;;  %5503 = vmatpush.bf16.msrb.mxu1 %v5171_v41  ;;  %v4233_v30 = vpack.i.b16 %v4232_v25, %v4231_v48  ;;  %v4202_v32 = vshrl.u32 %v14096_v40, 16  ;;  %v14097_v1 = vld [vmem:[#allocation119_spill] sm:$0xff]  ;;  %v14098_v41 = vld [vmem:[#allocation154_spill] sm:$0xff]  ;;  %v12157_v40 = vld [vmem:[%s12956_s1 + $0x10] sm:$0xff] }
 0x3e4   : > { %v3773_v42 = vsel %vm2199_vm8, %v3772_v19, %v3765_v4  ;;  %v4267_v38 = vshrl.u32 %v3697_v58, 16  ;;  %v4268_v59 = vshrl.u32 %v3735_v53, 16  ;;  %v4832_v60 = vpack.c.b16 %v4818_v29, %v4816_v0 }
 0x3e5   : > { %v4894_v31 = vpack.c.b16 %v4878_v33, %v4876_v52  ;;  %v3811_v36 = vsel %vm2199_vm8, %v3810_v15, %v3803_v27  ;;  %v4203_v63 = vpack.i.b16 %v4202_v32, %v4201_v46  ;;  %v4875_v55 = vunpack.c.h.b16 %v4233_v30  ;;  %v14099_v27 = vld [vmem:[#allocation145_spill] sm:$0xff] }
 0x3e6   : > { %v4296_v2 = vpack.i.b16 %v3811_v36, %v3773_v42  ;;  %v12121_v39 = vpack.i.b16 %v4268_v59, %v4267_v38  ;;  %v4297_v10 = vshrl.u32 %v3773_v42, 16  ;;  %v4298_v57 = vshrl.u32 %v3811_v36, 16 }
 0x3e7   : > { %5050 = vrot.lane.b32.xlu1 %v5029_v12, %s7345_s30  ;;  %4851 = vrot.lane.b32.xlu0 %v4832_v60, %s7343_s12  ;;  %v4941_v16 = vunpack.c.l.b16 %v4266_v23  ;;  %v4942_v53 = vunpack.c.h.b16 %v4266_v23  ;;  %v4874_v28 = vunpack.c.l.b16 %v4233_v30  ;;  %v4873_v29 = vunpack.c.h.b16 %v4203_v63  ;;  %v14100_v12 = vld [vmem:[#allocation11_spill] sm:$0xff] }
 0x3e8   : > { %4910 = vrot.lane.b32.xlu2 %v4894_v31, %s7344_s29  ;;  %v4943_v45 = vunpack.c.l.b16 %v4296_v2  ;;  %v4944_v11 = vunpack.c.h.b16 %v4296_v2  ;;  %v12131_v0 = vpack.i.b16 %v4298_v57, %v4297_v10  ;;  %v4872_v47 = vunpack.c.l.b16 %v4203_v63 }
 0x3e9   : > { %v12127_v7 = vpop.permute.xlu1 %940  ;;  %v937_v3 = vpop.permute.xlu0 %936  ;;  %v5006_v58 = vunpack.c.l.b16 %v12121_v39  ;;  %v1011_v37 = vrot.slane %v961_v44, 4  ;;  %v4893_v25 = vpack.c.b16 %v4875_v55, %v4873_v29  ;;  %v1003_v35 = vrot.slane %v11842_v9, 4 }
 0x3ea   : > { %v12133_v22 = vpop.permute.xlu2 %972  ;;  %v4959_v17 = vpack.c.b16 %v4943_v45, %v4941_v16  ;;  %v4960_v62 = vpack.c.b16 %v4944_v11, %v4942_v53  ;;  %v5008_v4 = vunpack.c.l.b16 %v12131_v0  ;;  %v4892_v23 = vpack.c.b16 %v4874_v28, %v4872_v47 }
 0x3eb   : > { %v1043_v24 = vsel %vm310_vm13, %v961_v44, %v1011_v37  ;;  %v4814_v8 = vunpack.c.h.b16 %v14097_v1  ;;  %v1035_v48 = vsel %vm310_vm13, %v11842_v9, %v1003_v35  ;;  %v4812_v52 = vunpack.c.h.b16 %v14098_v41  ;;  %v14101_v37 = vld [vmem:[#allocation148_spill] sm:$0xff] }
 0x3ec   : > { %v12137_v19 = vpack.c.b16 %v5008_v4, %v5006_v58  ;;  %v3520_v46 = vrot.slane %v1043_v24, 4  ;;  %v3522_v32 = vrot.slane %v1035_v48, 4  ;;  %v1021_v42 = vrot.slane %v11906_v49, 4 }
 0x3ed   : > { %v4830_v30 = vpack.c.b16 %v4814_v8, %v4812_v52  ;;  %v1019_v9 = vrot.slane %v11945_v61, 4  ;;  %v1005_v38 = vrot.slane %v11951_v18, 4  ;;  %v999_v31 = vrot.slane %v937_v3, 4 }
 0x3ee   : > { %v3521_v59 = vsel %vm2199_vm8, %v3520_v46, %v1035_v48  ;;  %v3523_v60 = vsel %vm2199_vm8, %v1043_v24, %v3522_v32  ;;  %v1001_v36 = vrot.slane %v12127_v7, 4  ;;  %v1053_v2 = vsel %vm310_vm13, %v11906_v49, %v1021_v42  ;;  %v14102_v48 = vld [vmem:[#allocation139_spill] sm:$0xff] }
 0x3ef   : > { %4908 = vrot.lane.b32.xlu1 %v4893_v25, %s7344_s29  ;;  %4906 = vrot.lane.b32.xlu0 %v4892_v23, %s7344_s29  ;;  %v1051_v55 = vsel %vm310_vm13, %v11945_v61, %v1019_v9  ;;  %v1037_v10 = vsel %vm310_vm13, %v11951_v18, %v1005_v38  ;;  %v3527_v45 = vperm.slane %v3521_v59, %v13579_v34  ;;  %v3636_v61 = vrot.slane %v1053_v2, 4 }
 0x3f0   : > { %4975 = vrot.lane.b32.xlu2 %v4959_v17, %s7346_s7  ;;  %v3531_v53 = vperm.slane %v3523_v60, %v13579_v34  ;;  %v1017_v17 = vrot.slane %v12133_v22, 4  ;;  %v3598_v58 = vrot.slane %v1051_v55, 4  ;;  %v12186_v18 = vsel %vm310_vm13, %v12127_v7, %v1001_v36 }
 0x3f1   : > { %v12144_v20 = vpop.permute.xlu1 %968  ;;  %v965_v33 = vpop.permute.xlu0 %964  ;;  %7099 = vmatmul.msk.bf16.gmra.mxu0 %vm5312_vm12, %v12157_v40  ;;  %7107 = vmatmul.msk.bf16.gmra.mxu2 %vm5312_vm12, %v12157_v40  ;;  %v3560_v4 = vrot.slane %v1037_v10, 4  ;;  %v4799_v25 = vsel %vm4796_vm5, %v14101_v37, %v12062_v54  ;;  %v12197_v7 = vrot.slane %v3527_v45, 4  ;;  %v3548_v41 = vrot.slane %v12186_v18, 4 }
 0x3f2   : > { %v4586_v51 = vpop.permute.xlu2 %4585  ;;  %7103 = vmatmul.msk.bf16.gmra.mxu1 %vm5312_vm12, %v12157_v40  ;;  %v1013_v11 = vrot.slane %v965_v33, 4  ;;  %v1015_v23 = vrot.slane %v12144_v20, 4  ;;  %v1049_v54 = vsel %vm310_vm13, %v12133_v22, %v1017_v17  ;;  %v5011_v59 = vunpack.c.h.b16 %v12010_v43 }
 0x3f3   : > { %v4604_v15 = vsel %vm443_vm14, %v14099_v27, %v4586_v51  ;;  %v3538_v51 = vrot.slane %v3531_v53, 4  ;;  %v3624_v42 = vrot.slane %v1049_v54, 4  ;;  %vm4926_vm6 = vcmask 113664  }
 0x3f4   : > { %v5123_v44 = vsel %vm425_vm0, %v4604_v15, %v14100_v12  ;;  %v5013_v15 = vunpack.c.h.b16 %v12018_v6  ;;  %v12211_v12 = vsel %vm310_vm13, %v12144_v20, %v1015_v23  ;;  %v12223_v6 = vld [vmem:[%s12956_s1 + $0x18] sm:$0xff] }
 0x3f5   : > { %5445 = vmatpush.bf16.msra.mxu3 %v5123_v44 }
 0x3f6   : > { %v5027_v43 = vpack.c.b16 %v5013_v15, %v5011_v59 }
 0x3f7   : > { %4847 = vrot.lane.b32.xlu1 %v4830_v30, %s7343_s12 }
 0x3f8   : > { %4977 = vrot.lane.b32.xlu2 %v4960_v62, %s7346_s7  ;;  %v1031_v62 = vsel %vm310_vm13, %v937_v3, %v999_v31  ;;  %v1045_v3 = vsel %vm310_vm13, %v965_v33, %v1013_v11 }
 0x3f9   : > { %v997_v63 = vpop.permute.xlu1 %996  ;;  %v993_v16 = vpop.permute.xlu0 %992  ;;  %v3510_v24 = vrot.slane %v1031_v62, 4  ;;  %v3558_v44 = vrot.slane %v1045_v3, 4  ;;  %v3561_v30 = vsel %vm2199_vm8, %v1045_v3, %v3560_v4 }
 0x3fa   : > { %v1029_v57 = vrot.slane %v997_v63, 4  ;;  %v953_v28 = vpop.permute.xlu2 %952  ;;  %v1027_v29 = vrot.slane %v993_v16, 4 }
 0x3fb   : > { %v1007_v47 = vrot.slane %v953_v28, 4 }
 0x3fc   : > { %v1061_v49 = vsel %vm310_vm13, %v997_v63, %v1029_v57  ;;  %v1059_v8 = vsel %vm310_vm13, %v993_v16, %v1027_v29  ;;  %v3586_v63 = vrot.slane %v12211_v12, 4  ;;  %v3559_v16 = vsel %vm2199_vm8, %v3558_v44, %v1037_v10 }
 0x3fd   : > { %v1039_v35 = vsel %vm310_vm13, %v953_v28, %v1007_v47  ;;  %v3634_v1 = vrot.slane %v1061_v49, 4  ;;  %v3637_v52 = vsel %vm2199_vm8, %v1061_v49, %v3636_v61  ;;  %v3596_v22 = vrot.slane %v1059_v8, 4  ;;  %v14103_v49 = vld [vmem:[#allocation137_spill] sm:$0xff]  ;;  %v14104_v47 = vld [vmem:[#allocation115_spill] sm:$0xff] }
 0x3fe   : > { %v3508_v46 = vrot.slane %v1039_v35, 4  ;;  %v3511_v27 = vsel %vm2199_vm8, %v1039_v35, %v3510_v24  ;;  %v3645_v20 = vperm.slane %v3637_v52, %v13579_v34  ;;  %v3599_v31 = vsel %vm2199_vm8, %v1059_v8, %v3598_v58 }
 0x3ff   : > { %4902 = vrot.lane.b32.xlu1 %v14102_v48, %s7344_s29  ;;  %v3635_v9 = vsel %vm2199_vm8, %v3634_v1, %v1053_v2  ;;  %v3519_v60 = vperm.slane %v3511_v27, %v13579_v34  ;;  %v3569_v2 = vperm.slane %v3561_v30, %v13579_v34  ;;  %v3597_v53 = vsel %vm2199_vm8, %v3596_v22, %v1051_v55  ;;  %v14105_v22 = vld [vmem:[#allocation87_spill] sm:$0xff] }
 0x400   : > { %5040 = vrot.lane.b32.xlu2 %v12137_v19, %s7345_s30  ;;  %v3509_v57 = vsel %vm2199_vm8, %v3508_v46, %v1031_v62  ;;  %v3641_v45 = vperm.slane %v3635_v9, %v13579_v34  ;;  %v3607_v28 = vperm.slane %v3599_v31, %v13579_v34  ;;  %v4810_v61 = vunpack.c.h.b16 %v14104_v47 }
 0x401   : > { %v12206_v33 = vpop.permute.xlu1 %4709  ;;  %v12214_v32 = vpop.permute.xlu0 %4845  ;;  %7100 = vmatmul.msk.bf16.gmra.mxu0 %vm5312_vm12, %v12223_v6  ;;  %v3652_v10 = vrot.slane %v3645_v20, 4  ;;  %v3515_v62 = vperm.slane %v3509_v57, %v13579_v34  ;;  %v3539_v55 = vsel %vm2199_vm8, %v3538_v51, %v3519_v60  ;;  %7108 = vmatmul.msk.bf16.gmra.mxu2 %vm5312_vm12, %v12223_v6  ;;  %v3565_v4 = vperm.slane %v3559_v16, %v13579_v34 }
 0x402   : > { %v989_v38 = vpop.permute.xlu2 %988  ;;  %v5199_v19 = vsel %vm4861_vm1, %v4799_v25, %v12214_v32  ;;  %v3576_v37 = vrot.slane %v3569_v2, 4  ;;  %v3603_v25 = vperm.slane %v3597_v53, %v13579_v34  ;;  %7104 = vmatmul.msk.bf16.gmra.mxu1 %vm5312_vm12, %v12223_v6  ;;  %v3646_v24 = vrot.slane %v3641_v45, 4 }
 0x403   : > { %v1025_v36 = vrot.slane %v989_v38, 4  ;;  %5531 = vmatpush.bf16.msrb.mxu2 %v5199_v19  ;;  %v3543_v51 = vperm.slane %v3539_v55, %v14034_v21  ;;  %v3614_v52 = vrot.slane %v3607_v28, 4  ;;  %v3533_v15 = vsel %vm2199_vm8, %v12197_v7, %v3515_v62 }
 0x404   : > { %v3608_v9 = vrot.slane %v3603_v25, 4 }
 0x405   : > { %v1057_v11 = vsel %vm310_vm13, %v989_v38, %v1025_v36  ;;  %v3537_v36 = vperm.slane %v3533_v15, %v14034_v21  ;;  %v3544_v16 = vrot.slane %v3543_v51, 4 }
 0x406   : > { %v3622_v29 = vrot.slane %v1057_v11, 4  ;;  %v3625_v17 = vsel %vm2199_vm8, %v1057_v11, %v3624_v42  ;;  %v3570_v11 = vrot.slane %v3565_v4, 4 }
 0x407   : > { %4967 = vrot.lane.b32.xlu1 %v14103_v49, %s7346_s7  ;;  %v3633_v58 = vperm.slane %v3625_v17, %v13579_v34 }
 0x408   : > { %v3623_v23 = vsel %vm2199_vm8, %v3622_v29, %v1049_v54  ;;  %5046 = vrot.lane.b32.xlu2 %v5027_v43, %s7345_s30  ;;  %v14107_v29 = vld [vmem:[#allocation141_spill] sm:$0xff] }
 0x409   : > { %v985_v35 = vpop.permute.xlu1 %984  ;;  %v3629_v3 = vperm.slane %v3623_v23, %v13579_v34  ;;  %v3653_v1 = vsel %vm2199_vm8, %v3652_v10, %v3633_v58  ;;  %v957_v48 = vpop.permute.xlu0 %956 }
 0x40a   : > { %v1023_v8 = vrot.slane %v985_v35, 4  ;;  %v3657_v46 = vperm.slane %v3653_v1, %v14034_v21  ;;  %v4582_v27 = vpop.permute.xlu2 %4581  ;;  %v1009_v54 = vrot.slane %v957_v48, 4 }
 0x40b   : > { %v3647_v44 = vsel %vm2199_vm8, %v3646_v24, %v3629_v3  ;;  %v4603_v42 = vsel %vm443_vm14, %v14105_v22, %v4582_v27  ;;  %v5009_v24 = vunpack.c.h.b16 %v12131_v0  ;;  %vm5056_vm14 = vcmask 146432  }
 0x40c   : > { %v1055_v30 = vsel %vm310_vm13, %v985_v35, %v1023_v8  ;;  %v3651_v38 = vperm.slane %v3647_v44, %v14034_v21  ;;  %v3658_v20 = vrot.slane %v3657_v46, 4  ;;  %v1041_v31 = vsel %vm310_vm13, %v957_v48, %v1009_v54  ;;  %v14108_v8 = vld [vmem:[#allocation162_spill] sm:$0xff] }
 0x40d   : > { %v3584_v19 = vrot.slane %v1055_v30, 4  ;;  %v3587_v59 = vsel %vm2199_vm8, %v1055_v30, %v3586_v63  ;;  %v5119_v7 = vsel %vm425_vm0, %v4603_v42, %v12053_v56  ;;  %v3546_v57 = vrot.slane %v1041_v31, 4  ;;  %v14106_v63 = vld [vmem:[#allocation80_spill] sm:$0xff] }
 0x40e   : > { %v3595_v60 = vperm.slane %v3587_v59, %v13579_v34  ;;  %v3549_v43 = vsel %vm2199_vm8, %v1041_v31, %v3548_v41  ;;  %5446 = vmatpush.bf16.msra.mxu3 %v5119_v7  ;;  %v3659_v58 = vsel %vm2199_vm8, %v3658_v20, %v3651_v38  ;;  %v5007_v35 = vunpack.c.h.b16 %v12121_v39 }
 0x40f   : > { %v3585_v2 = vsel %vm2199_vm8, %v3584_v19, %v12211_v12  ;;  %4969 = vrot.lane.b32.xlu1 %v14106_v63, %s7346_s7  ;;  %v3557_v56 = vperm.slane %v3549_v43, %v13579_v34  ;;  %v4732_v12 = vsel %vm4731_vm3, %v12093_v5, %v12206_v33  ;;  %v3547_v41 = vsel %vm2199_vm8, %v3546_v57, %v12186_v18 }
 0x410   : > { %v3591_v45 = vperm.slane %v3585_v2, %v13579_v34  ;;  %v3615_v53 = vsel %vm2199_vm8, %v3614_v52, %v3595_v60  ;;  %4904 = vrot.lane.b32.xlu2 %v14107_v29, %s7344_s29  ;;  %v3553_v10 = vperm.slane %v3547_v41, %v13579_v34  ;;  %v4808_v48 = vunpack.c.h.b16 %v14108_v8  ;;  %v14110_v29 = vld [vmem:[#allocation73_spill] sm:$0xff] }
 0x411   : > { %v3619_v28 = vperm.slane %v3615_v53, %v14034_v21  ;;  %v4779_v17 = vpop.permute.xlu1 %4778  ;;  %v3577_v62 = vsel %vm2199_vm8, %v3576_v37, %v3557_v56  ;;  %v4773_v55 = vpop.permute.xlu0 %4772  ;;  %7109 = vmatmul.msk.bf16.vlgmr.msra.gmra.mxu3 %vm5312_vm12, %v11991_v13  ;;  %v3545_v37 = vsel %vm2199_vm8, %v3544_v16, %v3537_v36  ;;  %v4238_v27 = vshrl.u32 %v3659_v58, 16  ;;  %7113 = vmatmul.msk.bf16.vlgmr.msrb.gmra.mxu0 %vm5312_vm12, %v11991_v13  ;;  %v14109_v56 = vld [vmem:[#allocation134_spill] sm:$0xff] }
 0x412   : > { %v3609_v49 = vsel %vm2199_vm8, %v3608_v9, %v3591_v45  ;;  %v3581_v18 = vperm.slane %v3577_v62, %v14034_v21  ;;  %v12296_v4 = vpop.permute.xlu2 %4837  ;;  %v5167_v25 = vsel %vm4796_vm5, %v4732_v12, %v4773_v55  ;;  %v3571_v23 = vsel %vm2199_vm8, %v3570_v11, %v3553_v10  ;;  %v14111_v62 = vld [vmem:[#allocation35_spill] sm:$0xff] }
 0x413   : > { %v3613_v5 = vperm.slane %v3609_v49, %v14034_v21  ;;  %v3620_v33 = vrot.slane %v3619_v28, 4  ;;  %5504 = vmatpush.bf16.msrb.mxu1 %v5167_v25  ;;  %v3575_v3 = vperm.slane %v3571_v23, %v14034_v21  ;;  %v12306_v54 = vpack.c.b16 %v5009_v24, %v5007_v35 }
 0x414   : > { %v3582_v1 = vrot.slane %v3581_v18, 4  ;;  %v4828_v15 = vpack.c.b16 %v4810_v61, %v4808_v48  ;;  %v4207_v39 = vshrl.u32 %v3545_v37, 16  ;;  %v4798_v47 = vsel %vm4796_vm5, %v12096_v50, %v4779_v17 }
 0x415   : > { %v3621_v51 = vsel %vm2199_vm8, %v3620_v33, %v3613_v5  ;;  %vm4991_vm13 = vcmask 130048   ;;  %v14112_v5 = vld [vmem:[#allocation136_spill] sm:$0xff]  ;;  %vm5817_vm0 = vcmask 523264   ;;  %vm6344_vm3 = vcmask 965632  }
 0x416   : > { %v4236_v52 = vpack.i.b16 %v3659_v58, %v3621_v51  ;;  %v4237_v46 = vshrl.u32 %v3621_v51, 16  ;;  %v3583_v44 = vsel %vm2199_vm8, %v3582_v1, %v3575_v3  ;;  %7117 = vmatmul.msk.bf16.vlgmr.msrb.gmra.mxu1 %vm5312_vm12, %v11991_v13 }
 0x417   : > { %v4206_v0 = vpack.i.b16 %v3583_v44, %v3545_v37  ;;  %v4208_v22 = vshrl.u32 %v3583_v44, 16  ;;  %v14113_v44 = vld [vmem:[#allocation132_spill] sm:$0xff] }
 0x418   : > { %v4939_v30 = vunpack.c.l.b16 %v4236_v52  ;;  %v4239_v42 = vpack.i.b16 %v4238_v27, %v4237_v46  ;;  %4843 = vrot.lane.b32.xlu2 %v4828_v15, %s7343_s12  ;;  %v4940_v38 = vunpack.c.h.b16 %v4236_v52 }
 0x419   : > { %v4775_v9 = vpop.permute.xlu1 %4774  ;;  %v12318_v61 = vpop.permute.xlu0 %4841  ;;  %v4937_v19 = vunpack.c.l.b16 %v4206_v0  ;;  %v4209_v59 = vpack.i.b16 %v4208_v22, %v4207_v39  ;;  %v4938_v7 = vunpack.c.h.b16 %v4206_v0 }
 0x41a   : > { %v5005_v20 = vunpack.c.h.b16 %v4239_v42  ;;  %v4988_v60 = vpop.permute.xlu2 %4987  ;;  %v5195_v31 = vsel %vm4861_vm1, %v4798_v47, %v12318_v61  ;;  %v5004_v36 = vunpack.c.l.b16 %v4239_v42  ;;  %v4797_v2 = vsel %vm4796_vm5, %v4773_v55, %v4775_v9 }
 0x41b   : > { %5532 = vmatpush.bf16.msrb.mxu2 %v5195_v31  ;;  %v4957_v57 = vpack.c.b16 %v4939_v30, %v4937_v19  ;;  %v5003_v43 = vunpack.c.h.b16 %v4209_v59  ;;  %v5002_v63 = vunpack.c.l.b16 %v4209_v59  ;;  %v4958_v16 = vpack.c.b16 %v4940_v38, %v4938_v7  ;;  %v14114_v59 = vld [vmem:[#allocation23_spill] sm:$0xff] }
 0x41c   : > { %v5191_v53 = vsel %vm4861_vm1, %v4797_v2, %v12296_v4  ;;  %vm6361_vm5 = vcmask 949248  }
 0x41d   : > { %4971 = vrot.lane.b32.xlu0 %v4957_v57, %s7346_s7  ;;  %v5023_v50 = vpack.c.b16 %v5005_v20, %v5003_v43  ;;  %v5022_v45 = vpack.c.b16 %v5004_v36, %v5002_v63 }
 0x41f   : > { %5038 = vrot.lane.b32.xlu1 %v5023_v50, %s7345_s30  ;;  %5533 = vmatpush.bf16.msrb.mxu2 %v5191_v53 }
 0x420   : > { %5032 = vrot.lane.b32.xlu2 %v14109_v56, %s7345_s30 }
 0x421   : > { %v4925_v11 = vpop.permute.xlu1 %4924  ;;  %v4923_v12 = vpop.permute.xlu0 %4922  ;;  %7110 = vmatmul.msk.bf16.gmra.mxu3 %vm5312_vm12, %v12115_v26  ;;  %7114 = vmatmul.msk.bf16.gmra.mxu0 %vm5312_vm12, %v12115_v26 }
 0x422   : > { %v4860_v28 = vpop.permute.xlu2 %4859  ;;  %v4932_v41 = vsel %vm4926_vm6, %v4923_v12, %v4925_v11  ;;  %7121 = vmatmul.msk.bf16.vlgmr.msrb.gmra.mxu2 %vm5312_vm12, %v11991_v13 }
 0x423   : > { %v4867_v17 = vsel %vm4861_vm1, %v14110_v29, %v4860_v28  ;;  %v5259_v49 = vsel %vm4991_vm13, %v4932_v41, %v4988_v60 }
 0x424   : > { %v5235_v10 = vsel %vm4926_vm6, %v4867_v17, %v4923_v12  ;;  %v5345_v55 = vand.u32 %v14111_v62, %v5259_v49 }
 0x425   : > { %4973 = vrot.lane.b32.xlu0 %v4958_v16, %s7346_s7  ;;  %v5343_v58 = vand.u32 %v14111_v62, %v5235_v10 }
 0x426   : > { %5586 = vmatpush.bf16.msra.mxu0 %v5345_v55  ;;  %7118 = vmatmul.msk.bf16.gmra.mxu1 %vm5312_vm12, %v12115_v26 }
 0x427   : > { %5557 = vmatpush.bf16.msrb.mxu3 %v5343_v58 }
 0x428   : > { %5034 = vrot.lane.b32.xlu2 %v14112_v5, %s7345_s30 }
 0x429   : > { %v5053_v33 = vpop.permute.xlu1 %5052  ;;  %v4990_v18 = vpop.permute.xlu0 %4989 }
 0x42a   : > { %v4984_v25 = vpop.permute.xlu2 %4983  ;;  %v4997_v23 = vsel %vm4991_vm13, %v4988_v60, %v4990_v18 }
 0x42b   : > { %v5283_v37 = vsel %vm5056_vm14, %v4997_v23, %v5053_v33 }
 0x42c   : > { %v5347_v35 = vand.u32 %v14111_v62, %v5283_v37 }
 0x42d   : > { %5036 = vrot.lane.b32.xlu0 %v5022_v45, %s7345_s30 }
 0x42e   : > { %5615 = vmatpush.bf16.msra.mxu1 %v5347_v35 }
 0x431   : > { %v4921_v24 = vpop.permute.xlu1 %4920  ;;  %v4919_v3 = vpop.permute.xlu0 %4918  ;;  %7111 = vmatmul.msk.bf16.gmra.mxu3 %vm5312_vm12, %v12157_v40  ;;  %7115 = vmatmul.msk.bf16.gmra.mxu0 %vm5312_vm12, %v12157_v40 }
 0x432   : > { %v4917_v1 = vpop.permute.xlu2 %4916  ;;  %v4931_v8 = vsel %vm4926_vm6, %v4919_v3, %v4921_v24  ;;  %7122 = vmatmul.msk.bf16.gmra.mxu2 %vm5312_vm12, %v12115_v26 }
 0x433   : > { %v5255_v48 = vsel %vm4991_vm13, %v4931_v8, %v4984_v25 }
 0x434   : > { %5587 = vmatpush.bf16.msra.mxu0 %v5255_v48 }
 0x435   : > { %5042 = vrot.lane.b32.xlu0 %v12306_v54, %s7345_s30 }
 0x436   : > { %7119 = vmatmul.msk.bf16.gmra.mxu1 %vm5312_vm12, %v12157_v40 }
 0x439   : > { %v4915_v51 = vpop.permute.xlu1 %4914  ;;  %v4986_v46 = vpop.permute.xlu0 %4985 }
 0x43a   : > { %v4930_v52 = vsel %vm4926_vm6, %v4915_v51, %v4917_v1  ;;  %v4980_v27 = vpop.permute.xlu2 %4979  ;;  %v4996_v54 = vsel %vm4991_vm13, %v4984_v25, %v4986_v46 }
 0x43b   : > { %v5251_v15 = vsel %vm4991_vm13, %v4930_v52, %v4980_v27 }
 0x43c   : > { %5588 = vmatpush.bf16.msra.mxu0 %v5251_v15 }
 0x43d   : > { %4839 = vrot.lane.b32.xlu0 %v14113_v44, %s7343_s12 }
 0x441   : > { %v5055_v39 = vpop.permute.xlu1 %5054  ;;  %v5049_v30 = vpop.permute.xlu0 %5048  ;;  %7112 = vmatmul.msk.bf16.gmra.mxu3 %vm5312_vm12, %v12223_v6  ;;  %7116 = vmatmul.msk.bf16.gmra.mxu0 %vm5312_vm12, %v12223_v6 }
 0x442   : > { %v5062_v0 = vsel %vm5056_vm14, %v5053_v33, %v5055_v39  ;;  %v4911_v42 = vpop.permute.xlu2 %4910  ;;  %v5279_v9 = vsel %vm5056_vm14, %v4996_v54, %v5049_v30  ;;  %7123 = vmatmul.msk.bf16.gmra.mxu2 %vm5312_vm12, %v12157_v40 }
 0x443   : > { %v5350_v22 = vand.u32 %v14111_v62, %v5062_v0  ;;  %5616 = vmatpush.bf16.msra.mxu1 %v5279_v9 }
 0x445   : > { %5644 = vmatpush.bf16.msra.mxu2 %v5350_v22 }
 0x446   : > { %7120 = vmatmul.msk.bf16.gmra.mxu1 %vm5312_vm12, %v12223_v6 }
 0x449   : > { %v4982_v38 = vpop.permute.xlu1 %4981  ;;  %v4856_v47 = vpop.permute.xlu0 %4855 }
 0x44a   : > { %v4976_v19 = vpop.permute.xlu2 %4975  ;;  %v4866_v20 = vsel %vm4861_vm1, %v14114_v59, %v4856_v47  ;;  %v12382_v31 = vpop.f32.mrf.mxu0  ;;  %v4995_v7 = vsel %vm4991_vm13, %v4980_v27, %v4982_v38 }
 0x44b   : > { %v5231_v60 = vsel %vm4926_vm6, %v4866_v20, %v4919_v3  ;;  %v12411_v25 = vpop.f32.mrf.mxu1 }
 0x44c   : > { %5558 = vmatpush.bf16.msrb.mxu3 %v5231_v60 }
 0x450   : > { %v12404_v55 = vpop.f32.mrf.mxu2 }
 0x451   : > { %v5045_v36 = vpop.permute.xlu1 %5044  ;;  %v4913_v2 = vpop.permute.xlu0 %4912 }
 0x452   : > { %v5275_v57 = vsel %vm5056_vm14, %v4995_v7, %v5045_v36  ;;  %v4978_v43 = vpop.permute.xlu2 %4977  ;;  %v4929_v63 = vsel %vm4926_vm6, %v4911_v42, %v4913_v2  ;;  %7124 = vmatmul.msk.bf16.gmra.mxu2 %vm5312_vm12, %v12223_v6  ;;  %v12391_v56 = vpop.f32.mrf.mxu0 }
 0x453   : > { %5617 = vmatpush.bf16.msra.mxu1 %v5275_v57  ;;  %v5247_v16 = vsel %vm4991_vm13, %v4929_v63, %v4976_v19  ;;  %v4994_v11 = vsel %vm4991_vm13, %v4976_v19, %v4978_v43 }
 0x454   : > { %5589 = vmatpush.bf16.msra.mxu0 %v5247_v16 }
 0x458   : > { %v12413_v23 = vpop.f32.mrf.mxu2 }
 0x459   : > { %v5051_v50 = vpop.permute.xlu1 %5050  ;;  %v4852_v45 = vpop.permute.xlu0 %4851 }
 0x45a   : > { %v5061_v53 = vsel %vm5056_vm14, %v5049_v30, %v5051_v50  ;;  %v12394_v12 = vpop.permute.xlu2 %5040  ;;  %v4865_v28 = vsel %vm4861_vm1, %v11901_v14, %v4852_v45 }
 0x45b   : > { %5645 = vmatpush.bf16.msra.mxu2 %v5061_v53  ;;  %v5271_v41 = vsel %vm5056_vm14, %v4994_v11, %v12394_v12  ;;  %v5227_v29 = vsel %vm4926_vm6, %v4865_v28, %v4915_v51 }
 0x45c   : > { %5618 = vmatpush.bf16.msra.mxu1 %v5271_v41  ;;  %5559 = vmatpush.bf16.msrb.mxu3 %v5227_v29 }
 0x45e   : > { %v12402_v62 = vpop.f32.mrf.mxu0 }
 0x461   : > { %v4909_v17 = vpop.permute.xlu1 %4908  ;;  %v4907_v35 = vpop.permute.xlu0 %4906 }
 0x462   : > { %v5047_v49 = vpop.permute.xlu2 %5046  ;;  %v4928_v39 = vsel %vm4926_vm6, %v4907_v35, %v4909_v17 }
 0x463   : > { %v5060_v10 = vsel %vm5056_vm14, %v5045_v36, %v5047_v49 }
 0x464   : > { %5646 = vmatpush.bf16.msra.mxu2 %v5060_v10  ;;  %v12422_v8 = vpop.f32.mrf.mxu2 }
 0x466   : > { %v12409_v18 = vpop.f32.mrf.mxu0 }
 0x469   : > { %v4848_v58 = vpop.permute.xlu1 %4847 }
 0x46a   : > { %v4864_v14 = vsel %vm4861_vm1, %v12214_v32, %v4848_v58  ;;  %v4905_v5 = vpop.permute.xlu2 %4904  ;;  %v12420_v32 = vpop.f32.mrf.mxu1 }
 0x46b   : > { %v5223_v33 = vsel %vm4926_vm6, %v4864_v14, %v4911_v42 }
 0x46c   : > { %5560 = vmatpush.bf16.msrb.mxu3 %v5223_v33  ;;  %v12428_v52 = vpop.f32.mrf.mxu2 }
 0x46e   : > { %v12417_v3 = vpop.f32.mrf.mxu0 }
 0x471   : > { %v12432_v27 = vpop.permute.xlu1 %4902 }
 0x472   : > { %v4844_v37 = vpop.permute.xlu2 %4843  ;;  %v12426_v51 = vpop.f32.mrf.mxu1  ;;  %v4927_v42 = vsel %vm4926_vm6, %v12432_v27, %v4905_v5 }
 0x473   : > { %v4863_v24 = vsel %vm4861_vm1, %v12318_v61, %v4844_v37  ;;  %v5695_v37 = vmax.f32 %v12422_v8, 0.0  ;;  %v5673_v8 = vmax.f32 %v12404_v55, 0.0 }
 0x474   : > { %v5219_v1 = vsel %vm4926_vm6, %v4863_v24, %v4907_v35  ;;  %v5429_v15 = vpop.f32.mrf.mxu2  ;;  %v5706_v35 = vmax.f32 %v12428_v52, 0.0  ;;  %v5684_v52 = vmax.f32 %v12413_v23, 0.0 }
 0x475   : > { %5561 = vmatpush.bf16.msrb.mxu3 %v5219_v1  ;;  %v5717_v17 = vmax.f32 %v5429_v15, 0.0 }
 0x476   : > { %v12424_v48 = vpop.f32.mrf.mxu0  ;;  %v5765_v23 = vpack.c.bf16 %v5684_v52, %v5673_v8 }
 0x479   : > { %v4968_v22 = vpop.permute.xlu1 %4967 }
 0x47a   : > { %v12434_v61 = vpop.f32.mrf.mxu1  ;;  %v5239_v38 = vsel %vm4991_vm13, %v4927_v42, %v4968_v22  ;;  %v5033_v45 = vpop.permute.xlu2 %5032  ;;  %v5776_v42 = vpack.c.bf16 %v5706_v35, %v5695_v37  ;;  %v5672_v37 = vmax.f32 %v12411_v25, 0.0  ;;  %v5683_v35 = vmax.f32 %v12420_v32, 0.0 }
 0x47c   : > { %v5431_v19 = vpop.f32.mrf.mxu2 }
 0x47d   : > { %v5728_v49 = vmax.f32 %v5431_v19, 0.0 }
 0x47e   : > { %v12430_v46 = vpop.f32.mrf.mxu0 }
 0x47f   : > { %v5787_v24 = vpack.c.bf16 %v5728_v49, %v5717_v17  ;;  %v5737_v15 = vmax.f32 %v12430_v46, 0.0  ;;  %v5715_v46 = vmax.f32 %v12417_v3, 0.0  ;;  %v5693_v3 = vmax.f32 %v12402_v62, 0.0 }
 0x481   : > { %v4970_v2 = vpop.permute.xlu1 %4969 }
 0x482   : > { %v12440_v30 = vpop.f32.mrf.mxu1  ;;  %v4992_v50 = vsel %vm4991_vm13, %v4968_v22, %v4970_v2 }
 0x483   : > { %v5263_v53 = vsel %vm5056_vm14, %v4992_v50, %v5033_v45 }
 0x484   : > { %v5434_v36 = vpop.f32.mrf.mxu2 }
 0x485   : > { %v5739_v28 = vmax.f32 %v5434_v36, 0.0 }
 0x486   : > { %v12436_v44 = vpop.f32.mrf.mxu0 }
 0x48a   : > { %v12451_v20 = vpop.f32.mrf.mxu1 }
 0x48b   : > { %v5727_v17 = vmax.f32 %v12451_v20, 0.0 }
 0x48c   : > { %v5436_v29 = vpop.f32.mrf.mxu2 }
 0x48d   : > { %v5750_v10 = vmax.f32 %v5436_v29, 0.0  ;;  %v5716_v29 = vmax.f32 %v12440_v30, 0.0 }
 0x48e   : > { %v12444_v9 = vpop.f32.mrf.mxu0 }
 0x48f   : > { %v4972_v54 = vpop.permute.xlu0 %4971  ;;  %v5798_v5 = vpack.c.bf16 %v5750_v10, %v5739_v28  ;;  %v5682_v28 = vmax.f32 %v12391_v56, 0.0  ;;  %v5705_v56 = vmax.f32 %v12434_v61, 0.0  ;;  %v5764_v61 = vpack.c.bf16 %v5683_v35, %v5672_v37 }
 0x490   : > { %v5243_v0 = vsel %vm4991_vm13, %v4928_v39, %v4972_v54  ;;  %v5748_v39 = vmax.f32 %v12436_v44, 0.0  ;;  %v5726_v44 = vmax.f32 %v12424_v48, 0.0  ;;  %v5704_v48 = vmax.f32 %v12409_v18, 0.0 }
 0x491   : > { %5590 = vmatpush.bf16.msra.mxu0 %v5243_v0  ;;  %v5039_v1 = vpop.permute.xlu1 %5038 }
 0x492   : > { %v12459_v16 = vpop.f32.mrf.mxu1  ;;  %v5774_v50 = vpack.c.bf16 %v5704_v48, %v5693_v3 }
 0x493   : > { %v5738_v62 = vmax.f32 %v12459_v16, 0.0  ;;  %v5786_v16 = vpack.c.bf16 %v5727_v17, %v5716_v29 }
 0x494   : > { %v12447_v47 = vpop.f32.mrf.mxu3 }
 0x495   : > { %5591 = vmatpush.bf16.msra.mxu0 %v5239_v38  ;;  %v5796_v38 = vpack.c.bf16 %v5748_v39, %v5737_v15 }
 0x496   : > { %v12453_v60 = vpop.f32.mrf.mxu0 }
 0x497   : > { %v4974_v59 = vpop.permute.xlu0 %4973 }
 0x498   : > { %7129 = vmatmul.msk.bf16.vlgmr.msra.gmra.mxu0 %vm5312_vm12, %v11991_v13  ;;  %v4993_v57 = vsel %vm4991_vm13, %v4972_v54, %v4974_v59  ;;  %vm14116_vm13 = vcmask 982016  }
 0x499   : > { %5866 = vmatpush.bf16.msrb.mxu0 %v5798_v5 }
 0x49a   : > { %v5407_v33 = vpop.f32.mrf.mxu1 }
 0x49b   : > { %v5749_v18 = vmax.f32 %v5407_v33, 0.0 }
 0x49c   : > { %v12455_v7 = vpop.f32.mrf.mxu3 }
 0x49d   : > { %5867 = vmatpush.bf16.msrb.mxu0 %v5787_v24  ;;  %v5797_v49 = vpack.c.bf16 %v5749_v18, %v5738_v62 }
 0x49e   : > { %v12463_v11 = vpop.f32.mrf.mxu0 }
 0x49f   : > { %v5037_v43 = vpop.permute.xlu0 %5036 }
 0x4a0   : > { %v5267_v63 = vsel %vm5056_vm14, %v4993_v57, %v5037_v43  ;;  %v5058_v54 = vsel %vm5056_vm14, %v5037_v43, %v5039_v1  ;;  %v5785_v57 = vpack.c.bf16 %v5726_v44, %v5715_v46 }
 0x4a1   : > { %5619 = vmatpush.bf16.msra.mxu1 %v5267_v63  ;;  %5868 = vmatpush.bf16.msrb.mxu0 %v5776_v42 }
 0x4a2   : > { %v12491_v2 = vpop.f32.mrf.mxu1 }
 0x4a4   : > { %v12465_v41 = vpop.f32.mrf.mxu3 }
 0x4a5   : > { %5620 = vmatpush.bf16.msra.mxu1 %v5263_v53  ;;  %v12482_v22 = vpop.f32.mrf.mxu2  ;;  %5869 = vmatpush.bf16.msrb.mxu0 %v5765_v23  ;;  %v5671_v53 = vmax.f32 %v12382_v31, 0.0  ;;  %v5694_v31 = vmax.f32 %v12426_v51, 0.0  ;;  %v5696_v23 = vmax.f32 %v12465_v41, 0.0 }
 0x4a7   : > { %v5043_v58 = vpop.permute.xlu0 %5042  ;;  %v5775_v24 = vpack.c.bf16 %v5705_v56, %v5694_v31 }
 0x4a8   : > { %7130 = vmatmul.msk.bf16.gmra.mxu0 %vm5312_vm12, %v12115_v26  ;;  %7133 = vmatmul.msk.bf16.vlgmr.msra.gmra.mxu1 %vm5312_vm12, %v11991_v13  ;;  %v5059_v14 = vsel %vm5056_vm14, %v12394_v12, %v5043_v58  ;;  %v12478_v13 = vpop.f32.mrf.mxu0  ;;  %v5035_v12 = vpop.permute.xlu2 %5034 }
 0x4a9   : > { %5647 = vmatpush.bf16.msra.mxu2 %v5059_v14  ;;  %v5057_v36 = vsel %vm5056_vm14, %v5033_v45, %v5035_v12  ;;  %v5763_v14 = vpack.c.bf16 %v5682_v28, %v5671_v53 }
 0x4aa   : > { %v12511_v45 = vpop.f32.mrf.mxu1 }
 0x4ac   : > { %v12480_v0 = vpop.f32.mrf.mxu3 }
 0x4ad   : > { %5648 = vmatpush.bf16.msra.mxu2 %v5058_v54  ;;  %v5707_v3 = vmax.f32 %v12480_v0, 0.0  ;;  %v5674_v0 = vmax.f32 %v12447_v47, 0.0 }
 0x4af   : > { %v4840_v19 = vpop.permute.xlu0 %4839 }
 0x4b0   : > { %v4862_v59 = vsel %vm4861_vm1, %v12296_v4, %v4840_v19  ;;  %v7282_v4 = vld [vmem:[%s12956_s1] sm:$0xff]  ;;  %v5487_v43 = vpop.f32.mrf.mxu0 }
 0x4b1   : > { %5649 = vmatpush.bf16.msra.mxu2 %v5057_v36  ;;  %v5215_v55 = vsel %vm4926_vm6, %v4862_v59, %v12432_v27  ;;  %v12504_v27 = vpop.f32.mrf.mxu2  ;;  %v5719_v54 = vmax.f32 %v5487_v43, 0.0  ;;  %v5697_v59 = vmax.f32 %v12463_v11, 0.0  ;;  %v5708_v36 = vmax.f32 %v12478_v13, 0.0 }
 0x4b2   : > { %5562 = vmatpush.bf16.msrb.mxu3 %v5215_v55  ;;  %v12519_v33 = vpop.f32.mrf.mxu1  ;;  %v5675_v11 = vmax.f32 %v12444_v9, 0.0  ;;  %v5686_v13 = vmax.f32 %v12453_v60, 0.0  ;;  %v5685_v43 = vmax.f32 %v12455_v7, 0.0  ;;  %v12566_v7 = vld [vmem:[%s12957_s2 + $0x8] sm:$0xff] }
 0x4b4   : > { %7137 = vmatmul.msk.bf16.vlgmr.msra.gmra.mxu2 %vm5312_vm12, %v7282_v4  ;;  %v12501_v63 = vpop.f32.mrf.mxu3  ;;  %v5767_v60 = vpack.c.bf16 %v5686_v13, %v5675_v11 }
 0x4b5   : > { %7125 = vmatmul.msk.bf16.vlgmr.msrb.gmra.mxu3 %vm5312_vm12, %v7282_v4  ;;  %v5718_v42 = vmax.f32 %v12501_v63, 0.0  ;;  %v5778_v4 = vpack.c.bf16 %v5708_v36, %v5697_v59  ;;  %v5777_v63 = vpack.c.bf16 %v5707_v3, %v5696_v23 }
 0x4b6   : > { %5828 = vmatpush.bf16.msra.mxu3 %v5796_v38 }
 0x4b8   : > { %7131 = vmatmul.msk.bf16.gmra.mxu0 %vm5312_vm12, %v12157_v40  ;;  %7134 = vmatmul.msk.bf16.gmra.mxu1 %vm5312_vm12, %v12115_v26  ;;  %v5489_v10 = vpop.f32.mrf.mxu0 }
 0x4b9   : > { %v12517_v5 = vpop.f32.mrf.mxu2  ;;  %v5730_v12 = vmax.f32 %v5489_v10, 0.0 }
 0x4ba   : > { %5829 = vmatpush.bf16.msra.mxu3 %v5785_v57  ;;  %v12535_v51 = vpop.f32.mrf.mxu1  ;;  %v12549_v57 = vld [vmem:[%s12957_s2] sm:$0xff] }
 0x4bb   : > { %v5789_v55 = vpack.c.bf16 %v5730_v12, %v5719_v54 }
 0x4bc   : > { %v5460_v58 = vpop.f32.mrf.mxu3 }
 0x4bd   : > { %v5729_v46 = vmax.f32 %v5460_v58, 0.0 }
 0x4be   : > { %5830 = vmatpush.bf16.msra.mxu3 %v5774_v50  ;;  %v5766_v50 = vpack.c.bf16 %v5685_v43, %v5674_v0 }
 0x4bf   : > { %v5788_v48 = vpack.c.bf16 %v5729_v46, %v5718_v42 }
 0x4c0   : > { %v5492_v30 = vpop.f32.mrf.mxu0 }
 0x4c1   : > { %v12529_v1 = vpop.f32.mrf.mxu2  ;;  %v5741_v15 = vmax.f32 %v5492_v30, 0.0 }
 0x4c2   : > { %5831 = vmatpush.bf16.msra.mxu3 %v5763_v14  ;;  %v12538_v19 = vpop.f32.mrf.mxu1  ;;  %v5710_v10 = vmax.f32 %v12529_v1, 0.0  ;;  %v5676_v1 = vmax.f32 %v12491_v2, 0.0 }
 0x4c3   : > { %v5720_v37 = vmax.f32 %v12538_v19, 0.0 }
 0x4c4   : > { %7138 = vmatmul.msk.bf16.gmra.mxu2 %vm5312_vm12, %v12115_v26  ;;  %v5463_v20 = vpop.f32.mrf.mxu3 }
 0x4c5   : > { %7126 = vmatmul.msk.bf16.gmra.mxu3 %vm5312_vm12, %v12115_v26  ;;  %v5740_v25 = vmax.f32 %v5463_v20, 0.0 }
 0x4c6   : > { %5847 = vmatpush.bf16.msrb.mxu3 %v5797_v49  ;;  %v5699_v49 = vmax.f32 %v12517_v5, 0.0 }
 0x4c8   : > { %7132 = vmatmul.msk.bf16.gmra.mxu0 %vm5312_vm12, %v12223_v6  ;;  %7135 = vmatmul.msk.bf16.gmra.mxu1 %vm5312_vm12, %v12157_v40  ;;  %v5494_v39 = vpop.f32.mrf.mxu0  ;;  %v5780_v31 = vpack.c.bf16 %v5710_v10, %v5699_v49 }
 0x4c9   : > { %v5752_v26 = vmax.f32 %v5494_v39, 0.0  ;;  %v5545_v52 = vpop.f32.mrf.mxu2 }
 0x4ca   : > { %5848 = vmatpush.bf16.msrb.mxu3 %v5786_v16  ;;  %v5518_v9 = vpop.f32.mrf.mxu1  ;;  %v5721_v53 = vmax.f32 %v5545_v52, 0.0  ;;  %v5688_v16 = vmax.f32 %v12504_v27, 0.0  ;;  %v5709_v27 = vmax.f32 %v12535_v51, 0.0 }
 0x4cb   : > { %v5800_v44 = vpack.c.bf16 %v5752_v26, %v5741_v15  ;;  %v5731_v35 = vmax.f32 %v5518_v9, 0.0 }
 0x4cc   : > { %v5465_v32 = vpop.f32.mrf.mxu3 }
 0x4cd   : > { %v5751_v8 = vmax.f32 %v5465_v32, 0.0  ;;  %5904 = vmatpush.bf16.msrb.mxu2 %v5800_v44  ;;  %v5790_v5 = vpack.c.bf16 %v5731_v35, %v5720_v37 }
 0x4ce   : > { %5849 = vmatpush.bf16.msrb.mxu3 %v5775_v24 }
 0x4cf   : > { %v5799_v38 = vpack.c.bf16 %v5751_v8, %v5740_v25 }
 0x4d1   : > { %5885 = vmatpush.bf16.msrb.mxu1 %v5799_v38  ;;  %5905 = vmatpush.bf16.msrb.mxu2 %v5789_v55  ;;  %v5547_v41 = vpop.f32.mrf.mxu2 }
 0x4d2   : > { %5850 = vmatpush.bf16.msrb.mxu3 %v5764_v61  ;;  %v5521_v62 = vpop.f32.mrf.mxu1  ;;  %v5732_v28 = vmax.f32 %v5547_v41, 0.0  ;;  %v5687_v61 = vmax.f32 %v12511_v45, 0.0 }
 0x4d3   : > { %v5742_v56 = vmax.f32 %v5521_v62, 0.0 }
 0x4d4   : > { %7139 = vmatmul.msk.bf16.gmra.mxu2 %vm5312_vm12, %v12157_v40  ;;  %v5791_v58 = vpack.c.bf16 %v5732_v28, %v5721_v53  ;;  %v5768_v25 = vpack.c.bf16 %v5687_v61, %v5676_v1 }
 0x4d5   : > { %7127 = vmatmul.msk.bf16.gmra.mxu3 %vm5312_vm12, %v12157_v40  ;;  %5886 = vmatpush.bf16.msrb.mxu1 %v5788_v48 }
 0x4d6   : > { %5906 = vmatpush.bf16.msrb.mxu2 %v5778_v4 }
 0x4d8   : > { %7136 = vmatmul.msk.bf16.gmra.mxu1 %vm5312_vm12, %v12223_v6  ;;  %7153 = vmatmul.msk.bf16.vlgmr.msrb.gmra.mxu0 %vm5817_vm0, %v12549_v57 }
 0x4d9   : > { %5887 = vmatpush.bf16.msrb.mxu1 %v5777_v63  ;;  %v5550_v40 = vpop.f32.mrf.mxu2 }
 0x4da   : > { %5907 = vmatpush.bf16.msrb.mxu2 %v5767_v60  ;;  %v5743_v47 = vmax.f32 %v5550_v40, 0.0  ;;  %v5523_v14 = vpop.f32.mrf.mxu1 }
 0x4db   : > { %v5753_v30 = vmax.f32 %v5523_v14, 0.0 }
 0x4dd   : > { %5888 = vmatpush.bf16.msrb.mxu1 %v5766_v50  ;;  %v5801_v24 = vpack.c.bf16 %v5753_v30, %v5742_v56 }
 0x4e1   : > { %v5552_v18 = vpop.f32.mrf.mxu2 }
 0x4e2   : > { %v5754_v29 = vmax.f32 %v5552_v18, 0.0 }
 0x4e4   : > { %7140 = vmatmul.msk.bf16.gmra.mxu2 %vm5312_vm12, %v12223_v6  ;;  %v5802_v17 = vpack.c.bf16 %v5754_v29, %v5743_v47 }
 0x4e5   : > { %7128 = vmatmul.msk.bf16.gmra.mxu3 %vm5312_vm12, %v12223_v6  ;;  %v5677_v6 = vmax.f32 %v12482_v22, 0.0  ;;  %v5698_v22 = vmax.f32 %v12519_v33, 0.0 }
 0x4e6   : > { %5942 = vmatpush.bf16.msra.mxu0 %v5802_v17 }
 0x4e7   : > { %v5769_v20 = vpack.c.bf16 %v5688_v16, %v5677_v6  ;;  %v5779_v15 = vpack.c.bf16 %v5709_v27, %v5698_v22 }
 0x4e8   : > { %7154 = vmatmul.msk.bf16.gmra.mxu0 %vm5817_vm0, %v12566_v7  ;;  %7155 = vmatmul.msk.bf16.vlgmr.msrb.gmra.mxu1 %vm5817_vm0, %v12549_v57 }
 0x4ea   : > { %5943 = vmatpush.bf16.msra.mxu0 %v5791_v58 }
 0x4ee   : > { %5944 = vmatpush.bf16.msra.mxu0 %v5780_v31 }
 0x4f2   : > { %5945 = vmatpush.bf16.msra.mxu0 %v5769_v20 }
 0x4f4   : > { %7157 = vmatmul.msk.bf16.vlgmr.msrb.gmra.mxu2 %vm5817_vm0, %v12549_v57 }
 0x4f5   : > { %7149 = vmatmul.msk.bf16.vlgmr.msra.gmra.mxu3 %vm5817_vm0, %v12549_v57 }
 0x4f6   : > { %5923 = vmatpush.bf16.msra.mxu3 %v5801_v24 }
 0x4f8   : > { %7156 = vmatmul.msk.bf16.gmra.mxu1 %vm5817_vm0, %v12566_v7  ;;  %7161 = vmatmul.msk.bf16.vlgmr.msra.gmra.mxu0 %vm5817_vm0, %v12549_v57 }
 0x4fa   : > { %5924 = vmatpush.bf16.msra.mxu3 %v5790_v5 }
 0x4fe   : > { %5925 = vmatpush.bf16.msra.mxu3 %v5779_v15 }
 0x502   : > { %5926 = vmatpush.bf16.msra.mxu3 %v5768_v25 }
 0x504   : > { %7158 = vmatmul.msk.bf16.gmra.mxu2 %vm5817_vm0, %v12566_v7 }
 0x505   : > { %7150 = vmatmul.msk.bf16.gmra.mxu3 %vm5817_vm0, %v12566_v7 }
 0x508   : > { %7162 = vmatmul.msk.bf16.gmra.mxu0 %vm5817_vm0, %v12566_v7 }
 0x515   : > { %v5593_v33 = vpop.f32.mrf.mxu0  ;;  %7151 = vmatmul.msk.bf16.vlgmr.msrb.gmra.mxu3 %vm5817_vm0, %v12549_v57 }
 0x516   : > { %v5679_v62 = vmax.f32 %v5593_v33, 0.0 }
 0x51d   : > { %v5595_v2 = vpop.f32.mrf.mxu0 }
 0x51e   : > { %v5690_v47 = vmax.f32 %v5595_v2, 0.0 }
 0x520   : > { %v5771_v28 = vpack.c.bf16 %v5690_v47, %v5679_v62 }
 0x525   : > { %v5598_v45 = vpop.f32.mrf.mxu0  ;;  %v12599_v51 = vpop.f32.mrf.mxu1  ;;  %7152 = vmatmul.msk.bf16.gmra.mxu3 %vm5817_vm0, %v12566_v7 }
 0x526   : > { %v5701_v43 = vmax.f32 %v5598_v45, 0.0  ;;  %v5680_v22 = vmax.f32 %v12599_v51, 0.0 }
 0x52d   : > { %v5600_v39 = vpop.f32.mrf.mxu0  ;;  %v5624_v32 = vpop.f32.mrf.mxu1 }
 0x52e   : > { %v5712_v63 = vmax.f32 %v5600_v39, 0.0  ;;  %v5691_v27 = vmax.f32 %v5624_v32, 0.0 }
 0x530   : > { %v5782_v18 = vpack.c.bf16 %v5712_v63, %v5701_v43  ;;  %v5772_v1 = vpack.c.bf16 %v5691_v27, %v5680_v22 }
 0x535   : > { %v5603_v54 = vpop.f32.mrf.mxu0  ;;  %v5627_v12 = vpop.f32.mrf.mxu1  ;;  %7159 = vmatmul.msk.bf16.vlgmr.msra.gmra.mxu3 %vm5817_vm0, %v12549_v57 }
 0x536   : > { %v5723_v13 = vmax.f32 %v5603_v54, 0.0  ;;  %v5702_v56 = vmax.f32 %v5627_v12, 0.0 }
 0x537   : > { %v12605_v26 = vpop.f32.mrf.mxu2 }
 0x538   : > { %v12607_v8 = vpop.f32.mrf.mxu3 }
 0x53d   : > { %v5605_v52 = vpop.f32.mrf.mxu0  ;;  %v5629_v42 = vpop.f32.mrf.mxu1 }
 0x53e   : > { %v5734_v4 = vmax.f32 %v5605_v52, 0.0  ;;  %v5713_v30 = vmax.f32 %v5629_v42, 0.0 }
 0x53f   : > { %v12609_v46 = vpop.f32.mrf.mxu2 }
 0x540   : > { %v12611_v44 = vpop.f32.mrf.mxu3  ;;  %v5793_v9 = vpack.c.bf16 %v5734_v4, %v5723_v13  ;;  %v5783_v35 = vpack.c.bf16 %v5713_v30, %v5702_v56  ;;  %v5692_v62 = vmax.f32 %v12609_v46, 0.0 }
 0x545   : > { %v5608_v38 = vpop.f32.mrf.mxu0  ;;  %v5632_v19 = vpop.f32.mrf.mxu1  ;;  %7160 = vmatmul.msk.bf16.gmra.mxu3 %vm5817_vm0, %v12566_v7 }
 0x546   : > { %v5745_v55 = vmax.f32 %v5608_v38, 0.0  ;;  %v5724_v10 = vmax.f32 %v5632_v19, 0.0 }
 0x547   : > { %v12615_v59 = vpop.f32.mrf.mxu2 }
 0x548   : > { %v12617_v36 = vpop.f32.mrf.mxu3  ;;  %v5703_v4 = vmax.f32 %v12615_v59, 0.0 }
 0x54d   : > { %v5610_v23 = vpop.f32.mrf.mxu0  ;;  %v5634_v3 = vpop.f32.mrf.mxu1 }
 0x54e   : > { %v5756_v48 = vmax.f32 %v5610_v23, 0.0  ;;  %v5735_v58 = vmax.f32 %v5634_v3, 0.0 }
 0x54f   : > { %v12619_v11 = vpop.f32.mrf.mxu2 }
 0x550   : > { %v5804_v41 = vpack.c.bf16 %v5756_v48, %v5745_v55  ;;  %v12621_v0 = vpop.f32.mrf.mxu3  ;;  %v5794_v20 = vpack.c.bf16 %v5735_v58, %v5724_v10 }
 0x551   : > { %v5711_v63 = vmax.f32 %v12621_v0, 0.0 }
 0x552   : > { %5980 = vmatpush.bf16.msra.mxu2 %v5804_v41  ;;  %v5714_v41 = vmax.f32 %v12619_v11, 0.0  ;;  %v5678_v11 = vmax.f32 %v12607_v8, 0.0  ;;  %v7173_v8 = vld [vmem:[%s12958_s3] sm:$0xf] }
 0x554   : > { %v5784_v47 = vpack.c.bf16 %v5714_v41, %v5703_v4 }
 0x555   : > { %v5637_v60 = vpop.f32.mrf.mxu1  ;;  %v5871_v50 = vpop.f32.mrf.mxu0 }
 0x556   : > { %5981 = vmatpush.bf16.msra.mxu2 %v5793_v9  ;;  %v5746_v29 = vmax.f32 %v5637_v60, 0.0  ;;  %v6035_v33 = vmax.f32 %v5871_v50, 0.0  ;;  %v5700_v50 = vmax.f32 %v12617_v36, 0.0 }
 0x557   : > { %v5661_v40 = vpop.f32.mrf.mxu2 }
 0x558   : > { %v5574_v53 = vpop.f32.mrf.mxu3  ;;  %v5725_v51 = vmax.f32 %v5661_v40, 0.0  ;;  %v5681_v40 = vmax.f32 %v12605_v26, 0.0  ;;  %v5781_v59 = vpack.c.bf16 %v5711_v63, %v5700_v50 }
 0x559   : > { %v5722_v13 = vmax.f32 %v5574_v53, 0.0 }
 0x55a   : > { %5982 = vmatpush.bf16.msra.mxu2 %v5782_v18  ;;  %v5689_v18 = vmax.f32 %v12611_v44, 0.0  ;;  %v5773_v0 = vpack.c.bf16 %v5692_v62, %v5681_v40  ;;  %v7198_v44 = vld [vmem:[%s12958_s3] sm:$0x10] }
 0x55b   : > { %v12650_v36 = vor.u32 %v7198_v44, %v7173_v8 }
 0x55d   : > { %v5639_v17 = vpop.f32.mrf.mxu1  ;;  %v5873_v49 = vpop.f32.mrf.mxu0 }
 0x55e   : > { %v5757_v14 = vmax.f32 %v5639_v17, 0.0  ;;  %5983 = vmatpush.bf16.msra.mxu2 %v5771_v28  ;;  %v6046_v2 = vmax.f32 %v5873_v49, 0.0  ;;  %v5770_v28 = vpack.c.bf16 %v5689_v18, %v5678_v11 }
 0x55f   : > { %v5663_v6 = vpop.f32.mrf.mxu2 }
 0x560   : > { %v5805_v16 = vpack.c.bf16 %v5757_v14, %v5746_v29  ;;  %v5576_v31 = vpop.f32.mrf.mxu3  ;;  %v5736_v32 = vmax.f32 %v5663_v6, 0.0  ;;  %v6081_v55 = vpack.c.bf16 %v6046_v2, %v6035_v33 }
 0x561   : > { %7165 = vmatmul.msk.bf16.vlgmr.msra.gmra.mxu2 %vm5817_vm0, %v12549_v57  ;;  %v5733_v23 = vmax.f32 %v5576_v31, 0.0 }
 0x562   : > { %5999 = vmatpush.bf16.msrb.mxu3 %v5805_v16  ;;  %v5795_v43 = vpack.c.bf16 %v5736_v32, %v5725_v51 }
 0x563   : > { %v5792_v9 = vpack.c.bf16 %v5733_v23, %v5722_v13 }
 0x565   : > { %v5876_v37 = vpop.f32.mrf.mxu0  ;;  %v5890_v48 = vpop.f32.mrf.mxu1 }
 0x566   : > { %6000 = vmatpush.bf16.msrb.mxu3 %v5794_v20  ;;  %v6057_v61 = vmax.f32 %v5876_v37, 0.0  ;;  %v6036_v20 = vmax.f32 %v5890_v48, 0.0 }
 0x567   : > { %v5666_v24 = vpop.f32.mrf.mxu2 }
 0x568   : > { %v5579_v5 = vpop.f32.mrf.mxu3  ;;  %v5747_v25 = vmax.f32 %v5666_v24, 0.0 }
 0x569   : > { %v5744_v42 = vmax.f32 %v5579_v5, 0.0 }
 0x56a   : > { %6001 = vmatpush.bf16.msrb.mxu3 %v5783_v35 }
 0x56d   : > { %v5878_v15 = vpop.f32.mrf.mxu0  ;;  %v5892_v53 = vpop.f32.mrf.mxu1 }
 0x56e   : > { %6002 = vmatpush.bf16.msrb.mxu3 %v5772_v1  ;;  %v6068_v45 = vmax.f32 %v5878_v15, 0.0  ;;  %v6047_v37 = vmax.f32 %v5892_v53, 0.0 }
 0x56f   : > { %v5668_v39 = vpop.f32.mrf.mxu2 }
 0x570   : > { %v5758_v54 = vmax.f32 %v5668_v39, 0.0  ;;  %v5581_v12 = vpop.f32.mrf.mxu3  ;;  %v6092_v52 = vpack.c.bf16 %v6068_v45, %v6057_v61  ;;  %v6082_v22 = vpack.c.bf16 %v6047_v37, %v6036_v20 }
 0x571   : > { %v5755_v38 = vmax.f32 %v5581_v12, 0.0  ;;  %7167 = vmatmul.msk.bf16.vlgmr.msrb.gmra.mxu3 %vm5817_vm0, %v12549_v57  ;;  %7166 = vmatmul.msk.bf16.gmra.mxu2 %vm5817_vm0, %v12566_v7 }
 0x572   : > { %v5806_v19 = vpack.c.bf16 %v5758_v54, %v5747_v25  ;;  %6144 = vmatpush.bf16.msra.mxu3 %v6092_v52 }
 0x573   : > { %v5803_v3 = vpack.c.bf16 %v5755_v38, %v5744_v42 }
 0x574   : > { %6018 = vmatpush.bf16.msrb.mxu0 %v5806_v19 }
 0x575   : > { %5961 = vmatpush.bf16.msra.mxu1 %v5803_v3  ;;  %v5895_v26 = vpop.f32.mrf.mxu1  ;;  %v5947_v15 = vpop.f32.mrf.mxu0 }
 0x576   : > { %6145 = vmatpush.bf16.msra.mxu3 %v6081_v55  ;;  %v6039_v41 = vmax.f32 %v5947_v15, 0.0 }
 0x577   : > { %v5909_v56 = vpop.f32.mrf.mxu2 }
 0x578   : > { %v5833_v60 = vpop.f32.mrf.mxu3  ;;  %6019 = vmatpush.bf16.msrb.mxu0 %v5795_v43  ;;  %v6037_v51 = vmax.f32 %v5909_v56, 0.0 }
 0x579   : > { %5962 = vmatpush.bf16.msra.mxu1 %v5792_v9  ;;  %v6033_v58 = vmax.f32 %v5833_v60, 0.0 }
 0x57c   : > { %6020 = vmatpush.bf16.msrb.mxu0 %v5784_v47 }
 0x57d   : > { %5963 = vmatpush.bf16.msra.mxu1 %v5781_v59  ;;  %v5897_v49 = vpop.f32.mrf.mxu1  ;;  %v5949_v42 = vpop.f32.mrf.mxu0 }
 0x57e   : > { %v6069_v16 = vmax.f32 %v5897_v49, 0.0  ;;  %v6050_v43 = vmax.f32 %v5949_v42, 0.0 }
 0x57f   : > { %v5911_v27 = vpop.f32.mrf.mxu2 }
 0x580   : > { %v5835_v29 = vpop.f32.mrf.mxu3  ;;  %6021 = vmatpush.bf16.msrb.mxu0 %v5773_v0  ;;  %v6048_v32 = vmax.f32 %v5911_v27, 0.0  ;;  %v6085_v50 = vpack.c.bf16 %v6050_v43, %v6039_v41 }
 0x581   : > { %5964 = vmatpush.bf16.msra.mxu1 %v5770_v28  ;;  %7168 = vmatmul.msk.bf16.gmra.mxu3 %vm5817_vm0, %v12566_v7  ;;  %v6044_v14 = vmax.f32 %v5835_v29, 0.0 }
 0x582   : > { %v6083_v23 = vpack.c.bf16 %v6048_v32, %v6037_v51 }
 0x583   : > { %7169 = vmatmul.msk.bf16.vlgmr.msrb.gmra.mxu0 %vm5817_vm0, %v12549_v57  ;;  %v6079_v30 = vpack.c.bf16 %v6044_v14, %v6033_v58 }
 0x584   : > { %7163 = vmatmul.msk.bf16.vlgmr.msra.gmra.mxu1 %vm5817_vm0, %v12549_v57  ;;  %v6058_v57 = vmax.f32 %v5895_v26, 0.0 }
 0x585   : > { %v5952_v3 = vpop.f32.mrf.mxu0 }
 0x586   : > { %v6093_v35 = vpack.c.bf16 %v6069_v16, %v6058_v57  ;;  %v6061_v13 = vmax.f32 %v5952_v3, 0.0 }
 0x587   : > { %v5914_v1 = vpop.f32.mrf.mxu2 }
 0x588   : > { %v5838_v46 = vpop.f32.mrf.mxu3  ;;  %v6059_v54 = vmax.f32 %v5914_v1, 0.0 }
 0x589   : > { %v6055_v17 = vmax.f32 %v5838_v46, 0.0 }
 0x58d   : > { %v5954_v4 = vpop.f32.mrf.mxu0 }
 0x58e   : > { %v6072_v63 = vmax.f32 %v5954_v4, 0.0 }
 0x590   : > { %v5840_v10 = vpop.f32.mrf.mxu3  ;;  %v6096_v60 = vpack.c.bf16 %v6072_v63, %v6061_v13 }
 0x591   : > { %v6066_v6 = vmax.f32 %v5840_v10, 0.0  ;;  %7177 = vmatmul.msk.bf16.vlgmr.msra.gmra.mxu3 %vm6106_vm2, %v12650_v36 }
 0x592   : > { %6200 = vmatpush.bf16.msra.mxu0 %v6096_v60 }
 0x593   : > { %v6090_v31 = vpack.c.bf16 %v6066_v6, %v6055_v17  ;;  %7170 = vmatmul.msk.bf16.gmra.mxu0 %vm5817_vm0, %v12566_v7 }
 0x594   : > { %7164 = vmatmul.msk.bf16.gmra.mxu1 %vm5817_vm0, %v12566_v7  ;;  %v5916_v7 = vpop.f32.mrf.mxu2 }
 0x595   : > { %6116 = vmatpush.bf16.msrb.mxu1 %v6090_v31  ;;  %v6070_v12 = vmax.f32 %v5916_v7, 0.0 }
 0x596   : > { %6201 = vmatpush.bf16.msra.mxu0 %v6085_v50 }
 0x597   : > { %v6094_v19 = vpack.c.bf16 %v6070_v12, %v6059_v54 }
 0x598   : > { %v5852_v24 = vpop.f32.mrf.mxu3 }
 0x599   : > { %6117 = vmatpush.bf16.msrb.mxu1 %v6079_v30  ;;  %v6034_v2 = vmax.f32 %v5852_v24, 0.0 }
 0x59d   : > { %6158 = vmatpush.bf16.msra.mxu1 %v6093_v35 }
 0x5a0   : > { %v5854_v5 = vpop.f32.mrf.mxu3 }
 0x5a1   : > { %6159 = vmatpush.bf16.msra.mxu1 %v6082_v22  ;;  %v6045_v45 = vmax.f32 %v5854_v5, 0.0 }
 0x5a3   : > { %v6080_v38 = vpack.c.bf16 %v6045_v45, %v6034_v2  ;;  %7181 = vmatmul.msk.bf16.vlgmr.msra.gmra.mxu0 %vm6106_vm2, %v12650_v36 }
 0x5a4   : > { %7175 = vmatmul.msk.bf16.vlgmr.msrb.gmra.mxu1 %vm6106_vm2, %v12650_v36 }
 0x5a8   : > { %v5857_v61 = vpop.f32.mrf.mxu3 }
 0x5a9   : > { %v6056_v25 = vmax.f32 %v5857_v61, 0.0 }
 0x5b0   : > { %v5859_v33 = vpop.f32.mrf.mxu3 }
 0x5b1   : > { %v6067_v39 = vmax.f32 %v5859_v33, 0.0 }
 0x5b3   : > { %v6091_v52 = vpack.c.bf16 %v6067_v39, %v6056_v25 }
 0x5b4   : > { %7178 = vmatmul.msk.bf16.vlgmr.msra.gmra.mxu1 %vm6106_vm2, %v12650_v36 }
 0x5b5   : > { %6130 = vmatpush.bf16.msrb.mxu2 %v6091_v52 }
 0x5b8   : > { %v5928_v55 = vpop.f32.mrf.mxu3 }
 0x5b9   : > { %6131 = vmatpush.bf16.msrb.mxu2 %v6080_v38  ;;  %v6038_v47 = vmax.f32 %v5928_v55, 0.0 }
 0x5bc   : > { %7176 = vmatmul.msk.bf16.vlgmr.msrb.gmra.mxu2 %vm6106_vm2, %v12650_v36 }
 0x5bd   : > { %6172 = vmatpush.bf16.msra.mxu2 %v6094_v19 }
 0x5c0   : > { %v5930_v48 = vpop.f32.mrf.mxu3 }
 0x5c1   : > { %6173 = vmatpush.bf16.msra.mxu2 %v6083_v23  ;;  %v6049_v18 = vmax.f32 %v5930_v48, 0.0 }
 0x5c3   : > { %v6084_v11 = vpack.c.bf16 %v6049_v18, %v6038_v47 }
 0x5c8   : > { %v5933_v9 = vpop.f32.mrf.mxu3 }
 0x5c9   : > { %v6060_v40 = vmax.f32 %v5933_v9, 0.0 }
 0x5cc   : > { %7179 = vmatmul.msk.bf16.vlgmr.msra.gmra.mxu2 %vm6106_vm2, %v12650_v36 }
 0x5d0   : > { %v5935_v62 = vpop.f32.mrf.mxu3 }
 0x5d1   : > { %v6071_v59 = vmax.f32 %v5935_v62, 0.0 }
 0x5d3   : > { %v6095_v53 = vpack.c.bf16 %v6071_v59, %v6060_v40 }
 0x5d5   : > { %6186 = vmatpush.bf16.msrb.mxu3 %v6095_v53 }
 0x5d9   : > { %6187 = vmatpush.bf16.msrb.mxu3 %v6084_v11 }
 0x5dc   : > { %7180 = vmatmul.msk.bf16.vlgmr.msrb.gmra.mxu3 %vm6106_vm2, %v12650_v36 }
 0x5e4   : > { %v5985_v0 = vpop.f32.mrf.mxu2 }
 0x5e5   : > { %v6041_v49 = vmax.f32 %v5985_v0, 0.0 }
 0x5ec   : > { %v5987_v28 = vpop.f32.mrf.mxu2 }
 0x5ed   : > { %v6052_v10 = vmax.f32 %v5987_v28, 0.0 }
 0x5ef   : > { %v6087_v57 = vpack.c.bf16 %v6052_v10, %v6041_v49 }
 0x5f4   : > { %v6004_v29 = vpop.f32.mrf.mxu3  ;;  %v5990_v26 = vpop.f32.mrf.mxu2 }
 0x5f5   : > { %v6063_v46 = vmax.f32 %v5990_v26, 0.0  ;;  %v6042_v37 = vmax.f32 %v6004_v29, 0.0 }
 0x5fc   : > { %v6006_v8 = vpop.f32.mrf.mxu3  ;;  %v5992_v44 = vpop.f32.mrf.mxu2 }
 0x5fd   : > { %v6074_v17 = vmax.f32 %v5992_v44, 0.0  ;;  %v6053_v35 = vmax.f32 %v6006_v8, 0.0 }
 0x5ff   : > { %v6098_v58 = vpack.c.bf16 %v6074_v17, %v6063_v46  ;;  %v6088_v5 = vpack.c.bf16 %v6053_v35, %v6042_v37 }
 0x600   : > { %v6023_v14 = vpop.f32.mrf.mxu0 }
 0x601   : > { %v5966_v6 = vpop.f32.mrf.mxu1  ;;  %6228 = vmatpush.bf16.msrb.mxu2 %v6098_v58  ;;  %v6043_v39 = vmax.f32 %v6023_v14, 0.0 }
 0x602   : > { %v6040_v38 = vmax.f32 %v5966_v6, 0.0 }
 0x604   : > { %v6009_v16 = vpop.f32.mrf.mxu3 }
 0x605   : > { %6229 = vmatpush.bf16.msrb.mxu2 %v6087_v57  ;;  %v6064_v30 = vmax.f32 %v6009_v16, 0.0 }
 0x608   : > { %v6025_v31 = vpop.f32.mrf.mxu0  ;;  %7183 = vmatmul.msk.bf16.vlgmr.msrb.gmra.mxu2 %vm6106_vm2, %v12650_v36 }
 0x609   : > { %v5968_v56 = vpop.f32.mrf.mxu1  ;;  %v6054_v54 = vmax.f32 %v6025_v31, 0.0 }
 0x60a   : > { %v6051_v52 = vmax.f32 %v5968_v56, 0.0 }
 0x60b   : > { %v6089_v51 = vpack.c.bf16 %v6054_v54, %v6043_v39 }
 0x60c   : > { %v6011_v20 = vpop.f32.mrf.mxu3  ;;  %v6086_v32 = vpack.c.bf16 %v6051_v52, %v6040_v38  ;;  %v6799_v38 = vlaneseq }
 0x60d   : > { %v6075_v24 = vmax.f32 %v6011_v20, 0.0 }
 0x60f   : > { %v6099_v22 = vpack.c.bf16 %v6075_v24, %v6064_v30 }
 0x610   : > { %v6028_v27 = vpop.f32.mrf.mxu0 }
 0x611   : > { %v5971_v1 = vpop.f32.mrf.mxu1  ;;  %6242 = vmatpush.bf16.msra.mxu3 %v6099_v22  ;;  %v6065_v15 = vmax.f32 %v6028_v27, 0.0  ;;  %v7352_v22 = vmov 0.0  }
 0x612   : > { %v6062_v2 = vmax.f32 %v5971_v1, 0.0  ;;  %v6896_v27 = vrot.slane %v7352_v22, 1 }
 0x614   : > { %v6147_v61 = vpop.f32.mrf.mxu3  ;;  %v7276_v1 = vpack.i.bf16 %v6896_v27, %v7352_v22 }
 0x615   : > { %6270 = vrot.lane.b32.xlu1 %v6147_v61, %s7324_s5  ;;  %6243 = vmatpush.bf16.msra.mxu3 %v6088_v5 }
 0x618   : > { %v6030_v25 = vpop.f32.mrf.mxu0  ;;  %7184 = vmatmul.msk.bf16.vlgmr.msra.gmra.mxu3 %vm6106_vm2, %v12650_v36 }
 0x619   : > { %v5973_v7 = vpop.f32.mrf.mxu1  ;;  %v6076_v33 = vmax.f32 %v6030_v25, 0.0 }
 0x61a   : > { %v6073_v45 = vmax.f32 %v5973_v7, 0.0 }
 0x61b   : > { %v6100_v12 = vpack.c.bf16 %v6076_v33, %v6065_v15 }
 0x61c   : > { %v6097_v42 = vpack.c.bf16 %v6073_v45, %v6062_v2  ;;  %v6149_v13 = vpop.f32.mrf.mxu3 }
 0x61d   : > { %6285 = vrot.lane.b32.xlu1 %v6147_v61, %s7327_s8  ;;  %6256 = vmatpush.bf16.msrb.mxu0 %v6100_v12 }
 0x61e   : > { %6214 = vmatpush.bf16.msrb.mxu1 %v6097_v42 }
 0x620   : > { %v6203_v43 = vpop.f32.mrf.mxu0 }
 0x621   : > { %v12676_v19 = vpop.f32.mrf.mxu1  ;;  %6257 = vmatpush.bf16.msrb.mxu0 %v6089_v51 }
 0x622   : > { %6215 = vmatpush.bf16.msrb.mxu1 %v6086_v32 }
 0x624   : > { %7185 = vmatmul.msk.bf16.vlgmr.msrb.gmra.mxu0 %vm6106_vm2, %v12650_v36 }
 0x625   : > { %7182 = vmatmul.msk.bf16.vlgmr.msrb.gmra.mxu1 %vm6106_vm2, %v12650_v36  ;;  %vm6395_vm2 = vcmask 916480  }
 0x628   : > { %v6205_v11 = vpop.f32.mrf.mxu0 }
 0x629   : > { %v12682_v55 = vpop.f32.mrf.mxu1 }
 0x631   : > { %v6161_v23 = vpop.f32.mrf.mxu1 }
 0x632   : > { %6287 = vrot.lane.b32.xlu2 %v6161_v23, %s7327_s8 }
 0x639   : > { %v6163_v3 = vpop.f32.mrf.mxu1 }
 0x63a   : > { %6291 = vrot.lane.b32.xlu1 %v6163_v3, %s7327_s8  ;;  %6302 = vrot.lane.b32.xlu2 %v6161_v23, %s7328_s9 }
 0x63f   : > { %v6133_v48 = vpop.f32.mrf.mxu2 }
 0x640   : > { %6268 = vrot.lane.b32.xlu0 %v6133_v48, %s7324_s5  ;;  %v6418_v48 = vrot.slane %v12676_v19, 4 }
 0x642   : > { %6306 = vrot.lane.b32.xlu1 %v6163_v3, %s7328_s9 }
 0x647   : > { %v6135_v4 = vpop.f32.mrf.mxu2 }
 0x648   : > { %6274 = vrot.lane.b32.xlu0 %v6149_v13, %s7324_s5  ;;  %6272 = vrot.lane.b32.xlu2 %v6135_v4, %s7324_s5 }
 0x64f   : > { %v6175_v36 = vpop.f32.mrf.mxu2 }
 0x650   : > { %6289 = vrot.lane.b32.xlu0 %v6149_v13, %s7327_s8  ;;  %s7349_s8 = smov 118  }
 0x657   : > { %v6177_v41 = vpop.f32.mrf.mxu2 }
 0x658   : > { %6304 = vrot.lane.b32.xlu0 %v6175_v36, %s7328_s9  ;;  %6308 = vrot.lane.b32.xlu2 %v6177_v41, %s7328_s9  ;;  %s7350_s9 = smov 112  }
 0x65f   : > { %v6189_v47 = vpop.f32.mrf.mxu3 }
 0x660   : > { %6319 = vrot.lane.b32.xlu0 %v6175_v36, %s7329_s10 }
 0x667   : > { %v6191_v46 = vpop.f32.mrf.mxu3 }
 0x668   : > { %6353 = vrot.lane.b32.xlu0 %v6203_v43, %s7347_s25 }
 0x687   : > { %v12699_v60 = vpop.permute.xlu1 %6270 }
 0x68b   : > { %v6231_v63 = vpop.f32.mrf.mxu2 }
 0x68c   : > { %6372 = vrot.lane.b32.xlu0 %v6231_v63, %s7348_s26  ;;  %v12697_v9 = vpop.permute.xlu2 %6287 }
 0x68f   : > { %v12705_v62 = vpop.permute.xlu1 %6285 }
 0x690   : > { %v6294_v52 = vsel %vm13856_vm4, %v12705_v62, %v12697_v9 }
 0x691   : > { %v6415_v23 = vrot.slane %v6294_v52, 4 }
 0x693   : > { %v6233_v37 = vpop.f32.mrf.mxu2 }
 0x694   : > { %v12701_v50 = vpop.permute.xlu2 %6302 }
 0x69b   : > { %v6245_v14 = vpop.f32.mrf.mxu3 }
 0x6a1   : > { %v6259_v8 = vpop.f32.mrf.mxu0 }
 0x6a2   : > { %v6217_v40 = vpop.f32.mrf.mxu1  ;;  %v6273_v59 = vpop.permute.xlu2 %6272 }
 0x6a3   : > { %6355 = vrot.lane.b32.xlu1 %v6217_v40, %s7347_s25  ;;  %6370 = vrot.lane.b32.xlu2 %v6217_v40, %s7348_s26  ;;  %v6247_v24 = vpop.f32.mrf.mxu3  ;;  %v6417_v40 = vsel %vm2199_vm8, %v6415_v23, %v12676_v19 }
 0x6a9   : > { %v6261_v35 = vpop.f32.mrf.mxu0 }
 0x6aa   : > { %v6219_v18 = vpop.f32.mrf.mxu1 }
 0x6ab   : > { %6336 = vrot.lane.b32.xlu1 %v6189_v47, %s7349_s8  ;;  %6374 = vrot.lane.b32.xlu0 %v6219_v18, %s7348_s26 }
 0x6ac   : > { %6338 = vrot.lane.b32.xlu2 %v6203_v43, %s7349_s8  ;;  %v6292_v53 = vpop.permute.xlu1 %6291  ;;  %v6807_v43 = vand.u32 127, %v6799_v38 }
 0x6b2   : > { %v6269_v0 = vpop.permute.xlu0 %6268  ;;  %v6309_v28 = vpop.permute.xlu2 %6308 }
 0x6b3   : > { %6321 = vrot.lane.b32.xlu1 %v6189_v47, %s7329_s10  ;;  %6342 = vrot.lane.b32.xlu0 %v6205_v11, %s7349_s8  ;;  %v6277_v12 = vsel %vm255_vm10, %v6269_v0, %v12699_v60  ;;  %v12758_v0 = vadd.s32 4294967295, %v6807_v43 }
 0x6b4   : > { %6359 = vrot.lane.b32.xlu2 %v6219_v18, %s7347_s25  ;;  %v6307_v29 = vpop.permute.xlu1 %6306  ;;  %v6430_v32 = vrot.slane %v6277_v12, 4 }
 0x6b5   : > { %v6312_v26 = vsel %vm299_vm9, %v6307_v29, %v6309_v28  ;;  %v6423_v28 = vperm.slane %v6417_v40, %v13579_v34  ;;  %vm6817_vm6 = vcmp.ge.s32.totalorder %v12758_v0, 0  ;;  %vm6823_vm0 = vcmp.lt.s32.totalorder %v12758_v0, 16 }
 0x6b6   : > { %v6578_v17 = vrot.slane %v6312_v26, 4 }
 0x6ba   : > { %v6275_v44 = vpop.permute.xlu0 %6274 }
 0x6bb   : > { %v6278_v49 = vsel %vm255_vm10, %v6273_v59, %v6275_v44  ;;  %6387 = vrot.lane.b32.xlu1 %v6231_v63, %s7350_s9  ;;  %6404 = vrot.lane.b32.xlu0 %v6259_v8, %s7351_s27  ;;  %v6419_v63 = vsel %vm2199_vm8, %v6294_v52, %v6418_v48 }
 0x6bc   : > { %6340 = vrot.lane.b32.xlu2 %v6191_v46, %s7349_s8  ;;  %v6579_v10 = vsel %vm2199_vm8, %v6578_v17, %v6278_v49  ;;  %v6427_v59 = vperm.slane %v6419_v63, %v13579_v34 }
 0x6bd   : > { %v6583_v58 = vperm.slane %v6579_v10, %v13579_v34 }
 0x6bf   : > { %v6596_v31 = vrot.slane %v6583_v58, 4 }
 0x6c2   : > { %v6290_v6 = vpop.permute.xlu0 %6289 }
 0x6c3   : > { %v6295_v57 = vsel %vm14115_vm11, %v6290_v6, %v6292_v53  ;;  %6357 = vrot.lane.b32.xlu1 %v6205_v11, %s7347_s25  ;;  %6323 = vrot.lane.b32.xlu0 %v6177_v41, %s7329_s10  ;;  %vm6410_vm11 = vcmask 900096  }
 0x6c4   : > { %v6572_v16 = vrot.slane %v6295_v57, 4  ;;  %6402 = vrot.lane.b32.xlu2 %v6245_v14, %s7351_s27 }
 0x6c6   : > { %v6573_v56 = vsel %vm2199_vm8, %v6572_v16, %v12682_v55  ;;  %v6800_v55 = vshrl.u32 %v6799_v38, 7  ;;  %v6466_v16 = vrot.slane %v6423_v28, 4 }
 0x6c7   : > { %v6577_v30 = vperm.slane %v6573_v56, %v13579_v34 }
 0x6c8   : > { %v6801_v44 = vadd.s32 8, %v6800_v55 }
 0x6c9   : > { %v12721_v20 = vsel %vm2199_vm8, %v6596_v31, %v6577_v30 }
 0x6ca   : > { %v6305_v5 = vpop.permute.xlu0 %6304 }
 0x6cb   : > { %6376 = vrot.lane.b32.xlu1 %v6233_v37, %s7348_s26  ;;  %6408 = vrot.lane.b32.xlu0 %v6261_v35, %s7351_s27  ;;  %v6311_v2 = vsel %vm299_vm9, %v12701_v50, %v6305_v5  ;;  %vm6378_vm9 = vcmask 932864  }
 0x6cc   : > { %6389 = vrot.lane.b32.xlu2 %v6245_v14, %s7350_s9  ;;  %v6428_v45 = vrot.slane %v6311_v2, 4  ;;  %v6431_v9 = vsel %vm2199_vm8, %v6311_v2, %v6430_v32  ;;  %v6478_v14 = vrot.slane %v6427_v59, 4 }
 0x6cd   : > { %v6439_v53 = vperm.slane %v6431_v9, %v13579_v34 }
 0x6ce   : > { %v6429_v51 = vsel %vm2199_vm8, %v6428_v45, %v6277_v12 }
 0x6cf   : > { %v6435_v13 = vperm.slane %v6429_v51, %v13579_v34  ;;  %v6476_v17 = vrot.slane %v6439_v53, 4  ;;  %v6479_v5 = vsel %vm2199_vm8, %v6439_v53, %v6478_v14 }
 0x6d1   : > { %v6464_v18 = vrot.slane %v6435_v13, 4  ;;  %v6477_v27 = vsel %vm2199_vm8, %v6476_v17, %v6427_v59 }
 0x6d2   : > { %v6320_v15 = vpop.permute.xlu0 %6319  ;;  %v6483_v63 = vperm.slane %v6477_v27, %v14034_v21 }
 0x6d3   : > { %6325 = vrot.lane.b32.xlu1 %v6191_v46, %s7329_s10  ;;  %7277 = vrot.lane.b32.xlu0 %v7276_v1, %s7324_s5  ;;  %s7186_s10 = sshll.u32 %s7305_s15, 3  ;;  %v6465_v8 = vsel %vm2199_vm8, %v6464_v18, %v6423_v28  ;;  %s7062_s15 = sshll.u32 %s14133_s16, 1 }
 0x6d4   : > { %6406 = vrot.lane.b32.xlu2 %v6247_v24, %s7351_s27  ;;  %s12741_s28 = sadd.s32 4294967295, %s7186_s10  ;;  %v12772_v30 = vperm.slane %v6465_v8, %v14034_v21  ;;  %v6522_v14 = vrot.slane %v6483_v63, 4 }
 0x6d5   : > { %v6803_v3 = vstv %s12741_s28 }
 0x6d6   : > { %v6804_v50 = vadd.s32 %v6803_v3, %v6800_v55  ;;  %v6514_v45 = vrot.slane %v12772_v30, 4 }
 0x6d8   : > { %vm6811_vm1 = vcmp.ge.s32.totalorder %v6804_v50, 0  ;;  %vm6813_vm15 = vcmp.lt.s32.totalorder %v6804_v50, 16 }
 0x6d9   : > { %vm6815_vm12 = vmand %vm6811_vm1, %vm6813_vm15 }
 0x6da   : > { %v6354_v7 = vpop.permute.xlu0 %6353  ;;  %vm6819_vm14 = vmand %vm6815_vm12, %vm6817_vm6 }
 0x6db   : > { %6391 = vrot.lane.b32.xlu1 %v6233_v37, %s7350_s9  ;;  %vm12789_vm4 = vmand %vm6819_vm14, %vm6823_vm0  ;;  %vm6883_vm14 = vcmask 1046528  }
 0x6dc   : > { %6393 = vrot.lane.b32.xlu2 %v6247_v24, %s7350_s9  ;;  %v6805_v24 = vadd.s32 %v6803_v3, %v6801_v44 }
 0x6de   : > { %vm6812_vm1 = vcmp.ge.s32.totalorder %v6805_v24, 0  ;;  %vm6814_vm15 = vcmp.lt.s32.totalorder %v6805_v24, 16 }
 0x6df   : > { %vm6816_vm12 = vmand %vm6812_vm1, %vm6814_vm15 }
 0x6e3   : > { %7272 = vrot.lane.b32.xlu1 %v7276_v1, %s7325_s6 }
 0x6fd   : > { %v6371_v61 = vpop.permute.xlu2 %6370 }
 0x6fe   : > { %v6373_v39 = vpop.permute.xlu0 %6372 }
 0x6ff   : > { %v6379_v4 = vsel %vm6378_vm9, %v6371_v61, %v6373_v39 }
 0x700   : > { %v6452_v62 = vrot.slane %v6379_v4, 4 }
 0x706   : > { %v6339_v25 = vpop.permute.xlu2 %6338 }
 0x70e   : > { %v12728_v33 = vpop.permute.xlu2 %6359 }
 0x715   : > { %v6356_v54 = vpop.permute.xlu1 %6355 }
 0x716   : > { %v12739_v42 = vpop.permute.xlu2 %6340  ;;  %v6362_v29 = vsel %vm6361_vm5, %v6354_v7, %v6356_v54  ;;  %v6467_v54 = vsel %vm2199_vm8, %v6435_v13, %v6466_v16  ;;  %v12803_v13 = vperm.slane %v6479_v5, %v14034_v21 }
 0x717   : > { %v6440_v49 = vrot.slane %v6362_v29, 4  ;;  %v12813_v40 = vperm.slane %v6467_v54, %v14034_v21 }
 0x71d   : > { %v6337_v36 = vpop.permute.xlu1 %6336  ;;  %v12748_v41 = vpop.permute.xlu0 %6374 }
 0x71e   : > { %v6345_v60 = vsel %vm6344_vm3, %v6337_v36, %v6339_v25  ;;  %v6403_v26 = vpop.permute.xlu2 %6402 }
 0x71f   : > { %v6454_v47 = vrot.slane %v6345_v60, 4  ;;  %v6453_v11 = vsel %vm2199_vm8, %v6452_v62, %v6345_v60 }
 0x720   : > { %v6459_v46 = vperm.slane %v6453_v11, %v13579_v34 }
 0x721   : > { %v6455_v19 = vsel %vm2199_vm8, %v6379_v4, %v6454_v47 }
 0x722   : > { %v6463_v6 = vperm.slane %v6455_v19, %v13579_v34  ;;  %v6488_v37 = vrot.slane %v6459_v46, 4 }
 0x724   : > { %v6500_v61 = vrot.slane %v6463_v6, 4 }
 0x725   : > { %v6322_v10 = vpop.permute.xlu1 %6321  ;;  %v12765_v58 = vpop.permute.xlu0 %6342 }
 0x726   : > { %v6328_v57 = vsel %vm14116_vm13, %v6320_v15, %v6322_v10  ;;  %v6390_v51 = vpop.permute.xlu2 %6389  ;;  %vm6821_vm13 = vmand %vm6816_vm12, %vm6817_vm6 }
 0x727   : > { %v6441_v31 = vsel %vm2199_vm8, %v6440_v49, %v6328_v57  ;;  %v6442_v56 = vrot.slane %v6328_v57, 4  ;;  %vm12842_vm6 = vmand %vm6821_vm13, %vm6823_vm0  ;;  %vm6925_vm0 = vcmask 1045504  }
 0x728   : > { %v6447_v35 = vperm.slane %v6441_v31, %v13579_v34 }
 0x729   : > { %v6443_v1 = vsel %vm2199_vm8, %v6362_v29, %v6442_v56 }
 0x72a   : > { %v6451_v15 = vperm.slane %v6443_v1, %v13579_v34  ;;  %v6489_v25 = vsel %vm2199_vm8, %v6488_v37, %v6447_v35  ;;  %v6490_v7 = vrot.slane %v6447_v35, 4 }
 0x72b   : > { %v12784_v2 = vperm.slane %v6489_v25, %v14034_v21 }
 0x72c   : > { %v6491_v12 = vsel %vm2199_vm8, %v6459_v46, %v6490_v7  ;;  %v6501_v52 = vsel %vm2199_vm8, %v6500_v61, %v6451_v15  ;;  %v6502_v38 = vrot.slane %v6451_v15, 4 }
 0x72d   : > { %v6507_v32 = vperm.slane %v6501_v52, %v14034_v21  ;;  %v6388_v55 = vpop.permute.xlu1 %6387  ;;  %v6405_v23 = vpop.permute.xlu0 %6404  ;;  %v6515_v3 = vsel %vm2199_vm8, %v12784_v2, %v6514_v45  ;;  %v12800_v48 = vperm.slane %v6491_v12, %v14034_v21 }
 0x72e   : > { %v6396_v4 = vsel %vm6395_vm2, %v6388_v55, %v6390_v51  ;;  %v6411_v36 = vsel %vm6410_vm11, %v6403_v26, %v6405_v23  ;;  %v6838_v43 = vsel %vm12789_vm4, %v6515_v3, 0.0  ;;  %v6503_v18 = vsel %vm2199_vm8, %v6463_v6, %v6502_v38 }
 0x72f   : > { %v6528_v9 = vrot.slane %v6396_v4, 4  ;;  %v6533_v60 = vperm.slane %v6396_v4, %v13579_v34  ;;  %v6538_v50 = vrot.slane %v6411_v36, 4  ;;  %6864 = vrot.lane.b32.xlu0 %v6838_v43, %s7325_s6  ;;  %v6516_v62 = vrot.slane %v12800_v48, 4 }
 0x730   : > { %v6520_v47 = vrot.slane %v6507_v32, 4  ;;  %v6543_v28 = vperm.slane %v6411_v36, %v13579_v34  ;;  %v12833_v44 = vperm.slane %v6503_v18, %v14034_v21  ;;  %v6526_v6 = vrot.slane %v12803_v13, 4  ;;  %v6407_v18 = vpop.permute.xlu2 %6406 }
 0x731   : > { %v6529_v59 = vsel %vm2199_vm8, 0.0, %v6528_v9  ;;  %v6548_v53 = vrot.slane %v6533_v60, 4  ;;  %v6539_v11 = vsel %vm2199_vm8, 0.0, %v6538_v50  ;;  %v6517_v19 = vsel %vm2199_vm8, %v6516_v62, %v12813_v40 }
 0x732   : > { %v6537_v29 = vperm.slane %v6529_v59, %v13579_v34  ;;  %v6547_v26 = vperm.slane %v6539_v11, %v13579_v34  ;;  %v6840_v8 = vsel %vm12789_vm4, %v6517_v19, 0.0  ;;  %v6521_v10 = vsel %vm2199_vm8, %v6520_v47, %v6483_v63 }
 0x733   : > { %v12826_v46 = vsel %vm2199_vm8, %v6543_v28, %v6548_v53  ;;  %6874 = vrot.lane.b32.xlu2 %v6840_v8, %s7324_s5  ;;  %v6523_v37 = vsel %vm2199_vm8, %v6507_v32, %v6522_v14  ;;  %v6844_v27 = vsel %vm12789_vm4, %v6521_v10, 0.0  ;;  %v6527_v5 = vsel %vm2199_vm8, %v12833_v44, %v6526_v6 }
 0x734   : > { %v6556_v17 = vrot.slane %v6537_v29, 4  ;;  %v6554_v49 = vrot.slane %v6547_v26, 4  ;;  %v6893_v15 = vrot.slane %v6844_v27, 1  ;;  %v6854_v7 = vsel %vm12789_vm4, %v6527_v5, 0.0 }
 0x735   : > { %v6358_v57 = vpop.permute.xlu1 %6357  ;;  %v6848_v45 = vsel %vm12789_vm4, %v6523_v37, 0.0  ;;  %v6324_v32 = vpop.permute.xlu0 %6323  ;;  %v6935_v23 = vrot.slane %v6854_v7, 2  ;;  %v6346_v50 = vsel %vm6344_vm3, %v12739_v42, %v12765_v58  ;;  %v6938_v47 = vrot.slane %v7352_v22, 2 }
 0x736   : > { %v6557_v16 = vsel %vm2199_vm8, %v6547_v26, %v6556_v17  ;;  %v6555_v31 = vsel %vm2199_vm8, %v6554_v49, %v6537_v29  ;;  %v6910_v4 = vrot.slane %v6848_v45, 1  ;;  %v6601_v8 = vperm.slane %v12721_v20, %v14034_v21 }
 0x737   : > { %v12848_v35 = vperm.slane %v6557_v16, %v14034_v21  ;;  %v6561_v24 = vperm.slane %v6555_v31, %v14034_v21  ;;  %v6553_v5 = vperm.slane %v12826_v46, %v14034_v21  ;;  %v6512_v46 = vrot.slane %v12784_v2, 4 }
 0x738   : > { %v6394_v17 = vpop.permute.xlu2 %6393 }
 0x739   : > { %v6846_v0 = vsel %vm12842_vm6, %v6561_v24, 0.0  ;;  %v6570_v1 = vrot.slane %v12848_v35, 4  ;;  %v6568_v61 = vrot.slane %v6561_v24, 4 }
 0x73a   : > { %v6894_v25 = vrot.slane %v6846_v0, 1  ;;  %v6566_v0 = vrot.slane %v6553_v5, 4 }
 0x73b   : > { %v6571_v54 = vsel %vm2199_vm8, 0.0, %v6570_v1  ;;  %v6569_v12 = vsel %vm2199_vm8, 0.0, %v6568_v61  ;;  %v6518_v61 = vrot.slane %v12813_v40, 4  ;;  %v6513_v40 = vsel %vm2199_vm8, %v6512_v46, %v12772_v30 }
 0x73c   : > { %v6895_v52 = vsel %vm6883_vm14, %v6893_v15, %v6894_v25  ;;  %v6856_v38 = vsel %vm12842_vm6, %v6571_v54, 0.0  ;;  %v6850_v51 = vsel %vm12842_vm6, %v6569_v12, 0.0  ;;  %v6567_v1 = vsel %vm2199_vm8, 0.0, %v6566_v0 }
 0x73d   : > { %v6377_v55 = vpop.permute.xlu1 %6376  ;;  %6899 = vrot.lane.b32.xlu1 %v6895_v52, %s7325_s6  ;;  %v6936_v3 = vrot.slane %v6856_v38, 2  ;;  %v6911_v36 = vrot.slane %v6850_v51, 1  ;;  %v6409_v58 = vpop.permute.xlu0 %6408  ;;  %v6519_v15 = vsel %vm2199_vm8, %v12800_v48, %v6518_v61  ;;  %v6843_v25 = vsel %vm12842_vm6, %v6567_v1, 0.0 }
 0x73e   : > { %v6380_v43 = vsel %vm6378_vm9, %v12748_v41, %v6377_v55  ;;  %v6363_v41 = vsel %vm6361_vm5, %v6358_v57, %v12728_v33  ;;  %vm14121_vm9 = vcmask 982016   ;;  %v6412_v22 = vsel %vm6410_vm11, %v6407_v18, %v6409_v58 }
 0x73f   : > { %v6590_v63 = vrot.slane %v6380_v43, 4  ;;  %v6937_v9 = vsel %vm6925_vm0, %v6935_v23, %v6936_v3  ;;  %v6912_v60 = vsel %vm6883_vm14, %v6910_v4, %v6911_v36  ;;  %v6584_v53 = vrot.slane %v6363_v41, 4 }
 0x740   : > { %6941 = vrot.lane.b32.xlu0 %v6937_v9, %s7325_s6  ;;  %6916 = vrot.lane.b32.xlu2 %v6912_v60, %s7324_s5  ;;  %v6612_v49 = vrot.slane %v6412_v22, 4  ;;  %v6842_v7 = vsel %vm12789_vm4, %v6519_v15, 0.0  ;;  %v6885_v45 = vrot.slane %v6843_v25, 1  ;;  %v6837_v55 = vsel %vm12789_vm4, %v6513_v40, 0.0 }
 0x741   : > { %v6591_v62 = vsel %vm2199_vm8, %v6590_v63, %v6346_v50  ;;  %v6884_v54 = vrot.slane %v6842_v7, 1  ;;  %v6524_v4 = vrot.slane %v12833_v44, 4  ;;  %v6853_v30 = vsel %vm12842_vm6, %v12848_v35, 0.0 }
 0x742   : > { %v6595_v59 = vperm.slane %v6591_v62, %v13579_v34  ;;  %v6927_v41 = vrot.slane %v6853_v30, 2 }
 0x743   : > { %v6886_v12 = vsel %vm6883_vm14, %v6884_v54, %v6885_v45  ;;  %v6525_v2 = vsel %vm2199_vm8, %v6524_v4, %v12803_v13 }
 0x744   : > { %v6602_v29 = vrot.slane %v6595_v59, 4  ;;  %v6852_v44 = vsel %vm12789_vm4, %v6525_v2, 0.0 }
 0x745   : > { %v6326_v11 = vpop.permute.xlu1 %6325  ;;  %6943 = vrot.lane.b32.xlu1 %v6938_v47, %s7325_s6  ;;  %v7278_v52 = vpop.permute.xlu0 %7277 }
 0x746   : > { %v6329_v42 = vsel %vm14121_vm9, %v6324_v32, %v6326_v11  ;;  %v7279_v32 = vunpack.i.l.bf16 %v7278_v52  ;;  %v7280_v63 = vunpack.i.h.bf16 %v7278_v52 }
 0x747   : > { %v6585_v28 = vsel %vm2199_vm8, %v6584_v53, %v6329_v42  ;;  %v6926_v53 = vrot.slane %v6852_v44, 2 }
 0x748   : > { %v6589_v26 = vperm.slane %v6585_v28, %v13579_v34  ;;  %6960 = vrot.lane.b32.xlu0 %v6938_v47, %s7324_s5 }
 0x749   : > { %v6928_v35 = vsel %vm6925_vm0, %v6926_v53, %v6927_v41 }
 0x74a   : > { %v6603_v33 = vsel %vm2199_vm8, %v6602_v29, %v6589_v26 }
 0x74b   : > { %v6607_v19 = vperm.slane %v6603_v33, %v14034_v21 }
 0x74d   : > { %v6608_v10 = vrot.slane %v6607_v19, 4  ;;  %v6392_v14 = vpop.permute.xlu1 %6391 }
 0x74e   : > { %v6397_v6 = vsel %vm6395_vm2, %v6392_v14, %v6394_v17 }
 0x74f   : > { %v6613_v57 = vsel %vm2199_vm8, %v6612_v49, %v6397_v6  ;;  %v6609_v34 = vsel %vm2199_vm8, %v6608_v10, %v6601_v8 }
 0x750   : > { %v6617_v16 = vperm.slane %v6613_v57, %v14034_v21  ;;  %v6858_v31 = vsel %vm12789_vm4, %v6609_v34, 0.0 }
 0x751   : > { %v6952_v20 = vrot.slane %v6858_v31, 2 }
 0x752   : > { %v6860_v37 = vsel %vm12842_vm6, %v6617_v16, 0.0 }
 0x753   : > { %v6953_v24 = vrot.slane %v6860_v37, 2 }
 0x755   : > { %v6954_v27 = vsel %vm6925_vm0, %v6952_v20, %v6953_v24  ;;  %v7273_v21 = vpop.permute.xlu1 %7272 }
 0x756   : > { %6958 = vrot.lane.b32.xlu2 %v6954_v27, %s7324_s5  ;;  %v7274_v38 = vunpack.i.l.bf16 %v7273_v21  ;;  %v7275_v9 = vunpack.i.h.bf16 %v7273_v21  ;;  %s229_s5 = sadd.s32 %s7062_s15, %s7414_s22 }
 0x757   : > { %s7063_s6 = sshll.u32 %s229_s5, 3 }
 0x758   : > { %s231_s30 = scalar_lea.vmem %s12959_s4, %s7063_s6 }
 0x78d   : > { %v6875_v23 = vpop.permute.xlu2 %6874 }
 0x78e   : > { %v6878_v36 = vsel %vm255_vm10, %v6875_v23, %v7279_v32 }
 0x79a   : > { %v6917_v60 = vpop.permute.xlu2 %6916 }
 0x79b   : > { %v6920_v13 = vsel %vm255_vm10, %v6917_v60, %v7280_v63 }
 0x7a1   : > { %v6865_v51 = vpop.permute.xlu0 %6864 }
 0x7a2   : > { %v6869_v48 = vsel %vm244_vm7, %v6865_v51, %v7274_v38 }
 0x7a3   : > { %v6871_v3 = vadd.f32 %v6869_v48, %v6837_v55 }
 0x7a5   : > { %v6880_v43 = vadd.f32 %v6878_v36, %v6871_v3 }
 0x7a7   : > { %v6888_v62 = vadd.f32 %v6886_v12, %v6880_v43 }
 0x7af   : > { %v6900_v50 = vpop.permute.xlu1 %6899 }
 0x7b0   : > { %v6903_v47 = vsel %vm244_vm7, %v6900_v50, %v7275_v9  ;;  %v6959_v39 = vpop.permute.xlu2 %6958 }
 0x7b1   : > { %v6905_v18 = vadd.f32 %v6903_v47, %v6888_v62 }
 0x7b2   : > { %v6942_v59 = vpop.permute.xlu0 %6941 }
 0x7b3   : > { %v6922_v56 = vadd.f32 %v6920_v13, %v6905_v18 }
 0x7b5   : > { %v6930_v11 = vadd.f32 %v6928_v35, %v6922_v56 }
 0x7b7   : > { %v6944_v42 = vpop.permute.xlu1 %6943 }
 0x7b8   : > { %v6945_v58 = vsel %vm244_vm7, %v6942_v59, %v6944_v42 }
 0x7b9   : > { %v6947_v28 = vadd.f32 %v6945_v58, %v6930_v11 }
 0x7ba   : > { %v6961_v29 = vpop.permute.xlu0 %6960 }
 0x7bb   : > { %v6962_v26 = vsel %vm255_vm10, %v6959_v39, %v6961_v29 }
 0x7bc   : > { %v6964_v22 = vadd.f32 %v6962_v26, %v6947_v28 }
 0x7be   : > { %v6965_v33 = vmax.f32 %v6964_v22, 0.0 }
 0x7c0   : > { %6966 = vst [vmem:[%s231_s30] sm:$0xff] %v6965_v33 }
 0x7c1 PF: > { %s14_s19 = sadd.s32 1, %s7321_s19   ;;  %s14122_s15 = smov %s7313_s17 }
 0x7c2   : > { %p11_p7 = scmp.ge.s32.totalorder %s14_s19, 6   ;;  %s14123_s16 = smov %s7317_s18 }
 0x7c3   : > { %s14124_s17 = smov %s14127_s20  ;;  %s14125_s18 = smov %s14131_s21 }
 0x7c4   :  { %13 = sbr.rel (!%p11_p7) target bundleno = 3 (0x3), region = 66 }

</bundles_post_ra>
